<compile_context>
chip_gen: v6e
topology: v6e:2x2x1
jax: 0.10.0
libtpu: 0.0.40
codegen_flags: <defaults>
</compile_context>

<pallas_src>
import functools

import jax
import jax.numpy as jnp
from jax.experimental import pallas as pl
from jax.experimental.pallas import tpu as pltpu


# ---------------------------------------------------------------------------
# Fused GEMM + bias + activation Pallas kernel
# ---------------------------------------------------------------------------
def _gemm_bias_act_kernel(a_ref, b_ref, bias_ref, o_ref, *, activation):
    x = jnp.dot(a_ref[...], b_ref[...], preferred_element_type=jnp.float32)
    x = x + bias_ref[...]          # bias is (M, 1) or (1, tn); broadcast on VPU
    if activation == "relu":
        x = jnp.maximum(x, 0.0)
    elif activation == "sigmoid":
        x = jax.nn.sigmoid(x)      # exp lowers to the EUP slot, free under MXU
    o_ref[...] = x.astype(o_ref.dtype)


def _tile_n(n):
    """Return (tile_n, padded_n).

    For n >= 256: split into (at least) two 128-aligned tiles so both v7x
    TensorCores get work and the output stores are unmasked / lane-dense.
    For n < 256: one whole-N block (lane-sparse layers; padding wouldn't help).
    """
    if n < 256:
        return n, n
    npad = -(-n // 256) * 256            # multiple of 256  =>  tn multiple of 128
    tn = npad // 2
    while tn > 2048 and tn % 256 == 0:   # keep per-block VMEM modest for big B
        tn //= 2
    return tn, npad


def matmul_bias_act(a, b, bias, activation="none", bias_along_rows=False):
    """o[M, N] = act(a[M, K] @ b[K, N] + bias), fused in one Pallas kernel.

    bias_along_rows=True  -> bias has shape (M,): per-output-channel bias of a
                             channels-major conv GEMM (broadcast over lanes).
    bias_along_rows=False -> bias has shape (N,): ordinary linear layer.

    NOTE: no K padding — whole-K blocks only need K % 8 == 0 (true for every
    layer here); Mosaic zero-fills the contraction lanes in-vreg at no HBM cost.
    """
    M, K = a.shape
    K2, N = b.shape
    assert K == K2
    assert K % 8 == 0, f"contraction dim {K} must be a multiple of 8"

    tn, npad = _tile_n(N)
    if npad != N:
        b = jnp.pad(b, ((0, 0), (0, npad - N)))
    grid = (npad // tn,)

    if bias_along_rows:
        bias2 = bias.reshape(M, 1)
        bias_spec = pl.BlockSpec((M, 1), lambda j: (0, 0))
    else:
        bias2 = bias.reshape(1, N)
        if npad != N:
            bias2 = jnp.pad(bias2, ((0, 0), (0, npad - N)))
        bias_spec = pl.BlockSpec((1, tn), lambda j: (0, j))

    kernel = functools.partial(_gemm_bias_act_kernel, activation=activation)
    out = pl.pallas_call(
        kernel,
        out_shape=jax.ShapeDtypeStruct((M, npad), jnp.float32),
        grid=grid,
        in_specs=[
            pl.BlockSpec((M, K), lambda j: (0, 0)),
            pl.BlockSpec((K, tn), lambda j: (0, j)),
            bias_spec,
        ],
        out_specs=pl.BlockSpec((M, tn), lambda j: (0, j)),
        compiler_params=pltpu.CompilerParams(dimension_semantics=("parallel",)),
    )(a, b, bias2)
    if npad != N:
        out = out[:, :N]
    return out


# ---------------------------------------------------------------------------
# Fused dense tail: fc1(relu) -> fc2 -> reparameterize -> d1(relu) -> d2(relu)
# One pallas_call, all weights resident in VMEM for the single grid step.
# ---------------------------------------------------------------------------
def _dense_tail_kernel(h_ref, w1_ref, b1_ref, wmu_ref, wlv_ref, bmu_ref, blv_ref,
                       eps_ref, wd1_ref, bd1_ref, wd2_ref, bd2_ref,
                       mu_ref, logvar_ref, z_ref, dec_ref):
    f32 = jnp.float32
    h1 = jnp.dot(h_ref[...], w1_ref[...], preferred_element_type=f32) + b1_ref[...]
    h1 = jnp.maximum(h1, 0.0)
    mu = jnp.dot(h1, wmu_ref[...], preferred_element_type=f32) + bmu_ref[...]
    logvar = jnp.dot(h1, wlv_ref[...], preferred_element_type=f32) + blv_ref[...]
    z = mu + eps_ref[...] * jnp.exp(0.5 * logvar)   # exp on EUP, under the MXU
    mu_ref[...] = mu
    logvar_ref[...] = logvar
    z_ref[...] = z
    d1 = jnp.dot(z, wd1_ref[...], preferred_element_type=f32) + bd1_ref[...]
    d1 = jnp.maximum(d1, 0.0)
    d2 = jnp.dot(d1, wd2_ref[...], preferred_element_type=f32) + bd2_ref[...]
    dec_ref[...] = jnp.maximum(d2, 0.0)


def dense_tail(h, params, eps, encode_dim):
    """h: [B, 1024] (PyTorch View order). Returns (mu, logvar, z, d2_out)."""
    B = h.shape[0]
    E = encode_dim
    w2, b2 = params["fc2_w"], params["fc2_b"]
    out_small = jax.ShapeDtypeStruct((B, E), jnp.float32)
    out_dec = jax.ShapeDtypeStruct((B, 64 * 4 * 4), jnp.float32)
    # ~2.1 MiB of weights + tiny activations: whole-array blocks, no grid.
    mu, logvar, z, dec = pl.pallas_call(
        _dense_tail_kernel,
        out_shape=(out_small, out_small, out_small, out_dec),
    )(h,
      params["fc1_w"], params["fc1_b"].reshape(1, -1),
      w2[:, :E], w2[:, E:], b2[:E].reshape(1, E), b2[E:].reshape(1, E),
      eps,
      params["d1_w"], params["d1_b"].reshape(1, -1),
      params["d2_w"], params["d2_b"].reshape(1, -1))
    return mu, logvar, z, dec


# ---------------------------------------------------------------------------
# Conv2d / ConvTranspose2d on channels-major activations
# ---------------------------------------------------------------------------
def conv2d_cm(x, w, b, stride, padding, activation):
    """PyTorch Conv2d. x: [Cin, B, H, W], w: [Cout, Cin, k, k], b: [Cout].
    Returns [Cout, B, Ho, Wo]."""
    Cout, Cin, k, _ = w.shape
    _, B, H, W = x.shape
    xp = jnp.pad(x, ((0, 0), (0, 0), (padding, padding), (padding, padding)))
    Ho = (H + 2 * padding - k) // stride + 1
    Wo = (W + 2 * padding - k) // stride + 1
    # TODO(synk): im2col tap gather stays in XLA (strided slices of a <=300 KB
    # tensor); in-kernel gather needs strided ref reads.
    taps = []
    for i in range(k):
        for j in range(k):
            taps.append(xp[:, :, i:i + stride * (Ho - 1) + 1:stride,
                                 j:j + stride * (Wo - 1) + 1:stride])
    # rows ordered (ci, kh, kw) to match w.reshape(Cout, Cin*k*k)
    cols = jnp.stack(taps, axis=1).reshape(Cin * k * k, B * Ho * Wo)
    w_mat = w.reshape(Cout, Cin * k * k)
    out = matmul_bias_act(w_mat, cols, b, activation, bias_along_rows=True)
    return out.reshape(Cout, B, Ho, Wo)


def deconv2d_cm(x, w_t, b, activation):
    """PyTorch ConvTranspose2d(k=4, stride=2, padding=1) as an exact sub-pixel
    convolution.  x: [Cin, B, H, W], w_t: [Cin, Cout, 4, 4], b: [Cout].
    Returns [Cout, B, 2H, 2W]."""
    Cin, Cout, k, _ = w_t.shape
    assert k == 4
    _, B, H, W = x.shape
    Hq, Wq = H + 1, W + 1
    xp = jnp.pad(x, ((0, 0), (0, 0), (1, 1), (1, 1)))
    taps = []
    for a in range(2):
        for c in range(2):
            taps.append(xp[:, :, a:a + Hq, c:c + Wq])
    # rows ordered (ci, a, c); columns ordered (b, u, v) over patch positions
    cols = jnp.stack(taps, axis=1).reshape(Cin * 4, B * Hq * Wq)

    # Patch (u, v), sub-pixel (rp, cp) lands at output pixel (2u+rp-1, 2v+cp-1);
    # patch tap (a, c) multiplies ConvT weight element (2-2a+rp, 2-2c+cp).
    idx = jnp.array([[2, 3], [0, 1]], dtype=jnp.int32)   # idx[a, rp] = 2-2a+rp
    wk = w_t[:, :, idx, :]                               # [Cin, Cout, a, rp, kx]
    wk = wk[:, :, :, :, idx]                             # [Cin, Cout, a, rp, c, cp]
    w_mat = wk.transpose(1, 3, 5, 0, 2, 4).reshape(Cout * 4, Cin * 4)
    bias_rows = jnp.repeat(b, 4)                         # bias per (co, rp, cp)

    out = matmul_bias_act(w_mat, cols, bias_rows, activation, bias_along_rows=True)

    # TODO(synk): pixel-shuffle (lane interleave) + halo crop stay in XLA; a
    # strided in-kernel store cannot be expressed with BlockSpec block placement.
    out = out.reshape(Cout, 2, 2, B, Hq, Wq)
    out = out.transpose(0, 3, 4, 1, 5, 2).reshape(Cout, B, 2 * Hq, 2 * Wq)
    return out[:, :, 1:2 * H + 1, 1:2 * W + 1]


# ---------------------------------------------------------------------------
# BetaVAE parameters / forward
# ---------------------------------------------------------------------------
def init_params(key, encode_dim):
    def nrm(key, shape, scale=0.05):
        return scale * jax.random.normal(key, shape, jnp.float32)

    ks = jax.random.split(key, 20)
    p = {}
    # encoder convs: [Cout, Cin, 4, 4]  (PyTorch Conv2d layout)
    p["e1_w"], p["e1_b"] = nrm(ks[0], (32, 1, 4, 4)), jnp.zeros((32,), jnp.float32)
    p["e2_w"], p["e2_b"] = nrm(ks[1], (32, 32, 4, 4)), jnp.zeros((32,), jnp.float32)
    p["e3_w"], p["e3_b"] = nrm(ks[2], (64, 32, 4, 4)), jnp.zeros((64,), jnp.float32)
    p["e4_w"], p["e4_b"] = nrm(ks[3], (64, 64, 4, 4)), jnp.zeros((64,), jnp.float32)
    # encoder linears (stored [in, out])
    p["fc1_w"], p["fc1_b"] = nrm(ks[4], (64 * 4 * 4, 256)), jnp.zeros((256,), jnp.float32)
    p["fc2_w"], p["fc2_b"] = nrm(ks[5], (256, encode_dim * 2)), jnp.zeros((encode_dim * 2,), jnp.float32)
    # decoder linears
    p["d1_w"], p["d1_b"] = nrm(ks[6], (encode_dim, 256)), jnp.zeros((256,), jnp.float32)
    p["d2_w"], p["d2_b"] = nrm(ks[7], (256, 64 * 4 * 4)), jnp.zeros((64 * 4 * 4,), jnp.float32)
    # decoder deconvs: [Cin, Cout, 4, 4]  (PyTorch ConvTranspose2d layout)
    p["dc1_w"], p["dc1_b"] = nrm(ks[8], (64, 64, 4, 4)), jnp.zeros((64,), jnp.float32)
    p["dc2_w"], p["dc2_b"] = nrm(ks[9], (64, 32, 4, 4)), jnp.zeros((32,), jnp.float32)
    p["dc3_w"], p["dc3_b"] = nrm(ks[10], (32, 32, 4, 4)), jnp.zeros((32,), jnp.float32)
    p["dc4_w"], p["dc4_b"] = nrm(ks[11], (32, 1, 4, 4)), jnp.zeros((1,), jnp.float32)
    return p


def beta_vae_forward(params, x, encode_dim, eps_key):
    B = x.shape[0]
    # ---- encoder (channels-major [C, B, H, W] internally) ----
    h = x.transpose(1, 0, 2, 3)                                        # [1, B, 64, 64]
    h = conv2d_cm(h, params["e1_w"], params["e1_b"], 2, 1, "relu")     # [32, B, 32, 32]
    h = conv2d_cm(h, params["e2_w"], params["e2_b"], 2, 1, "relu")     # [32, B, 16, 16]
    h = conv2d_cm(h, params["e3_w"], params["e3_b"], 2, 1, "relu")     # [64, B,  8,  8]
    h = conv2d_cm(h, params["e4_w"], params["e4_b"], 2, 1, "relu")     # [64, B,  4,  4]
    h = h.transpose(1, 0, 2, 3).reshape(B, 64 * 4 * 4)                 # PyTorch View order
    # ---- fused dense tail: fc1 -> fc2 -> reparam -> d1 -> d2 (one kernel) ----
    eps = jax.random.normal(eps_key, (B, encode_dim), jnp.float32)
    mu, logvar, z, dec = dense_tail(h, params, eps, encode_dim)
    # ---- decoder deconvs ----
    d = dec.reshape(B, 64, 4, 4).transpose(1, 0, 2, 3)                 # [64, B, 4, 4]
    d = deconv2d_cm(d, params["dc1_w"], params["dc1_b"], "relu")       # [64, B,  8,  8]
    d = deconv2d_cm(d, params["dc2_w"], params["dc2_b"], "relu")       # [32, B, 16, 16]
    d = deconv2d_cm(d, params["dc3_w"], params["dc3_b"], "relu")       # [32, B, 32, 32]
    d = deconv2d_cm(d, params["dc4_w"], params["dc4_b"], "sigmoid")    # [ 1, B, 64, 64]
    x_recon = d.transpose(1, 0, 2, 3)                                  # [B, 1, 64, 64]
    return {"x_recon": x_recon, "z": z, "mu": mu, "logvar": logvar}


# ---------------------------------------------------------------------------
# Pure-JAX (XLA) reference with PyTorch semantics, for validation
# ---------------------------------------------------------------------------
def _reference_forward(params, x, encode_dim, eps_key):
    prec = jax.lax.Precision.HIGHEST

    def conv(x, w, b, stride, pad):
        y = jax.lax.conv_general_dilated(
            x, w, window_strides=(stride, stride),
            padding=((pad, pad), (pad, pad)),
            dimension_numbers=("NCHW", "OIHW", "NCHW"), precision=prec)
        return y + b.reshape(1, -1, 1, 1)

    def deconv(x, w_t, b, stride, pad):
        k = w_t.shape[-1]
        w = jnp.flip(w_t, axis=(2, 3)).transpose(1, 0, 2, 3)
        y = jax.lax.conv_general_dilated(
            x, w, window_strides=(1, 1),
            padding=((k - 1 - pad,) * 2, (k - 1 - pad,) * 2),
            lhs_dilation=(stride, stride),
            dimension_numbers=("NCHW", "OIHW", "NCHW"), precision=prec)
        return y + b.reshape(1, -1, 1, 1)

    relu = jax.nn.relu
    B = x.shape[0]
    h = relu(conv(x, params["e1_w"], params["e1_b"], 2, 1))
    h = relu(conv(h, params["e2_w"], params["e2_b"], 2, 1))
    h = relu(conv(h, params["e3_w"], params["e3_b"], 2, 1))
    h = relu(conv(h, params["e4_w"], params["e4_b"], 2, 1))
    h = h.reshape(B, -1)
    h = relu(jnp.dot(h, params["fc1_w"], precision=prec) + params["fc1_b"])
    mu_logvar = jnp.dot(h, params["fc2_w"], precision=prec) + params["fc2_b"]
    mu, logvar = mu_logvar[:, :encode_dim], mu_logvar[:, encode_dim:]
    eps = jax.random.normal(eps_key, mu.shape, jnp.float32)
    z = mu + eps * jnp.exp(0.5 * logvar)
    d = relu(jnp.dot(z, params["d1_w"], precision=prec) + params["d1_b"])
    d = relu(jnp.dot(d, params["d2_w"], precision=prec) + params["d2_b"])
    d = d.reshape(B, 64, 4, 4)
    d = relu(deconv(d, params["dc1_w"], params["dc1_b"], 2, 1))
    d = relu(deconv(d, params["dc2_w"], params["dc2_b"], 2, 1))
    d = relu(deconv(d, params["dc3_w"], params["dc3_b"], 2, 1))
    x_recon = jax.nn.sigmoid(deconv(d, params["dc4_w"], params["dc4_b"], 2, 1))
    return {"x_recon": x_recon, "z": z, "mu": mu, "logvar": logvar}


if __name__ == "__main__":
    ENCODE_DIM = 16
    B = 2
    key = jax.random.PRNGKey(0)
    k_param, k_input, k_eps = jax.random.split(key, 3)

    params = init_params(k_param, ENCODE_DIM)
    # Input implied by the architecture: 1x64x64 (four stride-2 convs -> 4x4).
    x = jax.random.uniform(k_input, (B, 1, 64, 64), jnp.float32)

    fwd = jax.jit(lambda p, xx, k: beta_vae_forward(p, xx, ENCODE_DIM, k))
    out = fwd(params, x, k_eps)
    jax.block_until_ready(out)

    assert out["x_recon"].shape == (B, 1, 64, 64)
    assert out["z"].shape == (B, ENCODE_DIM)
    assert out["mu"].shape == (B, ENCODE_DIM)
    assert out["logvar"].shape == (B, ENCODE_DIM)
    assert bool(jnp.all(out["x_recon"] >= 0.0) & jnp.all(out["x_recon"] <= 1.0))

    # Validate against the plain-XLA reference (same params, same eps key).
    ref = jax.jit(lambda p, xx, k: _reference_forward(p, xx, ENCODE_DIM, k))(params, x, k_eps)
    for name in ("x_recon", "mu", "logvar", "z"):
        err = float(jnp.max(jnp.abs(out[name] - ref[name])))
        assert err < 5e-3, f"{name} mismatch vs XLA reference: max abs err {err}"

    print("KERNEL_OK")
</pallas_src>

<mosaic_0001>
module attributes {stable_mosaic.version = 11 : i64} {
  func.func @_gemm_bias_act_kernel(%arg0: i32, %arg1: memref<32x16xf32, #tpu.memory_space<vmem>>, %arg2: memref<16x1024xf32, #tpu.memory_space<vmem>>, %arg3: memref<32x1xf32, #tpu.memory_space<vmem>>, %arg4: memref<32x1024xf32, #tpu.memory_space<vmem>>) attributes {dimension_semantics = [#tpu.dimension_semantics<parallel>], iteration_bounds = array<i64: 2>, scalar_prefetch = 0 : i64, scratch_operands = 0 : i64, tpu.core_type = #tpu.core_type<tc>, window_params = [{pipeline_mode = #tpu.pipeline_mode<synchronous>, transform_indices = @transform_0, window_bounds = array<i64: 32, 16>}, {transform_indices = @transform_1, window_bounds = array<i64: 16, 1024>}, {pipeline_mode = #tpu.pipeline_mode<synchronous>, transform_indices = @transform_2, window_bounds = array<i64: 32, 1>}, {transform_indices = @transform_3, window_bounds = array<i64: 32, 1024>}]} {
    %c0 = arith.constant 0 : index
    %c0_0 = arith.constant 0 : index
    %0 = vector.load %arg1[%c0, %c0_0] : memref<32x16xf32, #tpu.memory_space<vmem>>, vector<32x16xf32>
    %c0_1 = arith.constant 0 : index
    %c0_2 = arith.constant 0 : index
    %1 = vector.load %arg2[%c0_1, %c0_2] : memref<16x1024xf32, #tpu.memory_space<vmem>>, vector<16x1024xf32>
    %cst = arith.constant dense<0.000000e+00> : vector<32x1024xf32>
    %2 = tpu.matmul %0, %1, %cst {dimension_numbers = #tpu.dot_dimension_numbers<[1], [0], [0], [1], [0, 0, 1, 1], [], []>} : vector<32x16xf32>, vector<16x1024xf32>, vector<32x1024xf32> -> vector<32x1024xf32>
    %c0_3 = arith.constant 0 : index
    %c0_4 = arith.constant 0 : index
    %3 = vector.load %arg3[%c0_3, %c0_4] : memref<32x1xf32, #tpu.memory_space<vmem>>, vector<32x1xf32>
    %4 = vector.broadcast %3 : vector<32x1xf32> to vector<32x1024xf32>
    %5 = arith.addf %2, %4 : vector<32x1024xf32>
    %cst_5 = arith.constant 0.000000e+00 : f32
    %6 = vector.broadcast %cst_5 : f32 to vector<32x1024xf32>
    %7 = arith.maximumf %5, %6 : vector<32x1024xf32>
    %c0_6 = arith.constant 0 : index
    %c0_7 = arith.constant 0 : index
    %8 = vector.load %arg4[%c0_6, %c0_7] : memref<32x1024xf32, #tpu.memory_space<vmem>>, vector<32x1024xf32>
    tpu.vector_store %arg4[%c0_6, %c0_7], %7 {strides = array<i32>} : memref<32x1024xf32, #tpu.memory_space<vmem>>, vector<32x1024xf32>,
    return
  }
  func.func @transform_0(%arg0: i32) -> (i32, i32) {
    %c0_i32 = arith.constant 0 : i32
    %c0_i32_0 = arith.constant 0 : i32
    %c0_i32_1 = arith.constant 0 : i32
    return %c0_i32, %c0_i32_0 : i32, i32
  }
  func.func @transform_1(%arg0: i32) -> (i32, i32) {
    %c0_i32 = arith.constant 0 : i32
    %c0_i32_0 = arith.constant 0 : i32
    return %c0_i32, %arg0 : i32, i32
  }
  func.func @transform_2(%arg0: i32) -> (i32, i32) {
    %c0_i32 = arith.constant 0 : i32
    %c0_i32_0 = arith.constant 0 : i32
    %c0_i32_1 = arith.constant 0 : i32
    return %c0_i32, %c0_i32_0 : i32, i32
  }
  func.func @transform_3(%arg0: i32) -> (i32, i32) {
    %c0_i32 = arith.constant 0 : i32
    %c0_i32_0 = arith.constant 0 : i32
    return %c0_i32, %arg0 : i32, i32
  }
}

module attributes {stable_mosaic.version = 11 : i64} {
  func.func @_gemm_bias_act_kernel(%arg0: i32, %arg1: memref<32x512xf32, #tpu.memory_space<vmem>>, %arg2: memref<512x256xf32, #tpu.memory_space<vmem>>, %arg3: memref<32x1xf32, #tpu.memory_space<vmem>>, %arg4: memref<32x256xf32, #tpu.memory_space<vmem>>) attributes {dimension_semantics = [#tpu.dimension_semantics<parallel>], iteration_bounds = array<i64: 2>, scalar_prefetch = 0 : i64, scratch_operands = 0 : i64, tpu.core_type = #tpu.core_type<tc>, window_params = [{pipeline_mode = #tpu.pipeline_mode<synchronous>, transform_indices = @transform_0, window_bounds = array<i64: 32, 512>}, {transform_indices = @transform_1, window_bounds = array<i64: 512, 256>}, {pipeline_mode = #tpu.pipeline_mode<synchronous>, transform_indices = @transform_2, window_bounds = array<i64: 32, 1>}, {transform_indices = @transform_3, window_bounds = array<i64: 32, 256>}]} {
    %c0 = arith.constant 0 : index
    %c0_0 = arith.constant 0 : index
    %0 = vector.load %arg1[%c0, %c0_0] : memref<32x512xf32, #tpu.memory_space<vmem>>, vector<32x512xf32>
    %c0_1 = arith.constant 0 : index
    %c0_2 = arith.constant 0 : index
    %1 = vector.load %arg2[%c0_1, %c0_2] : memref<512x256xf32, #tpu.memory_space<vmem>>, vector<512x256xf32>
    %cst = arith.constant dense<0.000000e+00> : vector<32x256xf32>
    %2 = tpu.matmul %0, %1, %cst {dimension_numbers = #tpu.dot_dimension_numbers<[1], [0], [0], [1], [0, 0, 1, 1], [], []>} : vector<32x512xf32>, vector<512x256xf32>, vector<32x256xf32> -> vector<32x256xf32>
    %c0_3 = arith.constant 0 : index
    %c0_4 = arith.constant 0 : index
    %3 = vector.load %arg3[%c0_3, %c0_4] : memref<32x1xf32, #tpu.memory_space<vmem>>, vector<32x1xf32>
    %4 = vector.broadcast %3 : vector<32x1xf32> to vector<32x256xf32>
    %5 = arith.addf %2, %4 : vector<32x256xf32>
    %cst_5 = arith.constant 0.000000e+00 : f32
    %6 = vector.broadcast %cst_5 : f32 to vector<32x256xf32>
    %7 = arith.maximumf %5, %6 : vector<32x256xf32>
    %c0_6 = arith.constant 0 : index
    %c0_7 = arith.constant 0 : index
    %8 = vector.load %arg4[%c0_6, %c0_7] : memref<32x256xf32, #tpu.memory_space<vmem>>, vector<32x256xf32>
    tpu.vector_store %arg4[%c0_6, %c0_7], %7 {strides = array<i32>} : memref<32x256xf32, #tpu.memory_space<vmem>>, vector<32x256xf32>,
    return
  }
  func.func @transform_0(%arg0: i32) -> (i32, i32) {
    %c0_i32 = arith.constant 0 : i32
    %c0_i32_0 = arith.constant 0 : i32
    %c0_i32_1 = arith.constant 0 : i32
    return %c0_i32, %c0_i32_0 : i32, i32
  }
  func.func @transform_1(%arg0: i32) -> (i32, i32) {
    %c0_i32 = arith.constant 0 : i32
    %c0_i32_0 = arith.constant 0 : i32
    return %c0_i32, %arg0 : i32, i32
  }
  func.func @transform_2(%arg0: i32) -> (i32, i32) {
    %c0_i32 = arith.constant 0 : i32
    %c0_i32_0 = arith.constant 0 : i32
    %c0_i32_1 = arith.constant 0 : i32
    return %c0_i32, %c0_i32_0 : i32, i32
  }
  func.func @transform_3(%arg0: i32) -> (i32, i32) {
    %c0_i32 = arith.constant 0 : i32
    %c0_i32_0 = arith.constant 0 : i32
    return %c0_i32, %arg0 : i32, i32
  }
}

module attributes {stable_mosaic.version = 11 : i64} {
  func.func @_gemm_bias_act_kernel(%arg0: i32, %arg1: memref<64x512xf32, #tpu.memory_space<vmem>>, %arg2: memref<512x128xf32, #tpu.memory_space<vmem>>, %arg3: memref<64x1xf32, #tpu.memory_space<vmem>>, %arg4: memref<64x128xf32, #tpu.memory_space<vmem>>) attributes {dimension_semantics = [#tpu.dimension_semantics<parallel>], iteration_bounds = array<i64: 1>, scalar_prefetch = 0 : i64, scratch_operands = 0 : i64, tpu.core_type = #tpu.core_type<tc>, window_params = [{pipeline_mode = #tpu.pipeline_mode<synchronous>, transform_indices = @transform_0, window_bounds = array<i64: 64, 512>}, {transform_indices = @transform_1, window_bounds = array<i64: 512, 128>}, {pipeline_mode = #tpu.pipeline_mode<synchronous>, transform_indices = @transform_2, window_bounds = array<i64: 64, 1>}, {transform_indices = @transform_3, window_bounds = array<i64: 64, 128>}]} {
    %c0 = arith.constant 0 : index
    %c0_0 = arith.constant 0 : index
    %0 = vector.load %arg1[%c0, %c0_0] : memref<64x512xf32, #tpu.memory_space<vmem>>, vector<64x512xf32>
    %c0_1 = arith.constant 0 : index
    %c0_2 = arith.constant 0 : index
    %1 = vector.load %arg2[%c0_1, %c0_2] : memref<512x128xf32, #tpu.memory_space<vmem>>, vector<512x128xf32>
    %cst = arith.constant dense<0.000000e+00> : vector<64x128xf32>
    %2 = tpu.matmul %0, %1, %cst {dimension_numbers = #tpu.dot_dimension_numbers<[1], [0], [0], [1], [0, 0, 1, 1], [], []>} : vector<64x512xf32>, vector<512x128xf32>, vector<64x128xf32> -> vector<64x128xf32>
    %c0_3 = arith.constant 0 : index
    %c0_4 = arith.constant 0 : index
    %3 = vector.load %arg3[%c0_3, %c0_4] : memref<64x1xf32, #tpu.memory_space<vmem>>, vector<64x1xf32>
    %4 = vector.broadcast %3 : vector<64x1xf32> to vector<64x128xf32>
    %5 = arith.addf %2, %4 : vector<64x128xf32>
    %cst_5 = arith.constant 0.000000e+00 : f32
    %6 = vector.broadcast %cst_5 : f32 to vector<64x128xf32>
    %7 = arith.maximumf %5, %6 : vector<64x128xf32>
    %c0_6 = arith.constant 0 : index
    %c0_7 = arith.constant 0 : index
    %8 = vector.load %arg4[%c0_6, %c0_7] : memref<64x128xf32, #tpu.memory_space<vmem>>, vector<64x128xf32>
    tpu.vector_store %arg4[%c0_6, %c0_7], %7 {strides = array<i32>} : memref<64x128xf32, #tpu.memory_space<vmem>>, vector<64x128xf32>,
    return
  }
  func.func @transform_0(%arg0: i32) -> (i32, i32) {
    %c0_i32 = arith.constant 0 : i32
    %c0_i32_0 = arith.constant 0 : i32
    %c0_i32_1 = arith.constant 0 : i32
    return %c0_i32, %c0_i32_0 : i32, i32
  }
  func.func @transform_1(%arg0: i32) -> (i32, i32) {
    %c0_i32 = arith.constant 0 : i32
    %c0_i32_0 = arith.constant 0 : i32
    return %c0_i32, %arg0 : i32, i32
  }
  func.func @transform_2(%arg0: i32) -> (i32, i32) {
    %c0_i32 = arith.constant 0 : i32
    %c0_i32_0 = arith.constant 0 : i32
    %c0_i32_1 = arith.constant 0 : i32
    return %c0_i32, %c0_i32_0 : i32, i32
  }
  func.func @transform_3(%arg0: i32) -> (i32, i32) {
    %c0_i32 = arith.constant 0 : i32
    %c0_i32_0 = arith.constant 0 : i32
    return %c0_i32, %arg0 : i32, i32
  }
}

module attributes {stable_mosaic.version = 11 : i64} {
  func.func @_gemm_bias_act_kernel(%arg0: i32, %arg1: memref<64x1024xf32, #tpu.memory_space<vmem>>, %arg2: memref<1024x32xf32, #tpu.memory_space<vmem>>, %arg3: memref<64x1xf32, #tpu.memory_space<vmem>>, %arg4: memref<64x32xf32, #tpu.memory_space<vmem>>) attributes {dimension_semantics = [#tpu.dimension_semantics<parallel>], iteration_bounds = array<i64: 1>, scalar_prefetch = 0 : i64, scratch_operands = 0 : i64, tpu.core_type = #tpu.core_type<tc>, window_params = [{pipeline_mode = #tpu.pipeline_mode<synchronous>, transform_indices = @transform_0, window_bounds = array<i64: 64, 1024>}, {transform_indices = @transform_1, window_bounds = array<i64: 1024, 32>}, {pipeline_mode = #tpu.pipeline_mode<synchronous>, transform_indices = @transform_2, window_bounds = array<i64: 64, 1>}, {transform_indices = @transform_3, window_bounds = array<i64: 64, 32>}]} {
    %c0 = arith.constant 0 : index
    %c0_0 = arith.constant 0 : index
    %0 = vector.load %arg1[%c0, %c0_0] : memref<64x1024xf32, #tpu.memory_space<vmem>>, vector<64x1024xf32>
    %c0_1 = arith.constant 0 : index
    %c0_2 = arith.constant 0 : index
    %1 = vector.load %arg2[%c0_1, %c0_2] : memref<1024x32xf32, #tpu.memory_space<vmem>>, vector<1024x32xf32>
    %cst = arith.constant dense<0.000000e+00> : vector<64x32xf32>
    %2 = tpu.matmul %0, %1, %cst {dimension_numbers = #tpu.dot_dimension_numbers<[1], [0], [0], [1], [0, 0, 1, 1], [], []>} : vector<64x1024xf32>, vector<1024x32xf32>, vector<64x32xf32> -> vector<64x32xf32>
    %c0_3 = arith.constant 0 : index
    %c0_4 = arith.constant 0 : index
    %3 = vector.load %arg3[%c0_3, %c0_4] : memref<64x1xf32, #tpu.memory_space<vmem>>, vector<64x1xf32>
    %4 = vector.broadcast %3 : vector<64x1xf32> to vector<64x32xf32>
    %5 = arith.addf %2, %4 : vector<64x32xf32>
    %cst_5 = arith.constant 0.000000e+00 : f32
    %6 = vector.broadcast %cst_5 : f32 to vector<64x32xf32>
    %7 = arith.maximumf %5, %6 : vector<64x32xf32>
    %c0_6 = arith.constant 0 : index
    %c0_7 = arith.constant 0 : index
    %8 = vector.load %arg4[%c0_6, %c0_7] : memref<64x32xf32, #tpu.memory_space<vmem>>, vector<64x32xf32>
    tpu.vector_store %arg4[%c0_6, %c0_7], %7 {strides = array<i32>} : memref<64x32xf32, #tpu.memory_space<vmem>>, vector<64x32xf32>,
    return
  }
  func.func @transform_0(%arg0: i32) -> (i32, i32) {
    %c0_i32 = arith.constant 0 : i32
    %c0_i32_0 = arith.constant 0 : i32
    %c0_i32_1 = arith.constant 0 : i32
    return %c0_i32, %c0_i32_0 : i32, i32
  }
  func.func @transform_1(%arg0: i32) -> (i32, i32) {
    %c0_i32 = arith.constant 0 : i32
    %c0_i32_0 = arith.constant 0 : i32
    return %c0_i32, %arg0 : i32, i32
  }
  func.func @transform_2(%arg0: i32) -> (i32, i32) {
    %c0_i32 = arith.constant 0 : i32
    %c0_i32_0 = arith.constant 0 : i32
    %c0_i32_1 = arith.constant 0 : i32
    return %c0_i32, %c0_i32_0 : i32, i32
  }
  func.func @transform_3(%arg0: i32) -> (i32, i32) {
    %c0_i32 = arith.constant 0 : i32
    %c0_i32_0 = arith.constant 0 : i32
    return %c0_i32, %arg0 : i32, i32
  }
}

module attributes {stable_mosaic.version = 11 : i64} {
  func.func @_dense_tail_kernel(%arg0: memref<2x1024xf32, #tpu.memory_space<vmem>>, %arg1: memref<1024x256xf32, #tpu.memory_space<vmem>>, %arg2: memref<1x256xf32, #tpu.memory_space<vmem>>, %arg3: memref<256x16xf32, #tpu.memory_space<vmem>>, %arg4: memref<256x16xf32, #tpu.memory_space<vmem>>, %arg5: memref<1x16xf32, #tpu.memory_space<vmem>>, %arg6: memref<1x16xf32, #tpu.memory_space<vmem>>, %arg7: memref<2x16xf32, #tpu.memory_space<vmem>>, %arg8: memref<16x256xf32, #tpu.memory_space<vmem>>, %arg9: memref<1x256xf32, #tpu.memory_space<vmem>>, %arg10: memref<256x1024xf32, #tpu.memory_space<vmem>>, %arg11: memref<1x1024xf32, #tpu.memory_space<vmem>>, %arg12: memref<2x16xf32, #tpu.memory_space<vmem>>, %arg13: memref<2x16xf32, #tpu.memory_space<vmem>>, %arg14: memref<2x16xf32, #tpu.memory_space<vmem>>, %arg15: memref<2x1024xf32, #tpu.memory_space<vmem>>) attributes {dimension_semantics = [], scalar_prefetch = 0 : i64, scratch_operands = 0 : i64, tpu.core_type = #tpu.core_type<tc>} {
    %c0 = arith.constant 0 : index
    %c0_0 = arith.constant 0 : index
    %0 = vector.load %arg0[%c0, %c0_0] : memref<2x1024xf32, #tpu.memory_space<vmem>>, vector<2x1024xf32>
    %c0_1 = arith.constant 0 : index
    %c0_2 = arith.constant 0 : index
    %1 = vector.load %arg1[%c0_1, %c0_2] : memref<1024x256xf32, #tpu.memory_space<vmem>>, vector<1024x256xf32>
    %cst = arith.constant dense<0.000000e+00> : vector<2x256xf32>
    %2 = tpu.matmul %0, %1, %cst {dimension_numbers = #tpu.dot_dimension_numbers<[1], [0], [0], [1], [0, 0, 1, 1], [], []>} : vector<2x1024xf32>, vector<1024x256xf32>, vector<2x256xf32> -> vector<2x256xf32>
    %c0_3 = arith.constant 0 : index
    %c0_4 = arith.constant 0 : index
    %3 = vector.load %arg2[%c0_3, %c0_4] : memref<1x256xf32, #tpu.memory_space<vmem>>, vector<1x256xf32>
    %4 = vector.broadcast %3 : vector<1x256xf32> to vector<2x256xf32>
    %5 = arith.addf %2, %4 : vector<2x256xf32>
    %cst_5 = arith.constant 0.000000e+00 : f32
    %6 = vector.broadcast %cst_5 : f32 to vector<2x256xf32>
    %7 = arith.maximumf %5, %6 : vector<2x256xf32>
    %c0_6 = arith.constant 0 : index
    %c0_7 = arith.constant 0 : index
    %8 = vector.load %arg3[%c0_6, %c0_7] : memref<256x16xf32, #tpu.memory_space<vmem>>, vector<256x16xf32>
    %cst_8 = arith.constant dense<0.000000e+00> : vector<2x16xf32>
    %9 = tpu.matmul %7, %8, %cst_8 {dimension_numbers = #tpu.dot_dimension_numbers<[1], [0], [0], [1], [0, 0, 1, 1], [], []>} : vector<2x256xf32>, vector<256x16xf32>, vector<2x16xf32> -> vector<2x16xf32>
    %c0_9 = arith.constant 0 : index
    %c0_10 = arith.constant 0 : index
    %10 = vector.load %arg5[%c0_9, %c0_10] : memref<1x16xf32, #tpu.memory_space<vmem>>, vector<1x16xf32>
    %11 = vector.broadcast %10 : vector<1x16xf32> to vector<2x16xf32>
    %12 = arith.addf %9, %11 : vector<2x16xf32>
    %c0_11 = arith.constant 0 : index
    %c0_12 = arith.constant 0 : index
    %13 = vector.load %arg4[%c0_11, %c0_12] : memref<256x16xf32, #tpu.memory_space<vmem>>, vector<256x16xf32>
    %cst_13 = arith.constant dense<0.000000e+00> : vector<2x16xf32>
    %14 = tpu.matmul %7, %13, %cst_13 {dimension_numbers = #tpu.dot_dimension_numbers<[1], [0], [0], [1], [0, 0, 1, 1], [], []>} : vector<2x256xf32>, vector<256x16xf32>, vector<2x16xf32> -> vector<2x16xf32>
    %c0_14 = arith.constant 0 : index
    %c0_15 = arith.constant 0 : index
    %15 = vector.load %arg6[%c0_14, %c0_15] : memref<1x16xf32, #tpu.memory_space<vmem>>, vector<1x16xf32>
    %16 = vector.broadcast %15 : vector<1x16xf32> to vector<2x16xf32>
    %17 = arith.addf %14, %16 : vector<2x16xf32>
    %c0_16 = arith.constant 0 : index
    %c0_17 = arith.constant 0 : index
    %18 = vector.load %arg7[%c0_16, %c0_17] : memref<2x16xf32, #tpu.memory_space<vmem>>, vector<2x16xf32>
    %cst_18 = arith.constant 5.000000e-01 : f32
    %19 = vector.broadcast %cst_18 : f32 to vector<2x16xf32>
    %20 = arith.mulf %19, %17 : vector<2x16xf32>
    %21 = math.exp %20 : vector<2x16xf32>
    %22 = arith.mulf %18, %21 : vector<2x16xf32>
    %23 = arith.addf %12, %22 : vector<2x16xf32>
    %c0_19 = arith.constant 0 : index
    %c0_20 = arith.constant 0 : index
    %24 = vector.load %arg12[%c0_19, %c0_20] : memref<2x16xf32, #tpu.memory_space<vmem>>, vector<2x16xf32>
    tpu.vector_store %arg12[%c0_19, %c0_20], %12 {strides = array<i32>} : memref<2x16xf32, #tpu.memory_space<vmem>>, vector<2x16xf32>,
    %c0_21 = arith.constant 0 : index
    %c0_22 = arith.constant 0 : index
    %25 = vector.load %arg13[%c0_21, %c0_22] : memref<2x16xf32, #tpu.memory_space<vmem>>, vector<2x16xf32>
    tpu.vector_store %arg13[%c0_21, %c0_22], %17 {strides = array<i32>} : memref<2x16xf32, #tpu.memory_space<vmem>>, vector<2x16xf32>,
    %c0_23 = arith.constant 0 : index
    %c0_24 = arith.constant 0 : index
    %26 = vector.load %arg14[%c0_23, %c0_24] : memref<2x16xf32, #tpu.memory_space<vmem>>, vector<2x16xf32>
    tpu.vector_store %arg14[%c0_23, %c0_24], %23 {strides = array<i32>} : memref<2x16xf32, #tpu.memory_space<vmem>>, vector<2x16xf32>,
    %c0_25 = arith.constant 0 : index
    %c0_26 = arith.constant 0 : index
    %27 = vector.load %arg8[%c0_25, %c0_26] : memref<16x256xf32, #tpu.memory_space<vmem>>, vector<16x256xf32>
    %cst_27 = arith.constant dense<0.000000e+00> : vector<2x256xf32>
    %28 = tpu.matmul %23, %27, %cst_27 {dimension_numbers = #tpu.dot_dimension_numbers<[1], [0], [0], [1], [0, 0, 1, 1], [], []>} : vector<2x16xf32>, vector<16x256xf32>, vector<2x256xf32> -> vector<2x256xf32>
    %c0_28 = arith.constant 0 : index
    %c0_29 = arith.constant 0 : index
    %29 = vector.load %arg9[%c0_28, %c0_29] : memref<1x256xf32, #tpu.memory_space<vmem>>, vector<1x256xf32>
    %30 = vector.broadcast %29 : vector<1x256xf32> to vector<2x256xf32>
    %31 = arith.addf %28, %30 : vector<2x256xf32>
    %cst_30 = arith.constant 0.000000e+00 : f32
    %32 = vector.broadcast %cst_30 : f32 to vector<2x256xf32>
    %33 = arith.maximumf %31, %32 : vector<2x256xf32>
    %c0_31 = arith.constant 0 : index
    %c0_32 = arith.constant 0 : index
    %34 = vector.load %arg10[%c0_31, %c0_32] : memref<256x1024xf32, #tpu.memory_space<vmem>>, vector<256x1024xf32>
    %cst_33 = arith.constant dense<0.000000e+00> : vector<2x1024xf32>
    %35 = tpu.matmul %33, %34, %cst_33 {dimension_numbers = #tpu.dot_dimension_numbers<[1], [0], [0], [1], [0, 0, 1, 1], [], []>} : vector<2x256xf32>, vector<256x1024xf32>, vector<2x1024xf32> -> vector<2x1024xf32>
    %c0_34 = arith.constant 0 : index
    %c0_35 = arith.constant 0 : index
    %36 = vector.load %arg11[%c0_34, %c0_35] : memref<1x1024xf32, #tpu.memory_space<vmem>>, vector<1x1024xf32>
    %37 = vector.broadcast %36 : vector<1x1024xf32> to vector<2x1024xf32>
    %38 = arith.addf %35, %37 : vector<2x1024xf32>
    %cst_36 = arith.constant 0.000000e+00 : f32
    %39 = vector.broadcast %cst_36 : f32 to vector<2x1024xf32>
    %40 = arith.maximumf %38, %39 : vector<2x1024xf32>
    %c0_37 = arith.constant 0 : index
    %c0_38 = arith.constant 0 : index
    %41 = vector.load %arg15[%c0_37, %c0_38] : memref<2x1024xf32, #tpu.memory_space<vmem>>, vector<2x1024xf32>
    tpu.vector_store %arg15[%c0_37, %c0_38], %40 {strides = array<i32>} : memref<2x1024xf32, #tpu.memory_space<vmem>>, vector<2x1024xf32>,
    return
  }
}

module attributes {stable_mosaic.version = 11 : i64} {
  func.func @_gemm_bias_act_kernel(%arg0: i32, %arg1: memref<256x256xf32, #tpu.memory_space<vmem>>, %arg2: memref<256x50xf32, #tpu.memory_space<vmem>>, %arg3: memref<256x1xf32, #tpu.memory_space<vmem>>, %arg4: memref<256x50xf32, #tpu.memory_space<vmem>>) attributes {dimension_semantics = [#tpu.dimension_semantics<parallel>], iteration_bounds = array<i64: 1>, scalar_prefetch = 0 : i64, scratch_operands = 0 : i64, tpu.core_type = #tpu.core_type<tc>, window_params = [{pipeline_mode = #tpu.pipeline_mode<synchronous>, transform_indices = @transform_0, window_bounds = array<i64: 256, 256>}, {transform_indices = @transform_1, window_bounds = array<i64: 256, 50>}, {pipeline_mode = #tpu.pipeline_mode<synchronous>, transform_indices = @transform_2, window_bounds = array<i64: 256, 1>}, {transform_indices = @transform_3, window_bounds = array<i64: 256, 50>}]} {
    %c0 = arith.constant 0 : index
    %c0_0 = arith.constant 0 : index
    %0 = vector.load %arg1[%c0, %c0_0] : memref<256x256xf32, #tpu.memory_space<vmem>>, vector<256x256xf32>
    %c0_1 = arith.constant 0 : index
    %c0_2 = arith.constant 0 : index
    %1 = vector.load %arg2[%c0_1, %c0_2] : memref<256x50xf32, #tpu.memory_space<vmem>>, vector<256x50xf32>
    %cst = arith.constant dense<0.000000e+00> : vector<256x50xf32>
    %2 = tpu.matmul %0, %1, %cst {dimension_numbers = #tpu.dot_dimension_numbers<[1], [0], [0], [1], [0, 0, 1, 1], [], []>} : vector<256x256xf32>, vector<256x50xf32>, vector<256x50xf32> -> vector<256x50xf32>
    %c0_3 = arith.constant 0 : index
    %c0_4 = arith.constant 0 : index
    %3 = vector.load %arg3[%c0_3, %c0_4] : memref<256x1xf32, #tpu.memory_space<vmem>>, vector<256x1xf32>
    %4 = vector.broadcast %3 : vector<256x1xf32> to vector<256x50xf32>
    %5 = arith.addf %2, %4 : vector<256x50xf32>
    %cst_5 = arith.constant 0.000000e+00 : f32
    %6 = vector.broadcast %cst_5 : f32 to vector<256x50xf32>
    %7 = arith.maximumf %5, %6 : vector<256x50xf32>
    %c0_6 = arith.constant 0 : index
    %c0_7 = arith.constant 0 : index
    %8 = vector.load %arg4[%c0_6, %c0_7] : memref<256x50xf32, #tpu.memory_space<vmem>>, vector<256x50xf32>
    tpu.vector_store %arg4[%c0_6, %c0_7], %7 {strides = array<i32>} : memref<256x50xf32, #tpu.memory_space<vmem>>, vector<256x50xf32>,
    return
  }
  func.func @transform_0(%arg0: i32) -> (i32, i32) {
    %c0_i32 = arith.constant 0 : i32
    %c0_i32_0 = arith.constant 0 : i32
    %c0_i32_1 = arith.constant 0 : i32
    return %c0_i32, %c0_i32_0 : i32, i32
  }
  func.func @transform_1(%arg0: i32) -> (i32, i32) {
    %c0_i32 = arith.constant 0 : i32
    %c0_i32_0 = arith.constant 0 : i32
    return %c0_i32, %arg0 : i32, i32
  }
  func.func @transform_2(%arg0: i32) -> (i32, i32) {
    %c0_i32 = arith.constant 0 : i32
    %c0_i32_0 = arith.constant 0 : i32
    %c0_i32_1 = arith.constant 0 : i32
    return %c0_i32, %c0_i32_0 : i32, i32
  }
  func.func @transform_3(%arg0: i32) -> (i32, i32) {
    %c0_i32 = arith.constant 0 : i32
    %c0_i32_0 = arith.constant 0 : i32
    return %c0_i32, %arg0 : i32, i32
  }
}

module attributes {stable_mosaic.version = 11 : i64} {
  func.func @_gemm_bias_act_kernel(%arg0: i32, %arg1: memref<128x256xf32, #tpu.memory_space<vmem>>, %arg2: memref<256x162xf32, #tpu.memory_space<vmem>>, %arg3: memref<128x1xf32, #tpu.memory_space<vmem>>, %arg4: memref<128x162xf32, #tpu.memory_space<vmem>>) attributes {dimension_semantics = [#tpu.dimension_semantics<parallel>], iteration_bounds = array<i64: 1>, scalar_prefetch = 0 : i64, scratch_operands = 0 : i64, tpu.core_type = #tpu.core_type<tc>, window_params = [{pipeline_mode = #tpu.pipeline_mode<synchronous>, transform_indices = @transform_0, window_bounds = array<i64: 128, 256>}, {transform_indices = @transform_1, window_bounds = array<i64: 256, 162>}, {pipeline_mode = #tpu.pipeline_mode<synchronous>, transform_indices = @transform_2, window_bounds = array<i64: 128, 1>}, {transform_indices = @transform_3, window_bounds = array<i64: 128, 162>}]} {
    %c0 = arith.constant 0 : index
    %c0_0 = arith.constant 0 : index
    %0 = vector.load %arg1[%c0, %c0_0] : memref<128x256xf32, #tpu.memory_space<vmem>>, vector<128x256xf32>
    %c0_1 = arith.constant 0 : index
    %c0_2 = arith.constant 0 : index
    %1 = vector.load %arg2[%c0_1, %c0_2] : memref<256x162xf32, #tpu.memory_space<vmem>>, vector<256x162xf32>
    %cst = arith.constant dense<0.000000e+00> : vector<128x162xf32>
    %2 = tpu.matmul %0, %1, %cst {dimension_numbers = #tpu.dot_dimension_numbers<[1], [0], [0], [1], [0, 0, 1, 1], [], []>} : vector<128x256xf32>, vector<256x162xf32>, vector<128x162xf32> -> vector<128x162xf32>
    %c0_3 = arith.constant 0 : index
    %c0_4 = arith.constant 0 : index
    %3 = vector.load %arg3[%c0_3, %c0_4] : memref<128x1xf32, #tpu.memory_space<vmem>>, vector<128x1xf32>
    %4 = vector.broadcast %3 : vector<128x1xf32> to vector<128x162xf32>
    %5 = arith.addf %2, %4 : vector<128x162xf32>
    %cst_5 = arith.constant 0.000000e+00 : f32
    %6 = vector.broadcast %cst_5 : f32 to vector<128x162xf32>
    %7 = arith.maximumf %5, %6 : vector<128x162xf32>
    %c0_6 = arith.constant 0 : index
    %c0_7 = arith.constant 0 : index
    %8 = vector.load %arg4[%c0_6, %c0_7] : memref<128x162xf32, #tpu.memory_space<vmem>>, vector<128x162xf32>
    tpu.vector_store %arg4[%c0_6, %c0_7], %7 {strides = array<i32>} : memref<128x162xf32, #tpu.memory_space<vmem>>, vector<128x162xf32>,
    return
  }
  func.func @transform_0(%arg0: i32) -> (i32, i32) {
    %c0_i32 = arith.constant 0 : i32
    %c0_i32_0 = arith.constant 0 : i32
    %c0_i32_1 = arith.constant 0 : i32
    return %c0_i32, %c0_i32_0 : i32, i32
  }
  func.func @transform_1(%arg0: i32) -> (i32, i32) {
    %c0_i32 = arith.constant 0 : i32
    %c0_i32_0 = arith.constant 0 : i32
    return %c0_i32, %arg0 : i32, i32
  }
  func.func @transform_2(%arg0: i32) -> (i32, i32) {
    %c0_i32 = arith.constant 0 : i32
    %c0_i32_0 = arith.constant 0 : i32
    %c0_i32_1 = arith.constant 0 : i32
    return %c0_i32, %c0_i32_0 : i32, i32
  }
  func.func @transform_3(%arg0: i32) -> (i32, i32) {
    %c0_i32 = arith.constant 0 : i32
    %c0_i32_0 = arith.constant 0 : i32
    return %c0_i32, %arg0 : i32, i32
  }
}

module attributes {stable_mosaic.version = 11 : i64} {
  func.func @_gemm_bias_act_kernel(%arg0: i32, %arg1: memref<128x128xf32, #tpu.memory_space<vmem>>, %arg2: memref<128x384xf32, #tpu.memory_space<vmem>>, %arg3: memref<128x1xf32, #tpu.memory_space<vmem>>, %arg4: memref<128x384xf32, #tpu.memory_space<vmem>>) attributes {dimension_semantics = [#tpu.dimension_semantics<parallel>], iteration_bounds = array<i64: 2>, scalar_prefetch = 0 : i64, scratch_operands = 0 : i64, tpu.core_type = #tpu.core_type<tc>, window_params = [{pipeline_mode = #tpu.pipeline_mode<synchronous>, transform_indices = @transform_0, window_bounds = array<i64: 128, 128>}, {transform_indices = @transform_1, window_bounds = array<i64: 128, 384>}, {pipeline_mode = #tpu.pipeline_mode<synchronous>, transform_indices = @transform_2, window_bounds = array<i64: 128, 1>}, {transform_indices = @transform_3, window_bounds = array<i64: 128, 384>}]} {
    %c0 = arith.constant 0 : index
    %c0_0 = arith.constant 0 : index
    %0 = vector.load %arg1[%c0, %c0_0] : memref<128x128xf32, #tpu.memory_space<vmem>>, vector<128x128xf32>
    %c0_1 = arith.constant 0 : index
    %c0_2 = arith.constant 0 : index
    %1 = vector.load %arg2[%c0_1, %c0_2] : memref<128x384xf32, #tpu.memory_space<vmem>>, vector<128x384xf32>
    %cst = arith.constant dense<0.000000e+00> : vector<128x384xf32>
    %2 = tpu.matmul %0, %1, %cst {dimension_numbers = #tpu.dot_dimension_numbers<[1], [0], [0], [1], [0, 0, 1, 1], [], []>} : vector<128x128xf32>, vector<128x384xf32>, vector<128x384xf32> -> vector<128x384xf32>
    %c0_3 = arith.constant 0 : index
    %c0_4 = arith.constant 0 : index
    %3 = vector.load %arg3[%c0_3, %c0_4] : memref<128x1xf32, #tpu.memory_space<vmem>>, vector<128x1xf32>
    %4 = vector.broadcast %3 : vector<128x1xf32> to vector<128x384xf32>
    %5 = arith.addf %2, %4 : vector<128x384xf32>
    %cst_5 = arith.constant 0.000000e+00 : f32
    %6 = vector.broadcast %cst_5 : f32 to vector<128x384xf32>
    %7 = arith.maximumf %5, %6 : vector<128x384xf32>
    %c0_6 = arith.constant 0 : index
    %c0_7 = arith.constant 0 : index
    %8 = vector.load %arg4[%c0_6, %c0_7] : memref<128x384xf32, #tpu.memory_space<vmem>>, vector<128x384xf32>
    tpu.vector_store %arg4[%c0_6, %c0_7], %7 {strides = array<i32>} : memref<128x384xf32, #tpu.memory_space<vmem>>, vector<128x384xf32>,
    return
  }
  func.func @transform_0(%arg0: i32) -> (i32, i32) {
    %c0_i32 = arith.constant 0 : i32
    %c0_i32_0 = arith.constant 0 : i32
    %c0_i32_1 = arith.constant 0 : i32
    return %c0_i32, %c0_i32_0 : i32, i32
  }
  func.func @transform_1(%arg0: i32) -> (i32, i32) {
    %c0_i32 = arith.constant 0 : i32
    %c0_i32_0 = arith.constant 0 : i32
    return %c0_i32, %arg0 : i32, i32
  }
  func.func @transform_2(%arg0: i32) -> (i32, i32) {
    %c0_i32 = arith.constant 0 : i32
    %c0_i32_0 = arith.constant 0 : i32
    %c0_i32_1 = arith.constant 0 : i32
    return %c0_i32, %c0_i32_0 : i32, i32
  }
  func.func @transform_3(%arg0: i32) -> (i32, i32) {
    %c0_i32 = arith.constant 0 : i32
    %c0_i32_0 = arith.constant 0 : i32
    return %c0_i32, %arg0 : i32, i32
  }
}

module attributes {stable_mosaic.version = 11 : i64} {
  func.func @_gemm_bias_act_kernel(%arg0: i32, %arg1: memref<4x128xf32, #tpu.memory_space<vmem>>, %arg2: memref<128x1152xf32, #tpu.memory_space<vmem>>, %arg3: memref<4x1xf32, #tpu.memory_space<vmem>>, %arg4: memref<4x1152xf32, #tpu.memory_space<vmem>>) attributes {dimension_semantics = [#tpu.dimension_semantics<parallel>], iteration_bounds = array<i64: 2>, scalar_prefetch = 0 : i64, scratch_operands = 0 : i64, tpu.core_type = #tpu.core_type<tc>, window_params = [{pipeline_mode = #tpu.pipeline_mode<synchronous>, transform_indices = @transform_0, window_bounds = array<i64: 4, 128>}, {transform_indices = @transform_1, window_bounds = array<i64: 128, 1152>}, {pipeline_mode = #tpu.pipeline_mode<synchronous>, transform_indices = @transform_2, window_bounds = array<i64: 4, 1>}, {transform_indices = @transform_3, window_bounds = array<i64: 4, 1152>}]} {
    %c0 = arith.constant 0 : index
    %c0_0 = arith.constant 0 : index
    %0 = vector.load %arg1[%c0, %c0_0] : memref<4x128xf32, #tpu.memory_space<vmem>>, vector<4x128xf32>
    %c0_1 = arith.constant 0 : index
    %c0_2 = arith.constant 0 : index
    %1 = vector.load %arg2[%c0_1, %c0_2] : memref<128x1152xf32, #tpu.memory_space<vmem>>, vector<128x1152xf32>
    %cst = arith.constant dense<0.000000e+00> : vector<4x1152xf32>
    %2 = tpu.matmul %0, %1, %cst {dimension_numbers = #tpu.dot_dimension_numbers<[1], [0], [0], [1], [0, 0, 1, 1], [], []>} : vector<4x128xf32>, vector<128x1152xf32>, vector<4x1152xf32> -> vector<4x1152xf32>
    %c0_3 = arith.constant 0 : index
    %c0_4 = arith.constant 0 : index
    %3 = vector.load %arg3[%c0_3, %c0_4] : memref<4x1xf32, #tpu.memory_space<vmem>>, vector<4x1xf32>
    %4 = vector.broadcast %3 : vector<4x1xf32> to vector<4x1152xf32>
    %5 = arith.addf %2, %4 : vector<4x1152xf32>
    %6 = arith.negf %5 : vector<4x1152xf32>
    %7 = math.exp %6 : vector<4x1152xf32>
    %cst_5 = arith.constant 1.000000e+00 : f32
    %8 = vector.broadcast %cst_5 : f32 to vector<4x1152xf32>
    %9 = arith.addf %8, %7 : vector<4x1152xf32>
    %10 = arith.divf %8, %9 : vector<4x1152xf32>
    %c0_6 = arith.constant 0 : index
    %c0_7 = arith.constant 0 : index
    %11 = vector.load %arg4[%c0_6, %c0_7] : memref<4x1152xf32, #tpu.memory_space<vmem>>, vector<4x1152xf32>
    tpu.vector_store %arg4[%c0_6, %c0_7], %10 {strides = array<i32>} : memref<4x1152xf32, #tpu.memory_space<vmem>>, vector<4x1152xf32>,
    return
  }
  func.func @transform_0(%arg0: i32) -> (i32, i32) {
    %c0_i32 = arith.constant 0 : i32
    %c0_i32_0 = arith.constant 0 : i32
    %c0_i32_1 = arith.constant 0 : i32
    return %c0_i32, %c0_i32_0 : i32, i32
  }
  func.func @transform_1(%arg0: i32) -> (i32, i32) {
    %c0_i32 = arith.constant 0 : i32
    %c0_i32_0 = arith.constant 0 : i32
    return %c0_i32, %arg0 : i32, i32
  }
  func.func @transform_2(%arg0: i32) -> (i32, i32) {
    %c0_i32 = arith.constant 0 : i32
    %c0_i32_0 = arith.constant 0 : i32
    %c0_i32_1 = arith.constant 0 : i32
    return %c0_i32, %c0_i32_0 : i32, i32
  }
  func.func @transform_3(%arg0: i32) -> (i32, i32) {
    %c0_i32 = arith.constant 0 : i32
    %c0_i32_0 = arith.constant 0 : i32
    return %c0_i32, %arg0 : i32, i32
  }
}

</mosaic_0001>

<bundles_post_ra>
// kernel: _lambda_.9
= control target key start
LH: loop header
LB: loop body
LE: loop exit
PB: predicated region body
PF: predicated region fallthrough
CT: control target
= control target key end

     0   :  { %s946_s12 = smov 0   ;;  %s948_s13 = smov 0   ;;  %s1242_s0 = inlined_call_operand.vmem [shape: f32[32,16], index: 0, kind: input, shape index: {}]   ;;  %s1243_s1 = inlined_call_operand.vmem [shape: f32[16,2048], index: 1, kind: input, shape index: {}]   ;;  %s1244_s2 = inlined_call_operand.vmem [shape: f32[32,1], index: 2, kind: input, shape index: {}]   ;;  %s1245_s3 = inlined_call_operand.vmem [shape: f32[32,2048], index: 3, kind: output, shape index: {}]  }
   0x1   :  { %s950_s14 = smov 0  }
   0x2 LB: > { %s839_s15 = sadd.s32 4294967295, %s922_s14   ;;  %s963_s16 = sadd.s32 1, %s922_s14   ;;  %s922_s14 = sphi %s950_s14, %s1249_s14   ;;  %s918_s13 = sphi %s948_s13, %s1248_s13   ;;  %s914_s12 = sphi %s946_s12, %s1247_s12  }
   0x3   : > { %s38_s17 = ssub.s32 %s922_s14, %s963_s16  ;;  %s41_s18 = sadd.s32 1, %s918_s13 }
   0x4   : > { %p39_p0 = scmp.eq.s32.totalorder %s38_s17, 0  ;;  %p48_p1 = scmp.ne.s32.totalorder %s918_s13, %s914_s12 }
   0x5   : > { %p49_p2 = scmp.eq.s32.totalorder %s922_s14, 0  ;;  %p99_p3 = scmp.eq.s32.totalorder %s839_s15, 1 }
   0x6   : > { %s974_s19 = scalar_select %p39_p0, %s918_s13, %s41_s18  }
   0x7   : > { %p50_p4 = por %p49_p2, %p48_p1  ;;  %p976_p5 = por %p99_p3, %p48_p1 }
   0x8   : > { %p842_p6 = scmp.ge.s32.totalorder %s922_s14, 2 }
   0xa   : > { %127 = sbr.rel (%p842_p6) target bundleno = 27 (0x1b), region = 24 }
   0xf   : > { %130 = sbr.rel (!%p50_p4) target bundleno = 27 (0x1b), region = 28  ;;  %s132_s21 = sand.u32 (%p50_p4), 1, %s918_s13  }
  0x10   : > { %s870_s22 = sshll.u32 (%p50_p4), %s922_s14, 6  ;;  %s843_s23 = sshll.u32 (%p50_p4), %s132_s21, 7 }
  0x11   : > { %s986_s26 = scalar_lea.vmem (%p50_p4), %s1243_s1, %s870_s22  ;;  %s134_s27 = scalar_lea.vmem (%p50_p4), [#allocation2], %s843_s23 }
  0x12   : > { %v150_v0 = vld [vmem:[%s986_s26] sm:$0xff] (%p50_p4)  ;;  %v152_v1 = vld [vmem:[%s986_s26 + $0x8] sm:$0xff] (%p50_p4)  ;;  %v154_v2 = vld [vmem:[%s986_s26 + $0x10] sm:$0xff] (%p50_p4) }
  0x13   : > { %151 = vst [vmem:[%s134_s27] sm:$0xff] (%p50_p4), %v150_v0  ;;  %153 = vst [vmem:[%s134_s27 + $0x8] sm:$0xff] (%p50_p4), %v152_v1  ;;  %v156_v3 = vld [vmem:[%s986_s26 + $0x18] sm:$0xff] (%p50_p4)  ;;  %v158_v4 = vld [vmem:[%s986_s26 + $0x20] sm:$0xff] (%p50_p4) }
  0x14   : > { %155 = vst [vmem:[%s134_s27 + $0x10] sm:$0xff] %v154_v2  ;;  %v160_v5 = vld [vmem:[%s986_s26 + $0x28] sm:$0xff]  ;;  %157 = vst [vmem:[%s134_s27 + $0x18] sm:$0xff] %v156_v3  ;;  %v162_v6 = vld [vmem:[%s986_s26 + $0x30] sm:$0xff] }
  0x15   : > { %159 = vst [vmem:[%s134_s27 + $0x20] sm:$0xff] %v158_v4  ;;  %161 = vst [vmem:[%s134_s27 + $0x28] sm:$0xff] %v160_v5  ;;  %v164_v7 = vld [vmem:[%s986_s26 + $0x38] sm:$0xff]  ;;  %v166_v8 = vld [vmem:[%s986_s26 + $0x80] sm:$0xff] }
  0x16   : > { %163 = vst [vmem:[%s134_s27 + $0x30] sm:$0xff] %v162_v6  ;;  %165 = vst [vmem:[%s134_s27 + $0x38] sm:$0xff] %v164_v7  ;;  %v168_v9 = vld [vmem:[%s986_s26 + $0x88] sm:$0xff]  ;;  %v170_v10 = vld [vmem:[%s986_s26 + $0x90] sm:$0xff] }
  0x17   : > { %167 = vst [vmem:[%s134_s27 + $0x40] sm:$0xff] %v166_v8  ;;  %v172_v11 = vld [vmem:[%s986_s26 + $0x98] sm:$0xff]  ;;  %169 = vst [vmem:[%s134_s27 + $0x48] sm:$0xff] %v168_v9  ;;  %v174_v12 = vld [vmem:[%s986_s26 + $0xa0] sm:$0xff] }
  0x18   : > { %171 = vst [vmem:[%s134_s27 + $0x50] sm:$0xff] %v170_v10  ;;  %173 = vst [vmem:[%s134_s27 + $0x58] sm:$0xff] %v172_v11  ;;  %v176_v13 = vld [vmem:[%s986_s26 + $0xa8] sm:$0xff]  ;;  %v178_v14 = vld [vmem:[%s986_s26 + $0xb0] sm:$0xff] }
  0x19   : > { %175 = vst [vmem:[%s134_s27 + $0x60] sm:$0xff] %v174_v12  ;;  %177 = vst [vmem:[%s134_s27 + $0x68] sm:$0xff] %v176_v13  ;;  %v180_v15 = vld [vmem:[%s986_s26 + $0xb8] sm:$0xff] }
  0x1a   : > { %179 = vst [vmem:[%s134_s27 + $0x70] sm:$0xff] %v178_v14  ;;  %181 = vst [vmem:[%s134_s27 + $0x78] sm:$0xff] %v180_v15 }
  0x1b PF: > { %p846_p7 = scmp.ge.s32.totalorder %s922_s14, 1  ;;  %p186_p8 = scmp.lt.s32.totalorder %s922_s14, 3 }
  0x1d   : > { %p187_p9 = pnand %p846_p7, %p186_p8 }
  0x1e   : > { %s193_s28 = sand.u32 (!%p187_p9), 1, %s914_s12  }
  0x1f   : > { %190 = sbr.rel (%p187_p9) target bundleno = 280 (0x118), region = 51  ;;  %s847_s29 = sshll.u32 (!%p187_p9), %s193_s28, 7 }
  0x20   : > { %s1017_s7 = scalar_lea.vmem (!%p187_p9), [#allocation2], %s847_s29  ;;  %s848_s27 = sshll.u32 (!%p187_p9), %s193_s28, 8 }
  0x21   : > { %s1095_s12 = scalar_lea.vmem (!%p187_p9), [#allocation3], %s848_s27 }
  0x24   : > { %v924_v16 = vmov 0.0   ;;  %v237_v17 = vld [vmem:[%s1244_s2] sm:$0xff]  ;;  %v925_v18 = vmov 0   ;;  %v239_v19 = vld [vmem:[%s1244_s2 + $0x10] sm:$0xff]  ;;  %v230_v20 = vld [vmem:[%s1017_s7 + $0x48] sm:$0xff]  ;;  %vm261_vm0 = vcmask 130048  }
  0x25   : > { %338 = vmatprep.mubr.f32.mxu0 %v924_v16  ;;  %427 = vmatprep.mubr.f32.mxu1 %v924_v16  ;;  %v232_v21 = vld [vmem:[%s1017_s7 + $0x58] sm:$0xff]  ;;  %v229_v22 = vld [vmem:[%s1017_s7 + $0x40] sm:$0xff]  ;;  %v231_v23 = vld [vmem:[%s1017_s7 + $0x50] sm:$0xff]  ;;  %s871_s28 = sshll.u32 (%p976_p5), %s839_s15, 6 }
  0x26   : > { %898 = vset.pattern.permute.xlu0 %v925_v18  ;;  %899 = vset.pattern.permute.xlu1 %v925_v18  ;;  %v222_v24 = vld [vmem:[%s1017_s7 + $0x8] sm:$0xff]  ;;  %v224_v25 = vld [vmem:[%s1017_s7 + $0x18] sm:$0xff]  ;;  %v221_v26 = vld [vmem:[%s1017_s7] sm:$0xff]  ;;  %s1169_s20 = scalar_lea.vmem (%p976_p5), %s1245_s3, %s871_s28 }
  0x27   : > { %243 = vperm.xlu0 %898, %v237_v17   ;;  %253 = vperm.xlu1 %899, %v239_v19   ;;  %v223_v27 = vld [vmem:[%s1017_s7 + $0x10] sm:$0xff]  ;;  %v217_v28 = vld [vmem:[%s1242_s0] sm:$0xff]  ;;  %v234_v29 = vld [vmem:[%s1017_s7 + $0x68] sm:$0xff] }
  0x28   : > { %302 = vmatprep.subr.mxu0 %v230_v20  ;;  %391 = vmatprep.subr.mxu1 %v232_v21  ;;  %v236_v30 = vld [vmem:[%s1017_s7 + $0x78] sm:$0xff]  ;;  %v233_v31 = vld [vmem:[%s1017_s7 + $0x60] sm:$0xff]  ;;  %v235_v32 = vld [vmem:[%s1017_s7 + $0x70] sm:$0xff] }
  0x29   : > { %303 = vmatpush1.msra.mxu0 %v229_v22  ;;  %392 = vmatpush1.msra.mxu1 %v231_v23  ;;  %v218_v33 = vld [vmem:[%s1242_s0 + $0x8] sm:$0xff]  ;;  %v228_v35 = vld [vmem:[%s1017_s7 + $0x38] sm:$0xff]  ;;  %v225_v36 = vld [vmem:[%s1017_s7 + $0x20] sm:$0xff] }
  0x2a   : > { %304 = vmatprep.subr.mxu0 %v222_v24  ;;  %393 = vmatprep.subr.mxu1 %v224_v25  ;;  %v226_v34 = vld [vmem:[%s1017_s7 + $0x28] sm:$0xff]  ;;  %v227_v37 = vld [vmem:[%s1017_s7 + $0x30] sm:$0xff]  ;;  %v240_v40 = vld [vmem:[%s1244_s2 + $0x18] sm:$0xff] }
  0x2b   : > { %305 = vmatpush1.msra.mxu0 %v221_v26  ;;  %394 = vmatpush1.msra.mxu1 %v223_v27  ;;  %v219_v38 = vld [vmem:[%s1242_s0 + $0x10] sm:$0xff]  ;;  %v238_v39 = vld [vmem:[%s1244_s2 + $0x8] sm:$0xff]  ;;  %v220_v41 = vld [vmem:[%s1242_s0 + $0x18] sm:$0xff] }
  0x2c   : > { %849 = vmatmul.mubr.msk.f32.vlgmr.msra.gmra.mxu0 %vm261_vm0, %v217_v28  ;;  %853 = vmatmul.mubr.msk.f32.vlgmr.msra.gmra.mxu1 %vm261_vm0, %v217_v28 }
  0x2d   : > { %480 = vmatprep.subr.mxu0 %v234_v29  ;;  %569 = vmatprep.subr.mxu1 %v236_v30 }
  0x2e   : > { %481 = vmatpush1.msra.mxu0 %v233_v31  ;;  %570 = vmatpush1.msra.mxu1 %v235_v32 }
  0x2f   : > { %344 = vmatprep.mubr.f32.mxu0 %v924_v16  ;;  %433 = vmatprep.mubr.f32.mxu1 %v924_v16 }
  0x30   : > { %850 = vmatmul.mubr.msk.f32.gmra.mxu0 %vm261_vm0, %v218_v33  ;;  %854 = vmatmul.mubr.msk.f32.gmra.mxu1 %vm261_vm0, %v218_v33 }
  0x31   : > { %350 = vmatprep.mubr.f32.mxu0 %v924_v16  ;;  %439 = vmatprep.mubr.f32.mxu1 %v924_v16 }
  0x32   : > { %482 = vmatprep.subr.mxu0 %v226_v34  ;;  %571 = vmatprep.subr.mxu1 %v228_v35 }
  0x33   : > { %483 = vmatpush1.msra.mxu0 %v225_v36  ;;  %572 = vmatpush1.msra.mxu1 %v227_v37 }
  0x34   : > { %851 = vmatmul.mubr.msk.f32.gmra.mxu0 %vm261_vm0, %v219_v38  ;;  %855 = vmatmul.mubr.msk.f32.gmra.mxu1 %vm261_vm0, %v219_v38 }
  0x35   : > { %356 = vmatprep.mubr.f32.mxu0 %v924_v16  ;;  %445 = vmatprep.mubr.f32.mxu1 %v924_v16 }
  0x36   : > { %248 = vperm.xlu0 %898, %v238_v39   ;;  %258 = vperm.xlu1 %899, %v240_v40  }
  0x38   : > { %852 = vmatmul.mubr.msk.f32.gmra.mxu0 %vm261_vm0, %v220_v41  ;;  %856 = vmatmul.mubr.msk.f32.gmra.mxu1 %vm261_vm0, %v220_v41 }
  0x39   : > { %516 = vmatprep.mubr.f32.mxu0 %v924_v16  ;;  %605 = vmatprep.mubr.f32.mxu1 %v924_v16 }
  0x3c   : > { %857 = vmatmul.mubr.msk.f32.vlgmr.msra.gmra.mxu0 %vm261_vm0, %v217_v28  ;;  %861 = vmatmul.mubr.msk.f32.vlgmr.msra.gmra.mxu1 %vm261_vm0, %v217_v28 }
  0x3d   : > { %522 = vmatprep.mubr.f32.mxu0 %v924_v16  ;;  %611 = vmatprep.mubr.f32.mxu1 %v924_v16 }
  0x40   : > { %858 = vmatmul.mubr.msk.f32.gmra.mxu0 %vm261_vm0, %v218_v33  ;;  %862 = vmatmul.mubr.msk.f32.gmra.mxu1 %vm261_vm0, %v218_v33 }
  0x41   : > { %528 = vmatprep.mubr.f32.mxu0 %v924_v16  ;;  %617 = vmatprep.mubr.f32.mxu1 %v924_v16 }
  0x44   : > { %859 = vmatmul.mubr.msk.f32.gmra.mxu0 %vm261_vm0, %v219_v38  ;;  %863 = vmatmul.mubr.msk.f32.gmra.mxu1 %vm261_vm0, %v219_v38 }
  0x45   : > { %534 = vmatprep.mubr.f32.mxu0 %v924_v16  ;;  %623 = vmatprep.mubr.f32.mxu1 %v924_v16 }
  0x48   : > { %860 = vmatmul.mubr.msk.f32.gmra.mxu0 %vm261_vm0, %v220_v41  ;;  %864 = vmatmul.mubr.msk.f32.gmra.mxu1 %vm261_vm0, %v220_v41 }
  0xa2   : > { %v1083_v42 = vpop.permute.xlu0 %243  ;;  %v1093_v54 = vpop.permute.xlu1 %253 }
  0xb1   : > { %v1089_v47 = vpop.permute.xlu0 %248  ;;  %v1109_v9 = vpop.permute.xlu1 %258 }
  0xec   : > { %v340_v43 = vpop.f32.mrf.mxu0  ;;  %v429_v44 = vpop.f32.mrf.mxu1 }
  0xed   : > { %v341_v45 = vadd.f32 %v340_v43, %v1083_v42  ;;  %v430_v46 = vadd.f32 %v429_v44, %v1083_v42 }
  0xee   : > { %v342_v48 = vpop.f32.mrf.mxu0  ;;  %v431_v49 = vpop.f32.mrf.mxu1 }
  0xef   : > { %v630_v50 = vmax.f32 %v341_v45, 0.0  ;;  %v632_v51 = vmax.f32 %v430_v46, 0.0  ;;  %v343_v52 = vadd.f32 %v342_v48, %v1083_v42  ;;  %v432_v53 = vadd.f32 %v431_v49, %v1083_v42 }
  0xf0   : > { %v346_v55 = vpop.f32.mrf.mxu0  ;;  %v435_v56 = vpop.f32.mrf.mxu1 }
  0xf1   : > { %662 = vst [vmem:[%s1095_s12] sm:$0xff] %v630_v50  ;;  %664 = vst [vmem:[%s1095_s12 + $0x10] sm:$0xff] %v632_v51  ;;  %v631_v57 = vmax.f32 %v343_v52, 0.0  ;;  %v633_v58 = vmax.f32 %v432_v53, 0.0  ;;  %v347_v59 = vadd.f32 %v346_v55, %v1089_v47  ;;  %v436_v60 = vadd.f32 %v435_v56, %v1089_v47 }
  0xf2   : > { %v348_v61 = vpop.f32.mrf.mxu0  ;;  %v437_v62 = vpop.f32.mrf.mxu1 }
  0xf3   : > { %663 = vst [vmem:[%s1095_s12 + $0x8] sm:$0xff] %v631_v57  ;;  %665 = vst [vmem:[%s1095_s12 + $0x18] sm:$0xff] %v633_v58  ;;  %v638_v63 = vmax.f32 %v347_v59, 0.0  ;;  %v640_v0 = vmax.f32 %v436_v60, 0.0  ;;  %v349_v1 = vadd.f32 %v348_v61, %v1089_v47  ;;  %v438_v2 = vadd.f32 %v437_v62, %v1089_v47 }
  0xf4   : > { %v352_v3 = vpop.f32.mrf.mxu0  ;;  %v441_v4 = vpop.f32.mrf.mxu1 }
  0xf5   : > { %670 = vst [vmem:[%s1095_s12 + $0x40] sm:$0xff] %v638_v63  ;;  %672 = vst [vmem:[%s1095_s12 + $0x50] sm:$0xff] %v640_v0  ;;  %v639_v5 = vmax.f32 %v349_v1, 0.0  ;;  %v641_v6 = vmax.f32 %v438_v2, 0.0  ;;  %v353_v7 = vadd.f32 %v352_v3, %v1093_v54  ;;  %v442_v8 = vadd.f32 %v441_v4, %v1093_v54 }
  0xf6   : > { %v354_v10 = vpop.f32.mrf.mxu0  ;;  %v443_v11 = vpop.f32.mrf.mxu1 }
  0xf7   : > { %671 = vst [vmem:[%s1095_s12 + $0x48] sm:$0xff] %v639_v5  ;;  %673 = vst [vmem:[%s1095_s12 + $0x58] sm:$0xff] %v641_v6  ;;  %v646_v12 = vmax.f32 %v353_v7, 0.0  ;;  %v648_v13 = vmax.f32 %v442_v8, 0.0  ;;  %v355_v14 = vadd.f32 %v354_v10, %v1093_v54  ;;  %v444_v15 = vadd.f32 %v443_v11, %v1093_v54 }
  0xf8   : > { %v358_v16 = vpop.f32.mrf.mxu0  ;;  %v447_v17 = vpop.f32.mrf.mxu1 }
  0xf9   : > { %678 = vst [vmem:[%s1095_s12 + $0x80] sm:$0xff] %v646_v12  ;;  %680 = vst [vmem:[%s1095_s12 + $0x90] sm:$0xff] %v648_v13  ;;  %v647_v18 = vmax.f32 %v355_v14, 0.0  ;;  %v649_v19 = vmax.f32 %v444_v15, 0.0  ;;  %v359_v20 = vadd.f32 %v358_v16, %v1109_v9  ;;  %v448_v21 = vadd.f32 %v447_v17, %v1109_v9  ;;  %v720_v16 = vld [vmem:[%s1095_s12 + $0x10] sm:$0xff] (%p976_p5) }
  0xfa   : > { %v360_v22 = vpop.f32.mrf.mxu0  ;;  %v449_v23 = vpop.f32.mrf.mxu1  ;;  %v718_v15 = vld [vmem:[%s1095_s12 + $0x8] sm:$0xff] (%p976_p5)  ;;  %v722_v17 = vld [vmem:[%s1095_s12 + $0x18] sm:$0xff] (%p976_p5)  ;;  %721 = vst [vmem:[%s1169_s20 + $0x10] sm:$0xff] (%p976_p5), %v720_v16 }
  0xfb   : > { %679 = vst [vmem:[%s1095_s12 + $0x88] sm:$0xff] %v647_v18  ;;  %681 = vst [vmem:[%s1095_s12 + $0x98] sm:$0xff] %v649_v19  ;;  %v654_v24 = vmax.f32 %v359_v20, 0.0  ;;  %v656_v25 = vmax.f32 %v448_v21, 0.0  ;;  %v361_v26 = vadd.f32 %v360_v22, %v1109_v9  ;;  %v450_v27 = vadd.f32 %v449_v23, %v1109_v9 }
  0xfc   : > { %v518_v28 = vpop.f32.mrf.mxu0  ;;  %v607_v29 = vpop.f32.mrf.mxu1  ;;  %719 = vst [vmem:[%s1169_s20 + $0x8] sm:$0xff] (%p976_p5), %v718_v15  ;;  %723 = vst [vmem:[%s1169_s20 + $0x18] sm:$0xff] (%p976_p5), %v722_v17  ;;  %v732_v22 = vld [vmem:[%s1095_s12 + $0x40] sm:$0xff] (%p976_p5) }
  0xfd   : > { %686 = vst [vmem:[%s1095_s12 + $0xc0] sm:$0xff] %v654_v24  ;;  %688 = vst [vmem:[%s1095_s12 + $0xd0] sm:$0xff] %v656_v25  ;;  %v655_v30 = vmax.f32 %v361_v26, 0.0  ;;  %v657_v31 = vmax.f32 %v450_v27, 0.0  ;;  %v519_v32 = vadd.f32 %v518_v28, %v1083_v42  ;;  %v608_v33 = vadd.f32 %v607_v29, %v1083_v42  ;;  %v736_v24 = vld [vmem:[%s1095_s12 + $0x50] sm:$0xff] (%p976_p5) }
  0xfe   : > { %v520_v34 = vpop.f32.mrf.mxu0  ;;  %v609_v35 = vpop.f32.mrf.mxu1  ;;  %733 = vst [vmem:[%s1169_s20 + $0x80] sm:$0xff] (%p976_p5), %v732_v22  ;;  %v734_v23 = vld [vmem:[%s1095_s12 + $0x48] sm:$0xff] (%p976_p5)  ;;  %v738_v25 = vld [vmem:[%s1095_s12 + $0x58] sm:$0xff] (%p976_p5)  ;;  %737 = vst [vmem:[%s1169_s20 + $0x90] sm:$0xff] (%p976_p5), %v736_v24 }
  0xff   : > { %687 = vst [vmem:[%s1095_s12 + $0xc8] sm:$0xff] %v655_v30  ;;  %689 = vst [vmem:[%s1095_s12 + $0xd8] sm:$0xff] %v657_v31  ;;  %v634_v36 = vmax.f32 %v519_v32, 0.0  ;;  %v636_v37 = vmax.f32 %v608_v33, 0.0  ;;  %v521_v38 = vadd.f32 %v520_v34, %v1083_v42  ;;  %v610_v39 = vadd.f32 %v609_v35, %v1083_v42 }
 0x100   : > { %v524_v40 = vpop.f32.mrf.mxu0  ;;  %v613_v41 = vpop.f32.mrf.mxu1  ;;  %735 = vst [vmem:[%s1169_s20 + $0x88] sm:$0xff] (%p976_p5), %v734_v23  ;;  %739 = vst [vmem:[%s1169_s20 + $0x98] sm:$0xff] (%p976_p5), %v738_v25  ;;  %v748_v30 = vld [vmem:[%s1095_s12 + $0x80] sm:$0xff] (%p976_p5)  ;;  %v752_v32 = vld [vmem:[%s1095_s12 + $0x90] sm:$0xff] (%p976_p5) }
 0x101   : > { %666 = vst [vmem:[%s1095_s12 + $0x20] sm:$0xff] %v634_v36  ;;  %668 = vst [vmem:[%s1095_s12 + $0x30] sm:$0xff] %v636_v37  ;;  %v635_v43 = vmax.f32 %v521_v38, 0.0  ;;  %v637_v44 = vmax.f32 %v610_v39, 0.0  ;;  %v525_v45 = vadd.f32 %v524_v40, %v1089_v47  ;;  %v614_v46 = vadd.f32 %v613_v41, %v1089_v47 }
 0x102   : > { %v526_v48 = vpop.f32.mrf.mxu0  ;;  %v615_v49 = vpop.f32.mrf.mxu1  ;;  %v750_v31 = vld [vmem:[%s1095_s12 + $0x88] sm:$0xff] (%p976_p5)  ;;  %749 = vst [vmem:[%s1169_s20 + $0x100] sm:$0xff] (%p976_p5), %v748_v30  ;;  %v754_v33 = vld [vmem:[%s1095_s12 + $0x98] sm:$0xff] (%p976_p5)  ;;  %753 = vst [vmem:[%s1169_s20 + $0x110] sm:$0xff] (%p976_p5), %v752_v32 }
 0x103   : > { %667 = vst [vmem:[%s1095_s12 + $0x28] sm:$0xff] %v635_v43  ;;  %669 = vst [vmem:[%s1095_s12 + $0x38] sm:$0xff] %v637_v44  ;;  %v642_v50 = vmax.f32 %v525_v45, 0.0  ;;  %v644_v42 = vmax.f32 %v614_v46, 0.0  ;;  %v527_v51 = vadd.f32 %v526_v48, %v1089_v47  ;;  %v616_v52 = vadd.f32 %v615_v49, %v1089_v47 }
 0x104   : > { %v530_v53 = vpop.f32.mrf.mxu0  ;;  %v619_v55 = vpop.f32.mrf.mxu1  ;;  %751 = vst [vmem:[%s1169_s20 + $0x108] sm:$0xff] (%p976_p5), %v750_v31  ;;  %755 = vst [vmem:[%s1169_s20 + $0x118] sm:$0xff] (%p976_p5), %v754_v33  ;;  %v764_v38 = vld [vmem:[%s1095_s12 + $0xc0] sm:$0xff] (%p976_p5)  ;;  %v768_v40 = vld [vmem:[%s1095_s12 + $0xd0] sm:$0xff] (%p976_p5) }
 0x105   : > { %674 = vst [vmem:[%s1095_s12 + $0x60] sm:$0xff] %v642_v50  ;;  %676 = vst [vmem:[%s1095_s12 + $0x70] sm:$0xff] %v644_v42  ;;  %v643_v56 = vmax.f32 %v527_v51, 0.0  ;;  %v645_v57 = vmax.f32 %v616_v52, 0.0  ;;  %v531_v58 = vadd.f32 %v530_v53, %v1093_v54  ;;  %v620_v59 = vadd.f32 %v619_v55, %v1093_v54 }
 0x106   : > { %v532_v60 = vpop.f32.mrf.mxu0  ;;  %v621_v61 = vpop.f32.mrf.mxu1  ;;  %v766_v39 = vld [vmem:[%s1095_s12 + $0xc8] sm:$0xff] (%p976_p5)  ;;  %765 = vst [vmem:[%s1169_s20 + $0x180] sm:$0xff] (%p976_p5), %v764_v38  ;;  %769 = vst [vmem:[%s1169_s20 + $0x190] sm:$0xff] (%p976_p5), %v768_v40  ;;  %v770_v41 = vld [vmem:[%s1095_s12 + $0xd8] sm:$0xff] (%p976_p5) }
 0x107   : > { %675 = vst [vmem:[%s1095_s12 + $0x68] sm:$0xff] %v643_v56  ;;  %677 = vst [vmem:[%s1095_s12 + $0x78] sm:$0xff] %v645_v57  ;;  %v650_v62 = vmax.f32 %v531_v58, 0.0  ;;  %v652_v47 = vmax.f32 %v620_v59, 0.0  ;;  %v533_v63 = vadd.f32 %v532_v60, %v1093_v54  ;;  %v622_v0 = vadd.f32 %v621_v61, %v1093_v54 }
 0x108   : > { %v536_v1 = vpop.f32.mrf.mxu0  ;;  %v625_v2 = vpop.f32.mrf.mxu1  ;;  %v724_v18 = vld [vmem:[%s1095_s12 + $0x20] sm:$0xff] (%p976_p5)  ;;  %v728_v20 = vld [vmem:[%s1095_s12 + $0x30] sm:$0xff] (%p976_p5)  ;;  %767 = vst [vmem:[%s1169_s20 + $0x188] sm:$0xff] (%p976_p5), %v766_v39  ;;  %771 = vst [vmem:[%s1169_s20 + $0x198] sm:$0xff] (%p976_p5), %v770_v41 }
 0x109   : > { %682 = vst [vmem:[%s1095_s12 + $0xa0] sm:$0xff] %v650_v62  ;;  %684 = vst [vmem:[%s1095_s12 + $0xb0] sm:$0xff] %v652_v47  ;;  %v651_v3 = vmax.f32 %v533_v63, 0.0  ;;  %v653_v4 = vmax.f32 %v622_v0, 0.0  ;;  %v537_v5 = vadd.f32 %v536_v1, %v1109_v9  ;;  %v626_v6 = vadd.f32 %v625_v2, %v1109_v9 }
 0x10a   : > { %v538_v7 = vpop.f32.mrf.mxu0  ;;  %v627_v8 = vpop.f32.mrf.mxu1  ;;  %v726_v19 = vld [vmem:[%s1095_s12 + $0x28] sm:$0xff] (%p976_p5)  ;;  %725 = vst [vmem:[%s1169_s20 + $0x20] sm:$0xff] (%p976_p5), %v724_v18  ;;  %v730_v21 = vld [vmem:[%s1095_s12 + $0x38] sm:$0xff] (%p976_p5)  ;;  %729 = vst [vmem:[%s1169_s20 + $0x30] sm:$0xff] (%p976_p5), %v728_v20 }
 0x10b   : > { %683 = vst [vmem:[%s1095_s12 + $0xa8] sm:$0xff] %v651_v3  ;;  %685 = vst [vmem:[%s1095_s12 + $0xb8] sm:$0xff] %v653_v4  ;;  %v658_v10 = vmax.f32 %v537_v5, 0.0  ;;  %v660_v54 = vmax.f32 %v626_v6, 0.0  ;;  %v539_v11 = vadd.f32 %v538_v7, %v1109_v9  ;;  %v628_v12 = vadd.f32 %v627_v8, %v1109_v9  ;;  %700 = sbr.rel (!%p976_p5) target bundleno = 280 (0x118), region = 59  ;;  %v716_v9 = vld [vmem:[%s1095_s12] sm:$0xff] (%p976_p5) }
 0x10c   : > { %717 = vst [vmem:[%s1169_s20] sm:$0xff] (%p976_p5), %v716_v9  ;;  %727 = vst [vmem:[%s1169_s20 + $0x28] sm:$0xff] (%p976_p5), %v726_v19  ;;  %v740_v26 = vld [vmem:[%s1095_s12 + $0x60] sm:$0xff] (%p976_p5)  ;;  %v744_v28 = vld [vmem:[%s1095_s12 + $0x70] sm:$0xff] (%p976_p5) }
 0x10d   : > { %690 = vst [vmem:[%s1095_s12 + $0xe0] sm:$0xff] %v658_v10  ;;  %692 = vst [vmem:[%s1095_s12 + $0xf0] sm:$0xff] %v660_v54  ;;  %v659_v13 = vmax.f32 %v539_v11, 0.0  ;;  %v661_v14 = vmax.f32 %v628_v12, 0.0 }
 0x10e   : > { %731 = vst [vmem:[%s1169_s20 + $0x38] sm:$0xff] (%p976_p5), %v730_v21  ;;  %v742_v27 = vld [vmem:[%s1095_s12 + $0x68] sm:$0xff] (%p976_p5)  ;;  %741 = vst [vmem:[%s1169_s20 + $0xa0] sm:$0xff] (%p976_p5), %v740_v26  ;;  %v746_v29 = vld [vmem:[%s1095_s12 + $0x78] sm:$0xff] (%p976_p5) }
 0x10f   : > { %691 = vst [vmem:[%s1095_s12 + $0xe8] sm:$0xff] %v659_v13  ;;  %693 = vst [vmem:[%s1095_s12 + $0xf8] sm:$0xff] %v661_v14 }
 0x110   : > { %743 = vst [vmem:[%s1169_s20 + $0xa8] sm:$0xff] %v742_v27  ;;  %745 = vst [vmem:[%s1169_s20 + $0xb0] sm:$0xff] %v744_v28  ;;  %v756_v34 = vld [vmem:[%s1095_s12 + $0xa0] sm:$0xff]  ;;  %v760_v36 = vld [vmem:[%s1095_s12 + $0xb0] sm:$0xff] }
 0x111   : > { %747 = vst [vmem:[%s1169_s20 + $0xb8] sm:$0xff] %v746_v29  ;;  %757 = vst [vmem:[%s1169_s20 + $0x120] sm:$0xff] %v756_v34 }
 0x112   : > { %v758_v35 = vld [vmem:[%s1095_s12 + $0xa8] sm:$0xff]  ;;  %v762_v37 = vld [vmem:[%s1095_s12 + $0xb8] sm:$0xff]  ;;  %761 = vst [vmem:[%s1169_s20 + $0x130] sm:$0xff] %v760_v36 }
 0x113   : > { %759 = vst [vmem:[%s1169_s20 + $0x128] sm:$0xff] %v758_v35  ;;  %763 = vst [vmem:[%s1169_s20 + $0x138] sm:$0xff] %v762_v37 }
 0x114   : > { %v772_v43 = vld [vmem:[%s1095_s12 + $0xe0] sm:$0xff]  ;;  %v776_v45 = vld [vmem:[%s1095_s12 + $0xf0] sm:$0xff] }
 0x115   : > { %773 = vst [vmem:[%s1169_s20 + $0x1a0] sm:$0xff] %v772_v43  ;;  %777 = vst [vmem:[%s1169_s20 + $0x1b0] sm:$0xff] %v776_v45 }
 0x116   : > { %v774_v44 = vld [vmem:[%s1095_s12 + $0xe8] sm:$0xff]  ;;  %v778_v46 = vld [vmem:[%s1095_s12 + $0xf8] sm:$0xff] }
 0x117   : > { %775 = vst [vmem:[%s1169_s20 + $0x1a8] sm:$0xff] %v774_v44  ;;  %779 = vst [vmem:[%s1169_s20 + $0x1b8] sm:$0xff] %v778_v46 }
 0x118 PF: > { %p10_p10 = scmp.ge.s32.totalorder %s963_s16, 4   ;;  %s1247_s12 = smov %s918_s13 }
 0x119   : > { %s1248_s13 = smov %s974_s19  ;;  %s1249_s14 = smov %s963_s16 }
 0x11a   :  { %12 = sbr.rel (!%p10_p10) target bundleno = 2 (0x2), region = 113 }

// kernel: _lambda_.10
= control target key start
LH: loop header
LB: loop body
LE: loop exit
PB: predicated region body
PF: predicated region fallthrough
CT: control target
= control target key end

     0   :  { %s989_s12 = smov 0   ;;  %s991_s13 = smov 0   ;;  %s1521_s0 = inlined_call_operand.vmem [shape: f32[32,512], index: 0, kind: input, shape index: {}]   ;;  %s1522_s1 = inlined_call_operand.vmem [shape: f32[512,512], index: 1, kind: input, shape index: {}]   ;;  %s1523_s2 = inlined_call_operand.vmem [shape: f32[32,1], index: 2, kind: input, shape index: {}]   ;;  %s1524_s3 = inlined_call_operand.vmem [shape: f32[32,512], index: 3, kind: output, shape index: {}]  }
   0x1   :  { %s993_s14 = smov 0  }
   0x2 LB: > { %s900_s15 = sadd.s32 4294967295, %s966_s14   ;;  %s1006_s16 = sadd.s32 1, %s966_s14   ;;  %s966_s14 = sphi %s993_s14, %s1528_s14   ;;  %s962_s13 = sphi %s991_s13, %s1527_s13   ;;  %s958_s12 = sphi %s989_s12, %s1526_s12  }
   0x3   : > { %s38_s17 = ssub.s32 %s966_s14, %s1006_s16  ;;  %s41_s18 = sadd.s32 1, %s962_s13 }
   0x4   : > { %p39_p0 = scmp.eq.s32.totalorder %s38_s17, 0  ;;  %p48_p1 = scmp.ne.s32.totalorder %s962_s13, %s958_s12 }
   0x5   : > { %p49_p2 = scmp.eq.s32.totalorder %s966_s14, 0  ;;  %p99_p3 = scmp.eq.s32.totalorder %s900_s15, 1 }
   0x6   : > { %s1017_s19 = scalar_select %p39_p0, %s962_s13, %s41_s18  }
   0x7   : > { %p50_p4 = por %p49_p2, %p48_p1  ;;  %p1019_p5 = por %p99_p3, %p48_p1 }
   0x8   : > { %p903_p6 = scmp.ge.s32.totalorder %s966_s14, 2 }
   0xa   : > { %127 = sbr.rel (%p903_p6) target bundleno = 83 (0x53), region = 24 }
   0xf   : > { %130 = sbr.rel (!%p50_p4) target bundleno = 83 (0x53), region = 28  ;;  %s132_s21 = sand.u32 (%p50_p4), 1, %s962_s13  }
  0x10   : > { %s915_s22 = sshll.u32 (%p50_p4), %s966_s14, 4  ;;  %s904_s23 = sshll.u32 (%p50_p4), %s132_s21, 10 }
  0x11   : > { %s1029_s26 = scalar_lea.vmem (%p50_p4), %s1522_s1, %s915_s22  ;;  %s1034_s27 = scalar_lea.vmem (%p50_p4), [#allocation2], %s904_s23 }
  0x12   : > { %v150_v0 = vld [vmem:[%s1029_s26] sm:$0xff] (%p50_p4)  ;;  %v152_v1 = vld [vmem:[%s1029_s26 + $0x8] sm:$0xff] (%p50_p4) }
  0x13   : > { %v154_v2 = vld [vmem:[%s1029_s26 + $0x20] sm:$0xff] (%p50_p4)  ;;  %151 = vst [vmem:[%s1034_s27] sm:$0xff] (%p50_p4), %v150_v0  ;;  %153 = vst [vmem:[%s1034_s27 + $0x8] sm:$0xff] (%p50_p4), %v152_v1  ;;  %v156_v3 = vld [vmem:[%s1029_s26 + $0x28] sm:$0xff] (%p50_p4) }
  0x14   : > { %155 = vst [vmem:[%s1034_s27 + $0x10] sm:$0xff] %v154_v2  ;;  %v158_v4 = vld [vmem:[%s1029_s26 + $0x40] sm:$0xff]  ;;  %v160_v5 = vld [vmem:[%s1029_s26 + $0x48] sm:$0xff]  ;;  %157 = vst [vmem:[%s1034_s27 + $0x18] sm:$0xff] %v156_v3 }
  0x15   : > { %159 = vst [vmem:[%s1034_s27 + $0x20] sm:$0xff] %v158_v4  ;;  %161 = vst [vmem:[%s1034_s27 + $0x28] sm:$0xff] %v160_v5  ;;  %v162_v6 = vld [vmem:[%s1029_s26 + $0x60] sm:$0xff]  ;;  %v164_v7 = vld [vmem:[%s1029_s26 + $0x68] sm:$0xff] }
  0x16   : > { %v166_v8 = vld [vmem:[%s1029_s26 + $0x80] sm:$0xff]  ;;  %163 = vst [vmem:[%s1034_s27 + $0x30] sm:$0xff] %v162_v6  ;;  %165 = vst [vmem:[%s1034_s27 + $0x38] sm:$0xff] %v164_v7  ;;  %v168_v9 = vld [vmem:[%s1029_s26 + $0x88] sm:$0xff] }
  0x17   : > { %167 = vst [vmem:[%s1034_s27 + $0x40] sm:$0xff] %v166_v8  ;;  %v170_v10 = vld [vmem:[%s1029_s26 + $0xa0] sm:$0xff]  ;;  %v172_v11 = vld [vmem:[%s1029_s26 + $0xa8] sm:$0xff]  ;;  %169 = vst [vmem:[%s1034_s27 + $0x48] sm:$0xff] %v168_v9 }
  0x18   : > { %171 = vst [vmem:[%s1034_s27 + $0x50] sm:$0xff] %v170_v10  ;;  %173 = vst [vmem:[%s1034_s27 + $0x58] sm:$0xff] %v172_v11  ;;  %v174_v12 = vld [vmem:[%s1029_s26 + $0xc0] sm:$0xff]  ;;  %v176_v13 = vld [vmem:[%s1029_s26 + $0xc8] sm:$0xff] }
  0x19   : > { %v178_v14 = vld [vmem:[%s1029_s26 + $0xe0] sm:$0xff]  ;;  %175 = vst [vmem:[%s1034_s27 + $0x60] sm:$0xff] %v174_v12  ;;  %177 = vst [vmem:[%s1034_s27 + $0x68] sm:$0xff] %v176_v13  ;;  %v180_v15 = vld [vmem:[%s1029_s26 + $0xe8] sm:$0xff] }
  0x1a   : > { %179 = vst [vmem:[%s1034_s27 + $0x70] sm:$0xff] %v178_v14  ;;  %v182_v16 = vld [vmem:[%s1029_s26 + $0x100] sm:$0xff]  ;;  %v184_v17 = vld [vmem:[%s1029_s26 + $0x108] sm:$0xff]  ;;  %181 = vst [vmem:[%s1034_s27 + $0x78] sm:$0xff] %v180_v15 }
  0x1b   : > { %183 = vst [vmem:[%s1034_s27 + $0x80] sm:$0xff] %v182_v16  ;;  %185 = vst [vmem:[%s1034_s27 + $0x88] sm:$0xff] %v184_v17  ;;  %v186_v18 = vld [vmem:[%s1029_s26 + $0x120] sm:$0xff]  ;;  %v188_v19 = vld [vmem:[%s1029_s26 + $0x128] sm:$0xff] }
  0x1c   : > { %v190_v20 = vld [vmem:[%s1029_s26 + $0x140] sm:$0xff]  ;;  %187 = vst [vmem:[%s1034_s27 + $0x90] sm:$0xff] %v186_v18  ;;  %189 = vst [vmem:[%s1034_s27 + $0x98] sm:$0xff] %v188_v19  ;;  %v192_v21 = vld [vmem:[%s1029_s26 + $0x148] sm:$0xff] }
  0x1d   : > { %191 = vst [vmem:[%s1034_s27 + $0xa0] sm:$0xff] %v190_v20  ;;  %v194_v22 = vld [vmem:[%s1029_s26 + $0x160] sm:$0xff]  ;;  %v196_v23 = vld [vmem:[%s1029_s26 + $0x168] sm:$0xff]  ;;  %193 = vst [vmem:[%s1034_s27 + $0xa8] sm:$0xff] %v192_v21 }
  0x1e   : > { %195 = vst [vmem:[%s1034_s27 + $0xb0] sm:$0xff] %v194_v22  ;;  %197 = vst [vmem:[%s1034_s27 + $0xb8] sm:$0xff] %v196_v23  ;;  %v198_v24 = vld [vmem:[%s1029_s26 + $0x180] sm:$0xff]  ;;  %v200_v25 = vld [vmem:[%s1029_s26 + $0x188] sm:$0xff] }
  0x1f   : > { %v202_v26 = vld [vmem:[%s1029_s26 + $0x1a0] sm:$0xff]  ;;  %199 = vst [vmem:[%s1034_s27 + $0xc0] sm:$0xff] %v198_v24  ;;  %201 = vst [vmem:[%s1034_s27 + $0xc8] sm:$0xff] %v200_v25  ;;  %v204_v27 = vld [vmem:[%s1029_s26 + $0x1a8] sm:$0xff] }
  0x20   : > { %203 = vst [vmem:[%s1034_s27 + $0xd0] sm:$0xff] %v202_v26  ;;  %v206_v28 = vld [vmem:[%s1029_s26 + $0x1c0] sm:$0xff]  ;;  %v208_v29 = vld [vmem:[%s1029_s26 + $0x1c8] sm:$0xff]  ;;  %205 = vst [vmem:[%s1034_s27 + $0xd8] sm:$0xff] %v204_v27 }
  0x21   : > { %207 = vst [vmem:[%s1034_s27 + $0xe0] sm:$0xff] %v206_v28  ;;  %209 = vst [vmem:[%s1034_s27 + $0xe8] sm:$0xff] %v208_v29  ;;  %v210_v30 = vld [vmem:[%s1029_s26 + $0x1e0] sm:$0xff]  ;;  %v212_v31 = vld [vmem:[%s1029_s26 + $0x1e8] sm:$0xff] }
  0x22   : > { %v214_v32 = vld [vmem:[%s1029_s26 + $0x200] sm:$0xff]  ;;  %211 = vst [vmem:[%s1034_s27 + $0xf0] sm:$0xff] %v210_v30  ;;  %213 = vst [vmem:[%s1034_s27 + $0xf8] sm:$0xff] %v212_v31  ;;  %v216_v33 = vld [vmem:[%s1029_s26 + $0x208] sm:$0xff] }
  0x23   : > { %215 = vst [vmem:[%s1034_s27 + $0x100] sm:$0xff] %v214_v32  ;;  %v218_v34 = vld [vmem:[%s1029_s26 + $0x220] sm:$0xff]  ;;  %v220_v35 = vld [vmem:[%s1029_s26 + $0x228] sm:$0xff]  ;;  %217 = vst [vmem:[%s1034_s27 + $0x108] sm:$0xff] %v216_v33 }
  0x24   : > { %219 = vst [vmem:[%s1034_s27 + $0x110] sm:$0xff] %v218_v34  ;;  %221 = vst [vmem:[%s1034_s27 + $0x118] sm:$0xff] %v220_v35  ;;  %v222_v36 = vld [vmem:[%s1029_s26 + $0x240] sm:$0xff]  ;;  %v224_v37 = vld [vmem:[%s1029_s26 + $0x248] sm:$0xff] }
  0x25   : > { %v226_v38 = vld [vmem:[%s1029_s26 + $0x260] sm:$0xff]  ;;  %223 = vst [vmem:[%s1034_s27 + $0x120] sm:$0xff] %v222_v36  ;;  %225 = vst [vmem:[%s1034_s27 + $0x128] sm:$0xff] %v224_v37  ;;  %v228_v39 = vld [vmem:[%s1029_s26 + $0x268] sm:$0xff] }
  0x26   : > { %227 = vst [vmem:[%s1034_s27 + $0x130] sm:$0xff] %v226_v38  ;;  %v230_v40 = vld [vmem:[%s1029_s26 + $0x280] sm:$0xff]  ;;  %v232_v41 = vld [vmem:[%s1029_s26 + $0x288] sm:$0xff]  ;;  %229 = vst [vmem:[%s1034_s27 + $0x138] sm:$0xff] %v228_v39 }
  0x27   : > { %231 = vst [vmem:[%s1034_s27 + $0x140] sm:$0xff] %v230_v40  ;;  %233 = vst [vmem:[%s1034_s27 + $0x148] sm:$0xff] %v232_v41  ;;  %v234_v42 = vld [vmem:[%s1029_s26 + $0x2a0] sm:$0xff]  ;;  %v236_v43 = vld [vmem:[%s1029_s26 + $0x2a8] sm:$0xff] }
  0x28   : > { %v238_v44 = vld [vmem:[%s1029_s26 + $0x2c0] sm:$0xff]  ;;  %235 = vst [vmem:[%s1034_s27 + $0x150] sm:$0xff] %v234_v42  ;;  %237 = vst [vmem:[%s1034_s27 + $0x158] sm:$0xff] %v236_v43  ;;  %v240_v45 = vld [vmem:[%s1029_s26 + $0x2c8] sm:$0xff] }
  0x29   : > { %239 = vst [vmem:[%s1034_s27 + $0x160] sm:$0xff] %v238_v44  ;;  %v242_v46 = vld [vmem:[%s1029_s26 + $0x2e0] sm:$0xff]  ;;  %v244_v47 = vld [vmem:[%s1029_s26 + $0x2e8] sm:$0xff]  ;;  %241 = vst [vmem:[%s1034_s27 + $0x168] sm:$0xff] %v240_v45 }
  0x2a   : > { %243 = vst [vmem:[%s1034_s27 + $0x170] sm:$0xff] %v242_v46  ;;  %245 = vst [vmem:[%s1034_s27 + $0x178] sm:$0xff] %v244_v47  ;;  %v246_v48 = vld [vmem:[%s1029_s26 + $0x300] sm:$0xff]  ;;  %v248_v49 = vld [vmem:[%s1029_s26 + $0x308] sm:$0xff] }
  0x2b   : > { %v250_v50 = vld [vmem:[%s1029_s26 + $0x320] sm:$0xff]  ;;  %247 = vst [vmem:[%s1034_s27 + $0x180] sm:$0xff] %v246_v48  ;;  %249 = vst [vmem:[%s1034_s27 + $0x188] sm:$0xff] %v248_v49  ;;  %v252_v51 = vld [vmem:[%s1029_s26 + $0x328] sm:$0xff] }
  0x2c   : > { %251 = vst [vmem:[%s1034_s27 + $0x190] sm:$0xff] %v250_v50  ;;  %v254_v52 = vld [vmem:[%s1029_s26 + $0x340] sm:$0xff]  ;;  %v256_v53 = vld [vmem:[%s1029_s26 + $0x348] sm:$0xff]  ;;  %253 = vst [vmem:[%s1034_s27 + $0x198] sm:$0xff] %v252_v51 }
  0x2d   : > { %255 = vst [vmem:[%s1034_s27 + $0x1a0] sm:$0xff] %v254_v52  ;;  %257 = vst [vmem:[%s1034_s27 + $0x1a8] sm:$0xff] %v256_v53  ;;  %v258_v54 = vld [vmem:[%s1029_s26 + $0x360] sm:$0xff]  ;;  %v260_v55 = vld [vmem:[%s1029_s26 + $0x368] sm:$0xff] }
  0x2e   : > { %v262_v56 = vld [vmem:[%s1029_s26 + $0x380] sm:$0xff]  ;;  %259 = vst [vmem:[%s1034_s27 + $0x1b0] sm:$0xff] %v258_v54  ;;  %261 = vst [vmem:[%s1034_s27 + $0x1b8] sm:$0xff] %v260_v55  ;;  %v264_v57 = vld [vmem:[%s1029_s26 + $0x388] sm:$0xff] }
  0x2f   : > { %263 = vst [vmem:[%s1034_s27 + $0x1c0] sm:$0xff] %v262_v56  ;;  %v266_v58 = vld [vmem:[%s1029_s26 + $0x3a0] sm:$0xff]  ;;  %v268_v59 = vld [vmem:[%s1029_s26 + $0x3a8] sm:$0xff]  ;;  %265 = vst [vmem:[%s1034_s27 + $0x1c8] sm:$0xff] %v264_v57 }
  0x30   : > { %267 = vst [vmem:[%s1034_s27 + $0x1d0] sm:$0xff] %v266_v58  ;;  %269 = vst [vmem:[%s1034_s27 + $0x1d8] sm:$0xff] %v268_v59  ;;  %v270_v60 = vld [vmem:[%s1029_s26 + $0x3c0] sm:$0xff]  ;;  %v272_v61 = vld [vmem:[%s1029_s26 + $0x3c8] sm:$0xff] }
  0x31   : > { %v274_v62 = vld [vmem:[%s1029_s26 + $0x3e0] sm:$0xff]  ;;  %271 = vst [vmem:[%s1034_s27 + $0x1e0] sm:$0xff] %v270_v60  ;;  %273 = vst [vmem:[%s1034_s27 + $0x1e8] sm:$0xff] %v272_v61  ;;  %v276_v63 = vld [vmem:[%s1029_s26 + $0x3e8] sm:$0xff] }
  0x32   : > { %275 = vst [vmem:[%s1034_s27 + $0x1f0] sm:$0xff] %v274_v62  ;;  %v278_v0 = vld [vmem:[%s1029_s26 + $0x400] sm:$0xff]  ;;  %v280_v1 = vld [vmem:[%s1029_s26 + $0x408] sm:$0xff]  ;;  %277 = vst [vmem:[%s1034_s27 + $0x1f8] sm:$0xff] %v276_v63 }
  0x33   : > { %279 = vst [vmem:[%s1034_s27 + $0x200] sm:$0xff] %v278_v0  ;;  %281 = vst [vmem:[%s1034_s27 + $0x208] sm:$0xff] %v280_v1  ;;  %v282_v2 = vld [vmem:[%s1029_s26 + $0x420] sm:$0xff]  ;;  %v284_v3 = vld [vmem:[%s1029_s26 + $0x428] sm:$0xff] }
  0x34   : > { %v286_v4 = vld [vmem:[%s1029_s26 + $0x440] sm:$0xff]  ;;  %283 = vst [vmem:[%s1034_s27 + $0x210] sm:$0xff] %v282_v2  ;;  %285 = vst [vmem:[%s1034_s27 + $0x218] sm:$0xff] %v284_v3  ;;  %v288_v5 = vld [vmem:[%s1029_s26 + $0x448] sm:$0xff] }
  0x35   : > { %287 = vst [vmem:[%s1034_s27 + $0x220] sm:$0xff] %v286_v4  ;;  %v290_v6 = vld [vmem:[%s1029_s26 + $0x460] sm:$0xff]  ;;  %v292_v7 = vld [vmem:[%s1029_s26 + $0x468] sm:$0xff]  ;;  %289 = vst [vmem:[%s1034_s27 + $0x228] sm:$0xff] %v288_v5 }
  0x36   : > { %291 = vst [vmem:[%s1034_s27 + $0x230] sm:$0xff] %v290_v6  ;;  %293 = vst [vmem:[%s1034_s27 + $0x238] sm:$0xff] %v292_v7  ;;  %v294_v8 = vld [vmem:[%s1029_s26 + $0x480] sm:$0xff]  ;;  %v296_v9 = vld [vmem:[%s1029_s26 + $0x488] sm:$0xff] }
  0x37   : > { %v298_v10 = vld [vmem:[%s1029_s26 + $0x4a0] sm:$0xff]  ;;  %295 = vst [vmem:[%s1034_s27 + $0x240] sm:$0xff] %v294_v8  ;;  %297 = vst [vmem:[%s1034_s27 + $0x248] sm:$0xff] %v296_v9  ;;  %v300_v11 = vld [vmem:[%s1029_s26 + $0x4a8] sm:$0xff] }
  0x38   : > { %299 = vst [vmem:[%s1034_s27 + $0x250] sm:$0xff] %v298_v10  ;;  %v302_v12 = vld [vmem:[%s1029_s26 + $0x4c0] sm:$0xff]  ;;  %v304_v13 = vld [vmem:[%s1029_s26 + $0x4c8] sm:$0xff]  ;;  %301 = vst [vmem:[%s1034_s27 + $0x258] sm:$0xff] %v300_v11 }
  0x39   : > { %303 = vst [vmem:[%s1034_s27 + $0x260] sm:$0xff] %v302_v12  ;;  %305 = vst [vmem:[%s1034_s27 + $0x268] sm:$0xff] %v304_v13  ;;  %v306_v14 = vld [vmem:[%s1029_s26 + $0x4e0] sm:$0xff]  ;;  %v308_v15 = vld [vmem:[%s1029_s26 + $0x4e8] sm:$0xff] }
  0x3a   : > { %v310_v16 = vld [vmem:[%s1029_s26 + $0x500] sm:$0xff]  ;;  %307 = vst [vmem:[%s1034_s27 + $0x270] sm:$0xff] %v306_v14  ;;  %309 = vst [vmem:[%s1034_s27 + $0x278] sm:$0xff] %v308_v15  ;;  %v312_v17 = vld [vmem:[%s1029_s26 + $0x508] sm:$0xff] }
  0x3b   : > { %311 = vst [vmem:[%s1034_s27 + $0x280] sm:$0xff] %v310_v16  ;;  %v314_v18 = vld [vmem:[%s1029_s26 + $0x520] sm:$0xff]  ;;  %v316_v19 = vld [vmem:[%s1029_s26 + $0x528] sm:$0xff]  ;;  %313 = vst [vmem:[%s1034_s27 + $0x288] sm:$0xff] %v312_v17 }
  0x3c   : > { %315 = vst [vmem:[%s1034_s27 + $0x290] sm:$0xff] %v314_v18  ;;  %317 = vst [vmem:[%s1034_s27 + $0x298] sm:$0xff] %v316_v19  ;;  %v318_v20 = vld [vmem:[%s1029_s26 + $0x540] sm:$0xff]  ;;  %v320_v21 = vld [vmem:[%s1029_s26 + $0x548] sm:$0xff] }
  0x3d   : > { %v322_v22 = vld [vmem:[%s1029_s26 + $0x560] sm:$0xff]  ;;  %319 = vst [vmem:[%s1034_s27 + $0x2a0] sm:$0xff] %v318_v20  ;;  %321 = vst [vmem:[%s1034_s27 + $0x2a8] sm:$0xff] %v320_v21  ;;  %v324_v23 = vld [vmem:[%s1029_s26 + $0x568] sm:$0xff] }
  0x3e   : > { %323 = vst [vmem:[%s1034_s27 + $0x2b0] sm:$0xff] %v322_v22  ;;  %v326_v24 = vld [vmem:[%s1029_s26 + $0x580] sm:$0xff]  ;;  %v328_v25 = vld [vmem:[%s1029_s26 + $0x588] sm:$0xff]  ;;  %325 = vst [vmem:[%s1034_s27 + $0x2b8] sm:$0xff] %v324_v23 }
  0x3f   : > { %327 = vst [vmem:[%s1034_s27 + $0x2c0] sm:$0xff] %v326_v24  ;;  %329 = vst [vmem:[%s1034_s27 + $0x2c8] sm:$0xff] %v328_v25  ;;  %v330_v26 = vld [vmem:[%s1029_s26 + $0x5a0] sm:$0xff]  ;;  %v332_v27 = vld [vmem:[%s1029_s26 + $0x5a8] sm:$0xff] }
  0x40   : > { %v334_v28 = vld [vmem:[%s1029_s26 + $0x5c0] sm:$0xff]  ;;  %331 = vst [vmem:[%s1034_s27 + $0x2d0] sm:$0xff] %v330_v26  ;;  %333 = vst [vmem:[%s1034_s27 + $0x2d8] sm:$0xff] %v332_v27  ;;  %v336_v29 = vld [vmem:[%s1029_s26 + $0x5c8] sm:$0xff] }
  0x41   : > { %335 = vst [vmem:[%s1034_s27 + $0x2e0] sm:$0xff] %v334_v28  ;;  %v338_v30 = vld [vmem:[%s1029_s26 + $0x5e0] sm:$0xff]  ;;  %v340_v31 = vld [vmem:[%s1029_s26 + $0x5e8] sm:$0xff]  ;;  %337 = vst [vmem:[%s1034_s27 + $0x2e8] sm:$0xff] %v336_v29 }
  0x42   : > { %339 = vst [vmem:[%s1034_s27 + $0x2f0] sm:$0xff] %v338_v30  ;;  %341 = vst [vmem:[%s1034_s27 + $0x2f8] sm:$0xff] %v340_v31  ;;  %v342_v32 = vld [vmem:[%s1029_s26 + $0x600] sm:$0xff]  ;;  %v344_v33 = vld [vmem:[%s1029_s26 + $0x608] sm:$0xff] }
  0x43   : > { %v346_v34 = vld [vmem:[%s1029_s26 + $0x620] sm:$0xff]  ;;  %343 = vst [vmem:[%s1034_s27 + $0x300] sm:$0xff] %v342_v32  ;;  %345 = vst [vmem:[%s1034_s27 + $0x308] sm:$0xff] %v344_v33  ;;  %v348_v35 = vld [vmem:[%s1029_s26 + $0x628] sm:$0xff] }
  0x44   : > { %347 = vst [vmem:[%s1034_s27 + $0x310] sm:$0xff] %v346_v34  ;;  %v350_v36 = vld [vmem:[%s1029_s26 + $0x640] sm:$0xff]  ;;  %v352_v37 = vld [vmem:[%s1029_s26 + $0x648] sm:$0xff]  ;;  %349 = vst [vmem:[%s1034_s27 + $0x318] sm:$0xff] %v348_v35 }
  0x45   : > { %351 = vst [vmem:[%s1034_s27 + $0x320] sm:$0xff] %v350_v36  ;;  %353 = vst [vmem:[%s1034_s27 + $0x328] sm:$0xff] %v352_v37  ;;  %v354_v38 = vld [vmem:[%s1029_s26 + $0x660] sm:$0xff]  ;;  %v356_v39 = vld [vmem:[%s1029_s26 + $0x668] sm:$0xff] }
  0x46   : > { %v358_v40 = vld [vmem:[%s1029_s26 + $0x680] sm:$0xff]  ;;  %355 = vst [vmem:[%s1034_s27 + $0x330] sm:$0xff] %v354_v38  ;;  %357 = vst [vmem:[%s1034_s27 + $0x338] sm:$0xff] %v356_v39  ;;  %v360_v41 = vld [vmem:[%s1029_s26 + $0x688] sm:$0xff] }
  0x47   : > { %359 = vst [vmem:[%s1034_s27 + $0x340] sm:$0xff] %v358_v40  ;;  %v362_v42 = vld [vmem:[%s1029_s26 + $0x6a0] sm:$0xff]  ;;  %v364_v43 = vld [vmem:[%s1029_s26 + $0x6a8] sm:$0xff]  ;;  %361 = vst [vmem:[%s1034_s27 + $0x348] sm:$0xff] %v360_v41 }
  0x48   : > { %363 = vst [vmem:[%s1034_s27 + $0x350] sm:$0xff] %v362_v42  ;;  %365 = vst [vmem:[%s1034_s27 + $0x358] sm:$0xff] %v364_v43  ;;  %v366_v44 = vld [vmem:[%s1029_s26 + $0x6c0] sm:$0xff]  ;;  %v368_v45 = vld [vmem:[%s1029_s26 + $0x6c8] sm:$0xff] }
  0x49   : > { %v370_v46 = vld [vmem:[%s1029_s26 + $0x6e0] sm:$0xff]  ;;  %367 = vst [vmem:[%s1034_s27 + $0x360] sm:$0xff] %v366_v44  ;;  %369 = vst [vmem:[%s1034_s27 + $0x368] sm:$0xff] %v368_v45  ;;  %v372_v47 = vld [vmem:[%s1029_s26 + $0x6e8] sm:$0xff] }
  0x4a   : > { %371 = vst [vmem:[%s1034_s27 + $0x370] sm:$0xff] %v370_v46  ;;  %v374_v48 = vld [vmem:[%s1029_s26 + $0x700] sm:$0xff]  ;;  %v376_v49 = vld [vmem:[%s1029_s26 + $0x708] sm:$0xff]  ;;  %373 = vst [vmem:[%s1034_s27 + $0x378] sm:$0xff] %v372_v47 }
  0x4b   : > { %375 = vst [vmem:[%s1034_s27 + $0x380] sm:$0xff] %v374_v48  ;;  %377 = vst [vmem:[%s1034_s27 + $0x388] sm:$0xff] %v376_v49  ;;  %v378_v50 = vld [vmem:[%s1029_s26 + $0x720] sm:$0xff]  ;;  %v380_v51 = vld [vmem:[%s1029_s26 + $0x728] sm:$0xff] }
  0x4c   : > { %v382_v52 = vld [vmem:[%s1029_s26 + $0x740] sm:$0xff]  ;;  %379 = vst [vmem:[%s1034_s27 + $0x390] sm:$0xff] %v378_v50  ;;  %381 = vst [vmem:[%s1034_s27 + $0x398] sm:$0xff] %v380_v51  ;;  %v384_v53 = vld [vmem:[%s1029_s26 + $0x748] sm:$0xff] }
  0x4d   : > { %383 = vst [vmem:[%s1034_s27 + $0x3a0] sm:$0xff] %v382_v52  ;;  %v386_v54 = vld [vmem:[%s1029_s26 + $0x760] sm:$0xff]  ;;  %v388_v55 = vld [vmem:[%s1029_s26 + $0x768] sm:$0xff]  ;;  %385 = vst [vmem:[%s1034_s27 + $0x3a8] sm:$0xff] %v384_v53 }
  0x4e   : > { %387 = vst [vmem:[%s1034_s27 + $0x3b0] sm:$0xff] %v386_v54  ;;  %389 = vst [vmem:[%s1034_s27 + $0x3b8] sm:$0xff] %v388_v55  ;;  %v390_v56 = vld [vmem:[%s1029_s26 + $0x780] sm:$0xff]  ;;  %v392_v57 = vld [vmem:[%s1029_s26 + $0x788] sm:$0xff] }
  0x4f   : > { %v394_v58 = vld [vmem:[%s1029_s26 + $0x7a0] sm:$0xff]  ;;  %391 = vst [vmem:[%s1034_s27 + $0x3c0] sm:$0xff] %v390_v56  ;;  %393 = vst [vmem:[%s1034_s27 + $0x3c8] sm:$0xff] %v392_v57  ;;  %v396_v59 = vld [vmem:[%s1029_s26 + $0x7a8] sm:$0xff] }
  0x50   : > { %395 = vst [vmem:[%s1034_s27 + $0x3d0] sm:$0xff] %v394_v58  ;;  %v398_v60 = vld [vmem:[%s1029_s26 + $0x7c0] sm:$0xff]  ;;  %v400_v61 = vld [vmem:[%s1029_s26 + $0x7c8] sm:$0xff]  ;;  %397 = vst [vmem:[%s1034_s27 + $0x3d8] sm:$0xff] %v396_v59 }
  0x51   : > { %399 = vst [vmem:[%s1034_s27 + $0x3e0] sm:$0xff] %v398_v60  ;;  %401 = vst [vmem:[%s1034_s27 + $0x3e8] sm:$0xff] %v400_v61  ;;  %v402_v62 = vld [vmem:[%s1029_s26 + $0x7e0] sm:$0xff]  ;;  %v404_v63 = vld [vmem:[%s1029_s26 + $0x7e8] sm:$0xff] }
  0x52   : > { %403 = vst [vmem:[%s1034_s27 + $0x3f0] sm:$0xff] %v402_v62  ;;  %405 = vst [vmem:[%s1034_s27 + $0x3f8] sm:$0xff] %v404_v63 }
  0x53 PF: > { %p907_p7 = scmp.ge.s32.totalorder %s966_s14, 1  ;;  %p410_p8 = scmp.lt.s32.totalorder %s966_s14, 3 }
  0x55   : > { %p411_p9 = pnand %p907_p7, %p410_p8 }
  0x56   : > { %s417_s28 = sand.u32 (!%p411_p9), 1, %s958_s12  }
  0x57   : > { %414 = sbr.rel (%p411_p9) target bundleno = 381 (0x17d), region = 51  ;;  %s908_s6 = sshll.u32 (!%p411_p9), %s417_s28, 10 }
  0x58   : > { %s1300_s7 = scalar_lea.vmem (!%p411_p9), [#allocation2], %s908_s6  ;;  %s909_s6 = sshll.u32 (!%p411_p9), %s417_s28, 6 }
  0x5c   : > { %v442_v0 = vld [vmem:[%s1521_s0 + $0x8] sm:$0xff]  ;;  %v444_v1 = vld [vmem:[%s1521_s0 + $0x18] sm:$0xff]  ;;  %v968_v2 = vmov 0   ;;  %v487_v5 = vld [vmem:[%s1300_s7 + $0xf0] sm:$0xff]  ;;  %s916_s12 = sshll.u32 (%p1019_p5), %s900_s15, 4 }
  0x5d   : > { %673 = vmatprep.mubr.f32.mxu0 %v442_v0  ;;  %762 = vmatprep.mubr.f32.mxu1 %v444_v1  ;;  %v488_v3 = vld [vmem:[%s1300_s7 + $0xf8] sm:$0xff]  ;;  %v551_v6 = vld [vmem:[%s1300_s7 + $0x2f0] sm:$0xff]  ;;  %v486_v7 = vld [vmem:[%s1300_s7 + $0xe8] sm:$0xff]  ;;  %s812_s9 = scalar_lea.vmem (%p1019_p5), %s1524_s3, %s916_s12 }
  0x5e   : > { %942 = vset.pattern.permute.xlu0 %v968_v2  ;;  %943 = vset.pattern.permute.xlu1 %v968_v2  ;;  %v552_v4 = vld [vmem:[%s1300_s7 + $0x2f8] sm:$0xff]  ;;  %v550_v8 = vld [vmem:[%s1300_s7 + $0x2e8] sm:$0xff]  ;;  %v485_v9 = vld [vmem:[%s1300_s7 + $0xe0] sm:$0xff] }
  0x5f   : > { %609 = vmatprep.subr.mxu0 %v488_v3  ;;  %698 = vmatprep.subr.mxu1 %v552_v4  ;;  %v549_v10 = vld [vmem:[%s1300_s7 + $0x2e0] sm:$0xff]  ;;  %v484_v11 = vld [vmem:[%s1300_s7 + $0xd8] sm:$0xff]  ;;  %v483_v13 = vld [vmem:[%s1300_s7 + $0xd0] sm:$0xff] }
  0x60   : > { %610 = vmatpush1.msra.mxu0 %v487_v5  ;;  %699 = vmatpush1.msra.mxu1 %v551_v6  ;;  %v548_v12 = vld [vmem:[%s1300_s7 + $0x2d8] sm:$0xff]  ;;  %v547_v14 = vld [vmem:[%s1300_s7 + $0x2d0] sm:$0xff]  ;;  %v482_v15 = vld [vmem:[%s1300_s7 + $0xc8] sm:$0xff] }
  0x61   : > { %611 = vmatprep.subr.mxu0 %v486_v7  ;;  %700 = vmatprep.subr.mxu1 %v550_v8  ;;  %v546_v16 = vld [vmem:[%s1300_s7 + $0x2c8] sm:$0xff]  ;;  %v481_v17 = vld [vmem:[%s1300_s7 + $0xc0] sm:$0xff]  ;;  %v480_v19 = vld [vmem:[%s1300_s7 + $0xb8] sm:$0xff] }
  0x62   : > { %612 = vmatpush1.msra.mxu0 %v485_v9  ;;  %701 = vmatpush1.msra.mxu1 %v549_v10  ;;  %v545_v18 = vld [vmem:[%s1300_s7 + $0x2c0] sm:$0xff]  ;;  %v544_v20 = vld [vmem:[%s1300_s7 + $0x2b8] sm:$0xff]  ;;  %v479_v21 = vld [vmem:[%s1300_s7 + $0xb0] sm:$0xff] }
  0x63   : > { %613 = vmatprep.subr.mxu0 %v484_v11  ;;  %702 = vmatprep.subr.mxu1 %v548_v12  ;;  %v543_v22 = vld [vmem:[%s1300_s7 + $0x2b0] sm:$0xff]  ;;  %v478_v23 = vld [vmem:[%s1300_s7 + $0xa8] sm:$0xff]  ;;  %v477_v25 = vld [vmem:[%s1300_s7 + $0xa0] sm:$0xff] }
  0x64   : > { %614 = vmatpush1.msra.mxu0 %v483_v13  ;;  %703 = vmatpush1.msra.mxu1 %v547_v14  ;;  %v542_v24 = vld [vmem:[%s1300_s7 + $0x2a8] sm:$0xff]  ;;  %v541_v26 = vld [vmem:[%s1300_s7 + $0x2a0] sm:$0xff]  ;;  %v476_v27 = vld [vmem:[%s1300_s7 + $0x98] sm:$0xff] }
  0x65   : > { %615 = vmatprep.subr.mxu0 %v482_v15  ;;  %704 = vmatprep.subr.mxu1 %v546_v16  ;;  %v540_v28 = vld [vmem:[%s1300_s7 + $0x298] sm:$0xff]  ;;  %v475_v29 = vld [vmem:[%s1300_s7 + $0x90] sm:$0xff]  ;;  %v474_v31 = vld [vmem:[%s1300_s7 + $0x88] sm:$0xff] }
  0x66   : > { %616 = vmatpush1.msra.mxu0 %v481_v17  ;;  %705 = vmatpush1.msra.mxu1 %v545_v18  ;;  %v539_v30 = vld [vmem:[%s1300_s7 + $0x290] sm:$0xff]  ;;  %v538_v32 = vld [vmem:[%s1300_s7 + $0x288] sm:$0xff]  ;;  %v473_v33 = vld [vmem:[%s1300_s7 + $0x80] sm:$0xff] }
  0x67   : > { %617 = vmatprep.subr.mxu0 %v480_v19  ;;  %706 = vmatprep.subr.mxu1 %v544_v20  ;;  %v537_v34 = vld [vmem:[%s1300_s7 + $0x280] sm:$0xff]  ;;  %v472_v35 = vld [vmem:[%s1300_s7 + $0x78] sm:$0xff]  ;;  %v471_v37 = vld [vmem:[%s1300_s7 + $0x70] sm:$0xff] }
  0x68   : > { %618 = vmatpush1.msra.mxu0 %v479_v21  ;;  %707 = vmatpush1.msra.mxu1 %v543_v22  ;;  %v536_v36 = vld [vmem:[%s1300_s7 + $0x278] sm:$0xff]  ;;  %v535_v38 = vld [vmem:[%s1300_s7 + $0x270] sm:$0xff]  ;;  %v470_v39 = vld [vmem:[%s1300_s7 + $0x68] sm:$0xff] }
  0x69   : > { %619 = vmatprep.subr.mxu0 %v478_v23  ;;  %708 = vmatprep.subr.mxu1 %v542_v24  ;;  %v534_v40 = vld [vmem:[%s1300_s7 + $0x268] sm:$0xff]  ;;  %v469_v41 = vld [vmem:[%s1300_s7 + $0x60] sm:$0xff]  ;;  %v468_v43 = vld [vmem:[%s1300_s7 + $0x58] sm:$0xff] }
  0x6a   : > { %620 = vmatpush1.msra.mxu0 %v477_v25  ;;  %709 = vmatpush1.msra.mxu1 %v541_v26  ;;  %v533_v42 = vld [vmem:[%s1300_s7 + $0x260] sm:$0xff]  ;;  %v532_v44 = vld [vmem:[%s1300_s7 + $0x258] sm:$0xff]  ;;  %v467_v45 = vld [vmem:[%s1300_s7 + $0x50] sm:$0xff] }
  0x6b   : > { %621 = vmatprep.subr.mxu0 %v476_v27  ;;  %710 = vmatprep.subr.mxu1 %v540_v28  ;;  %v531_v46 = vld [vmem:[%s1300_s7 + $0x250] sm:$0xff]  ;;  %v466_v47 = vld [vmem:[%s1300_s7 + $0x48] sm:$0xff]  ;;  %v465_v49 = vld [vmem:[%s1300_s7 + $0x40] sm:$0xff] }
  0x6c   : > { %622 = vmatpush1.msra.mxu0 %v475_v29  ;;  %711 = vmatpush1.msra.mxu1 %v539_v30  ;;  %v530_v48 = vld [vmem:[%s1300_s7 + $0x248] sm:$0xff]  ;;  %v529_v50 = vld [vmem:[%s1300_s7 + $0x240] sm:$0xff]  ;;  %v464_v51 = vld [vmem:[%s1300_s7 + $0x38] sm:$0xff] }
  0x6d   : > { %623 = vmatprep.subr.mxu0 %v474_v31  ;;  %712 = vmatprep.subr.mxu1 %v538_v32  ;;  %v528_v52 = vld [vmem:[%s1300_s7 + $0x238] sm:$0xff]  ;;  %v463_v53 = vld [vmem:[%s1300_s7 + $0x30] sm:$0xff]  ;;  %v462_v55 = vld [vmem:[%s1300_s7 + $0x28] sm:$0xff] }
  0x6e   : > { %624 = vmatpush1.msra.mxu0 %v473_v33  ;;  %713 = vmatpush1.msra.mxu1 %v537_v34  ;;  %v527_v54 = vld [vmem:[%s1300_s7 + $0x230] sm:$0xff]  ;;  %v526_v56 = vld [vmem:[%s1300_s7 + $0x228] sm:$0xff]  ;;  %v461_v57 = vld [vmem:[%s1300_s7 + $0x20] sm:$0xff] }
  0x6f   : > { %625 = vmatprep.subr.mxu0 %v472_v35  ;;  %714 = vmatprep.subr.mxu1 %v536_v36  ;;  %v525_v58 = vld [vmem:[%s1300_s7 + $0x220] sm:$0xff]  ;;  %v460_v59 = vld [vmem:[%s1300_s7 + $0x18] sm:$0xff]  ;;  %v459_v61 = vld [vmem:[%s1300_s7 + $0x10] sm:$0xff] }
  0x70   : > { %626 = vmatpush1.msra.mxu0 %v471_v37  ;;  %715 = vmatpush1.msra.mxu1 %v535_v38  ;;  %v524_v60 = vld [vmem:[%s1300_s7 + $0x218] sm:$0xff]  ;;  %v523_v62 = vld [vmem:[%s1300_s7 + $0x210] sm:$0xff]  ;;  %v458_v63 = vld [vmem:[%s1300_s7 + $0x8] sm:$0xff] }
  0x71   : > { %627 = vmatprep.subr.mxu0 %v470_v39  ;;  %716 = vmatprep.subr.mxu1 %v534_v40  ;;  %v522_v0 = vld [vmem:[%s1300_s7 + $0x208] sm:$0xff]  ;;  %v457_v1 = vld [vmem:[%s1300_s7] sm:$0xff]  ;;  %v520_v3 = vld [vmem:[%s1300_s7 + $0x1f8] sm:$0xff] }
  0x72   : > { %628 = vmatpush1.msra.mxu0 %v469_v41  ;;  %717 = vmatpush1.msra.mxu1 %v533_v42  ;;  %v521_v2 = vld [vmem:[%s1300_s7 + $0x200] sm:$0xff]  ;;  %v584_v4 = vld [vmem:[%s1300_s7 + $0x3f8] sm:$0xff]  ;;  %v519_v5 = vld [vmem:[%s1300_s7 + $0x1f0] sm:$0xff] }
  0x73   : > { %629 = vmatprep.subr.mxu0 %v468_v43  ;;  %718 = vmatprep.subr.mxu1 %v532_v44  ;;  %v583_v6 = vld [vmem:[%s1300_s7 + $0x3f0] sm:$0xff]  ;;  %v518_v7 = vld [vmem:[%s1300_s7 + $0x1e8] sm:$0xff]  ;;  %v517_v9 = vld [vmem:[%s1300_s7 + $0x1e0] sm:$0xff] }
  0x74   : > { %630 = vmatpush1.msra.mxu0 %v467_v45  ;;  %719 = vmatpush1.msra.mxu1 %v531_v46  ;;  %v582_v8 = vld [vmem:[%s1300_s7 + $0x3e8] sm:$0xff]  ;;  %v581_v10 = vld [vmem:[%s1300_s7 + $0x3e0] sm:$0xff]  ;;  %v516_v11 = vld [vmem:[%s1300_s7 + $0x1d8] sm:$0xff] }
  0x75   : > { %631 = vmatprep.subr.mxu0 %v466_v47  ;;  %720 = vmatprep.subr.mxu1 %v530_v48  ;;  %v580_v12 = vld [vmem:[%s1300_s7 + $0x3d8] sm:$0xff]  ;;  %v515_v13 = vld [vmem:[%s1300_s7 + $0x1d0] sm:$0xff]  ;;  %v514_v15 = vld [vmem:[%s1300_s7 + $0x1c8] sm:$0xff] }
  0x76   : > { %632 = vmatpush1.msra.mxu0 %v465_v49  ;;  %721 = vmatpush1.msra.mxu1 %v529_v50  ;;  %v579_v14 = vld [vmem:[%s1300_s7 + $0x3d0] sm:$0xff]  ;;  %v578_v16 = vld [vmem:[%s1300_s7 + $0x3c8] sm:$0xff]  ;;  %v513_v17 = vld [vmem:[%s1300_s7 + $0x1c0] sm:$0xff] }
  0x77   : > { %633 = vmatprep.subr.mxu0 %v464_v51  ;;  %722 = vmatprep.subr.mxu1 %v528_v52  ;;  %v577_v18 = vld [vmem:[%s1300_s7 + $0x3c0] sm:$0xff]  ;;  %v512_v19 = vld [vmem:[%s1300_s7 + $0x1b8] sm:$0xff]  ;;  %v511_v21 = vld [vmem:[%s1300_s7 + $0x1b0] sm:$0xff] }
  0x78   : > { %634 = vmatpush1.msra.mxu0 %v463_v53  ;;  %723 = vmatpush1.msra.mxu1 %v527_v54  ;;  %v576_v20 = vld [vmem:[%s1300_s7 + $0x3b8] sm:$0xff]  ;;  %v575_v22 = vld [vmem:[%s1300_s7 + $0x3b0] sm:$0xff]  ;;  %v510_v23 = vld [vmem:[%s1300_s7 + $0x1a8] sm:$0xff] }
  0x79   : > { %635 = vmatprep.subr.mxu0 %v462_v55  ;;  %724 = vmatprep.subr.mxu1 %v526_v56  ;;  %v574_v24 = vld [vmem:[%s1300_s7 + $0x3a8] sm:$0xff]  ;;  %v509_v25 = vld [vmem:[%s1300_s7 + $0x1a0] sm:$0xff]  ;;  %v508_v27 = vld [vmem:[%s1300_s7 + $0x198] sm:$0xff] }
  0x7a   : > { %636 = vmatpush1.msra.mxu0 %v461_v57  ;;  %725 = vmatpush1.msra.mxu1 %v525_v58  ;;  %v573_v26 = vld [vmem:[%s1300_s7 + $0x3a0] sm:$0xff]  ;;  %v572_v28 = vld [vmem:[%s1300_s7 + $0x398] sm:$0xff]  ;;  %v507_v29 = vld [vmem:[%s1300_s7 + $0x190] sm:$0xff] }
  0x7b   : > { %637 = vmatprep.subr.mxu0 %v460_v59  ;;  %726 = vmatprep.subr.mxu1 %v524_v60  ;;  %v571_v30 = vld [vmem:[%s1300_s7 + $0x390] sm:$0xff]  ;;  %v506_v31 = vld [vmem:[%s1300_s7 + $0x188] sm:$0xff]  ;;  %v505_v33 = vld [vmem:[%s1300_s7 + $0x180] sm:$0xff] }
  0x7c   : > { %638 = vmatpush1.msra.mxu0 %v459_v61  ;;  %727 = vmatpush1.msra.mxu1 %v523_v62  ;;  %v570_v32 = vld [vmem:[%s1300_s7 + $0x388] sm:$0xff]  ;;  %v569_v34 = vld [vmem:[%s1300_s7 + $0x380] sm:$0xff]  ;;  %v504_v35 = vld [vmem:[%s1300_s7 + $0x178] sm:$0xff] }
  0x7d   : > { %639 = vmatprep.subr.mxu0 %v458_v63  ;;  %728 = vmatprep.subr.mxu1 %v522_v0  ;;  %v568_v36 = vld [vmem:[%s1300_s7 + $0x378] sm:$0xff]  ;;  %v503_v37 = vld [vmem:[%s1300_s7 + $0x170] sm:$0xff]  ;;  %v502_v39 = vld [vmem:[%s1300_s7 + $0x168] sm:$0xff] }
  0x7e   : > { %640 = vmatpush1.msra.mxu0 %v457_v1  ;;  %729 = vmatpush1.msra.mxu1 %v521_v2  ;;  %v567_v38 = vld [vmem:[%s1300_s7 + $0x370] sm:$0xff]  ;;  %v566_v40 = vld [vmem:[%s1300_s7 + $0x368] sm:$0xff]  ;;  %v501_v41 = vld [vmem:[%s1300_s7 + $0x160] sm:$0xff] }
  0x7f   : > { %641 = vmatprep.subr.mxu0 %v520_v3  ;;  %730 = vmatprep.subr.mxu1 %v584_v4  ;;  %v565_v42 = vld [vmem:[%s1300_s7 + $0x360] sm:$0xff]  ;;  %v500_v43 = vld [vmem:[%s1300_s7 + $0x158] sm:$0xff]  ;;  %v499_v45 = vld [vmem:[%s1300_s7 + $0x150] sm:$0xff] }
  0x80   : > { %642 = vmatpush2.msra.mxu0 %v519_v5  ;;  %731 = vmatpush2.msra.mxu1 %v583_v6  ;;  %v564_v44 = vld [vmem:[%s1300_s7 + $0x358] sm:$0xff]  ;;  %v563_v46 = vld [vmem:[%s1300_s7 + $0x350] sm:$0xff]  ;;  %v498_v47 = vld [vmem:[%s1300_s7 + $0x148] sm:$0xff] }
  0x81   : > { %643 = vmatprep.subr.mxu0 %v518_v7  ;;  %732 = vmatprep.subr.mxu1 %v582_v8  ;;  %v562_v48 = vld [vmem:[%s1300_s7 + $0x348] sm:$0xff]  ;;  %v497_v49 = vld [vmem:[%s1300_s7 + $0x140] sm:$0xff]  ;;  %v496_v51 = vld [vmem:[%s1300_s7 + $0x138] sm:$0xff] }
  0x82   : > { %644 = vmatpush2.msra.mxu0 %v517_v9  ;;  %733 = vmatpush2.msra.mxu1 %v581_v10  ;;  %v561_v50 = vld [vmem:[%s1300_s7 + $0x340] sm:$0xff]  ;;  %v560_v52 = vld [vmem:[%s1300_s7 + $0x338] sm:$0xff]  ;;  %v495_v53 = vld [vmem:[%s1300_s7 + $0x130] sm:$0xff] }
  0x83   : > { %645 = vmatprep.subr.mxu0 %v516_v11  ;;  %734 = vmatprep.subr.mxu1 %v580_v12  ;;  %v559_v54 = vld [vmem:[%s1300_s7 + $0x330] sm:$0xff]  ;;  %v494_v55 = vld [vmem:[%s1300_s7 + $0x128] sm:$0xff]  ;;  %v493_v57 = vld [vmem:[%s1300_s7 + $0x120] sm:$0xff] }
  0x84   : > { %646 = vmatpush2.msra.mxu0 %v515_v13  ;;  %735 = vmatpush2.msra.mxu1 %v579_v14  ;;  %v558_v56 = vld [vmem:[%s1300_s7 + $0x328] sm:$0xff]  ;;  %v557_v58 = vld [vmem:[%s1300_s7 + $0x320] sm:$0xff]  ;;  %v492_v59 = vld [vmem:[%s1300_s7 + $0x118] sm:$0xff] }
  0x85   : > { %647 = vmatprep.subr.mxu0 %v514_v15  ;;  %736 = vmatprep.subr.mxu1 %v578_v16  ;;  %v556_v60 = vld [vmem:[%s1300_s7 + $0x318] sm:$0xff]  ;;  %v491_v61 = vld [vmem:[%s1300_s7 + $0x110] sm:$0xff]  ;;  %v490_v63 = vld [vmem:[%s1300_s7 + $0x108] sm:$0xff] }
  0x86   : > { %648 = vmatpush2.msra.mxu0 %v513_v17  ;;  %737 = vmatpush2.msra.mxu1 %v577_v18  ;;  %v555_v62 = vld [vmem:[%s1300_s7 + $0x310] sm:$0xff]  ;;  %v554_v0 = vld [vmem:[%s1300_s7 + $0x308] sm:$0xff]  ;;  %v489_v1 = vld [vmem:[%s1300_s7 + $0x100] sm:$0xff] }
  0x87   : > { %649 = vmatprep.subr.mxu0 %v512_v19  ;;  %738 = vmatprep.subr.mxu1 %v576_v20  ;;  %v553_v2 = vld [vmem:[%s1300_s7 + $0x300] sm:$0xff]  ;;  %v443_v4 = vld [vmem:[%s1521_s0 + $0x10] sm:$0xff]  ;;  %v446_v5 = vld [vmem:[%s1521_s0 + $0x28] sm:$0xff]  ;;  %s1486_s7 = scalar_lea.vmem [#allocation3], %s909_s6 }
  0x88   : > { %650 = vmatpush2.msra.mxu0 %v511_v21  ;;  %739 = vmatpush2.msra.mxu1 %v575_v22  ;;  %v441_v3 = vld [vmem:[%s1521_s0] sm:$0xff]  ;;  %v448_v6 = vld [vmem:[%s1521_s0 + $0x38] sm:$0xff]  ;;  %v587_v8 = vld [vmem:[%s1523_s2 + $0x10] sm:$0xff] }
  0x89   : > { %651 = vmatprep.subr.mxu0 %v510_v23  ;;  %740 = vmatprep.subr.mxu1 %v574_v24  ;;  %v585_v7 = vld [vmem:[%s1523_s2] sm:$0xff]  ;;  %v447_v10 = vld [vmem:[%s1521_s0 + $0x30] sm:$0xff]  ;;  %v450_v11 = vld [vmem:[%s1521_s0 + $0x48] sm:$0xff] }
  0x8a   : > { %652 = vmatpush2.msra.mxu0 %v509_v25  ;;  %741 = vmatpush2.msra.mxu1 %v573_v26  ;;  %v445_v9 = vld [vmem:[%s1521_s0 + $0x20] sm:$0xff]  ;;  %v452_v12 = vld [vmem:[%s1521_s0 + $0x58] sm:$0xff]  ;;  %v586_v13 = vld [vmem:[%s1523_s2 + $0x8] sm:$0xff] }
  0x8b   : > { %653 = vmatprep.subr.mxu0 %v508_v27  ;;  %742 = vmatprep.subr.mxu1 %v572_v28  ;;  %v588_v14 = vld [vmem:[%s1523_s2 + $0x18] sm:$0xff]  ;;  %v449_v15 = vld [vmem:[%s1521_s0 + $0x40] sm:$0xff]  ;;  %v451_v16 = vld [vmem:[%s1521_s0 + $0x50] sm:$0xff] }
  0x8c   : > { %654 = vmatpush2.msra.mxu0 %v507_v29  ;;  %743 = vmatpush2.msra.mxu1 %v571_v30  ;;  %v454_v17 = vld [vmem:[%s1521_s0 + $0x68] sm:$0xff]  ;;  %v456_v18 = vld [vmem:[%s1521_s0 + $0x78] sm:$0xff]  ;;  %v453_v19 = vld [vmem:[%s1521_s0 + $0x60] sm:$0xff] }
  0x8d   : > { %655 = vmatprep.subr.mxu0 %v506_v31  ;;  %744 = vmatprep.subr.mxu1 %v570_v32  ;;  %v455_v20 = vld [vmem:[%s1521_s0 + $0x70] sm:$0xff] }
  0x8e   : > { %656 = vmatpush2.msra.mxu0 %v505_v33  ;;  %745 = vmatpush2.msra.mxu1 %v569_v34 }
  0x8f   : > { %657 = vmatprep.subr.mxu0 %v504_v35  ;;  %746 = vmatprep.subr.mxu1 %v568_v36 }
  0x90   : > { %658 = vmatpush2.msra.mxu0 %v503_v37  ;;  %747 = vmatpush2.msra.mxu1 %v567_v38 }
  0x91   : > { %659 = vmatprep.subr.mxu0 %v502_v39  ;;  %748 = vmatprep.subr.mxu1 %v566_v40 }
  0x92   : > { %660 = vmatpush2.msra.mxu0 %v501_v41  ;;  %749 = vmatpush2.msra.mxu1 %v565_v42 }
  0x93   : > { %661 = vmatprep.subr.mxu0 %v500_v43  ;;  %750 = vmatprep.subr.mxu1 %v564_v44 }
  0x94   : > { %662 = vmatpush2.msra.mxu0 %v499_v45  ;;  %751 = vmatpush2.msra.mxu1 %v563_v46 }
  0x95   : > { %663 = vmatprep.subr.mxu0 %v498_v47  ;;  %752 = vmatprep.subr.mxu1 %v562_v48 }
  0x96   : > { %664 = vmatpush2.msra.mxu0 %v497_v49  ;;  %753 = vmatpush2.msra.mxu1 %v561_v50 }
  0x97   : > { %665 = vmatprep.subr.mxu0 %v496_v51  ;;  %754 = vmatprep.subr.mxu1 %v560_v52 }
  0x98   : > { %666 = vmatpush2.msra.mxu0 %v495_v53  ;;  %755 = vmatpush2.msra.mxu1 %v559_v54 }
  0x99   : > { %667 = vmatprep.subr.mxu0 %v494_v55  ;;  %756 = vmatprep.subr.mxu1 %v558_v56 }
  0x9a   : > { %668 = vmatpush2.msra.mxu0 %v493_v57  ;;  %757 = vmatpush2.msra.mxu1 %v557_v58 }
  0x9b   : > { %669 = vmatprep.subr.mxu0 %v492_v59  ;;  %758 = vmatprep.subr.mxu1 %v556_v60 }
  0x9c   : > { %670 = vmatpush2.msra.mxu0 %v491_v61  ;;  %759 = vmatpush2.msra.mxu1 %v555_v62 }
  0x9d   : > { %671 = vmatprep.subr.mxu0 %v490_v63  ;;  %760 = vmatprep.subr.mxu1 %v554_v0 }
  0x9e   : > { %672 = vmatpush2.msra.mxu0 %v489_v1  ;;  %761 = vmatpush2.msra.mxu1 %v553_v2 }
  0x9f   : > { %674 = vmatmul.mubr.f32.vlgmr.msra.gmra.mxu0 %v441_v3  ;;  %763 = vmatmul.mubr.f32.vlgmr.msra.gmra.mxu1 %v443_v4 }
  0xa0   : > { %679 = vmatprep.mubr.f32.mxu0 %v446_v5  ;;  %768 = vmatprep.mubr.f32.mxu1 %v448_v6 }
  0xa1   : > { %591 = vperm.xlu0 %942, %v585_v7   ;;  %601 = vperm.xlu1 %943, %v587_v8  }
  0xa3   : > { %680 = vmatmul.mubr.f32.gmra.mxu0 %v445_v9  ;;  %769 = vmatmul.mubr.f32.gmra.mxu1 %v447_v10 }
  0xa4   : > { %685 = vmatprep.mubr.f32.mxu0 %v450_v11  ;;  %774 = vmatprep.mubr.f32.mxu1 %v452_v12 }
  0xa5   : > { %596 = vperm.xlu0 %942, %v586_v13   ;;  %606 = vperm.xlu1 %943, %v588_v14  }
  0xa7   : > { %686 = vmatmul.mubr.f32.gmra.mxu0 %v449_v15  ;;  %775 = vmatmul.mubr.f32.gmra.mxu1 %v451_v16 }
  0xa8   : > { %691 = vmatprep.mubr.f32.mxu0 %v454_v17  ;;  %780 = vmatprep.mubr.f32.mxu1 %v456_v18 }
  0xab   : > { %692 = vmatmul.mubr.f32.gmra.mxu0 %v453_v19  ;;  %781 = vmatmul.mubr.f32.gmra.mxu1 %v455_v20 }
 0x11c   : > { %v592_v21 = vpop.permute.xlu0 %591  ;;  %v602_v35 = vpop.permute.xlu1 %601 }
 0x120   : > { %v597_v25 = vpop.permute.xlu0 %596  ;;  %v607_v50 = vpop.permute.xlu1 %606 }
 0x15f   : > { %v675_v22 = vpop.f32.mrf.mxu0  ;;  %v764_v23 = vpop.f32.mrf.mxu1 }
 0x160   : > { %v676_v24 = vadd.f32 %v675_v22, %v592_v21 }
 0x161   : > { %v677_v26 = vpop.f32.mrf.mxu0  ;;  %v766_v27 = vpop.f32.mrf.mxu1 }
 0x162   : > { %v765_v28 = vadd.f32 %v764_v23, %v676_v24  ;;  %v678_v29 = vadd.f32 %v677_v26, %v592_v21 }
 0x163   : > { %v681_v30 = vpop.f32.mrf.mxu0  ;;  %v770_v31 = vpop.f32.mrf.mxu1 }
 0x164   : > { %v787_v32 = vmax.f32 %v765_v28, 0.0  ;;  %v767_v33 = vadd.f32 %v766_v27, %v678_v29  ;;  %v682_v34 = vadd.f32 %v681_v30, %v597_v25 }
 0x165   : > { %v683_v36 = vpop.f32.mrf.mxu0  ;;  %v772_v37 = vpop.f32.mrf.mxu1 }
 0x166   : > { %795 = vst [vmem:[%s1486_s7] sm:$0xff] %v787_v32  ;;  %v788_v38 = vmax.f32 %v767_v33, 0.0  ;;  %v771_v39 = vadd.f32 %v770_v31, %v682_v34  ;;  %v684_v40 = vadd.f32 %v683_v36, %v597_v25 }
 0x167   : > { %v687_v41 = vpop.f32.mrf.mxu0  ;;  %v776_v42 = vpop.f32.mrf.mxu1 }
 0x168   : > { %796 = vst [vmem:[%s1486_s7 + $0x8] sm:$0xff] %v788_v38  ;;  %v789_v43 = vmax.f32 %v771_v39, 0.0  ;;  %v773_v44 = vadd.f32 %v772_v37, %v684_v40  ;;  %v688_v45 = vadd.f32 %v687_v41, %v602_v35 }
 0x169   : > { %v689_v46 = vpop.f32.mrf.mxu0  ;;  %v778_v47 = vpop.f32.mrf.mxu1 }
 0x16a   : > { %797 = vst [vmem:[%s1486_s7 + $0x10] sm:$0xff] %v789_v43  ;;  %v790_v48 = vmax.f32 %v773_v44, 0.0  ;;  %v777_v49 = vadd.f32 %v776_v42, %v688_v45  ;;  %v690_v51 = vadd.f32 %v689_v46, %v602_v35 }
 0x16b   : > { %v693_v52 = vpop.f32.mrf.mxu0  ;;  %v782_v53 = vpop.f32.mrf.mxu1 }
 0x16c   : > { %798 = vst [vmem:[%s1486_s7 + $0x18] sm:$0xff] %v790_v48  ;;  %v791_v54 = vmax.f32 %v777_v49, 0.0  ;;  %v779_v55 = vadd.f32 %v778_v47, %v690_v51  ;;  %v694_v56 = vadd.f32 %v693_v52, %v607_v50 }
 0x16d   : > { %v695_v57 = vpop.f32.mrf.mxu0  ;;  %v784_v61 = vpop.f32.mrf.mxu1  ;;  %v825_v1 = vld [vmem:[%s1486_s7] sm:$0xff] (%p1019_p5) }
 0x16e   : > { %799 = vst [vmem:[%s1486_s7 + $0x20] sm:$0xff] %v791_v54  ;;  %v792_v58 = vmax.f32 %v779_v55, 0.0  ;;  %v783_v59 = vadd.f32 %v782_v53, %v694_v56  ;;  %v696_v60 = vadd.f32 %v695_v57, %v607_v50  ;;  %826 = vst [vmem:[%s812_s9] sm:$0xff] (%p1019_p5), %v825_v1 }
 0x16f   : > { %v827_v2 = vld [vmem:[%s1486_s7 + $0x8] sm:$0xff] (%p1019_p5) }
 0x170   : > { %800 = vst [vmem:[%s1486_s7 + $0x28] sm:$0xff] %v792_v58  ;;  %v793_v62 = vmax.f32 %v783_v59, 0.0  ;;  %v785_v63 = vadd.f32 %v784_v61, %v696_v60  ;;  %809 = sbr.rel (!%p1019_p5) target bundleno = 381 (0x17d), region = 59  ;;  %828 = vst [vmem:[%s812_s9 + $0x8] sm:$0xff] (%p1019_p5), %v827_v2 }
 0x171   : > { %v829_v3 = vld [vmem:[%s1486_s7 + $0x10] sm:$0xff] (%p1019_p5) }
 0x172   : > { %801 = vst [vmem:[%s1486_s7 + $0x30] sm:$0xff] %v793_v62  ;;  %v794_v0 = vmax.f32 %v785_v63, 0.0  ;;  %830 = vst [vmem:[%s812_s9 + $0x20] sm:$0xff] (%p1019_p5), %v829_v3 }
 0x173   : > { %v831_v4 = vld [vmem:[%s1486_s7 + $0x18] sm:$0xff] (%p1019_p5) }
 0x174   : > { %802 = vst [vmem:[%s1486_s7 + $0x38] sm:$0xff] %v794_v0  ;;  %832 = vst [vmem:[%s812_s9 + $0x28] sm:$0xff] (%p1019_p5), %v831_v4 }
 0x175   : > { %v833_v5 = vld [vmem:[%s1486_s7 + $0x20] sm:$0xff] }
 0x176   : > { %834 = vst [vmem:[%s812_s9 + $0x40] sm:$0xff] %v833_v5 }
 0x177   : > { %v835_v6 = vld [vmem:[%s1486_s7 + $0x28] sm:$0xff] }
 0x178   : > { %836 = vst [vmem:[%s812_s9 + $0x48] sm:$0xff] %v835_v6 }
 0x179   : > { %v837_v7 = vld [vmem:[%s1486_s7 + $0x30] sm:$0xff] }
 0x17a   : > { %838 = vst [vmem:[%s812_s9 + $0x60] sm:$0xff] %v837_v7 }
 0x17b   : > { %v839_v8 = vld [vmem:[%s1486_s7 + $0x38] sm:$0xff] }
 0x17c   : > { %840 = vst [vmem:[%s812_s9 + $0x68] sm:$0xff] %v839_v8 }
 0x17d PF: > { %p10_p10 = scmp.ge.s32.totalorder %s1006_s16, 4   ;;  %s1526_s12 = smov %s962_s13 }
 0x17e   : > { %s1527_s13 = smov %s1017_s19  ;;  %s1528_s14 = smov %s1006_s16 }
 0x17f   :  { %12 = sbr.rel (!%p10_p10) target bundleno = 2 (0x2), region = 113 }

// kernel: _lambda_.11
= control target key start
LH: loop header
LB: loop body
LE: loop exit
PB: predicated region body
PF: predicated region fallthrough
CT: control target
= control target key end

     0   :  { %v503_v3 = vmov 0   ;;  %s860_s1 = inlined_call_operand.vmem [shape: f32[512,128], index: 1, kind: input, shape index: {}]   ;;  %s861_s0 = inlined_call_operand.vmem [shape: f32[64,512], index: 0, kind: input, shape index: {}]   ;;  %s862_s2 = inlined_call_operand.vmem [shape: f32[64,1], index: 2, kind: input, shape index: {}]   ;;  %s863_s3 = inlined_call_operand.vmem [shape: f32[64,128], index: 3, kind: output, shape index: {}]  }
   0x1   :  { %v77_v0 = vld [vmem:[%s860_s1 + $0xf8] sm:$0xff]  ;;  %501 = vset.pattern.permute.xlu0 %v503_v3  ;;  %502 = vset.pattern.permute.xlu1 %v503_v3  ;;  %v76_v5 = vld [vmem:[%s860_s1 + $0xf0] sm:$0xff]  ;;  %v75_v9 = vld [vmem:[%s860_s1 + $0xe8] sm:$0xff] }
   0x2   :  { %v109_v1 = vld [vmem:[%s860_s1 + $0x1f8] sm:$0xff]  ;;  %388 = vmatprep.subr.mxu0 %v77_v0  ;;  %v108_v6 = vld [vmem:[%s860_s1 + $0x1f0] sm:$0xff]  ;;  %v107_v10 = vld [vmem:[%s860_s1 + $0x1e8] sm:$0xff] }
   0x3   :  { %v61_v2 = vld [vmem:[%s860_s1 + $0x78] sm:$0xff]  ;;  %444 = vmatprep.subr.mxu1 %v109_v1  ;;  %v60_v7 = vld [vmem:[%s860_s1 + $0x70] sm:$0xff]  ;;  %v59_v11 = vld [vmem:[%s860_s1 + $0x68] sm:$0xff] }
   0x4   :  { %v93_v4 = vld [vmem:[%s860_s1 + $0x178] sm:$0xff]  ;;  %389 = vmatpush3.msra.mxu0 %v61_v2  ;;  %v92_v8 = vld [vmem:[%s860_s1 + $0x170] sm:$0xff]  ;;  %v91_v12 = vld [vmem:[%s860_s1 + $0x168] sm:$0xff] }
   0x5   :  { %445 = vmatpush3.msra.mxu1 %v93_v4  ;;  %390 = vmatprep.subr.mxu0 %v76_v5  ;;  %v74_v13 = vld [vmem:[%s860_s1 + $0xe0] sm:$0xff]  ;;  %v73_v17 = vld [vmem:[%s860_s1 + $0xd8] sm:$0xff]  ;;  %v72_v21 = vld [vmem:[%s860_s1 + $0xd0] sm:$0xff] }
   0x6   :  { %446 = vmatprep.subr.mxu1 %v108_v6  ;;  %391 = vmatpush3.msra.mxu0 %v60_v7  ;;  %v106_v14 = vld [vmem:[%s860_s1 + $0x1e0] sm:$0xff]  ;;  %v105_v18 = vld [vmem:[%s860_s1 + $0x1d8] sm:$0xff]  ;;  %v104_v22 = vld [vmem:[%s860_s1 + $0x1d0] sm:$0xff] }
   0x7   :  { %447 = vmatpush3.msra.mxu1 %v92_v8  ;;  %392 = vmatprep.subr.mxu0 %v75_v9  ;;  %v58_v15 = vld [vmem:[%s860_s1 + $0x60] sm:$0xff]  ;;  %v57_v19 = vld [vmem:[%s860_s1 + $0x58] sm:$0xff]  ;;  %v56_v23 = vld [vmem:[%s860_s1 + $0x50] sm:$0xff] }
   0x8   :  { %448 = vmatprep.subr.mxu1 %v107_v10  ;;  %v90_v16 = vld [vmem:[%s860_s1 + $0x160] sm:$0xff]  ;;  %393 = vmatpush3.msra.mxu0 %v59_v11  ;;  %v89_v20 = vld [vmem:[%s860_s1 + $0x158] sm:$0xff]  ;;  %v88_v24 = vld [vmem:[%s860_s1 + $0x150] sm:$0xff] }
   0x9   :  { %449 = vmatpush3.msra.mxu1 %v91_v12  ;;  %394 = vmatprep.subr.mxu0 %v74_v13  ;;  %v71_v25 = vld [vmem:[%s860_s1 + $0xc8] sm:$0xff]  ;;  %v70_v29 = vld [vmem:[%s860_s1 + $0xc0] sm:$0xff]  ;;  %v69_v33 = vld [vmem:[%s860_s1 + $0xb8] sm:$0xff] }
   0xa   :  { %450 = vmatprep.subr.mxu1 %v106_v14  ;;  %395 = vmatpush3.msra.mxu0 %v58_v15  ;;  %v103_v26 = vld [vmem:[%s860_s1 + $0x1c8] sm:$0xff]  ;;  %v102_v30 = vld [vmem:[%s860_s1 + $0x1c0] sm:$0xff]  ;;  %v101_v34 = vld [vmem:[%s860_s1 + $0x1b8] sm:$0xff] }
   0xb   :  { %451 = vmatpush3.msra.mxu1 %v90_v16  ;;  %396 = vmatprep.subr.mxu0 %v73_v17  ;;  %v55_v27 = vld [vmem:[%s860_s1 + $0x48] sm:$0xff]  ;;  %v54_v31 = vld [vmem:[%s860_s1 + $0x40] sm:$0xff]  ;;  %v53_v35 = vld [vmem:[%s860_s1 + $0x38] sm:$0xff] }
   0xc   :  { %452 = vmatprep.subr.mxu1 %v105_v18  ;;  %397 = vmatpush3.msra.mxu0 %v57_v19  ;;  %v87_v28 = vld [vmem:[%s860_s1 + $0x148] sm:$0xff]  ;;  %v86_v32 = vld [vmem:[%s860_s1 + $0x140] sm:$0xff]  ;;  %v85_v36 = vld [vmem:[%s860_s1 + $0x138] sm:$0xff] }
   0xd   :  { %453 = vmatpush3.msra.mxu1 %v89_v20  ;;  %398 = vmatprep.subr.mxu0 %v72_v21  ;;  %v68_v37 = vld [vmem:[%s860_s1 + $0xb0] sm:$0xff]  ;;  %v67_v41 = vld [vmem:[%s860_s1 + $0xa8] sm:$0xff]  ;;  %v66_v45 = vld [vmem:[%s860_s1 + $0xa0] sm:$0xff] }
   0xe   :  { %454 = vmatprep.subr.mxu1 %v104_v22  ;;  %399 = vmatpush3.msra.mxu0 %v56_v23  ;;  %v100_v38 = vld [vmem:[%s860_s1 + $0x1b0] sm:$0xff]  ;;  %v99_v42 = vld [vmem:[%s860_s1 + $0x1a8] sm:$0xff]  ;;  %v98_v46 = vld [vmem:[%s860_s1 + $0x1a0] sm:$0xff] }
   0xf   :  { %455 = vmatpush3.msra.mxu1 %v88_v24  ;;  %400 = vmatprep.subr.mxu0 %v71_v25  ;;  %v52_v39 = vld [vmem:[%s860_s1 + $0x30] sm:$0xff]  ;;  %v51_v43 = vld [vmem:[%s860_s1 + $0x28] sm:$0xff]  ;;  %v50_v47 = vld [vmem:[%s860_s1 + $0x20] sm:$0xff] }
  0x10   :  { %456 = vmatprep.subr.mxu1 %v103_v26  ;;  %401 = vmatpush3.msra.mxu0 %v55_v27  ;;  %v84_v40 = vld [vmem:[%s860_s1 + $0x130] sm:$0xff]  ;;  %v83_v44 = vld [vmem:[%s860_s1 + $0x128] sm:$0xff]  ;;  %v82_v48 = vld [vmem:[%s860_s1 + $0x120] sm:$0xff] }
  0x11   :  { %457 = vmatpush3.msra.mxu1 %v87_v28  ;;  %402 = vmatprep.subr.mxu0 %v70_v29  ;;  %v65_v49 = vld [vmem:[%s860_s1 + $0x98] sm:$0xff]  ;;  %v64_v53 = vld [vmem:[%s860_s1 + $0x90] sm:$0xff]  ;;  %v63_v57 = vld [vmem:[%s860_s1 + $0x88] sm:$0xff] }
  0x12   :  { %458 = vmatprep.subr.mxu1 %v102_v30  ;;  %403 = vmatpush3.msra.mxu0 %v54_v31  ;;  %v97_v50 = vld [vmem:[%s860_s1 + $0x198] sm:$0xff]  ;;  %v96_v54 = vld [vmem:[%s860_s1 + $0x190] sm:$0xff]  ;;  %v95_v58 = vld [vmem:[%s860_s1 + $0x188] sm:$0xff] }
  0x13   :  { %459 = vmatpush3.msra.mxu1 %v86_v32  ;;  %404 = vmatprep.subr.mxu0 %v69_v33  ;;  %v49_v51 = vld [vmem:[%s860_s1 + $0x18] sm:$0xff]  ;;  %v48_v55 = vld [vmem:[%s860_s1 + $0x10] sm:$0xff]  ;;  %v47_v59 = vld [vmem:[%s860_s1 + $0x8] sm:$0xff] }
  0x14   :  { %460 = vmatprep.subr.mxu1 %v101_v34  ;;  %405 = vmatpush3.msra.mxu0 %v53_v35  ;;  %v81_v52 = vld [vmem:[%s860_s1 + $0x118] sm:$0xff]  ;;  %v80_v56 = vld [vmem:[%s860_s1 + $0x110] sm:$0xff]  ;;  %v79_v60 = vld [vmem:[%s860_s1 + $0x108] sm:$0xff] }
  0x15   :  { %461 = vmatpush3.msra.mxu1 %v85_v36  ;;  %406 = vmatprep.subr.mxu0 %v68_v37  ;;  %v62_v61 = vld [vmem:[%s860_s1 + $0x80] sm:$0xff]  ;;  %v15_v0 = vld [vmem:[%s861_s0 + $0x8] sm:$0xff]  ;;  %v17_v2 = vld [vmem:[%s861_s0 + $0x18] sm:$0xff] }
  0x16   :  { %462 = vmatprep.subr.mxu1 %v100_v38  ;;  %407 = vmatpush3.msra.mxu0 %v52_v39  ;;  %v94_v62 = vld [vmem:[%s860_s1 + $0x180] sm:$0xff]  ;;  %v16_v4 = vld [vmem:[%s861_s0 + $0x10] sm:$0xff]  ;;  %v19_v5 = vld [vmem:[%s861_s0 + $0x28] sm:$0xff] }
  0x17   :  { %463 = vmatpush3.msra.mxu1 %v84_v40  ;;  %408 = vmatprep.subr.mxu0 %v67_v41  ;;  %v46_v63 = vld [vmem:[%s860_s1] sm:$0xff]  ;;  %v21_v6 = vld [vmem:[%s861_s0 + $0x38] sm:$0xff]  ;;  %v112_v8 = vld [vmem:[%s862_s2 + $0x10] sm:$0xff] }
  0x18   :  { %464 = vmatprep.subr.mxu1 %v99_v42  ;;  %409 = vmatpush3.msra.mxu0 %v51_v43  ;;  %v78_v1 = vld [vmem:[%s860_s1 + $0x100] sm:$0xff]  ;;  %v20_v10 = vld [vmem:[%s861_s0 + $0x30] sm:$0xff]  ;;  %v23_v11 = vld [vmem:[%s861_s0 + $0x48] sm:$0xff] }
  0x19   :  { %465 = vmatpush3.msra.mxu1 %v83_v44  ;;  %410 = vmatprep.subr.mxu0 %v66_v45  ;;  %v14_v3 = vld [vmem:[%s861_s0] sm:$0xff]  ;;  %v25_v12 = vld [vmem:[%s861_s0 + $0x58] sm:$0xff]  ;;  %v111_v13 = vld [vmem:[%s862_s2 + $0x8] sm:$0xff] }
  0x1a   :  { %466 = vmatprep.subr.mxu1 %v98_v46  ;;  %411 = vmatpush3.msra.mxu0 %v50_v47  ;;  %v110_v7 = vld [vmem:[%s862_s2] sm:$0xff]  ;;  %v113_v14 = vld [vmem:[%s862_s2 + $0x18] sm:$0xff]  ;;  %v24_v16 = vld [vmem:[%s861_s0 + $0x50] sm:$0xff] }
  0x1b   :  { %467 = vmatpush3.msra.mxu1 %v82_v48  ;;  %412 = vmatprep.subr.mxu0 %v65_v49  ;;  %v18_v9 = vld [vmem:[%s861_s0 + $0x20] sm:$0xff]  ;;  %v27_v17 = vld [vmem:[%s861_s0 + $0x68] sm:$0xff]  ;;  %v29_v18 = vld [vmem:[%s861_s0 + $0x78] sm:$0xff] }
  0x1c   :  { %468 = vmatprep.subr.mxu1 %v97_v50  ;;  %413 = vmatpush3.msra.mxu0 %v49_v51  ;;  %v22_v15 = vld [vmem:[%s861_s0 + $0x40] sm:$0xff]  ;;  %v115_v19 = vld [vmem:[%s862_s2 + $0x28] sm:$0xff]  ;;  %v28_v22 = vld [vmem:[%s861_s0 + $0x70] sm:$0xff] }
  0x1d   :  { %469 = vmatpush3.msra.mxu1 %v81_v52  ;;  %414 = vmatprep.subr.mxu0 %v64_v53  ;;  %v114_v20 = vld [vmem:[%s862_s2 + $0x20] sm:$0xff]  ;;  %v31_v23 = vld [vmem:[%s861_s0 + $0x88] sm:$0xff]  ;;  %v33_v24 = vld [vmem:[%s861_s0 + $0x98] sm:$0xff] }
  0x1e   :  { %470 = vmatprep.subr.mxu1 %v96_v54  ;;  %415 = vmatpush3.msra.mxu0 %v48_v55  ;;  %v26_v21 = vld [vmem:[%s861_s0 + $0x60] sm:$0xff]  ;;  %v117_v25 = vld [vmem:[%s862_s2 + $0x38] sm:$0xff]  ;;  %v116_v26 = vld [vmem:[%s862_s2 + $0x30] sm:$0xff] }
  0x1f   :  { %471 = vmatpush3.msra.mxu1 %v80_v56  ;;  %416 = vmatprep.subr.mxu0 %v63_v57  ;;  %v30_v27 = vld [vmem:[%s861_s0 + $0x80] sm:$0xff]  ;;  %v32_v28 = vld [vmem:[%s861_s0 + $0x90] sm:$0xff]  ;;  %v35_v29 = vld [vmem:[%s861_s0 + $0xa8] sm:$0xff] }
  0x20   :  { %472 = vmatprep.subr.mxu1 %v95_v58  ;;  %417 = vmatpush3.msra.mxu0 %v47_v59  ;;  %v37_v30 = vld [vmem:[%s861_s0 + $0xb8] sm:$0xff]  ;;  %v34_v31 = vld [vmem:[%s861_s0 + $0xa0] sm:$0xff]  ;;  %v36_v32 = vld [vmem:[%s861_s0 + $0xb0] sm:$0xff] }
  0x21   :  { %473 = vmatpush3.msra.mxu1 %v79_v60  ;;  %418 = vmatprep.subr.mxu0 %v62_v61  ;;  %v39_v33 = vld [vmem:[%s861_s0 + $0xc8] sm:$0xff]  ;;  %v41_v34 = vld [vmem:[%s861_s0 + $0xd8] sm:$0xff]  ;;  %v38_v35 = vld [vmem:[%s861_s0 + $0xc0] sm:$0xff] }
  0x22   :  { %474 = vmatprep.subr.mxu1 %v94_v62  ;;  %419 = vmatpush3.msra.mxu0 %v46_v63  ;;  %v40_v36 = vld [vmem:[%s861_s0 + $0xd0] sm:$0xff]  ;;  %v43_v37 = vld [vmem:[%s861_s0 + $0xe8] sm:$0xff]  ;;  %v45_v38 = vld [vmem:[%s861_s0 + $0xf8] sm:$0xff] }
  0x23   :  { %222 = vmatprep.mubr.f32.mxu0 %v15_v0  ;;  %475 = vmatpush3.msra.mxu1 %v78_v1  ;;  %v42_v39 = vld [vmem:[%s861_s0 + $0xe0] sm:$0xff]  ;;  %v44_v40 = vld [vmem:[%s861_s0 + $0xf0] sm:$0xff] }
  0x24   :  { %327 = vmatprep.mubr.f32.mxu1 %v17_v2  ;;  %223 = vmatmul.mubr.f32.vlgmr.msra.gmra.mxu0 %v14_v3 }
  0x25   :  { %328 = vmatmul.mubr.f32.vlgmr.msra.gmra.mxu1 %v16_v4  ;;  %227 = vmatprep.mubr.f32.mxu0 %v19_v5 }
  0x26   :  { %332 = vmatprep.mubr.f32.mxu1 %v21_v6  ;;  %120 = vperm.xlu0 %501, %v110_v7  }
  0x27   :  { %130 = vperm.xlu1 %502, %v112_v8  }
  0x28   :  { %228 = vmatmul.mubr.f32.gmra.mxu0 %v18_v9 }
  0x29   :  { %333 = vmatmul.mubr.f32.gmra.mxu1 %v20_v10  ;;  %232 = vmatprep.mubr.f32.mxu0 %v23_v11 }
  0x2a   :  { %337 = vmatprep.mubr.f32.mxu1 %v25_v12  ;;  %125 = vperm.xlu0 %501, %v111_v13  }
  0x2b   :  { %135 = vperm.xlu1 %502, %v113_v14  }
  0x2c   :  { %233 = vmatmul.mubr.f32.gmra.mxu0 %v22_v15 }
  0x2d   :  { %338 = vmatmul.mubr.f32.gmra.mxu1 %v24_v16  ;;  %237 = vmatprep.mubr.f32.mxu0 %v27_v17 }
  0x2e   :  { %342 = vmatprep.mubr.f32.mxu1 %v29_v18  ;;  %140 = vperm.xlu0 %501, %v114_v20  }
  0x2f   :  { %145 = vperm.xlu1 %502, %v115_v19  }
  0x30   :  { %238 = vmatmul.mubr.f32.gmra.mxu0 %v26_v21 }
  0x31   :  { %343 = vmatmul.mubr.f32.gmra.mxu1 %v28_v22  ;;  %242 = vmatprep.mubr.f32.mxu0 %v31_v23 }
  0x32   :  { %347 = vmatprep.mubr.f32.mxu1 %v33_v24  ;;  %150 = vperm.xlu0 %501, %v116_v26  }
  0x33   :  { %155 = vperm.xlu1 %502, %v117_v25  }
  0x34   :  { %243 = vmatmul.mubr.f32.gmra.mxu0 %v30_v27 }
  0x35   :  { %348 = vmatmul.mubr.f32.gmra.mxu1 %v32_v28  ;;  %247 = vmatprep.mubr.f32.mxu0 %v35_v29 }
  0x36   :  { %352 = vmatprep.mubr.f32.mxu1 %v37_v30 }
  0x38   :  { %248 = vmatmul.mubr.f32.gmra.mxu0 %v34_v31 }
  0x39   :  { %353 = vmatmul.mubr.f32.gmra.mxu1 %v36_v32  ;;  %252 = vmatprep.mubr.f32.mxu0 %v39_v33 }
  0x3a   :  { %357 = vmatprep.mubr.f32.mxu1 %v41_v34 }
  0x3c   :  { %253 = vmatmul.mubr.f32.gmra.mxu0 %v38_v35 }
  0x3d   :  { %358 = vmatmul.mubr.f32.gmra.mxu1 %v40_v36  ;;  %257 = vmatprep.mubr.f32.mxu0 %v43_v37 }
  0x3e   :  { %362 = vmatprep.mubr.f32.mxu1 %v45_v38 }
  0x40   :  { %258 = vmatmul.mubr.f32.gmra.mxu0 %v42_v39 }
  0x41   :  { %363 = vmatmul.mubr.f32.gmra.mxu1 %v44_v40 }
  0xa1   :  { %v121_v41 = vpop.permute.xlu0 %120 }
  0xa2   :  { %v131_v60 = vpop.permute.xlu1 %130 }
  0xa5   :  { %v126_v51 = vpop.permute.xlu0 %125 }
  0xa6   :  { %v136_v10 = vpop.permute.xlu1 %135 }
  0xa9   :  { %v141_v20 = vpop.permute.xlu0 %140 }
  0xaa   :  { %v146_v29 = vpop.permute.xlu1 %145 }
  0xad   :  { %v151_v39 = vpop.permute.xlu0 %150 }
  0xe4   :  { %v420_v42 = vpop.f32.mrf.mxu0 }
  0xe5   :  { %v476_v43 = vpop.f32.mrf.mxu1 }
  0xe6   :  { %v421_v44 = vpop.f32.mrf.mxu0 }
  0xe7   :  { %v477_v45 = vpop.f32.mrf.mxu1  ;;  %v422_v46 = vadd.f32 %v421_v44, %v420_v42 }
  0xe8   :  { %v423_v47 = vpop.f32.mrf.mxu0  ;;  %v478_v49 = vadd.f32 %v477_v45, %v476_v43 }
  0xe9   :  { %v479_v48 = vpop.f32.mrf.mxu1  ;;  %v225_v50 = vadd.f32 %v422_v46, %v121_v41 }
  0xea   :  { %v424_v52 = vpop.f32.mrf.mxu0 }
  0xeb   :  { %v480_v53 = vpop.f32.mrf.mxu1  ;;  %v330_v54 = vadd.f32 %v478_v49, %v225_v50  ;;  %v425_v55 = vadd.f32 %v424_v52, %v423_v47 }
  0xec   :  { %v426_v56 = vpop.f32.mrf.mxu0  ;;  %v481_v59 = vadd.f32 %v480_v53, %v479_v48 }
  0xed   :  { %v482_v57 = vpop.f32.mrf.mxu1  ;;  %v368_v58 = vmax.f32 %v330_v54, 0.0  ;;  %v230_v61 = vadd.f32 %v425_v55, %v126_v51  ;;  %v156_v51 = vpop.permute.xlu1 %155 }
  0xee   :  { %v427_v62 = vpop.f32.mrf.mxu0 }
  0xef   :  { %v483_v63 = vpop.f32.mrf.mxu1  ;;  %376 = vst [vmem:[%s863_s3] sm:$0xff] %v368_v58  ;;  %v335_v0 = vadd.f32 %v481_v59, %v230_v61  ;;  %v428_v1 = vadd.f32 %v427_v62, %v426_v56 }
  0xf0   :  { %v429_v2 = vpop.f32.mrf.mxu0  ;;  %v484_v6 = vadd.f32 %v483_v63, %v482_v57 }
  0xf1   :  { %v485_v3 = vpop.f32.mrf.mxu1  ;;  %v369_v4 = vmax.f32 %v335_v0, 0.0  ;;  %v235_v5 = vadd.f32 %v428_v1, %v131_v60 }
  0xf2   :  { %v430_v7 = vpop.f32.mrf.mxu0 }
  0xf3   :  { %v486_v8 = vpop.f32.mrf.mxu1  ;;  %377 = vst [vmem:[%s863_s3 + $0x8] sm:$0xff] %v369_v4  ;;  %v340_v9 = vadd.f32 %v484_v6, %v235_v5  ;;  %v431_v11 = vadd.f32 %v430_v7, %v429_v2 }
  0xf4   :  { %v432_v12 = vpop.f32.mrf.mxu0  ;;  %v487_v16 = vadd.f32 %v486_v8, %v485_v3 }
  0xf5   :  { %v488_v13 = vpop.f32.mrf.mxu1  ;;  %v370_v14 = vmax.f32 %v340_v9, 0.0  ;;  %v240_v15 = vadd.f32 %v431_v11, %v136_v10 }
  0xf6   :  { %v433_v17 = vpop.f32.mrf.mxu0 }
  0xf7   :  { %v489_v18 = vpop.f32.mrf.mxu1  ;;  %378 = vst [vmem:[%s863_s3 + $0x10] sm:$0xff] %v370_v14  ;;  %v345_v19 = vadd.f32 %v487_v16, %v240_v15  ;;  %v434_v21 = vadd.f32 %v433_v17, %v432_v12 }
  0xf8   :  { %v435_v22 = vpop.f32.mrf.mxu0  ;;  %v490_v26 = vadd.f32 %v489_v18, %v488_v13 }
  0xf9   :  { %v491_v23 = vpop.f32.mrf.mxu1  ;;  %v371_v24 = vmax.f32 %v345_v19, 0.0  ;;  %v245_v25 = vadd.f32 %v434_v21, %v141_v20 }
  0xfa   :  { %v436_v27 = vpop.f32.mrf.mxu0 }
  0xfb   :  { %v492_v28 = vpop.f32.mrf.mxu1  ;;  %379 = vst [vmem:[%s863_s3 + $0x18] sm:$0xff] %v371_v24  ;;  %v350_v30 = vadd.f32 %v490_v26, %v245_v25  ;;  %v437_v31 = vadd.f32 %v436_v27, %v435_v22 }
  0xfc   :  { %v438_v32 = vpop.f32.mrf.mxu0  ;;  %v493_v36 = vadd.f32 %v492_v28, %v491_v23 }
  0xfd   :  { %v494_v33 = vpop.f32.mrf.mxu1  ;;  %v372_v34 = vmax.f32 %v350_v30, 0.0  ;;  %v250_v35 = vadd.f32 %v437_v31, %v146_v29 }
  0xfe   :  { %v439_v37 = vpop.f32.mrf.mxu0 }
  0xff   :  { %v495_v38 = vpop.f32.mrf.mxu1  ;;  %380 = vst [vmem:[%s863_s3 + $0x20] sm:$0xff] %v372_v34  ;;  %v355_v40 = vadd.f32 %v493_v36, %v250_v35  ;;  %v440_v41 = vadd.f32 %v439_v37, %v438_v32 }
 0x100   :  { %v441_v42 = vpop.f32.mrf.mxu0  ;;  %v496_v46 = vadd.f32 %v495_v38, %v494_v33 }
 0x101   :  { %v497_v43 = vpop.f32.mrf.mxu1  ;;  %v373_v44 = vmax.f32 %v355_v40, 0.0  ;;  %v255_v45 = vadd.f32 %v440_v41, %v151_v39 }
 0x102   :  { %v442_v47 = vpop.f32.mrf.mxu0 }
 0x103   :  { %v498_v48 = vpop.f32.mrf.mxu1  ;;  %381 = vst [vmem:[%s863_s3 + $0x28] sm:$0xff] %v373_v44  ;;  %v360_v49 = vadd.f32 %v496_v46, %v255_v45  ;;  %v443_v50 = vadd.f32 %v442_v47, %v441_v42 }
 0x104   :  { %v499_v54 = vadd.f32 %v498_v48, %v497_v43 }
 0x105   :  { %v374_v52 = vmax.f32 %v360_v49, 0.0  ;;  %v260_v53 = vadd.f32 %v443_v50, %v156_v51 }
 0x107   :  { %382 = vst [vmem:[%s863_s3 + $0x30] sm:$0xff] %v374_v52  ;;  %v365_v55 = vadd.f32 %v499_v54, %v260_v53 }
 0x109   :  { %v375_v56 = vmax.f32 %v365_v55, 0.0 }
 0x10b   :  { %383 = vst [vmem:[%s863_s3 + $0x38] sm:$0xff] %v375_v56 }

// kernel: _lambda_.12
= control target key start
LH: loop header
LB: loop body
LE: loop exit
PB: predicated region body
PF: predicated region fallthrough
CT: control target
= control target key end

     0   :  { %v922_v3 = vmov 0   ;;  %vm682_vm0 = vcmask 261120   ;;  %s1617_s1 = inlined_call_operand.vmem [shape: f32[1024,32], index: 1, kind: input, shape index: {}]   ;;  %s1618_s0 = inlined_call_operand.vmem [shape: f32[64,1024], index: 0, kind: input, shape index: {}]   ;;  %s1619_s2 = inlined_call_operand.vmem [shape: f32[64,1], index: 2, kind: input, shape index: {}]   ;;  %s1620_s3 = inlined_call_operand.vmem [shape: f32[64,32], index: 3, kind: output, shape index: {}]  }
   0x1   :  { %v109_v0 = vld [vmem:[%s1617_s1 + $0xf8] sm:$0xff]  ;;  %920 = vset.pattern.permute.xlu0 %v922_v3  ;;  %921 = vset.pattern.permute.xlu1 %v922_v3  ;;  %v108_v4 = vld [vmem:[%s1617_s1 + $0xf0] sm:$0xff]  ;;  %v107_v8 = vld [vmem:[%s1617_s1 + $0xe8] sm:$0xff] }
   0x2   :  { %v93_v1 = vld [vmem:[%s1617_s1 + $0x78] sm:$0xff]  ;;  %695 = vmatprep.subr.mxu0 %v109_v0  ;;  %v92_v6 = vld [vmem:[%s1617_s1 + $0x70] sm:$0xff]  ;;  %v91_v10 = vld [vmem:[%s1617_s1 + $0x68] sm:$0xff] }
   0x3   :  { %v141_v2 = vld [vmem:[%s1617_s1 + $0x1f8] sm:$0xff]  ;;  %696 = vmatpush3.msra.mxu0 %v93_v1  ;;  %v140_v7 = vld [vmem:[%s1617_s1 + $0x1f0] sm:$0xff]  ;;  %v139_v11 = vld [vmem:[%s1617_s1 + $0x1e8] sm:$0xff] }
   0x4   :  { %751 = vmatprep.subr.mxu1 %v141_v2  ;;  %v125_v5 = vld [vmem:[%s1617_s1 + $0x178] sm:$0xff]  ;;  %v124_v9 = vld [vmem:[%s1617_s1 + $0x170] sm:$0xff]  ;;  %697 = vmatprep.subr.mxu0 %v108_v4  ;;  %v106_v12 = vld [vmem:[%s1617_s1 + $0xe0] sm:$0xff] }
   0x5   :  { %752 = vmatpush3.msra.mxu1 %v125_v5  ;;  %698 = vmatpush3.msra.mxu0 %v92_v6  ;;  %v123_v13 = vld [vmem:[%s1617_s1 + $0x168] sm:$0xff]  ;;  %v138_v14 = vld [vmem:[%s1617_s1 + $0x1e0] sm:$0xff]  ;;  %v105_v17 = vld [vmem:[%s1617_s1 + $0xd8] sm:$0xff] }
   0x6   :  { %753 = vmatprep.subr.mxu1 %v140_v7  ;;  %699 = vmatprep.subr.mxu0 %v107_v8  ;;  %v90_v15 = vld [vmem:[%s1617_s1 + $0x60] sm:$0xff]  ;;  %v137_v18 = vld [vmem:[%s1617_s1 + $0x1d8] sm:$0xff]  ;;  %v104_v21 = vld [vmem:[%s1617_s1 + $0xd0] sm:$0xff] }
   0x7   :  { %754 = vmatpush3.msra.mxu1 %v124_v9  ;;  %v122_v16 = vld [vmem:[%s1617_s1 + $0x160] sm:$0xff]  ;;  %700 = vmatpush3.msra.mxu0 %v91_v10  ;;  %v89_v19 = vld [vmem:[%s1617_s1 + $0x58] sm:$0xff]  ;;  %v136_v22 = vld [vmem:[%s1617_s1 + $0x1d0] sm:$0xff] }
   0x8   :  { %755 = vmatprep.subr.mxu1 %v139_v11  ;;  %701 = vmatprep.subr.mxu0 %v106_v12  ;;  %v121_v20 = vld [vmem:[%s1617_s1 + $0x158] sm:$0xff]  ;;  %v88_v23 = vld [vmem:[%s1617_s1 + $0x50] sm:$0xff]  ;;  %v103_v25 = vld [vmem:[%s1617_s1 + $0xc8] sm:$0xff] }
   0x9   :  { %756 = vmatpush3.msra.mxu1 %v123_v13  ;;  %702 = vmatpush3.msra.mxu0 %v90_v15  ;;  %v120_v24 = vld [vmem:[%s1617_s1 + $0x150] sm:$0xff]  ;;  %v135_v26 = vld [vmem:[%s1617_s1 + $0x1c8] sm:$0xff]  ;;  %v102_v29 = vld [vmem:[%s1617_s1 + $0xc0] sm:$0xff] }
   0xa   :  { %757 = vmatprep.subr.mxu1 %v138_v14  ;;  %703 = vmatprep.subr.mxu0 %v105_v17  ;;  %v87_v27 = vld [vmem:[%s1617_s1 + $0x48] sm:$0xff]  ;;  %v134_v30 = vld [vmem:[%s1617_s1 + $0x1c0] sm:$0xff]  ;;  %v101_v33 = vld [vmem:[%s1617_s1 + $0xb8] sm:$0xff] }
   0xb   :  { %758 = vmatpush3.msra.mxu1 %v122_v16  ;;  %704 = vmatpush3.msra.mxu0 %v89_v19  ;;  %v119_v28 = vld [vmem:[%s1617_s1 + $0x148] sm:$0xff]  ;;  %v86_v31 = vld [vmem:[%s1617_s1 + $0x40] sm:$0xff]  ;;  %v133_v34 = vld [vmem:[%s1617_s1 + $0x1b8] sm:$0xff] }
   0xc   :  { %759 = vmatprep.subr.mxu1 %v137_v18  ;;  %705 = vmatprep.subr.mxu0 %v104_v21  ;;  %v118_v32 = vld [vmem:[%s1617_s1 + $0x140] sm:$0xff]  ;;  %v85_v35 = vld [vmem:[%s1617_s1 + $0x38] sm:$0xff]  ;;  %v100_v37 = vld [vmem:[%s1617_s1 + $0xb0] sm:$0xff] }
   0xd   :  { %760 = vmatpush3.msra.mxu1 %v121_v20  ;;  %706 = vmatpush3.msra.mxu0 %v88_v23  ;;  %v117_v36 = vld [vmem:[%s1617_s1 + $0x138] sm:$0xff]  ;;  %v132_v38 = vld [vmem:[%s1617_s1 + $0x1b0] sm:$0xff]  ;;  %v99_v41 = vld [vmem:[%s1617_s1 + $0xa8] sm:$0xff] }
   0xe   :  { %761 = vmatprep.subr.mxu1 %v136_v22  ;;  %707 = vmatprep.subr.mxu0 %v103_v25  ;;  %v84_v39 = vld [vmem:[%s1617_s1 + $0x30] sm:$0xff]  ;;  %v131_v42 = vld [vmem:[%s1617_s1 + $0x1a8] sm:$0xff]  ;;  %v98_v45 = vld [vmem:[%s1617_s1 + $0xa0] sm:$0xff] }
   0xf   :  { %762 = vmatpush3.msra.mxu1 %v120_v24  ;;  %708 = vmatpush3.msra.mxu0 %v87_v27  ;;  %v116_v40 = vld [vmem:[%s1617_s1 + $0x130] sm:$0xff]  ;;  %v83_v43 = vld [vmem:[%s1617_s1 + $0x28] sm:$0xff]  ;;  %v130_v46 = vld [vmem:[%s1617_s1 + $0x1a0] sm:$0xff] }
  0x10   :  { %763 = vmatprep.subr.mxu1 %v135_v26  ;;  %709 = vmatprep.subr.mxu0 %v102_v29  ;;  %v115_v44 = vld [vmem:[%s1617_s1 + $0x128] sm:$0xff]  ;;  %v82_v47 = vld [vmem:[%s1617_s1 + $0x20] sm:$0xff]  ;;  %v97_v49 = vld [vmem:[%s1617_s1 + $0x98] sm:$0xff] }
  0x11   :  { %764 = vmatpush3.msra.mxu1 %v119_v28  ;;  %710 = vmatpush3.msra.mxu0 %v86_v31  ;;  %v114_v48 = vld [vmem:[%s1617_s1 + $0x120] sm:$0xff]  ;;  %v129_v50 = vld [vmem:[%s1617_s1 + $0x198] sm:$0xff]  ;;  %v96_v53 = vld [vmem:[%s1617_s1 + $0x90] sm:$0xff] }
  0x12   :  { %765 = vmatprep.subr.mxu1 %v134_v30  ;;  %711 = vmatprep.subr.mxu0 %v101_v33  ;;  %v81_v51 = vld [vmem:[%s1617_s1 + $0x18] sm:$0xff]  ;;  %v128_v54 = vld [vmem:[%s1617_s1 + $0x190] sm:$0xff]  ;;  %v95_v57 = vld [vmem:[%s1617_s1 + $0x88] sm:$0xff] }
  0x13   :  { %766 = vmatpush3.msra.mxu1 %v118_v32  ;;  %712 = vmatpush3.msra.mxu0 %v85_v35  ;;  %v113_v52 = vld [vmem:[%s1617_s1 + $0x118] sm:$0xff]  ;;  %v80_v55 = vld [vmem:[%s1617_s1 + $0x10] sm:$0xff]  ;;  %v127_v58 = vld [vmem:[%s1617_s1 + $0x188] sm:$0xff] }
  0x14   :  { %767 = vmatprep.subr.mxu1 %v133_v34  ;;  %713 = vmatprep.subr.mxu0 %v100_v37  ;;  %v112_v56 = vld [vmem:[%s1617_s1 + $0x110] sm:$0xff]  ;;  %v79_v59 = vld [vmem:[%s1617_s1 + $0x8] sm:$0xff]  ;;  %v94_v61 = vld [vmem:[%s1617_s1 + $0x80] sm:$0xff] }
  0x15   :  { %768 = vmatpush3.msra.mxu1 %v117_v36  ;;  %714 = vmatpush3.msra.mxu0 %v84_v39  ;;  %v111_v60 = vld [vmem:[%s1617_s1 + $0x108] sm:$0xff]  ;;  %v78_v63 = vld [vmem:[%s1617_s1] sm:$0xff]  ;;  %v17_v3 = vld [vmem:[%s1618_s0 + $0x18] sm:$0xff] }
  0x16   :  { %769 = vmatprep.subr.mxu1 %v132_v38  ;;  %715 = vmatprep.subr.mxu0 %v99_v41  ;;  %v15_v62 = vld [vmem:[%s1618_s0 + $0x8] sm:$0xff]  ;;  %v126_v0 = vld [vmem:[%s1617_s1 + $0x180] sm:$0xff]  ;;  %v173_v4 = vld [vmem:[%s1617_s1 + $0x2f8] sm:$0xff] }
  0x17   :  { %770 = vmatpush3.msra.mxu1 %v116_v40  ;;  %716 = vmatpush3.msra.mxu0 %v83_v43  ;;  %v14_v1 = vld [vmem:[%s1618_s0] sm:$0xff]  ;;  %v16_v5 = vld [vmem:[%s1618_s0 + $0x10] sm:$0xff]  ;;  %v157_v6 = vld [vmem:[%s1617_s1 + $0x278] sm:$0xff] }
  0x18   :  { %771 = vmatprep.subr.mxu1 %v131_v42  ;;  %717 = vmatprep.subr.mxu0 %v98_v45  ;;  %v110_v2 = vld [vmem:[%s1617_s1 + $0x100] sm:$0xff]  ;;  %v205_v7 = vld [vmem:[%s1617_s1 + $0x3f8] sm:$0xff]  ;;  %v172_v8 = vld [vmem:[%s1617_s1 + $0x2f0] sm:$0xff] }
  0x19   :  { %772 = vmatpush3.msra.mxu1 %v115_v44  ;;  %718 = vmatpush3.msra.mxu0 %v82_v47  ;;  %v189_v9 = vld [vmem:[%s1617_s1 + $0x378] sm:$0xff]  ;;  %v23_v10 = vld [vmem:[%s1618_s0 + $0x48] sm:$0xff]  ;;  %v156_v11 = vld [vmem:[%s1617_s1 + $0x270] sm:$0xff] }
  0x1a   :  { %773 = vmatprep.subr.mxu1 %v130_v46  ;;  %719 = vmatprep.subr.mxu0 %v97_v49  ;;  %v204_v12 = vld [vmem:[%s1617_s1 + $0x3f0] sm:$0xff]  ;;  %v22_v13 = vld [vmem:[%s1618_s0 + $0x40] sm:$0xff]  ;;  %v25_v14 = vld [vmem:[%s1618_s0 + $0x58] sm:$0xff] }
  0x1b   :  { %774 = vmatpush3.msra.mxu1 %v114_v48  ;;  %720 = vmatpush3.msra.mxu0 %v81_v51  ;;  %v171_v15 = vld [vmem:[%s1617_s1 + $0x2e8] sm:$0xff]  ;;  %v188_v16 = vld [vmem:[%s1617_s1 + $0x370] sm:$0xff]  ;;  %v170_v20 = vld [vmem:[%s1617_s1 + $0x2e0] sm:$0xff] }
  0x1c   :  { %775 = vmatprep.subr.mxu1 %v129_v50  ;;  %721 = vmatprep.subr.mxu0 %v96_v53  ;;  %v24_v17 = vld [vmem:[%s1618_s0 + $0x50] sm:$0xff]  ;;  %v155_v18 = vld [vmem:[%s1617_s1 + $0x268] sm:$0xff]  ;;  %v154_v23 = vld [vmem:[%s1617_s1 + $0x260] sm:$0xff] }
  0x1d   :  { %776 = vmatpush3.msra.mxu1 %v113_v52  ;;  %722 = vmatpush3.msra.mxu0 %v80_v55  ;;  %v203_v19 = vld [vmem:[%s1617_s1 + $0x3e8] sm:$0xff]  ;;  %v202_v24 = vld [vmem:[%s1617_s1 + $0x3e0] sm:$0xff]  ;;  %v33_v26 = vld [vmem:[%s1618_s0 + $0x98] sm:$0xff] }
  0x1e   :  { %777 = vmatprep.subr.mxu1 %v128_v54  ;;  %723 = vmatprep.subr.mxu0 %v95_v57  ;;  %v187_v21 = vld [vmem:[%s1617_s1 + $0x368] sm:$0xff]  ;;  %v30_v25 = vld [vmem:[%s1618_s0 + $0x80] sm:$0xff]  ;;  %v169_v27 = vld [vmem:[%s1617_s1 + $0x2d8] sm:$0xff] }
  0x1f   :  { %778 = vmatpush3.msra.mxu1 %v112_v56  ;;  %724 = vmatpush3.msra.mxu0 %v79_v59  ;;  %v31_v22 = vld [vmem:[%s1618_s0 + $0x88] sm:$0xff]  ;;  %v186_v28 = vld [vmem:[%s1617_s1 + $0x360] sm:$0xff]  ;;  %v32_v29 = vld [vmem:[%s1618_s0 + $0x90] sm:$0xff] }
  0x20   :  { %779 = vmatprep.subr.mxu1 %v127_v58  ;;  %725 = vmatprep.subr.mxu0 %v94_v61  ;;  %v153_v30 = vld [vmem:[%s1617_s1 + $0x258] sm:$0xff]  ;;  %v168_v32 = vld [vmem:[%s1617_s1 + $0x2d0] sm:$0xff]  ;;  %v39_v34 = vld [vmem:[%s1618_s0 + $0xc8] sm:$0xff] }
  0x21   :  { %780 = vmatpush3.msra.mxu1 %v111_v60  ;;  %318 = vmatprep.mubr.f32.mxu0 %v15_v62  ;;  %v201_v31 = vld [vmem:[%s1617_s1 + $0x3d8] sm:$0xff]  ;;  %v152_v35 = vld [vmem:[%s1617_s1 + $0x250] sm:$0xff]  ;;  %v38_v37 = vld [vmem:[%s1618_s0 + $0xc0] sm:$0xff] }
  0x22   :  { %726 = vmatpush3.msra.mxu0 %v78_v63  ;;  %781 = vmatprep.subr.mxu1 %v126_v0  ;;  %v185_v33 = vld [vmem:[%s1617_s1 + $0x358] sm:$0xff]  ;;  %v200_v36 = vld [vmem:[%s1617_s1 + $0x3d0] sm:$0xff]  ;;  %v167_v39 = vld [vmem:[%s1617_s1 + $0x2c8] sm:$0xff] }
  0x23   :  { %319 = vmatmul.mubr.f32.vlgmr.msra.gmra.mxu0 %v14_v1  ;;  %782 = vmatpush3.msra.mxu1 %v110_v2  ;;  %v41_v38 = vld [vmem:[%s1618_s0 + $0xd8] sm:$0xff]  ;;  %v184_v40 = vld [vmem:[%s1617_s1 + $0x350] sm:$0xff]  ;;  %v151_v42 = vld [vmem:[%s1617_s1 + $0x248] sm:$0xff] }
  0x24   :  { %423 = vmatprep.mubr.f32.mxu1 %v17_v3  ;;  %807 = vmatprep.subr.mxu0 %v173_v4  ;;  %v40_v41 = vld [vmem:[%s1618_s0 + $0xd0] sm:$0xff]  ;;  %v199_v43 = vld [vmem:[%s1617_s1 + $0x3c8] sm:$0xff]  ;;  %v166_v44 = vld [vmem:[%s1617_s1 + $0x2c0] sm:$0xff] }
  0x25   :  { %424 = vmatmul.mubr.f32.vlgmr.msra.gmra.mxu1 %v16_v5  ;;  %808 = vmatpush3.msra.mxu0 %v157_v6  ;;  %v183_v45 = vld [vmem:[%s1617_s1 + $0x348] sm:$0xff]  ;;  %v150_v47 = vld [vmem:[%s1617_s1 + $0x240] sm:$0xff]  ;;  %v49_v50 = vld [vmem:[%s1618_s0 + $0x118] sm:$0xff] }
  0x26   :  { %863 = vmatprep.subr.mxu1 %v205_v7  ;;  %809 = vmatprep.subr.mxu0 %v172_v8  ;;  %v47_v46 = vld [vmem:[%s1618_s0 + $0x108] sm:$0xff]  ;;  %v198_v48 = vld [vmem:[%s1617_s1 + $0x3c0] sm:$0xff]  ;;  %v165_v51 = vld [vmem:[%s1617_s1 + $0x2b8] sm:$0xff] }
  0x27   :  { %864 = vmatpush3.msra.mxu1 %v189_v9  ;;  %323 = vmatprep.mubr.f32.mxu0 %v23_v10  ;;  %v46_v49 = vld [vmem:[%s1618_s0 + $0x100] sm:$0xff]  ;;  %v48_v53 = vld [vmem:[%s1618_s0 + $0x110] sm:$0xff]  ;;  %v149_v54 = vld [vmem:[%s1617_s1 + $0x238] sm:$0xff] }
  0x28   :  { %810 = vmatpush3.msra.mxu0 %v156_v11  ;;  %865 = vmatprep.subr.mxu1 %v204_v12  ;;  %v182_v52 = vld [vmem:[%s1617_s1 + $0x340] sm:$0xff]  ;;  %v197_v55 = vld [vmem:[%s1617_s1 + $0x3b8] sm:$0xff]  ;;  %v164_v56 = vld [vmem:[%s1617_s1 + $0x2b0] sm:$0xff] }
  0x29   :  { %324 = vmatmul.mubr.f32.gmra.mxu0 %v22_v13  ;;  %428 = vmatprep.mubr.f32.mxu1 %v25_v14  ;;  %v181_v57 = vld [vmem:[%s1617_s1 + $0x338] sm:$0xff]  ;;  %v55_v58 = vld [vmem:[%s1618_s0 + $0x148] sm:$0xff]  ;;  %v148_v59 = vld [vmem:[%s1617_s1 + $0x230] sm:$0xff] }
  0x2a   :  { %811 = vmatprep.subr.mxu0 %v171_v15  ;;  %866 = vmatpush3.msra.mxu1 %v188_v16  ;;  %v196_v60 = vld [vmem:[%s1617_s1 + $0x3b0] sm:$0xff]  ;;  %v54_v61 = vld [vmem:[%s1618_s0 + $0x140] sm:$0xff]  ;;  %v57_v62 = vld [vmem:[%s1618_s0 + $0x158] sm:$0xff] }
  0x2b   :  { %429 = vmatmul.mubr.f32.gmra.mxu1 %v24_v17  ;;  %812 = vmatpush3.msra.mxu0 %v155_v18  ;;  %v163_v63 = vld [vmem:[%s1617_s1 + $0x2a8] sm:$0xff]  ;;  %v180_v0 = vld [vmem:[%s1617_s1 + $0x330] sm:$0xff]  ;;  %v162_v4 = vld [vmem:[%s1617_s1 + $0x2a0] sm:$0xff] }
  0x2c   :  { %867 = vmatprep.subr.mxu1 %v203_v19  ;;  %813 = vmatprep.subr.mxu0 %v170_v20  ;;  %v56_v1 = vld [vmem:[%s1618_s0 + $0x150] sm:$0xff]  ;;  %v147_v2 = vld [vmem:[%s1617_s1 + $0x228] sm:$0xff]  ;;  %v146_v7 = vld [vmem:[%s1617_s1 + $0x220] sm:$0xff] }
  0x2d   :  { %868 = vmatpush3.msra.mxu1 %v187_v21  ;;  %328 = vmatprep.mubr.f32.mxu0 %v31_v22  ;;  %v195_v3 = vld [vmem:[%s1617_s1 + $0x3a8] sm:$0xff]  ;;  %v194_v8 = vld [vmem:[%s1617_s1 + $0x3a0] sm:$0xff]  ;;  %v65_v10 = vld [vmem:[%s1618_s0 + $0x198] sm:$0xff] }
  0x2e   :  { %814 = vmatpush3.msra.mxu0 %v154_v23  ;;  %869 = vmatprep.subr.mxu1 %v202_v24  ;;  %v179_v5 = vld [vmem:[%s1617_s1 + $0x328] sm:$0xff]  ;;  %v62_v9 = vld [vmem:[%s1618_s0 + $0x180] sm:$0xff]  ;;  %v161_v11 = vld [vmem:[%s1617_s1 + $0x298] sm:$0xff] }
  0x2f   :  { %329 = vmatmul.mubr.f32.gmra.mxu0 %v30_v25  ;;  %433 = vmatprep.mubr.f32.mxu1 %v33_v26  ;;  %v63_v6 = vld [vmem:[%s1618_s0 + $0x188] sm:$0xff]  ;;  %v178_v12 = vld [vmem:[%s1617_s1 + $0x320] sm:$0xff]  ;;  %v64_v13 = vld [vmem:[%s1618_s0 + $0x190] sm:$0xff] }
  0x30   :  { %815 = vmatprep.subr.mxu0 %v169_v27  ;;  %870 = vmatpush3.msra.mxu1 %v186_v28  ;;  %v145_v14 = vld [vmem:[%s1617_s1 + $0x218] sm:$0xff]  ;;  %v160_v16 = vld [vmem:[%s1617_s1 + $0x290] sm:$0xff]  ;;  %v71_v18 = vld [vmem:[%s1618_s0 + $0x1c8] sm:$0xff] }
  0x31   :  { %434 = vmatmul.mubr.f32.gmra.mxu1 %v32_v29  ;;  %816 = vmatpush3.msra.mxu0 %v153_v30  ;;  %v193_v15 = vld [vmem:[%s1617_s1 + $0x398] sm:$0xff]  ;;  %v144_v19 = vld [vmem:[%s1617_s1 + $0x210] sm:$0xff]  ;;  %v70_v21 = vld [vmem:[%s1618_s0 + $0x1c0] sm:$0xff] }
  0x32   :  { %871 = vmatprep.subr.mxu1 %v201_v31  ;;  %817 = vmatprep.subr.mxu0 %v168_v32  ;;  %v177_v17 = vld [vmem:[%s1617_s1 + $0x318] sm:$0xff]  ;;  %v192_v20 = vld [vmem:[%s1617_s1 + $0x390] sm:$0xff]  ;;  %v159_v23 = vld [vmem:[%s1617_s1 + $0x288] sm:$0xff] }
  0x33   :  { %872 = vmatpush3.msra.mxu1 %v185_v33  ;;  %333 = vmatprep.mubr.f32.mxu0 %v39_v34  ;;  %v73_v22 = vld [vmem:[%s1618_s0 + $0x1d8] sm:$0xff]  ;;  %v176_v24 = vld [vmem:[%s1617_s1 + $0x310] sm:$0xff]  ;;  %v143_v26 = vld [vmem:[%s1617_s1 + $0x208] sm:$0xff] }
  0x34   :  { %818 = vmatpush3.msra.mxu0 %v152_v35  ;;  %873 = vmatprep.subr.mxu1 %v200_v36  ;;  %v72_v25 = vld [vmem:[%s1618_s0 + $0x1d0] sm:$0xff]  ;;  %v191_v27 = vld [vmem:[%s1617_s1 + $0x388] sm:$0xff]  ;;  %v158_v28 = vld [vmem:[%s1617_s1 + $0x280] sm:$0xff] }
  0x35   :  { %334 = vmatmul.mubr.f32.gmra.mxu0 %v38_v37  ;;  %438 = vmatprep.mubr.f32.mxu1 %v41_v38  ;;  %v175_v29 = vld [vmem:[%s1617_s1 + $0x308] sm:$0xff]  ;;  %v142_v30 = vld [vmem:[%s1617_s1 + $0x200] sm:$0xff]  ;;  %v21_v35 = vld [vmem:[%s1618_s0 + $0x38] sm:$0xff] }
  0x36   :  { %819 = vmatprep.subr.mxu0 %v167_v39  ;;  %874 = vmatpush3.msra.mxu1 %v184_v40  ;;  %v19_v31 = vld [vmem:[%s1618_s0 + $0x28] sm:$0xff]  ;;  %v190_v32 = vld [vmem:[%s1617_s1 + $0x380] sm:$0xff]  ;;  %v20_v37 = vld [vmem:[%s1618_s0 + $0x30] sm:$0xff] }
  0x37   :  { %439 = vmatmul.mubr.f32.gmra.mxu1 %v40_v41  ;;  %820 = vmatpush3.msra.mxu0 %v151_v42  ;;  %v18_v33 = vld [vmem:[%s1618_s0 + $0x20] sm:$0xff]  ;;  %v27_v36 = vld [vmem:[%s1618_s0 + $0x68] sm:$0xff]  ;;  %v29_v39 = vld [vmem:[%s1618_s0 + $0x78] sm:$0xff] }
  0x38   :  { %875 = vmatprep.subr.mxu1 %v199_v43  ;;  %821 = vmatprep.subr.mxu0 %v166_v44  ;;  %v174_v34 = vld [vmem:[%s1617_s1 + $0x300] sm:$0xff]  ;;  %v208_v40 = vld [vmem:[%s1619_s2 + $0x10] sm:$0xff]  ;;  %v35_v42 = vld [vmem:[%s1618_s0 + $0xa8] sm:$0xff] }
  0x39   :  { %876 = vmatpush3.msra.mxu1 %v183_v45  ;;  %338 = vmatprep.mubr.f32.mxu0 %v47_v46  ;;  %v206_v38 = vld [vmem:[%s1619_s2] sm:$0xff]  ;;  %v28_v43 = vld [vmem:[%s1618_s0 + $0x70] sm:$0xff]  ;;  %v207_v44 = vld [vmem:[%s1619_s2 + $0x8] sm:$0xff] }
  0x3a   :  { %822 = vmatpush3.msra.mxu0 %v150_v47  ;;  %877 = vmatprep.subr.mxu1 %v198_v48  ;;  %v26_v41 = vld [vmem:[%s1618_s0 + $0x60] sm:$0xff]  ;;  %v37_v45 = vld [vmem:[%s1618_s0 + $0xb8] sm:$0xff]  ;;  %v43_v48 = vld [vmem:[%s1618_s0 + $0xe8] sm:$0xff] }
  0x3b   :  { %339 = vmatmul.mubr.f32.gmra.mxu0 %v46_v49  ;;  %443 = vmatprep.mubr.f32.mxu1 %v49_v50  ;;  %v209_v46 = vld [vmem:[%s1619_s2 + $0x18] sm:$0xff]  ;;  %v34_v47 = vld [vmem:[%s1618_s0 + $0xa0] sm:$0xff]  ;;  %v36_v49 = vld [vmem:[%s1618_s0 + $0xb0] sm:$0xff] }
  0x3c   :  { %823 = vmatprep.subr.mxu0 %v165_v51  ;;  %878 = vmatpush3.msra.mxu1 %v182_v52  ;;  %v210_v50 = vld [vmem:[%s1619_s2 + $0x20] sm:$0xff]  ;;  %v45_v51 = vld [vmem:[%s1618_s0 + $0xf8] sm:$0xff]  ;;  %v211_v52 = vld [vmem:[%s1619_s2 + $0x28] sm:$0xff] }
  0x3d   :  { %444 = vmatmul.mubr.f32.gmra.mxu1 %v48_v53  ;;  %824 = vmatpush3.msra.mxu0 %v149_v54  ;;  %v42_v53 = vld [vmem:[%s1618_s0 + $0xe0] sm:$0xff]  ;;  %v51_v54 = vld [vmem:[%s1618_s0 + $0x128] sm:$0xff] }
  0x3e   :  { %879 = vmatprep.subr.mxu1 %v197_v55  ;;  %825 = vmatprep.subr.mxu0 %v164_v56  ;;  %v44_v55 = vld [vmem:[%s1618_s0 + $0xf0] sm:$0xff] }
  0x3f   :  { %880 = vmatpush3.msra.mxu1 %v181_v57  ;;  %343 = vmatprep.mubr.f32.mxu0 %v55_v58  ;;  %v212_v56 = vld [vmem:[%s1619_s2 + $0x30] sm:$0xff]  ;;  %v53_v57 = vld [vmem:[%s1618_s0 + $0x138] sm:$0xff] }
  0x40   :  { %826 = vmatpush3.msra.mxu0 %v148_v59  ;;  %881 = vmatprep.subr.mxu1 %v196_v60  ;;  %v213_v58 = vld [vmem:[%s1619_s2 + $0x38] sm:$0xff]  ;;  %v50_v59 = vld [vmem:[%s1618_s0 + $0x120] sm:$0xff]  ;;  %v59_v60 = vld [vmem:[%s1618_s0 + $0x168] sm:$0xff] }
  0x41   :  { %344 = vmatmul.mubr.f32.gmra.mxu0 %v54_v61  ;;  %448 = vmatprep.mubr.f32.mxu1 %v57_v62  ;;  %v52_v61 = vld [vmem:[%s1618_s0 + $0x130] sm:$0xff]  ;;  %v61_v62 = vld [vmem:[%s1618_s0 + $0x178] sm:$0xff] }
  0x42   :  { %827 = vmatprep.subr.mxu0 %v163_v63  ;;  %882 = vmatpush3.msra.mxu1 %v180_v0  ;;  %v58_v63 = vld [vmem:[%s1618_s0 + $0x160] sm:$0xff]  ;;  %v67_v0 = vld [vmem:[%s1618_s0 + $0x1a8] sm:$0xff] }
  0x43   :  { %449 = vmatmul.mubr.f32.gmra.mxu1 %v56_v1  ;;  %828 = vmatpush3.msra.mxu0 %v147_v2  ;;  %v60_v1 = vld [vmem:[%s1618_s0 + $0x170] sm:$0xff]  ;;  %v69_v2 = vld [vmem:[%s1618_s0 + $0x1b8] sm:$0xff] }
  0x44   :  { %883 = vmatprep.subr.mxu1 %v195_v3  ;;  %829 = vmatprep.subr.mxu0 %v162_v4  ;;  %v66_v3 = vld [vmem:[%s1618_s0 + $0x1a0] sm:$0xff]  ;;  %v75_v4 = vld [vmem:[%s1618_s0 + $0x1e8] sm:$0xff] }
  0x45   :  { %884 = vmatpush3.msra.mxu1 %v179_v5  ;;  %348 = vmatprep.mubr.f32.mxu0 %v63_v6  ;;  %v68_v5 = vld [vmem:[%s1618_s0 + $0x1b0] sm:$0xff]  ;;  %v77_v6 = vld [vmem:[%s1618_s0 + $0x1f8] sm:$0xff] }
  0x46   :  { %830 = vmatpush3.msra.mxu0 %v146_v7  ;;  %885 = vmatprep.subr.mxu1 %v194_v8  ;;  %v74_v7 = vld [vmem:[%s1618_s0 + $0x1e0] sm:$0xff]  ;;  %v76_v8 = vld [vmem:[%s1618_s0 + $0x1f0] sm:$0xff] }
  0x47   :  { %349 = vmatmul.mubr.f32.gmra.mxu0 %v62_v9  ;;  %453 = vmatprep.mubr.f32.mxu1 %v65_v10 }
  0x48   :  { %831 = vmatprep.subr.mxu0 %v161_v11  ;;  %886 = vmatpush3.msra.mxu1 %v178_v12 }
  0x49   :  { %454 = vmatmul.mubr.f32.gmra.mxu1 %v64_v13  ;;  %832 = vmatpush3.msra.mxu0 %v145_v14 }
  0x4a   :  { %887 = vmatprep.subr.mxu1 %v193_v15  ;;  %833 = vmatprep.subr.mxu0 %v160_v16 }
  0x4b   :  { %888 = vmatpush3.msra.mxu1 %v177_v17  ;;  %353 = vmatprep.mubr.f32.mxu0 %v71_v18 }
  0x4c   :  { %834 = vmatpush3.msra.mxu0 %v144_v19  ;;  %889 = vmatprep.subr.mxu1 %v192_v20 }
  0x4d   :  { %354 = vmatmul.mubr.f32.gmra.mxu0 %v70_v21  ;;  %458 = vmatprep.mubr.f32.mxu1 %v73_v22 }
  0x4e   :  { %835 = vmatprep.subr.mxu0 %v159_v23  ;;  %890 = vmatpush3.msra.mxu1 %v176_v24 }
  0x4f   :  { %459 = vmatmul.mubr.f32.gmra.mxu1 %v72_v25  ;;  %836 = vmatpush3.msra.mxu0 %v143_v26 }
  0x50   :  { %891 = vmatprep.subr.mxu1 %v191_v27  ;;  %837 = vmatprep.subr.mxu0 %v158_v28 }
  0x51   :  { %892 = vmatpush3.msra.mxu1 %v175_v29  ;;  %838 = vmatpush3.msra.mxu0 %v142_v30 }
  0x52   :  { %528 = vmatprep.mubr.f32.mxu0 %v19_v31  ;;  %893 = vmatprep.subr.mxu1 %v190_v32 }
  0x53   :  { %529 = vmatmul.mubr.f32.vlgmr.msra.gmra.mxu0 %v18_v33  ;;  %894 = vmatpush3.msra.mxu1 %v174_v34 }
  0x54   :  { %633 = vmatprep.mubr.f32.mxu1 %v21_v35  ;;  %533 = vmatprep.mubr.f32.mxu0 %v27_v36 }
  0x55   :  { %634 = vmatmul.mubr.f32.vlgmr.msra.gmra.mxu1 %v20_v37  ;;  %216 = vperm.xlu0 %920, %v206_v38  }
  0x56   :  { %638 = vmatprep.mubr.f32.mxu1 %v29_v39  ;;  %226 = vperm.xlu1 %921, %v208_v40  }
  0x57   :  { %534 = vmatmul.mubr.f32.gmra.mxu0 %v26_v41 }
  0x58   :  { %538 = vmatprep.mubr.f32.mxu0 %v35_v42 }
  0x59   :  { %639 = vmatmul.mubr.f32.gmra.mxu1 %v28_v43  ;;  %221 = vperm.xlu0 %920, %v207_v44  }
  0x5a   :  { %643 = vmatprep.mubr.f32.mxu1 %v37_v45  ;;  %231 = vperm.xlu1 %921, %v209_v46  }
  0x5b   :  { %539 = vmatmul.mubr.f32.gmra.mxu0 %v34_v47 }
  0x5c   :  { %543 = vmatprep.mubr.f32.mxu0 %v43_v48 }
  0x5d   :  { %644 = vmatmul.mubr.f32.gmra.mxu1 %v36_v49  ;;  %236 = vperm.xlu0 %920, %v210_v50  }
  0x5e   :  { %648 = vmatprep.mubr.f32.mxu1 %v45_v51  ;;  %241 = vperm.xlu1 %921, %v211_v52  }
  0x5f   :  { %544 = vmatmul.mubr.f32.gmra.mxu0 %v42_v53 }
  0x60   :  { %548 = vmatprep.mubr.f32.mxu0 %v51_v54 }
  0x61   :  { %649 = vmatmul.mubr.f32.gmra.mxu1 %v44_v55  ;;  %246 = vperm.xlu0 %920, %v212_v56  }
  0x62   :  { %653 = vmatprep.mubr.f32.mxu1 %v53_v57  ;;  %251 = vperm.xlu1 %921, %v213_v58  }
  0x63   :  { %549 = vmatmul.mubr.f32.gmra.mxu0 %v50_v59 }
  0x64   :  { %553 = vmatprep.mubr.f32.mxu0 %v59_v60 }
  0x65   :  { %654 = vmatmul.mubr.f32.gmra.mxu1 %v52_v61 }
  0x66   :  { %658 = vmatprep.mubr.f32.mxu1 %v61_v62 }
  0x67   :  { %554 = vmatmul.mubr.f32.gmra.mxu0 %v58_v63 }
  0x68   :  { %558 = vmatprep.mubr.f32.mxu0 %v67_v0 }
  0x69   :  { %659 = vmatmul.mubr.f32.gmra.mxu1 %v60_v1 }
  0x6a   :  { %663 = vmatprep.mubr.f32.mxu1 %v69_v2 }
  0x6b   :  { %559 = vmatmul.mubr.f32.gmra.mxu0 %v66_v3 }
  0x6c   :  { %563 = vmatprep.mubr.f32.mxu0 %v75_v4 }
  0x6d   :  { %664 = vmatmul.mubr.f32.gmra.mxu1 %v68_v5 }
  0x6e   :  { %668 = vmatprep.mubr.f32.mxu1 %v77_v6 }
  0x6f   :  { %564 = vmatmul.mubr.f32.gmra.mxu0 %v74_v7 }
  0x71   :  { %669 = vmatmul.mubr.f32.gmra.mxu1 %v76_v8 }
  0xd0   :  { %v217_v37 = vpop.permute.xlu0 %216 }
  0xd1   :  { %v227_v48 = vpop.permute.xlu1 %226 }
  0xd4   :  { %v222_v45 = vpop.permute.xlu0 %221 }
  0xd5   :  { %v232_v1 = vpop.permute.xlu1 %231 }
  0xe3   :  { %v727_v9 = vpop.f32.mrf.mxu0 }
  0xe5   :  { %v783_v10 = vpop.f32.mrf.mxu1  ;;  %v728_v11 = vpop.f32.mrf.mxu0 }
  0xe6   :  { %v729_v39 = vadd.f32 %v728_v11, %v727_v9 }
  0xe7   :  { %v784_v12 = vpop.f32.mrf.mxu1 }
  0xe8   :  { %v321_v43 = vadd.f32 %v729_v39, %v217_v37  ;;  %v785_v47 = vadd.f32 %v784_v12, %v783_v10 }
  0xe9   :  { %v730_v13 = vpop.f32.mrf.mxu0 }
  0xea   :  { %v426_v52 = vadd.f32 %v785_v47, %v321_v43 }
  0xeb   :  { %v786_v14 = vpop.f32.mrf.mxu1  ;;  %v731_v15 = vpop.f32.mrf.mxu0 }
  0xec   :  { %v732_v44 = vadd.f32 %v731_v15, %v730_v13  ;;  %v237_v15 = vpop.permute.xlu0 %236 }
  0xed   :  { %v787_v16 = vpop.f32.mrf.mxu1 }
  0xee   :  { %v326_v53 = vadd.f32 %v732_v44, %v222_v45  ;;  %v788_v57 = vadd.f32 %v787_v16, %v786_v14  ;;  %v242_v45 = vpop.permute.xlu1 %241 }
  0xef   :  { %v733_v17 = vpop.f32.mrf.mxu0 }
  0xf0   :  { %v431_v63 = vadd.f32 %v788_v57, %v326_v53 }
  0xf1   :  { %v789_v18 = vpop.f32.mrf.mxu1  ;;  %v734_v19 = vpop.f32.mrf.mxu0 }
  0xf2   :  { %v735_v49 = vadd.f32 %v734_v19, %v733_v17 }
  0xf3   :  { %v790_v20 = vpop.f32.mrf.mxu1 }
  0xf4   :  { %v331_v60 = vadd.f32 %v735_v49, %v227_v48  ;;  %v791_v4 = vadd.f32 %v790_v20, %v789_v18 }
  0xf5   :  { %v736_v21 = vpop.f32.mrf.mxu0 }
  0xf6   :  { %v436_v10 = vadd.f32 %v791_v4, %v331_v60 }
  0xf7   :  { %v1543_v22 = vpop.f32.mrf.mxu1  ;;  %v737_v23 = vpop.f32.mrf.mxu0 }
  0xf8   :  { %v738_v0 = vadd.f32 %v737_v23, %v736_v21 }
  0xf9   :  { %v1545_v24 = vpop.f32.mrf.mxu1 }
  0xfa   :  { %v336_v13 = vadd.f32 %v738_v0, %v232_v1  ;;  %v794_v20 = vadd.f32 %v1545_v24, %v1543_v22  ;;  %v252_v1 = vpop.permute.xlu1 %251 }
  0xfb   :  { %v739_v25 = vpop.f32.mrf.mxu0 }
  0xfd   :  { %v1547_v26 = vpop.f32.mrf.mxu1  ;;  %v740_v27 = vpop.f32.mrf.mxu0 }
  0xfe   :  { %v741_v14 = vadd.f32 %v740_v27, %v739_v25  ;;  %v441_v25 = vadd.f32 %v794_v20, %v336_v13 }
  0xff   :  { %v1549_v28 = vpop.f32.mrf.mxu1 }
 0x100   :  { %v341_v27 = vadd.f32 %v741_v14, %v237_v15  ;;  %v797_v22 = vadd.f32 %v1549_v28, %v1547_v26 }
 0x101   :  { %v742_v29 = vpop.f32.mrf.mxu0 }
 0x102   :  { %v446_v53 = vadd.f32 %v797_v22, %v341_v27 }
 0x103   :  { %v1551_v30 = vpop.f32.mrf.mxu1  ;;  %v743_v31 = vpop.f32.mrf.mxu0 }
 0x104   :  { %v744_v39 = vadd.f32 %v743_v31, %v742_v29 }
 0x105   :  { %v1553_v32 = vpop.f32.mrf.mxu1 }
 0x106   :  { %v346_v31 = vadd.f32 %v744_v39, %v242_v45  ;;  %v800_v26 = vadd.f32 %v1553_v32, %v1551_v30 }
 0x107   :  { %v1555_v33 = vpop.f32.mrf.mxu0 }
 0x109   :  { %v1557_v34 = vpop.f32.mrf.mxu1  ;;  %v1559_v35 = vpop.f32.mrf.mxu0 }
 0x10b   :  { %v1561_v36 = vpop.f32.mrf.mxu1 }
 0x10c   :  { %v803_v4 = vadd.f32 %v1561_v36, %v1557_v34 }
 0x10d   :  { %v1563_v38 = vpop.f32.mrf.mxu0 }
 0x10f   :  { %v1565_v40 = vpop.f32.mrf.mxu1  ;;  %v1567_v41 = vpop.f32.mrf.mxu0 }
 0x111   :  { %v1569_v42 = vpop.f32.mrf.mxu1 }
 0x112   :  { %v806_v14 = vadd.f32 %v1569_v42, %v1565_v40 }
 0x113   :  { %v839_v46 = vpop.f32.mrf.mxu0 }
 0x115   :  { %v895_v50 = vpop.f32.mrf.mxu1  ;;  %v840_v51 = vpop.f32.mrf.mxu0 }
 0x116   :  { %v841_v54 = vadd.f32 %v840_v51, %v839_v46 }
 0x117   :  { %v896_v55 = vpop.f32.mrf.mxu1  ;;  %v842_v56 = vpop.f32.mrf.mxu0 }
 0x118   :  { %v531_v58 = vadd.f32 %v841_v54, %v426_v52  ;;  %v897_v59 = vadd.f32 %v896_v55, %v895_v50  ;;  %v747_v54 = vadd.f32 %v1559_v35, %v1555_v33  ;;  %v247_v55 = vpop.permute.xlu0 %246  ;;  %v750_v35 = vadd.f32 %v1567_v41, %v1563_v38 }
 0x119   :  { %v898_v61 = vpop.f32.mrf.mxu1  ;;  %v843_v62 = vpop.f32.mrf.mxu0 }
 0x11a   :  { %v636_v2 = vadd.f32 %v897_v59, %v531_v58  ;;  %v844_v3 = vadd.f32 %v843_v62, %v842_v56  ;;  %v451_v62 = vadd.f32 %v800_v26, %v346_v31  ;;  %v351_v33 = vadd.f32 %v747_v54, %v247_v55 }
 0x11b   :  { %v899_v5 = vpop.f32.mrf.mxu1  ;;  %v845_v6 = vpop.f32.mrf.mxu0  ;;  %v356_v38 = vadd.f32 %v750_v35, %v252_v1 }
 0x11c   :  { %v674_v7 = vmax.f32 %v636_v2, 0.0  ;;  %v536_v8 = vadd.f32 %v844_v3, %v431_v63  ;;  %v900_v9 = vadd.f32 %v899_v5, %v898_v61 }
 0x11d   :  { %v901_v11 = vpop.f32.mrf.mxu1  ;;  %v846_v12 = vpop.f32.mrf.mxu0 }
 0x11e   :  { %683 = vst.msk [vmem:[%s1620_s3] sm:$0xff] %vm682_vm0, %v674_v7  ;;  %v641_v16 = vadd.f32 %v900_v9, %v536_v8  ;;  %v847_v17 = vadd.f32 %v846_v12, %v845_v6 }
 0x11f   :  { %v902_v18 = vpop.f32.mrf.mxu1  ;;  %v848_v19 = vpop.f32.mrf.mxu0 }
 0x120   :  { %v675_v21 = vmax.f32 %v641_v16, 0.0  ;;  %v541_v23 = vadd.f32 %v847_v17, %v436_v10  ;;  %v903_v37 = vadd.f32 %v902_v18, %v901_v11  ;;  %v456_v10 = vadd.f32 %v803_v4, %v351_v33 }
 0x121   :  { %v904_v43 = vpop.f32.mrf.mxu1  ;;  %v849_v44 = vpop.f32.mrf.mxu0  ;;  %v461_v18 = vadd.f32 %v806_v14, %v356_v38 }
 0x122   :  { %684 = vst.msk [vmem:[%s1620_s3 + $0x8] sm:$0xff] %vm682_vm0, %v675_v21  ;;  %v646_v46 = vadd.f32 %v903_v37, %v541_v23  ;;  %v850_v47 = vadd.f32 %v849_v44, %v848_v19 }
 0x123   :  { %v905_v48 = vpop.f32.mrf.mxu1  ;;  %v851_v49 = vpop.f32.mrf.mxu0 }
 0x124   :  { %v676_v24 = vmax.f32 %v646_v46, 0.0  ;;  %v546_v50 = vadd.f32 %v850_v47, %v441_v25  ;;  %v906_v29 = vadd.f32 %v905_v48, %v904_v43 }
 0x125   :  { %v907_v51 = vpop.f32.mrf.mxu1  ;;  %v852_v52 = vpop.f32.mrf.mxu0 }
 0x126   :  { %685 = vst.msk [vmem:[%s1620_s3 + $0x10] sm:$0xff] %vm682_vm0, %v676_v24  ;;  %v651_v56 = vadd.f32 %v906_v29, %v546_v50  ;;  %v853_v57 = vadd.f32 %v852_v52, %v851_v49 }
 0x127   :  { %v908_v28 = vpop.f32.mrf.mxu1  ;;  %v854_v58 = vpop.f32.mrf.mxu0 }
 0x128   :  { %v677_v59 = vmax.f32 %v651_v56, 0.0  ;;  %v551_v60 = vadd.f32 %v853_v57, %v446_v53  ;;  %v909_v61 = vadd.f32 %v908_v28, %v907_v51 }
 0x129   :  { %v910_v63 = vpop.f32.mrf.mxu1  ;;  %v855_v0 = vpop.f32.mrf.mxu0 }
 0x12a   :  { %686 = vst.msk [vmem:[%s1620_s3 + $0x18] sm:$0xff] %vm682_vm0, %v677_v59  ;;  %v656_v2 = vadd.f32 %v909_v61, %v551_v60  ;;  %v856_v30 = vadd.f32 %v855_v0, %v854_v58 }
 0x12b   :  { %v911_v32 = vpop.f32.mrf.mxu1  ;;  %v857_v3 = vpop.f32.mrf.mxu0 }
 0x12c   :  { %v678_v5 = vmax.f32 %v656_v2, 0.0  ;;  %v556_v6 = vadd.f32 %v856_v30, %v451_v62  ;;  %v912_v7 = vadd.f32 %v911_v32, %v910_v63 }
 0x12d   :  { %v913_v8 = vpop.f32.mrf.mxu1  ;;  %v858_v9 = vpop.f32.mrf.mxu0 }
 0x12e   :  { %687 = vst.msk [vmem:[%s1620_s3 + $0x20] sm:$0xff] %vm682_vm0, %v678_v5  ;;  %v661_v41 = vadd.f32 %v912_v7, %v556_v6  ;;  %v859_v11 = vadd.f32 %v858_v9, %v857_v3 }
 0x12f   :  { %v914_v12 = vpop.f32.mrf.mxu1  ;;  %v860_v13 = vpop.f32.mrf.mxu0 }
 0x130   :  { %v679_v34 = vmax.f32 %v661_v41, 0.0  ;;  %v561_v36 = vadd.f32 %v859_v11, %v456_v10  ;;  %v915_v15 = vadd.f32 %v914_v12, %v913_v8 }
 0x131   :  { %v916_v16 = vpop.f32.mrf.mxu1  ;;  %v861_v17 = vpop.f32.mrf.mxu0 }
 0x132   :  { %688 = vst.msk [vmem:[%s1620_s3 + $0x28] sm:$0xff] %vm682_vm0, %v679_v34  ;;  %v666_v19 = vadd.f32 %v915_v15, %v561_v36  ;;  %v862_v20 = vadd.f32 %v861_v17, %v860_v13 }
 0x133   :  { %v917_v21 = vpop.f32.mrf.mxu1 }
 0x134   :  { %v680_v23 = vmax.f32 %v666_v19, 0.0  ;;  %v566_v37 = vadd.f32 %v862_v20, %v461_v18  ;;  %v918_v39 = vadd.f32 %v917_v21, %v916_v16 }
 0x136   :  { %689 = vst.msk [vmem:[%s1620_s3 + $0x30] sm:$0xff] %vm682_vm0, %v680_v23  ;;  %v671_v40 = vadd.f32 %v918_v39, %v566_v37 }
 0x138   :  { %v681_v42 = vmax.f32 %v671_v40, 0.0 }
 0x13a   :  { %690 = vst.msk [vmem:[%s1620_s3 + $0x38] sm:$0xff] %vm682_vm0, %v681_v42 }

// kernel: _lambda_.13
= control target key start
LH: loop header
LB: loop body
LE: loop exit
PB: predicated region body
PF: predicated region fallthrough
CT: control target
= control target key end

     0   :  { %21 = vsyncpa [#allocation3], 0  ;;  %s3699_s0 = inlined_call_operand.vmem [shape: f32[2,1024], index: 0, kind: input, shape index: {}]   ;;  %s3700_s1 = inlined_call_operand.vmem [shape: f32[1024,256], index: 1, kind: input, shape index: {}]   ;;  %s3701_s2 = inlined_call_operand.vmem [shape: f32[1,256], index: 2, kind: input, shape index: {}]   ;;  %s3702_s3 = inlined_call_operand.vmem [shape: f32[256,16], index: 3, kind: input, shape index: {}]   ;;  %s3703_s4 = inlined_call_operand.vmem [shape: f32[256,16], index: 4, kind: input, shape index: {}]   ;;  %s3704_s5 = inlined_call_operand.vmem [shape: f32[1,16], index: 5, kind: input, shape index: {}]   ;;  %s3705_s6 = inlined_call_operand.vmem [shape: f32[1,16], index: 6, kind: input, shape index: {}]   ;;  %s3706_s7 = inlined_call_operand.vmem [shape: f32[2,16], index: 7, kind: input, shape index: {}]   ;;  %s3707_s8 = inlined_call_operand.vmem [shape: f32[16,256], index: 8, kind: input, shape index: {}]   ;;  %s3708_s9 = inlined_call_operand.vmem [shape: f32[1,256], index: 9, kind: input, shape index: {}]   ;;  %s3709_s10 = inlined_call_operand.vmem [shape: f32[256,1024], index: 10, kind: input, shape index: {}]   ;;  %s3710_s11 = inlined_call_operand.vmem [shape: f32[1,1024], index: 11, kind: input, shape index: {}]   ;;  %s3711_s12 = inlined_call_operand.hbm [shape: f32[2,16], index: 12, kind: output, shape index: {0}]   ;;  %s3712_s13 = inlined_call_operand.hbm [shape: f32[2,16], index: 13, kind: output, shape index: {1}]   ;;  %s3713_s14 = inlined_call_operand.hbm [shape: f32[2,16], index: 14, kind: output, shape index: {2}]   ;;  %s3714_s15 = inlined_call_operand.vmem [shape: f32[2,1024], index: 15, kind: output, shape index: {3}]  }
   0x1   :  { %v80_v0 = vld [vmem:[%s3700_s1 + $0xf8] sm:$0xff]  ;;  %v79_v2 = vld [vmem:[%s3700_s1 + $0xf0] sm:$0xff]  ;;  %v78_v4 = vld [vmem:[%s3700_s1 + $0xe8] sm:$0xff] }
   0x2   :  { %v144_v1 = vld [vmem:[%s3700_s1 + $0x2f8] sm:$0xff]  ;;  %361 = vmatprep.subr.mxu0 %v80_v0  ;;  %v143_v3 = vld [vmem:[%s3700_s1 + $0x2f0] sm:$0xff]  ;;  %v142_v5 = vld [vmem:[%s3700_s1 + $0x2e8] sm:$0xff] }
   0x3   :  { %432 = vmatprep.subr.mxu1 %v144_v1  ;;  %362 = vmatpush1.msra.mxu0 %v79_v2  ;;  %v77_v6 = vld [vmem:[%s3700_s1 + $0xe0] sm:$0xff]  ;;  %v76_v8 = vld [vmem:[%s3700_s1 + $0xd8] sm:$0xff]  ;;  %v75_v10 = vld [vmem:[%s3700_s1 + $0xd0] sm:$0xff] }
   0x4   :  { %433 = vmatpush1.msra.mxu1 %v143_v3  ;;  %v141_v7 = vld [vmem:[%s3700_s1 + $0x2e0] sm:$0xff]  ;;  %363 = vmatprep.subr.mxu0 %v78_v4  ;;  %v140_v9 = vld [vmem:[%s3700_s1 + $0x2d8] sm:$0xff]  ;;  %v139_v11 = vld [vmem:[%s3700_s1 + $0x2d0] sm:$0xff] }
   0x5   :  { %434 = vmatprep.subr.mxu1 %v142_v5  ;;  %364 = vmatpush1.msra.mxu0 %v77_v6  ;;  %v74_v12 = vld [vmem:[%s3700_s1 + $0xc8] sm:$0xff]  ;;  %v73_v14 = vld [vmem:[%s3700_s1 + $0xc0] sm:$0xff]  ;;  %v72_v16 = vld [vmem:[%s3700_s1 + $0xb8] sm:$0xff] }
   0x6   :  { %435 = vmatpush1.msra.mxu1 %v141_v7  ;;  %v138_v13 = vld [vmem:[%s3700_s1 + $0x2c8] sm:$0xff]  ;;  %365 = vmatprep.subr.mxu0 %v76_v8  ;;  %v137_v15 = vld [vmem:[%s3700_s1 + $0x2c0] sm:$0xff]  ;;  %v136_v17 = vld [vmem:[%s3700_s1 + $0x2b8] sm:$0xff] }
   0x7   :  { %436 = vmatprep.subr.mxu1 %v140_v9  ;;  %366 = vmatpush1.msra.mxu0 %v75_v10  ;;  %v71_v18 = vld [vmem:[%s3700_s1 + $0xb0] sm:$0xff]  ;;  %v70_v20 = vld [vmem:[%s3700_s1 + $0xa8] sm:$0xff]  ;;  %v69_v22 = vld [vmem:[%s3700_s1 + $0xa0] sm:$0xff] }
   0x8   :  { %437 = vmatpush1.msra.mxu1 %v139_v11  ;;  %367 = vmatprep.subr.mxu0 %v74_v12  ;;  %v135_v19 = vld [vmem:[%s3700_s1 + $0x2b0] sm:$0xff]  ;;  %v134_v21 = vld [vmem:[%s3700_s1 + $0x2a8] sm:$0xff]  ;;  %v133_v23 = vld [vmem:[%s3700_s1 + $0x2a0] sm:$0xff] }
   0x9   :  { %438 = vmatprep.subr.mxu1 %v138_v13  ;;  %368 = vmatpush1.msra.mxu0 %v73_v14  ;;  %v68_v24 = vld [vmem:[%s3700_s1 + $0x98] sm:$0xff]  ;;  %v67_v26 = vld [vmem:[%s3700_s1 + $0x90] sm:$0xff]  ;;  %v66_v28 = vld [vmem:[%s3700_s1 + $0x88] sm:$0xff] }
   0xa   :  { %439 = vmatpush1.msra.mxu1 %v137_v15  ;;  %369 = vmatprep.subr.mxu0 %v72_v16  ;;  %v132_v25 = vld [vmem:[%s3700_s1 + $0x298] sm:$0xff]  ;;  %v131_v27 = vld [vmem:[%s3700_s1 + $0x290] sm:$0xff]  ;;  %v130_v29 = vld [vmem:[%s3700_s1 + $0x288] sm:$0xff] }
   0xb   :  { %440 = vmatprep.subr.mxu1 %v136_v17  ;;  %370 = vmatpush1.msra.mxu0 %v71_v18  ;;  %v65_v30 = vld [vmem:[%s3700_s1 + $0x80] sm:$0xff]  ;;  %v64_v32 = vld [vmem:[%s3700_s1 + $0x78] sm:$0xff]  ;;  %v63_v34 = vld [vmem:[%s3700_s1 + $0x70] sm:$0xff] }
   0xc   :  { %441 = vmatpush1.msra.mxu1 %v135_v19  ;;  %371 = vmatprep.subr.mxu0 %v70_v20  ;;  %v129_v31 = vld [vmem:[%s3700_s1 + $0x280] sm:$0xff]  ;;  %v128_v33 = vld [vmem:[%s3700_s1 + $0x278] sm:$0xff]  ;;  %v127_v35 = vld [vmem:[%s3700_s1 + $0x270] sm:$0xff] }
   0xd   :  { %442 = vmatprep.subr.mxu1 %v134_v21  ;;  %372 = vmatpush1.msra.mxu0 %v69_v22  ;;  %v62_v36 = vld [vmem:[%s3700_s1 + $0x68] sm:$0xff]  ;;  %v61_v38 = vld [vmem:[%s3700_s1 + $0x60] sm:$0xff]  ;;  %v60_v40 = vld [vmem:[%s3700_s1 + $0x58] sm:$0xff] }
   0xe   :  { %443 = vmatpush1.msra.mxu1 %v133_v23  ;;  %373 = vmatprep.subr.mxu0 %v68_v24  ;;  %v126_v37 = vld [vmem:[%s3700_s1 + $0x268] sm:$0xff]  ;;  %v125_v39 = vld [vmem:[%s3700_s1 + $0x260] sm:$0xff]  ;;  %v124_v41 = vld [vmem:[%s3700_s1 + $0x258] sm:$0xff] }
   0xf   :  { %444 = vmatprep.subr.mxu1 %v132_v25  ;;  %374 = vmatpush1.msra.mxu0 %v67_v26  ;;  %v59_v42 = vld [vmem:[%s3700_s1 + $0x50] sm:$0xff]  ;;  %v58_v44 = vld [vmem:[%s3700_s1 + $0x48] sm:$0xff]  ;;  %v57_v46 = vld [vmem:[%s3700_s1 + $0x40] sm:$0xff] }
  0x10   :  { %445 = vmatpush1.msra.mxu1 %v131_v27  ;;  %375 = vmatprep.subr.mxu0 %v66_v28  ;;  %v123_v43 = vld [vmem:[%s3700_s1 + $0x250] sm:$0xff]  ;;  %v122_v45 = vld [vmem:[%s3700_s1 + $0x248] sm:$0xff]  ;;  %v121_v47 = vld [vmem:[%s3700_s1 + $0x240] sm:$0xff] }
  0x11   :  { %446 = vmatprep.subr.mxu1 %v130_v29  ;;  %376 = vmatpush1.msra.mxu0 %v65_v30  ;;  %v56_v48 = vld [vmem:[%s3700_s1 + $0x38] sm:$0xff]  ;;  %v55_v50 = vld [vmem:[%s3700_s1 + $0x30] sm:$0xff]  ;;  %v54_v52 = vld [vmem:[%s3700_s1 + $0x28] sm:$0xff]  ;;  %v307_v30 = vlaneseq }
  0x12   :  { %447 = vmatpush1.msra.mxu1 %v129_v31  ;;  %377 = vmatprep.subr.mxu0 %v64_v32  ;;  %v120_v49 = vld [vmem:[%s3700_s1 + $0x238] sm:$0xff]  ;;  %v119_v51 = vld [vmem:[%s3700_s1 + $0x230] sm:$0xff]  ;;  %v118_v53 = vld [vmem:[%s3700_s1 + $0x228] sm:$0xff]  ;;  %v1795_v31 = vmov 1983009808  }
  0x13   :  { %448 = vmatprep.subr.mxu1 %v128_v33  ;;  %378 = vmatpush1.msra.mxu0 %v63_v34  ;;  %v53_v54 = vld [vmem:[%s3700_s1 + $0x20] sm:$0xff]  ;;  %v52_v56 = vld [vmem:[%s3700_s1 + $0x18] sm:$0xff]  ;;  %v51_v58 = vld [vmem:[%s3700_s1 + $0x10] sm:$0xff]  ;;  %v321_v32 = vunpack.c.l.s4 %v1795_v31 }
  0x14   :  { %449 = vmatpush1.msra.mxu1 %v127_v35  ;;  %379 = vmatprep.subr.mxu0 %v62_v36  ;;  %v117_v55 = vld [vmem:[%s3700_s1 + $0x220] sm:$0xff]  ;;  %v116_v57 = vld [vmem:[%s3700_s1 + $0x218] sm:$0xff]  ;;  %v115_v59 = vld [vmem:[%s3700_s1 + $0x210] sm:$0xff] }
  0x15   :  { %450 = vmatprep.subr.mxu1 %v126_v37  ;;  %380 = vmatpush1.msra.mxu0 %v61_v38  ;;  %v50_v60 = vld [vmem:[%s3700_s1 + $0x8] sm:$0xff]  ;;  %v49_v62 = vld [vmem:[%s3700_s1] sm:$0xff]  ;;  %v112_v0 = vld [vmem:[%s3700_s1 + $0x1f8] sm:$0xff] }
  0x16   :  { %451 = vmatpush1.msra.mxu1 %v125_v39  ;;  %381 = vmatprep.subr.mxu0 %v60_v40  ;;  %v114_v61 = vld [vmem:[%s3700_s1 + $0x208] sm:$0xff]  ;;  %v113_v63 = vld [vmem:[%s3700_s1 + $0x200] sm:$0xff]  ;;  %v176_v1 = vld [vmem:[%s3700_s1 + $0x3f8] sm:$0xff] }
  0x17   :  { %452 = vmatprep.subr.mxu1 %v124_v41  ;;  %382 = vmatpush1.msra.mxu0 %v59_v42  ;;  %v111_v2 = vld [vmem:[%s3700_s1 + $0x1f0] sm:$0xff]  ;;  %v110_v4 = vld [vmem:[%s3700_s1 + $0x1e8] sm:$0xff]  ;;  %v109_v6 = vld [vmem:[%s3700_s1 + $0x1e0] sm:$0xff]  ;;  %v2186_v41 = vshrl.u32 %v307_v30, 7  ;;  %v322_v42 = vunpack.c.0.s8 %v321_v32 }
  0x18   :  { %453 = vmatpush1.msra.mxu1 %v123_v43  ;;  %383 = vmatprep.subr.mxu0 %v58_v44  ;;  %v175_v3 = vld [vmem:[%s3700_s1 + $0x3f0] sm:$0xff]  ;;  %v174_v5 = vld [vmem:[%s3700_s1 + $0x3e8] sm:$0xff]  ;;  %v173_v7 = vld [vmem:[%s3700_s1 + $0x3e0] sm:$0xff] }
  0x19   :  { %454 = vmatprep.subr.mxu1 %v122_v45  ;;  %384 = vmatpush1.msra.mxu0 %v57_v46  ;;  %v108_v8 = vld [vmem:[%s3700_s1 + $0x1d8] sm:$0xff]  ;;  %v107_v10 = vld [vmem:[%s3700_s1 + $0x1d0] sm:$0xff]  ;;  %v106_v12 = vld [vmem:[%s3700_s1 + $0x1c8] sm:$0xff] }
  0x1a   :  { %455 = vmatpush1.msra.mxu1 %v121_v47  ;;  %385 = vmatprep.subr.mxu0 %v56_v48  ;;  %v172_v9 = vld [vmem:[%s3700_s1 + $0x3d8] sm:$0xff]  ;;  %v171_v11 = vld [vmem:[%s3700_s1 + $0x3d0] sm:$0xff]  ;;  %v170_v13 = vld [vmem:[%s3700_s1 + $0x3c8] sm:$0xff] }
  0x1b   :  { %456 = vmatprep.subr.mxu1 %v120_v49  ;;  %386 = vmatpush1.msra.mxu0 %v55_v50  ;;  %v105_v14 = vld [vmem:[%s3700_s1 + $0x1c0] sm:$0xff]  ;;  %v104_v16 = vld [vmem:[%s3700_s1 + $0x1b8] sm:$0xff]  ;;  %v103_v18 = vld [vmem:[%s3700_s1 + $0x1b0] sm:$0xff] }
  0x1c   :  { %457 = vmatpush1.msra.mxu1 %v119_v51  ;;  %387 = vmatprep.subr.mxu0 %v54_v52  ;;  %v169_v15 = vld [vmem:[%s3700_s1 + $0x3c0] sm:$0xff]  ;;  %v168_v17 = vld [vmem:[%s3700_s1 + $0x3b8] sm:$0xff]  ;;  %v167_v19 = vld [vmem:[%s3700_s1 + $0x3b0] sm:$0xff]  ;;  %v2216_v52 = vsub.s32 %v322_v42, %v2186_v41 }
  0x1d   :  { %458 = vmatprep.subr.mxu1 %v118_v53  ;;  %388 = vmatpush1.msra.mxu0 %v53_v54  ;;  %v102_v20 = vld [vmem:[%s3700_s1 + $0x1a8] sm:$0xff]  ;;  %v101_v22 = vld [vmem:[%s3700_s1 + $0x1a0] sm:$0xff]  ;;  %v100_v24 = vld [vmem:[%s3700_s1 + $0x198] sm:$0xff] }
  0x1e   :  { %459 = vmatpush1.msra.mxu1 %v117_v55  ;;  %389 = vmatprep.subr.mxu0 %v52_v56  ;;  %v166_v21 = vld [vmem:[%s3700_s1 + $0x3a8] sm:$0xff]  ;;  %v165_v23 = vld [vmem:[%s3700_s1 + $0x3a0] sm:$0xff]  ;;  %v164_v25 = vld [vmem:[%s3700_s1 + $0x398] sm:$0xff] }
  0x1f   :  { %460 = vmatprep.subr.mxu1 %v116_v57  ;;  %390 = vmatpush1.msra.mxu0 %v51_v58  ;;  %v99_v26 = vld [vmem:[%s3700_s1 + $0x190] sm:$0xff]  ;;  %v98_v28 = vld [vmem:[%s3700_s1 + $0x188] sm:$0xff]  ;;  %v97_v33 = vld [vmem:[%s3700_s1 + $0x180] sm:$0xff] }
  0x20   :  { %461 = vmatpush1.msra.mxu1 %v115_v59  ;;  %391 = vmatprep.subr.mxu0 %v50_v60  ;;  %v163_v27 = vld [vmem:[%s3700_s1 + $0x390] sm:$0xff]  ;;  %v162_v29 = vld [vmem:[%s3700_s1 + $0x388] sm:$0xff]  ;;  %v161_v34 = vld [vmem:[%s3700_s1 + $0x380] sm:$0xff] }
  0x21   :  { %462 = vmatprep.subr.mxu1 %v114_v61  ;;  %392 = vmatpush1.msra.mxu0 %v49_v62  ;;  %v96_v35 = vld [vmem:[%s3700_s1 + $0x178] sm:$0xff]  ;;  %v95_v37 = vld [vmem:[%s3700_s1 + $0x170] sm:$0xff]  ;;  %v94_v39 = vld [vmem:[%s3700_s1 + $0x168] sm:$0xff] }
  0x22   :  { %463 = vmatpush1.msra.mxu1 %v113_v63  ;;  %393 = vmatprep.subr.mxu0 %v112_v0  ;;  %v160_v36 = vld [vmem:[%s3700_s1 + $0x378] sm:$0xff]  ;;  %v159_v38 = vld [vmem:[%s3700_s1 + $0x370] sm:$0xff]  ;;  %v158_v40 = vld [vmem:[%s3700_s1 + $0x368] sm:$0xff] }
  0x23   :  { %464 = vmatprep.subr.mxu1 %v176_v1  ;;  %394 = vmatpush2.msra.mxu0 %v111_v2  ;;  %v93_v43 = vld [vmem:[%s3700_s1 + $0x160] sm:$0xff]  ;;  %v92_v45 = vld [vmem:[%s3700_s1 + $0x158] sm:$0xff]  ;;  %v91_v47 = vld [vmem:[%s3700_s1 + $0x150] sm:$0xff] }
  0x24   :  { %465 = vmatpush2.msra.mxu1 %v175_v3  ;;  %395 = vmatprep.subr.mxu0 %v110_v4  ;;  %v157_v44 = vld [vmem:[%s3700_s1 + $0x360] sm:$0xff]  ;;  %v156_v46 = vld [vmem:[%s3700_s1 + $0x358] sm:$0xff]  ;;  %v155_v48 = vld [vmem:[%s3700_s1 + $0x350] sm:$0xff] }
  0x25   :  { %466 = vmatprep.subr.mxu1 %v174_v5  ;;  %396 = vmatpush2.msra.mxu0 %v109_v6  ;;  %v47_v49 = vld [vmem:[%s3699_s0] sm:$0xff]  ;;  %v90_v50 = vld [vmem:[%s3700_s1 + $0x148] sm:$0xff]  ;;  %v88_v55 = vld [vmem:[%s3700_s1 + $0x138] sm:$0xff] }
  0x26   :  { %467 = vmatpush2.msra.mxu1 %v173_v7  ;;  %397 = vmatprep.subr.mxu0 %v108_v8  ;;  %v154_v51 = vld [vmem:[%s3700_s1 + $0x348] sm:$0xff]  ;;  %v89_v53 = vld [vmem:[%s3700_s1 + $0x140] sm:$0xff]  ;;  %v152_v56 = vld [vmem:[%s3700_s1 + $0x338] sm:$0xff]  ;;  %v319_v57 = vcombine.high %v47_v49, %v47_v49  ;;  %v326_v62 = vrot.slane %v47_v49, %v2216_v52 }
  0x27   :  { %468 = vmatprep.subr.mxu1 %v172_v9  ;;  %398 = vmatpush2.msra.mxu0 %v107_v10  ;;  %v153_v54 = vld [vmem:[%s3700_s1 + $0x340] sm:$0xff]  ;;  %v87_v58 = vld [vmem:[%s3700_s1 + $0x130] sm:$0xff]  ;;  %v86_v60 = vld [vmem:[%s3700_s1 + $0x128] sm:$0xff] }
  0x28   :  { %469 = vmatpush2.msra.mxu1 %v171_v11  ;;  %399 = vmatprep.subr.mxu0 %v106_v12  ;;  %v151_v59 = vld [vmem:[%s3700_s1 + $0x330] sm:$0xff]  ;;  %v150_v61 = vld [vmem:[%s3700_s1 + $0x328] sm:$0xff]  ;;  %v85_v63 = vld [vmem:[%s3700_s1 + $0x120] sm:$0xff]  ;;  %v333_v3 = vrot.slane %v319_v57, %v2216_v52  ;;  %v334_v8 = vcombine.high %v326_v62, %v326_v62 }
  0x29   :  { %470 = vmatprep.subr.mxu1 %v170_v13  ;;  %400 = vmatpush2.msra.mxu0 %v105_v14  ;;  %v149_v0 = vld [vmem:[%s3700_s1 + $0x320] sm:$0xff]  ;;  %v84_v1 = vld [vmem:[%s3700_s1 + $0x118] sm:$0xff]  ;;  %v83_v4 = vld [vmem:[%s3700_s1 + $0x110] sm:$0xff] }
  0x2a   :  { %471 = vmatpush2.msra.mxu1 %v169_v15  ;;  %401 = vmatprep.subr.mxu0 %v104_v16  ;;  %v148_v2 = vld [vmem:[%s3700_s1 + $0x318] sm:$0xff]  ;;  %v147_v5 = vld [vmem:[%s3700_s1 + $0x310] sm:$0xff]  ;;  %v82_v6 = vld [vmem:[%s3700_s1 + $0x108] sm:$0xff]  ;;  %v335_v11 = vcombine.high %v333_v3, %v333_v3 }
  0x2b   :  { %472 = vmatprep.subr.mxu1 %v168_v17  ;;  %402 = vmatpush2.msra.mxu0 %v103_v18  ;;  %v146_v7 = vld [vmem:[%s3700_s1 + $0x308] sm:$0xff]  ;;  %v81_v9 = vld [vmem:[%s3700_s1 + $0x100] sm:$0xff]  ;;  %v208_v12 = vld [vmem:[%s3700_s1 + $0x4f8] sm:$0xff] }
  0x2c   :  { %473 = vmatpush2.msra.mxu1 %v167_v19  ;;  %403 = vmatprep.subr.mxu0 %v102_v20  ;;  %v145_v10 = vld [vmem:[%s3700_s1 + $0x300] sm:$0xff]  ;;  %v272_v13 = vld [vmem:[%s3700_s1 + $0x6f8] sm:$0xff]  ;;  %v207_v14 = vld [vmem:[%s3700_s1 + $0x4f0] sm:$0xff] }
  0x2d   :  { %474 = vmatprep.subr.mxu1 %v166_v21  ;;  %404 = vmatpush2.msra.mxu0 %v101_v22  ;;  %v271_v15 = vld [vmem:[%s3700_s1 + $0x6f0] sm:$0xff]  ;;  %v206_v16 = vld [vmem:[%s3700_s1 + $0x4e8] sm:$0xff]  ;;  %v205_v18 = vld [vmem:[%s3700_s1 + $0x4e0] sm:$0xff] }
  0x2e   :  { %475 = vmatpush2.msra.mxu1 %v165_v23  ;;  %405 = vmatprep.subr.mxu0 %v100_v24  ;;  %v270_v17 = vld [vmem:[%s3700_s1 + $0x6e8] sm:$0xff]  ;;  %v269_v19 = vld [vmem:[%s3700_s1 + $0x6e0] sm:$0xff]  ;;  %v204_v20 = vld [vmem:[%s3700_s1 + $0x4d8] sm:$0xff] }
  0x2f   :  { %476 = vmatprep.subr.mxu1 %v164_v25  ;;  %406 = vmatpush2.msra.mxu0 %v99_v26  ;;  %v268_v21 = vld [vmem:[%s3700_s1 + $0x6d8] sm:$0xff]  ;;  %v203_v22 = vld [vmem:[%s3700_s1 + $0x4d0] sm:$0xff]  ;;  %v202_v24 = vld [vmem:[%s3700_s1 + $0x4c8] sm:$0xff] }
  0x30   :  { %477 = vmatpush2.msra.mxu1 %v163_v27  ;;  %407 = vmatprep.subr.mxu0 %v98_v28  ;;  %v267_v23 = vld [vmem:[%s3700_s1 + $0x6d0] sm:$0xff]  ;;  %v266_v25 = vld [vmem:[%s3700_s1 + $0x6c8] sm:$0xff]  ;;  %v201_v26 = vld [vmem:[%s3700_s1 + $0x4c0] sm:$0xff] }
  0x31   :  { %478 = vmatprep.subr.mxu1 %v162_v29  ;;  %408 = vmatpush2.msra.mxu0 %v97_v33  ;;  %v265_v27 = vld [vmem:[%s3700_s1 + $0x6c0] sm:$0xff]  ;;  %v200_v28 = vld [vmem:[%s3700_s1 + $0x4b8] sm:$0xff]  ;;  %v199_v30 = vld [vmem:[%s3700_s1 + $0x4b0] sm:$0xff] }
  0x32   :  { %479 = vmatpush2.msra.mxu1 %v161_v34  ;;  %409 = vmatprep.subr.mxu0 %v96_v35  ;;  %v264_v29 = vld [vmem:[%s3700_s1 + $0x6b8] sm:$0xff]  ;;  %v263_v31 = vld [vmem:[%s3700_s1 + $0x6b0] sm:$0xff]  ;;  %v198_v32 = vld [vmem:[%s3700_s1 + $0x4a8] sm:$0xff] }
  0x33   :  { %480 = vmatprep.subr.mxu1 %v160_v36  ;;  %410 = vmatpush2.msra.mxu0 %v95_v37  ;;  %v262_v33 = vld [vmem:[%s3700_s1 + $0x6a8] sm:$0xff]  ;;  %v197_v34 = vld [vmem:[%s3700_s1 + $0x4a0] sm:$0xff]  ;;  %v196_v36 = vld [vmem:[%s3700_s1 + $0x498] sm:$0xff] }
  0x34   :  { %481 = vmatpush2.msra.mxu1 %v159_v38  ;;  %411 = vmatprep.subr.mxu0 %v94_v39  ;;  %v261_v35 = vld [vmem:[%s3700_s1 + $0x6a0] sm:$0xff]  ;;  %v260_v37 = vld [vmem:[%s3700_s1 + $0x698] sm:$0xff]  ;;  %v195_v38 = vld [vmem:[%s3700_s1 + $0x490] sm:$0xff] }
  0x35   :  { %482 = vmatprep.subr.mxu1 %v158_v40  ;;  %412 = vmatpush2.msra.mxu0 %v93_v43  ;;  %v259_v39 = vld [vmem:[%s3700_s1 + $0x690] sm:$0xff]  ;;  %v194_v40 = vld [vmem:[%s3700_s1 + $0x488] sm:$0xff]  ;;  %v193_v43 = vld [vmem:[%s3700_s1 + $0x480] sm:$0xff] }
  0x36   :  { %483 = vmatpush2.msra.mxu1 %v157_v44  ;;  %413 = vmatprep.subr.mxu0 %v92_v45  ;;  %v258_v42 = vld [vmem:[%s3700_s1 + $0x688] sm:$0xff]  ;;  %v257_v44 = vld [vmem:[%s3700_s1 + $0x680] sm:$0xff]  ;;  %v192_v45 = vld [vmem:[%s3700_s1 + $0x478] sm:$0xff] }
  0x37   :  { %484 = vmatprep.subr.mxu1 %v156_v46  ;;  %414 = vmatpush2.msra.mxu0 %v91_v47  ;;  %v256_v46 = vld [vmem:[%s3700_s1 + $0x678] sm:$0xff]  ;;  %v191_v47 = vld [vmem:[%s3700_s1 + $0x470] sm:$0xff]  ;;  %v190_v49 = vld [vmem:[%s3700_s1 + $0x468] sm:$0xff] }
  0x38   :  { %485 = vmatpush2.msra.mxu1 %v155_v48  ;;  %415 = vmatprep.subr.mxu0 %v90_v50  ;;  %v255_v48 = vld [vmem:[%s3700_s1 + $0x670] sm:$0xff]  ;;  %v254_v50 = vld [vmem:[%s3700_s1 + $0x668] sm:$0xff] }
  0x39   :  { %486 = vmatprep.subr.mxu1 %v154_v51  ;;  %416 = vmatpush2.msra.mxu0 %v89_v53  ;;  %v189_v51 = vld [vmem:[%s3700_s1 + $0x460] sm:$0xff]  ;;  %v251_v57 = vld [vmem:[%s3700_s1 + $0x650] sm:$0xff] }
  0x3a   :  { %487 = vmatpush2.msra.mxu1 %v153_v54  ;;  %417 = vmatprep.subr.mxu0 %v88_v55  ;;  %v253_v53 = vld [vmem:[%s3700_s1 + $0x660] sm:$0xff]  ;;  %v188_v54 = vld [vmem:[%s3700_s1 + $0x458] sm:$0xff] }
  0x3b   :  { %488 = vmatprep.subr.mxu1 %v152_v56  ;;  %418 = vmatpush2.msra.mxu0 %v87_v58  ;;  %v252_v55 = vld [vmem:[%s3700_s1 + $0x658] sm:$0xff]  ;;  %v187_v56 = vld [vmem:[%s3700_s1 + $0x450] sm:$0xff]  ;;  %v186_v58 = vld [vmem:[%s3700_s1 + $0x448] sm:$0xff] }
  0x3c   :  { %489 = vmatpush2.msra.mxu1 %v151_v59  ;;  %419 = vmatprep.subr.mxu0 %v86_v60  ;;  %v250_v59 = vld [vmem:[%s3700_s1 + $0x648] sm:$0xff] }
  0x3d   :  { %490 = vmatprep.subr.mxu1 %v150_v61  ;;  %420 = vmatpush2.msra.mxu0 %v85_v63 }
  0x3e   :  { %491 = vmatpush2.msra.mxu1 %v149_v0  ;;  %421 = vmatprep.subr.mxu0 %v84_v1 }
  0x3f   :  { %492 = vmatprep.subr.mxu1 %v148_v2  ;;  %422 = vmatpush2.msra.mxu0 %v83_v4 }
  0x40   :  { %493 = vmatpush2.msra.mxu1 %v147_v5  ;;  %423 = vmatprep.subr.mxu0 %v82_v6 }
  0x41   :  { %494 = vmatprep.subr.mxu1 %v146_v7  ;;  %424 = vmatpush2.msra.mxu0 %v81_v9 }
  0x42   :  { %425 = vmatprep.mubr.f32.mxu0 %v334_v8  ;;  %495 = vmatpush2.msra.mxu1 %v145_v10 }
  0x43   :  { %426 = vmatmul.mubr.f32.vlgmr.msra.gmra.mxu0 %v326_v62  ;;  %496 = vmatprep.mubr.f32.mxu1 %v335_v11 }
  0x44   :  { %503 = vmatprep.subr.mxu0 %v208_v12  ;;  %574 = vmatprep.subr.mxu1 %v272_v13 }
  0x45   :  { %497 = vmatmul.mubr.f32.vlgmr.msra.gmra.mxu1 %v333_v3  ;;  %504 = vmatpush1.msra.mxu0 %v207_v14 }
  0x46   :  { %575 = vmatpush1.msra.mxu1 %v271_v15  ;;  %505 = vmatprep.subr.mxu0 %v206_v16 }
  0x47   :  { %576 = vmatprep.subr.mxu1 %v270_v17  ;;  %506 = vmatpush1.msra.mxu0 %v205_v18 }
  0x48   :  { %577 = vmatpush1.msra.mxu1 %v269_v19  ;;  %507 = vmatprep.subr.mxu0 %v204_v20 }
  0x49   :  { %578 = vmatprep.subr.mxu1 %v268_v21  ;;  %508 = vmatpush1.msra.mxu0 %v203_v22 }
  0x4a   :  { %579 = vmatpush1.msra.mxu1 %v267_v23  ;;  %509 = vmatprep.subr.mxu0 %v202_v24 }
  0x4b   :  { %580 = vmatprep.subr.mxu1 %v266_v25  ;;  %510 = vmatpush1.msra.mxu0 %v201_v26 }
  0x4c   :  { %581 = vmatpush1.msra.mxu1 %v265_v27  ;;  %511 = vmatprep.subr.mxu0 %v200_v28 }
  0x4d   :  { %582 = vmatprep.subr.mxu1 %v264_v29  ;;  %512 = vmatpush1.msra.mxu0 %v199_v30 }
  0x4e   :  { %583 = vmatpush1.msra.mxu1 %v263_v31  ;;  %513 = vmatprep.subr.mxu0 %v198_v32 }
  0x4f   :  { %584 = vmatprep.subr.mxu1 %v262_v33  ;;  %514 = vmatpush1.msra.mxu0 %v197_v34 }
  0x50   :  { %585 = vmatpush1.msra.mxu1 %v261_v35  ;;  %515 = vmatprep.subr.mxu0 %v196_v36 }
  0x51   :  { %586 = vmatprep.subr.mxu1 %v260_v37  ;;  %516 = vmatpush1.msra.mxu0 %v195_v38 }
  0x52   :  { %587 = vmatpush1.msra.mxu1 %v259_v39  ;;  %517 = vmatprep.subr.mxu0 %v194_v40 }
  0x53   :  { %588 = vmatprep.subr.mxu1 %v258_v42  ;;  %518 = vmatpush1.msra.mxu0 %v193_v43 }
  0x54   :  { %589 = vmatpush1.msra.mxu1 %v257_v44  ;;  %519 = vmatprep.subr.mxu0 %v192_v45 }
  0x55   :  { %590 = vmatprep.subr.mxu1 %v256_v46  ;;  %520 = vmatpush1.msra.mxu0 %v191_v47 }
  0x56   :  { %591 = vmatpush1.msra.mxu1 %v255_v48  ;;  %521 = vmatprep.subr.mxu0 %v190_v49 }
  0x57   :  { %592 = vmatprep.subr.mxu1 %v254_v50  ;;  %522 = vmatpush1.msra.mxu0 %v189_v51 }
  0x58   :  { %593 = vmatpush1.msra.mxu1 %v253_v53 }
  0x59   :  { %22 = vsyncpa [#allocation5], 0  ;;  %523 = vmatprep.subr.mxu0 %v188_v54  ;;  %594 = vmatprep.subr.mxu1 %v252_v55  ;;  %v185_v60 = vld [vmem:[%s3700_s1 + $0x440] sm:$0xff]  ;;  %v184_v62 = vld [vmem:[%s3700_s1 + $0x438] sm:$0xff]  ;;  %vm871_vm0 = vcmask 123904   ;;  %vm891_vm1 = vcmask 130048  }
  0x5a   :  { %v249_v61 = vld [vmem:[%s3700_s1 + $0x640] sm:$0xff]  ;;  %524 = vmatpush1.msra.mxu0 %v187_v56  ;;  %595 = vmatpush1.msra.mxu1 %v251_v57  ;;  %v248_v63 = vld [vmem:[%s3700_s1 + $0x638] sm:$0xff]  ;;  %v183_v0 = vld [vmem:[%s3700_s1 + $0x430] sm:$0xff]  ;;  %s1797_s18 = smov [#allocation4]  }
  0x5b   :  { %525 = vmatprep.subr.mxu0 %v186_v58  ;;  %596 = vmatprep.subr.mxu1 %v250_v59  ;;  %v247_v1 = vld [vmem:[%s3700_s1 + $0x630] sm:$0xff]  ;;  %v182_v2 = vld [vmem:[%s3700_s1 + $0x428] sm:$0xff]  ;;  %v181_v4 = vld [vmem:[%s3700_s1 + $0x420] sm:$0xff]  ;;  %s1620_s19 = sshll.u32 %s1797_s18, 4  ;;  %s1621_s19 = int_to_ptr.vmem [resolvable:$true] %s1620_s19 }
  0x5c   :  { %526 = vmatpush1.msra.mxu0 %v185_v60  ;;  %597 = vmatpush1.msra.mxu1 %v249_v61  ;;  %v246_v3 = vld [vmem:[%s3700_s1 + $0x628] sm:$0xff]  ;;  %v245_v5 = vld [vmem:[%s3700_s1 + $0x620] sm:$0xff]  ;;  %v180_v6 = vld [vmem:[%s3700_s1 + $0x418] sm:$0xff]  ;;  %s1731_s20 = scalar_lea.vmem %s1621_s19, 32  ;;  %p1736_p1 = scmp.lt.s32.totalorder %s1621_s19, %s1621_s19 }
  0x5d   :  { %527 = vmatprep.subr.mxu0 %v184_v62  ;;  %598 = vmatprep.subr.mxu1 %v248_v63  ;;  %v244_v7 = vld [vmem:[%s3700_s1 + $0x618] sm:$0xff]  ;;  %v179_v8 = vld [vmem:[%s3700_s1 + $0x410] sm:$0xff]  ;;  %v178_v10 = vld [vmem:[%s3700_s1 + $0x408] sm:$0xff]  ;;  %p1732_p0 = scmp.ne.s32.totalorder %s1621_s19, %s1731_s20  ;;  %p1737_p2 = scmp.lt.s32.totalorder %s1731_s20, %s1731_s20 }
  0x5e   :  { %528 = vmatpush1.msra.mxu0 %v183_v0  ;;  %599 = vmatpush1.msra.mxu1 %v247_v1  ;;  %v243_v9 = vld [vmem:[%s3700_s1 + $0x610] sm:$0xff]  ;;  %v242_v11 = vld [vmem:[%s3700_s1 + $0x608] sm:$0xff]  ;;  %v177_v12 = vld [vmem:[%s3700_s1 + $0x400] sm:$0xff] }
  0x5f   :  { %529 = vmatprep.subr.mxu0 %v182_v2  ;;  %600 = vmatprep.subr.mxu1 %v246_v3  ;;  %v241_v13 = vld [vmem:[%s3700_s1 + $0x600] sm:$0xff]  ;;  %v240_v14 = vld [vmem:[%s3700_s1 + $0x5f8] sm:$0xff]  ;;  %v239_v16 = vld [vmem:[%s3700_s1 + $0x5f0] sm:$0xff]  ;;  %p1738_p3 = por %p1737_p2, %p1736_p1 }
  0x60   :  { %530 = vmatpush1.msra.mxu0 %v181_v4  ;;  %601 = vmatpush1.msra.mxu1 %v245_v5  ;;  %v304_v15 = vld [vmem:[%s3700_s1 + $0x7f8] sm:$0xff]  ;;  %v303_v17 = vld [vmem:[%s3700_s1 + $0x7f0] sm:$0xff]  ;;  %v238_v18 = vld [vmem:[%s3700_s1 + $0x5e8] sm:$0xff] }
  0x61   :  { %531 = vmatprep.subr.mxu0 %v180_v6  ;;  %602 = vmatprep.subr.mxu1 %v244_v7  ;;  %v302_v19 = vld [vmem:[%s3700_s1 + $0x7e8] sm:$0xff]  ;;  %v237_v20 = vld [vmem:[%s3700_s1 + $0x5e0] sm:$0xff]  ;;  %v236_v22 = vld [vmem:[%s3700_s1 + $0x5d8] sm:$0xff]  ;;  %p1739_p4 = pnand %p1738_p3, %p1732_p0 }
  0x62   :  { %532 = vmatpush1.msra.mxu0 %v179_v8  ;;  %603 = vmatpush1.msra.mxu1 %v243_v9  ;;  %v301_v21 = vld [vmem:[%s3700_s1 + $0x7e0] sm:$0xff]  ;;  %v300_v23 = vld [vmem:[%s3700_s1 + $0x7d8] sm:$0xff]  ;;  %v235_v24 = vld [vmem:[%s3700_s1 + $0x5d0] sm:$0xff] }
  0x63   :  { %533 = vmatprep.subr.mxu0 %v178_v10  ;;  %604 = vmatprep.subr.mxu1 %v242_v11  ;;  %v299_v25 = vld [vmem:[%s3700_s1 + $0x7d0] sm:$0xff]  ;;  %v234_v26 = vld [vmem:[%s3700_s1 + $0x5c8] sm:$0xff]  ;;  %v233_v28 = vld [vmem:[%s3700_s1 + $0x5c0] sm:$0xff] }
  0x64   :  { %534 = vmatpush1.msra.mxu0 %v177_v12  ;;  %605 = vmatpush1.msra.mxu1 %v241_v13  ;;  %v298_v27 = vld [vmem:[%s3700_s1 + $0x7c8] sm:$0xff]  ;;  %v297_v29 = vld [vmem:[%s3700_s1 + $0x7c0] sm:$0xff]  ;;  %v232_v30 = vld [vmem:[%s3700_s1 + $0x5b8] sm:$0xff] }
  0x65   :  { %535 = vmatprep.subr.mxu0 %v240_v14  ;;  %606 = vmatprep.subr.mxu1 %v304_v15  ;;  %v296_v31 = vld [vmem:[%s3700_s1 + $0x7b8] sm:$0xff]  ;;  %v231_v32 = vld [vmem:[%s3700_s1 + $0x5b0] sm:$0xff]  ;;  %v230_v34 = vld [vmem:[%s3700_s1 + $0x5a8] sm:$0xff] }
  0x66   :  { %536 = vmatpush2.msra.mxu0 %v239_v16  ;;  %607 = vmatpush2.msra.mxu1 %v303_v17  ;;  %v295_v33 = vld [vmem:[%s3700_s1 + $0x7b0] sm:$0xff]  ;;  %v294_v35 = vld [vmem:[%s3700_s1 + $0x7a8] sm:$0xff]  ;;  %v229_v36 = vld [vmem:[%s3700_s1 + $0x5a0] sm:$0xff] }
  0x67   :  { %537 = vmatprep.subr.mxu0 %v238_v18  ;;  %608 = vmatprep.subr.mxu1 %v302_v19  ;;  %v293_v37 = vld [vmem:[%s3700_s1 + $0x7a0] sm:$0xff]  ;;  %v228_v38 = vld [vmem:[%s3700_s1 + $0x598] sm:$0xff]  ;;  %v227_v40 = vld [vmem:[%s3700_s1 + $0x590] sm:$0xff] }
  0x68   :  { %538 = vmatpush2.msra.mxu0 %v237_v20  ;;  %609 = vmatpush2.msra.mxu1 %v301_v21  ;;  %v292_v39 = vld [vmem:[%s3700_s1 + $0x798] sm:$0xff]  ;;  %v291_v42 = vld [vmem:[%s3700_s1 + $0x790] sm:$0xff]  ;;  %v226_v43 = vld [vmem:[%s3700_s1 + $0x588] sm:$0xff] }
  0x69   :  { %539 = vmatprep.subr.mxu0 %v236_v22  ;;  %610 = vmatprep.subr.mxu1 %v300_v23  ;;  %v290_v44 = vld [vmem:[%s3700_s1 + $0x788] sm:$0xff]  ;;  %v225_v45 = vld [vmem:[%s3700_s1 + $0x580] sm:$0xff]  ;;  %v224_v47 = vld [vmem:[%s3700_s1 + $0x578] sm:$0xff] }
  0x6a   :  { %540 = vmatpush2.msra.mxu0 %v235_v24  ;;  %611 = vmatpush2.msra.mxu1 %v299_v25  ;;  %v289_v46 = vld [vmem:[%s3700_s1 + $0x780] sm:$0xff]  ;;  %v288_v48 = vld [vmem:[%s3700_s1 + $0x778] sm:$0xff]  ;;  %v223_v49 = vld [vmem:[%s3700_s1 + $0x570] sm:$0xff] }
  0x6b   :  { %541 = vmatprep.subr.mxu0 %v234_v26  ;;  %612 = vmatprep.subr.mxu1 %v298_v27  ;;  %v287_v50 = vld [vmem:[%s3700_s1 + $0x770] sm:$0xff]  ;;  %v222_v51 = vld [vmem:[%s3700_s1 + $0x568] sm:$0xff]  ;;  %v221_v54 = vld [vmem:[%s3700_s1 + $0x560] sm:$0xff] }
  0x6c   :  { %542 = vmatpush2.msra.mxu0 %v233_v28  ;;  %613 = vmatpush2.msra.mxu1 %v297_v29  ;;  %v286_v53 = vld [vmem:[%s3700_s1 + $0x768] sm:$0xff]  ;;  %v285_v55 = vld [vmem:[%s3700_s1 + $0x760] sm:$0xff]  ;;  %v220_v56 = vld [vmem:[%s3700_s1 + $0x558] sm:$0xff] }
  0x6d   :  { %543 = vmatprep.subr.mxu0 %v232_v30  ;;  %614 = vmatprep.subr.mxu1 %v296_v31  ;;  %v284_v57 = vld [vmem:[%s3700_s1 + $0x758] sm:$0xff]  ;;  %v48_v58 = vld [vmem:[%s3699_s0 + $0x8] sm:$0xff]  ;;  %v219_v59 = vld [vmem:[%s3700_s1 + $0x550] sm:$0xff] }
  0x6e   :  { %544 = vmatpush2.msra.mxu0 %v231_v32  ;;  %615 = vmatpush2.msra.mxu1 %v295_v33  ;;  %v283_v60 = vld [vmem:[%s3700_s1 + $0x750] sm:$0xff]  ;;  %v218_v61 = vld [vmem:[%s3700_s1 + $0x548] sm:$0xff]  ;;  %v217_v63 = vld [vmem:[%s3700_s1 + $0x540] sm:$0xff]  ;;  %v336_v1 = vcombine.high %v48_v58, %v48_v58  ;;  %v343_v8 = vrot.slane %v48_v58, %v2216_v52 }
  0x6f   :  { %545 = vmatprep.subr.mxu0 %v230_v34  ;;  %616 = vmatprep.subr.mxu1 %v294_v35  ;;  %v282_v62 = vld [vmem:[%s3700_s1 + $0x748] sm:$0xff]  ;;  %v281_v0 = vld [vmem:[%s3700_s1 + $0x740] sm:$0xff]  ;;  %v216_v2 = vld [vmem:[%s3700_s1 + $0x538] sm:$0xff] }
  0x70   :  { %546 = vmatpush2.msra.mxu0 %v229_v36  ;;  %617 = vmatpush2.msra.mxu1 %v293_v37  ;;  %v280_v3 = vld [vmem:[%s3700_s1 + $0x738] sm:$0xff]  ;;  %v215_v4 = vld [vmem:[%s3700_s1 + $0x530] sm:$0xff]  ;;  %v214_v6 = vld [vmem:[%s3700_s1 + $0x528] sm:$0xff]  ;;  %v350_v11 = vrot.slane %v336_v1, %v2216_v52  ;;  %v351_v18 = vcombine.high %v343_v8, %v343_v8 }
  0x71   :  { %547 = vmatprep.subr.mxu0 %v228_v38  ;;  %618 = vmatprep.subr.mxu1 %v292_v39  ;;  %v279_v5 = vld [vmem:[%s3700_s1 + $0x730] sm:$0xff]  ;;  %v278_v7 = vld [vmem:[%s3700_s1 + $0x728] sm:$0xff]  ;;  %v213_v9 = vld [vmem:[%s3700_s1 + $0x520] sm:$0xff] }
  0x72   :  { %548 = vmatpush2.msra.mxu0 %v227_v40  ;;  %619 = vmatpush2.msra.mxu1 %v291_v42  ;;  %v277_v10 = vld [vmem:[%s3700_s1 + $0x720] sm:$0xff]  ;;  %v212_v12 = vld [vmem:[%s3700_s1 + $0x518] sm:$0xff]  ;;  %v211_v14 = vld [vmem:[%s3700_s1 + $0x510] sm:$0xff]  ;;  %v352_v20 = vcombine.high %v350_v11, %v350_v11 }
  0x73   :  { %549 = vmatprep.subr.mxu0 %v226_v43  ;;  %620 = vmatprep.subr.mxu1 %v290_v44  ;;  %v276_v13 = vld [vmem:[%s3700_s1 + $0x718] sm:$0xff]  ;;  %v275_v15 = vld [vmem:[%s3700_s1 + $0x710] sm:$0xff]  ;;  %v210_v16 = vld [vmem:[%s3700_s1 + $0x508] sm:$0xff] }
  0x74   :  { %550 = vmatpush2.msra.mxu0 %v225_v45  ;;  %621 = vmatpush2.msra.mxu1 %v289_v46  ;;  %v274_v17 = vld [vmem:[%s3700_s1 + $0x708] sm:$0xff]  ;;  %v209_v19 = vld [vmem:[%s3700_s1 + $0x500] sm:$0xff]  ;;  %v678_v22 = vld [vmem:[%s3702_s3 + $0xf8] sm:$0xff] }
  0x75   :  { %551 = vmatprep.subr.mxu0 %v224_v47  ;;  %622 = vmatprep.subr.mxu1 %v288_v48  ;;  %v273_v21 = vld [vmem:[%s3700_s1 + $0x700] sm:$0xff]  ;;  %v787_v23 = vld [vmem:[%s3703_s4 + $0xf8] sm:$0xff]  ;;  %v677_v26 = vld [vmem:[%s3702_s3 + $0xf0] sm:$0xff] }
  0x76   :  { %552 = vmatpush2.msra.mxu0 %v223_v49  ;;  %623 = vmatpush2.msra.mxu1 %v287_v50  ;;  %v662_v24 = vld [vmem:[%s3702_s3 + $0x78] sm:$0xff]  ;;  %v786_v27 = vld [vmem:[%s3703_s4 + $0xf0] sm:$0xff]  ;;  %v676_v30 = vld [vmem:[%s3702_s3 + $0xe8] sm:$0xff] }
  0x77   :  { %553 = vmatprep.subr.mxu0 %v222_v51  ;;  %624 = vmatprep.subr.mxu1 %v286_v53  ;;  %v771_v25 = vld [vmem:[%s3703_s4 + $0x78] sm:$0xff]  ;;  %v661_v28 = vld [vmem:[%s3702_s3 + $0x70] sm:$0xff]  ;;  %v785_v31 = vld [vmem:[%s3703_s4 + $0xe8] sm:$0xff] }
  0x78   :  { %554 = vmatpush2.msra.mxu0 %v221_v54  ;;  %625 = vmatpush2.msra.mxu1 %v285_v55  ;;  %v770_v29 = vld [vmem:[%s3703_s4 + $0x70] sm:$0xff]  ;;  %v660_v32 = vld [vmem:[%s3702_s3 + $0x68] sm:$0xff]  ;;  %v675_v34 = vld [vmem:[%s3702_s3 + $0xe0] sm:$0xff] }
  0x79   :  { %555 = vmatprep.subr.mxu0 %v220_v56  ;;  %626 = vmatprep.subr.mxu1 %v284_v57  ;;  %v769_v33 = vld [vmem:[%s3703_s4 + $0x68] sm:$0xff]  ;;  %v784_v35 = vld [vmem:[%s3703_s4 + $0xe0] sm:$0xff]  ;;  %v674_v38 = vld [vmem:[%s3702_s3 + $0xd8] sm:$0xff] }
  0x7a   :  { %556 = vmatpush2.msra.mxu0 %v219_v59  ;;  %627 = vmatpush2.msra.mxu1 %v283_v60  ;;  %v659_v36 = vld [vmem:[%s3702_s3 + $0x60] sm:$0xff]  ;;  %v783_v39 = vld [vmem:[%s3703_s4 + $0xd8] sm:$0xff]  ;;  %v673_v43 = vld [vmem:[%s3702_s3 + $0xd0] sm:$0xff] }
  0x7b   :  { %557 = vmatprep.subr.mxu0 %v218_v61  ;;  %628 = vmatprep.subr.mxu1 %v282_v62  ;;  %v768_v37 = vld [vmem:[%s3703_s4 + $0x60] sm:$0xff]  ;;  %v658_v40 = vld [vmem:[%s3702_s3 + $0x58] sm:$0xff]  ;;  %v782_v44 = vld [vmem:[%s3703_s4 + $0xd0] sm:$0xff] }
  0x7c   :  { %558 = vmatpush2.msra.mxu0 %v217_v63  ;;  %629 = vmatpush2.msra.mxu1 %v281_v0  ;;  %v767_v42 = vld [vmem:[%s3703_s4 + $0x58] sm:$0xff]  ;;  %v657_v45 = vld [vmem:[%s3702_s3 + $0x50] sm:$0xff]  ;;  %v672_v47 = vld [vmem:[%s3702_s3 + $0xc8] sm:$0xff] }
  0x7d   :  { %559 = vmatprep.subr.mxu0 %v216_v2  ;;  %630 = vmatprep.subr.mxu1 %v280_v3  ;;  %v766_v46 = vld [vmem:[%s3703_s4 + $0x50] sm:$0xff]  ;;  %v781_v48 = vld [vmem:[%s3703_s4 + $0xc8] sm:$0xff]  ;;  %v671_v51 = vld [vmem:[%s3702_s3 + $0xc0] sm:$0xff] }
  0x7e   :  { %560 = vmatpush2.msra.mxu0 %v215_v4  ;;  %631 = vmatpush2.msra.mxu1 %v279_v5  ;;  %v656_v49 = vld [vmem:[%s3702_s3 + $0x48] sm:$0xff]  ;;  %v780_v53 = vld [vmem:[%s3703_s4 + $0xc0] sm:$0xff]  ;;  %v670_v56 = vld [vmem:[%s3702_s3 + $0xb8] sm:$0xff] }
  0x7f   :  { %561 = vmatprep.subr.mxu0 %v214_v6  ;;  %632 = vmatprep.subr.mxu1 %v278_v7  ;;  %v765_v50 = vld [vmem:[%s3703_s4 + $0x48] sm:$0xff]  ;;  %v655_v54 = vld [vmem:[%s3702_s3 + $0x40] sm:$0xff]  ;;  %v779_v57 = vld [vmem:[%s3703_s4 + $0xb8] sm:$0xff] }
  0x80   :  { %562 = vmatpush2.msra.mxu0 %v213_v9  ;;  %633 = vmatpush2.msra.mxu1 %v277_v10  ;;  %v764_v55 = vld [vmem:[%s3703_s4 + $0x40] sm:$0xff]  ;;  %v654_v58 = vld [vmem:[%s3702_s3 + $0x38] sm:$0xff]  ;;  %v669_v60 = vld [vmem:[%s3702_s3 + $0xb0] sm:$0xff] }
  0x81   :  { %563 = vmatprep.subr.mxu0 %v212_v12  ;;  %634 = vmatprep.subr.mxu1 %v276_v13  ;;  %v763_v59 = vld [vmem:[%s3703_s4 + $0x38] sm:$0xff]  ;;  %v778_v61 = vld [vmem:[%s3703_s4 + $0xb0] sm:$0xff]  ;;  %v668_v0 = vld [vmem:[%s3702_s3 + $0xa8] sm:$0xff] }
  0x82   :  { %564 = vmatpush2.msra.mxu0 %v211_v14  ;;  %635 = vmatpush2.msra.mxu1 %v275_v15  ;;  %v653_v62 = vld [vmem:[%s3702_s3 + $0x30] sm:$0xff]  ;;  %v777_v1 = vld [vmem:[%s3703_s4 + $0xa8] sm:$0xff]  ;;  %v667_v4 = vld [vmem:[%s3702_s3 + $0xa0] sm:$0xff] }
  0x83   :  { %565 = vmatprep.subr.mxu0 %v210_v16  ;;  %636 = vmatprep.subr.mxu1 %v274_v17  ;;  %v762_v63 = vld [vmem:[%s3703_s4 + $0x30] sm:$0xff]  ;;  %v652_v2 = vld [vmem:[%s3702_s3 + $0x28] sm:$0xff]  ;;  %v776_v5 = vld [vmem:[%s3703_s4 + $0xa0] sm:$0xff] }
  0x84   :  { %566 = vmatpush2.msra.mxu0 %v209_v19  ;;  %567 = vmatprep.mubr.f32.mxu0 %v351_v18  ;;  %v761_v3 = vld [vmem:[%s3703_s4 + $0x28] sm:$0xff]  ;;  %v651_v6 = vld [vmem:[%s3702_s3 + $0x20] sm:$0xff]  ;;  %v775_v9 = vld [vmem:[%s3703_s4 + $0x98] sm:$0xff] }
  0x85   :  { %637 = vmatpush2.msra.mxu1 %v273_v21  ;;  %638 = vmatprep.mubr.f32.mxu1 %v352_v20  ;;  %v760_v7 = vld [vmem:[%s3703_s4 + $0x20] sm:$0xff]  ;;  %v650_v10 = vld [vmem:[%s3702_s3 + $0x18] sm:$0xff]  ;;  %v665_v12 = vld [vmem:[%s3702_s3 + $0x90] sm:$0xff] }
  0x86   :  { %568 = vmatmul.mubr.f32.vlgmr.msra.gmra.mxu0 %v343_v8  ;;  %639 = vmatmul.mubr.f32.vlgmr.msra.gmra.mxu1 %v350_v11  ;;  %v666_v8 = vld [vmem:[%s3702_s3 + $0x98] sm:$0xff]  ;;  %v774_v13 = vld [vmem:[%s3703_s4 + $0x90] sm:$0xff]  ;;  %v664_v16 = vld [vmem:[%s3702_s3 + $0x88] sm:$0xff] }
  0x87   :  { %1652 = vmatprep.subr.mxu0 %v678_v22  ;;  %1687 = vmatprep.subr.mxu1 %v787_v23  ;;  %v759_v11 = vld [vmem:[%s3703_s4 + $0x18] sm:$0xff]  ;;  %v649_v14 = vld [vmem:[%s3702_s3 + $0x10] sm:$0xff]  ;;  %v773_v17 = vld [vmem:[%s3703_s4 + $0x88] sm:$0xff] }
  0x88   :  { %1653 = vmatpush3.msra.mxu0 %v662_v24  ;;  %1688 = vmatpush3.msra.mxu1 %v771_v25  ;;  %v758_v15 = vld [vmem:[%s3703_s4 + $0x10] sm:$0xff]  ;;  %v648_v18 = vld [vmem:[%s3702_s3 + $0x8] sm:$0xff]  ;;  %v663_v20 = vld [vmem:[%s3702_s3 + $0x80] sm:$0xff]  ;;  %v2856_v24 = vsub.s32 0, %v2186_v41 }
  0x89   :  { %1654 = vmatprep.subr.mxu0 %v677_v26  ;;  %1689 = vmatprep.subr.mxu1 %v786_v27  ;;  %v757_v19 = vld [vmem:[%s3703_s4 + $0x8] sm:$0xff]  ;;  %v772_v21 = vld [vmem:[%s3703_s4 + $0x80] sm:$0xff]  ;;  %v2862_v26 = vsub.s32 1, %v2186_v41 }
  0x8a   :  { %1655 = vmatpush3.msra.mxu0 %v661_v28  ;;  %1690 = vmatpush3.msra.mxu1 %v770_v29  ;;  %v647_v22 = vld [vmem:[%s3702_s3] sm:$0xff] }
  0x8b   :  { %1656 = vmatprep.subr.mxu0 %v676_v30  ;;  %1691 = vmatprep.subr.mxu1 %v785_v31  ;;  %v756_v23 = vld [vmem:[%s3703_s4] sm:$0xff] }
  0x8c   :  { %1657 = vmatpush3.msra.mxu0 %v660_v32  ;;  %1692 = vmatpush3.msra.mxu1 %v769_v33  ;;  %v305_v25 = vld [vmem:[%s3701_s2] sm:$0x3] }
  0x8d   :  { %1658 = vmatprep.subr.mxu0 %v675_v34  ;;  %1693 = vmatprep.subr.mxu1 %v784_v35  ;;  %v310_v28 = vrot.slane %v305_v25, %v2856_v24  ;;  %v314_v29 = vrot.slane %v305_v25, %v2862_v26  ;;  %v1216_v25 = vld [vmem:[%s3709_s10 + $0x7c0] sm:$0xff] }
  0x8e   :  { %1659 = vmatpush3.msra.mxu0 %v659_v36  ;;  %1694 = vmatpush3.msra.mxu1 %v768_v37 }
  0x8f   :  { %1660 = vmatprep.subr.mxu0 %v674_v38  ;;  %1695 = vmatprep.subr.mxu1 %v783_v39 }
  0x90   :  { %1661 = vmatpush3.msra.mxu0 %v658_v40  ;;  %1696 = vmatpush3.msra.mxu1 %v767_v42 }
  0x91   :  { %1662 = vmatprep.subr.mxu0 %v673_v43  ;;  %1697 = vmatprep.subr.mxu1 %v782_v44 }
  0x92   :  { %1663 = vmatpush3.msra.mxu0 %v657_v45  ;;  %1698 = vmatpush3.msra.mxu1 %v766_v46 }
  0x93   :  { %1664 = vmatprep.subr.mxu0 %v672_v47  ;;  %1699 = vmatprep.subr.mxu1 %v781_v48  ;;  %v878_v48 = vld [vmem:[%s3707_s8 + $0x18] sm:$0xff] }
  0x94   :  { %1665 = vmatpush3.msra.mxu0 %v656_v49  ;;  %1700 = vmatpush3.msra.mxu1 %v765_v50  ;;  %v877_v49 = vld [vmem:[%s3707_s8 + $0x10] sm:$0xff]  ;;  %v876_v50 = vld [vmem:[%s3707_s8 + $0x8] sm:$0xff] }
  0x95   :  { %1666 = vmatprep.subr.mxu0 %v671_v51  ;;  %1701 = vmatprep.subr.mxu1 %v780_v53  ;;  %v875_v51 = vld [vmem:[%s3707_s8] sm:$0xff]  ;;  %v1796_v53 = vmov 0.0  }
  0x96   :  { %1667 = vmatpush3.msra.mxu0 %v655_v54  ;;  %1702 = vmatpush3.msra.mxu1 %v764_v55  ;;  %v1089_v54 = vld [vmem:[%s3709_s10 + $0x3c8] sm:$0xff]  ;;  %v1091_v55 = vld [vmem:[%s3709_s10 + $0x3d8] sm:$0xff] }
  0x97   :  { %1668 = vmatprep.subr.mxu0 %v670_v56  ;;  %1703 = vmatprep.subr.mxu1 %v779_v57  ;;  %v1088_v56 = vld [vmem:[%s3709_s10 + $0x3c0] sm:$0xff]  ;;  %v1081_v57 = vld [vmem:[%s3709_s10 + $0x388] sm:$0xff] }
  0x98   :  { %1669 = vmatpush3.msra.mxu0 %v654_v58  ;;  %1704 = vmatpush3.msra.mxu1 %v763_v59  ;;  %v1080_v58 = vld [vmem:[%s3709_s10 + $0x380] sm:$0xff]  ;;  %v1073_v59 = vld [vmem:[%s3709_s10 + $0x348] sm:$0xff] }
  0x99   :  { %1670 = vmatprep.subr.mxu0 %v669_v60  ;;  %1705 = vmatprep.subr.mxu1 %v778_v61  ;;  %v1072_v60 = vld [vmem:[%s3709_s10 + $0x340] sm:$0xff]  ;;  %v1065_v61 = vld [vmem:[%s3709_s10 + $0x308] sm:$0xff] }
  0x9a   :  { %1671 = vmatpush3.msra.mxu0 %v653_v62  ;;  %1706 = vmatpush3.msra.mxu1 %v762_v63  ;;  %v1064_v62 = vld [vmem:[%s3709_s10 + $0x300] sm:$0xff]  ;;  %v1057_v63 = vld [vmem:[%s3709_s10 + $0x2c8] sm:$0xff] }
  0x9b   :  { %1672 = vmatprep.subr.mxu0 %v668_v0  ;;  %1707 = vmatprep.subr.mxu1 %v777_v1  ;;  %v1056_v0 = vld [vmem:[%s3709_s10 + $0x2c0] sm:$0xff]  ;;  %v1049_v1 = vld [vmem:[%s3709_s10 + $0x288] sm:$0xff] }
  0x9c   :  { %1673 = vmatpush3.msra.mxu0 %v652_v2  ;;  %1708 = vmatpush3.msra.mxu1 %v761_v3  ;;  %v1048_v2 = vld [vmem:[%s3709_s10 + $0x280] sm:$0xff]  ;;  %v1041_v3 = vld [vmem:[%s3709_s10 + $0x248] sm:$0xff] }
  0x9d   :  { %1674 = vmatprep.subr.mxu0 %v667_v4  ;;  %1709 = vmatprep.subr.mxu1 %v776_v5  ;;  %v1040_v4 = vld [vmem:[%s3709_s10 + $0x240] sm:$0xff]  ;;  %v1033_v5 = vld [vmem:[%s3709_s10 + $0x208] sm:$0xff] }
  0x9e   :  { %1675 = vmatpush3.msra.mxu0 %v651_v6  ;;  %1710 = vmatpush3.msra.mxu1 %v760_v7  ;;  %v1032_v6 = vld [vmem:[%s3709_s10 + $0x200] sm:$0xff]  ;;  %v1025_v7 = vld [vmem:[%s3709_s10 + $0x1c8] sm:$0xff] }
  0x9f   :  { %1676 = vmatprep.subr.mxu0 %v666_v8  ;;  %1711 = vmatprep.subr.mxu1 %v775_v9  ;;  %v1024_v8 = vld [vmem:[%s3709_s10 + $0x1c0] sm:$0xff]  ;;  %v1017_v9 = vld [vmem:[%s3709_s10 + $0x188] sm:$0xff] }
  0xa0   :  { %1677 = vmatpush3.msra.mxu0 %v650_v10  ;;  %1712 = vmatpush3.msra.mxu1 %v759_v11  ;;  %v1016_v10 = vld [vmem:[%s3709_s10 + $0x180] sm:$0xff]  ;;  %v1009_v11 = vld [vmem:[%s3709_s10 + $0x148] sm:$0xff] }
  0xa1   :  { %1678 = vmatprep.subr.mxu0 %v665_v12  ;;  %1713 = vmatprep.subr.mxu1 %v774_v13  ;;  %v1008_v12 = vld [vmem:[%s3709_s10 + $0x140] sm:$0xff]  ;;  %v1001_v13 = vld [vmem:[%s3709_s10 + $0x108] sm:$0xff] }
  0xa2   :  { %1679 = vmatpush3.msra.mxu0 %v649_v14  ;;  %1714 = vmatpush3.msra.mxu1 %v758_v15  ;;  %v1000_v14 = vld [vmem:[%s3709_s10 + $0x100] sm:$0xff]  ;;  %v993_v15 = vld [vmem:[%s3709_s10 + $0xc8] sm:$0xff] }
  0xa3   :  { %1680 = vmatprep.subr.mxu0 %v664_v16  ;;  %1715 = vmatprep.subr.mxu1 %v773_v17  ;;  %v992_v16 = vld [vmem:[%s3709_s10 + $0xc0] sm:$0xff]  ;;  %v985_v17 = vld [vmem:[%s3709_s10 + $0x88] sm:$0xff] }
  0xa4   :  { %1681 = vmatpush3.msra.mxu0 %v648_v18  ;;  %1716 = vmatpush3.msra.mxu1 %v757_v19  ;;  %v984_v18 = vld [vmem:[%s3709_s10 + $0x80] sm:$0xff]  ;;  %v977_v19 = vld [vmem:[%s3709_s10 + $0x48] sm:$0xff] }
  0xa5   :  { %1682 = vmatprep.subr.mxu0 %v663_v20  ;;  %1717 = vmatprep.subr.mxu1 %v772_v21  ;;  %v976_v20 = vld [vmem:[%s3709_s10 + $0x40] sm:$0xff]  ;;  %v969_v21 = vld [vmem:[%s3709_s10 + $0x8] sm:$0xff] }
  0xa6   :  { %1683 = vmatpush3.msra.mxu0 %v647_v22  ;;  %1718 = vmatpush3.msra.mxu1 %v756_v23  ;;  %v968_v22 = vld [vmem:[%s3709_s10] sm:$0xff]  ;;  %v1217_v23 = vld [vmem:[%s3709_s10 + $0x7c8] sm:$0xff] }
  0xa7   :  { %923 = vmatprep.subr.mxu0 %v878_v48  ;;  %1266 = vmatprep.subr.mxu1 %v1089_v54  ;;  %v1129_v48 = vld [vmem:[%s3709_s10 + $0x508] sm:$0xff]  ;;  %v1649_v54 = vld [vmem:[%s3704_s5] ss:$0 sm:$0xff] }
 0x103   :  { %v427_v27 = vpop.f32.mrf.mxu0 }
 0x104   :  { %v428_v32 = vadd.f32 %v427_v27, %v310_v28  ;;  %v1209_v27 = vld [vmem:[%s3709_s10 + $0x788] sm:$0xff]  ;;  %v1208_v28 = vld [vmem:[%s3709_s10 + $0x780] sm:$0xff] }
 0x105   :  { %v498_v30 = vpop.f32.mrf.mxu1  ;;  %v429_v31 = vpop.f32.mrf.mxu0 }
 0x106   :  { %v430_v33 = vadd.f32 %v429_v31, %v314_v29  ;;  %v499_v35 = vadd.f32 %v498_v30, %v428_v32  ;;  %v1201_v29 = vld [vmem:[%s3709_s10 + $0x748] sm:$0xff]  ;;  %v1200_v30 = vld [vmem:[%s3709_s10 + $0x740] sm:$0xff] }
 0x107   :  { %v500_v34 = vpop.f32.mrf.mxu1  ;;  %v1193_v31 = vld [vmem:[%s3709_s10 + $0x708] sm:$0xff]  ;;  %v1192_v32 = vld [vmem:[%s3709_s10 + $0x700] sm:$0xff] }
 0x108   :  { %v501_v38 = vadd.f32 %v500_v34, %v430_v33  ;;  %v1185_v33 = vld [vmem:[%s3709_s10 + $0x6c8] sm:$0xff]  ;;  %v1184_v34 = vld [vmem:[%s3709_s10 + $0x6c0] sm:$0xff] }
 0x146   :  { %v569_v36 = vpop.f32.mrf.mxu0  ;;  %v640_v37 = vpop.f32.mrf.mxu1 }
 0x147   :  { %v570_v39 = vadd.f32 %v569_v36, %v499_v35  ;;  %v1177_v35 = vld [vmem:[%s3709_s10 + $0x688] sm:$0xff]  ;;  %v1176_v36 = vld [vmem:[%s3709_s10 + $0x680] sm:$0xff] }
 0x148   :  { %v571_v40 = vpop.f32.mrf.mxu0  ;;  %v642_v44 = vpop.f32.mrf.mxu1 }
 0x149   :  { %v572_v42 = vadd.f32 %v571_v40, %v501_v38  ;;  %v641_v43 = vadd.f32 %v640_v37, %v570_v39  ;;  %v1169_v37 = vld [vmem:[%s3709_s10 + $0x648] sm:$0xff]  ;;  %v1168_v38 = vld [vmem:[%s3709_s10 + $0x640] sm:$0xff] }
 0x14a   :  { %v1161_v39 = vld [vmem:[%s3709_s10 + $0x608] sm:$0xff]  ;;  %v1160_v40 = vld [vmem:[%s3709_s10 + $0x600] sm:$0xff] }
 0x14b   :  { %v643_v45 = vadd.f32 %v642_v44, %v572_v42  ;;  %v645_v47 = vmax.f32 %v641_v43, 0.0  ;;  %v1153_v42 = vld [vmem:[%s3709_s10 + $0x5c8] sm:$0xff]  ;;  %v1152_v43 = vld [vmem:[%s3709_s10 + $0x5c0] sm:$0xff] }
 0x14c   :  { %v1145_v44 = vld [vmem:[%s3709_s10 + $0x588] sm:$0xff] }
 0x14d   :  { %v646_v46 = vmax.f32 %v643_v45, 0.0  ;;  %v1144_v45 = vld [vmem:[%s3709_s10 + $0x580] sm:$0xff] }
 0x14f   :  { %750 = vmatprep.mubr.f32.mxu0 %v646_v46  ;;  %859 = vmatprep.mubr.f32.mxu1 %v646_v46  ;;  %v1137_v46 = vld [vmem:[%s3709_s10 + $0x548] sm:$0xff] }
 0x150   :  { %751 = vmatmul.mubr.f32.vlgmr.msra.gmra.mxu0 %v645_v47  ;;  %860 = vmatmul.mubr.f32.vlgmr.msra.gmra.mxu1 %v645_v47  ;;  %v1136_v47 = vld [vmem:[%s3709_s10 + $0x540] sm:$0xff] }
 0x151   :  { %959 = vmatprep.mubr.f32.mxu0 %v1796_v53  ;;  %924 = vmatpush1.msra.mxu0 %v877_v49  ;;  %v1128_v49 = vld [vmem:[%s3709_s10 + $0x500] sm:$0xff] }
 0x152   :  { %925 = vmatprep.subr.mxu0 %v876_v50  ;;  %1267 = vmatpush1.msra.mxu1 %v1088_v56  ;;  %v1121_v50 = vld [vmem:[%s3709_s10 + $0x4c8] sm:$0xff]  ;;  %v1650_v56 = vld [vmem:[%s3705_s6] ss:$0 sm:$0xff] }
 0x153   :  { %926 = vmatpush1.msra.mxu0 %v875_v51  ;;  %1268 = vmatprep.subr.mxu1 %v1081_v57 }
 0x154   :  { %1337 = vmatprep.subr.mxu0 %v1091_v55  ;;  %1269 = vmatpush1.msra.mxu1 %v1080_v58 }
 0x155   :  { %1270 = vmatprep.subr.mxu1 %v1073_v59 }
 0x156   :  { %1271 = vmatpush1.msra.mxu1 %v1072_v60 }
 0x157   :  { %1272 = vmatprep.subr.mxu1 %v1065_v61 }
 0x158   :  { %1273 = vmatpush1.msra.mxu1 %v1064_v62 }
 0x159   :  { %1274 = vmatprep.subr.mxu1 %v1057_v63 }
 0x15a   :  { %1275 = vmatpush1.msra.mxu1 %v1056_v0  ;;  %v865_v0 = vld [vmem:[%s3706_s7] sm:$0x3] }
 0x15b   :  { %1276 = vmatprep.subr.mxu1 %v1049_v1 }
 0x15c   :  { %1277 = vmatpush1.msra.mxu1 %v1048_v2 }
 0x15d   :  { %1278 = vmatprep.subr.mxu1 %v1041_v3 }
 0x15e   :  { %1279 = vmatpush1.msra.mxu1 %v1040_v4  ;;  %v1090_v4 = vld [vmem:[%s3709_s10 + $0x3d0] sm:$0xff] }
 0x15f   :  { %1280 = vmatprep.subr.mxu1 %v1033_v5  ;;  %v1083_v5 = vld [vmem:[%s3709_s10 + $0x398] sm:$0xff] }
 0x160   :  { %1281 = vmatpush1.msra.mxu1 %v1032_v6  ;;  %v1082_v6 = vld [vmem:[%s3709_s10 + $0x390] sm:$0xff] }
 0x161   :  { %1282 = vmatprep.subr.mxu1 %v1025_v7  ;;  %v1075_v7 = vld [vmem:[%s3709_s10 + $0x358] sm:$0xff] }
 0x162   :  { %1283 = vmatpush1.msra.mxu1 %v1024_v8  ;;  %v1074_v8 = vld [vmem:[%s3709_s10 + $0x350] sm:$0xff] }
 0x163   :  { %1284 = vmatprep.subr.mxu1 %v1017_v9  ;;  %v1067_v9 = vld [vmem:[%s3709_s10 + $0x318] sm:$0xff] }
 0x164   :  { %1285 = vmatpush1.msra.mxu1 %v1016_v10  ;;  %v1066_v10 = vld [vmem:[%s3709_s10 + $0x310] sm:$0xff] }
 0x165   :  { %1286 = vmatprep.subr.mxu1 %v1009_v11  ;;  %v1059_v11 = vld [vmem:[%s3709_s10 + $0x2d8] sm:$0xff] }
 0x166   :  { %1287 = vmatpush1.msra.mxu1 %v1008_v12  ;;  %v1058_v12 = vld [vmem:[%s3709_s10 + $0x2d0] sm:$0xff] }
 0x167   :  { %1288 = vmatprep.subr.mxu1 %v1001_v13  ;;  %v1051_v13 = vld [vmem:[%s3709_s10 + $0x298] sm:$0xff] }
 0x168   :  { %1289 = vmatpush1.msra.mxu1 %v1000_v14  ;;  %v1050_v14 = vld [vmem:[%s3709_s10 + $0x290] sm:$0xff] }
 0x169   :  { %1290 = vmatprep.subr.mxu1 %v993_v15  ;;  %v1043_v15 = vld [vmem:[%s3709_s10 + $0x258] sm:$0xff] }
 0x16a   :  { %1291 = vmatpush1.msra.mxu1 %v992_v16  ;;  %v1042_v16 = vld [vmem:[%s3709_s10 + $0x250] sm:$0xff] }
 0x16b   :  { %1292 = vmatprep.subr.mxu1 %v985_v17  ;;  %v1035_v17 = vld [vmem:[%s3709_s10 + $0x218] sm:$0xff] }
 0x16c   :  { %1293 = vmatpush1.msra.mxu1 %v984_v18  ;;  %v1034_v18 = vld [vmem:[%s3709_s10 + $0x210] sm:$0xff] }
 0x16d   :  { %1294 = vmatprep.subr.mxu1 %v977_v19  ;;  %v1027_v19 = vld [vmem:[%s3709_s10 + $0x1d8] sm:$0xff] }
 0x16e   :  { %1295 = vmatpush1.msra.mxu1 %v976_v20  ;;  %v1026_v20 = vld [vmem:[%s3709_s10 + $0x1d0] sm:$0xff] }
 0x16f   :  { %1296 = vmatprep.subr.mxu1 %v969_v21  ;;  %v1019_v21 = vld [vmem:[%s3709_s10 + $0x198] sm:$0xff] }
 0x170   :  { %1297 = vmatpush1.msra.mxu1 %v968_v22  ;;  %v1018_v22 = vld [vmem:[%s3709_s10 + $0x190] sm:$0xff] }
 0x171   :  { %1298 = vmatprep.subr.mxu1 %v1217_v23  ;;  %v1011_v23 = vld [vmem:[%s3709_s10 + $0x158] sm:$0xff] }
 0x172   :  { %1299 = vmatpush2.msra.mxu1 %v1216_v25  ;;  %v1010_v25 = vld [vmem:[%s3709_s10 + $0x150] sm:$0xff] }
 0x173   :  { %1300 = vmatprep.subr.mxu1 %v1209_v27  ;;  %v1003_v27 = vld [vmem:[%s3709_s10 + $0x118] sm:$0xff] }
 0x174   :  { %1301 = vmatpush2.msra.mxu1 %v1208_v28  ;;  %v1002_v28 = vld [vmem:[%s3709_s10 + $0x110] sm:$0xff] }
 0x175   :  { %1302 = vmatprep.subr.mxu1 %v1201_v29  ;;  %v995_v29 = vld [vmem:[%s3709_s10 + $0xd8] sm:$0xff] }
 0x176   :  { %1303 = vmatpush2.msra.mxu1 %v1200_v30  ;;  %v994_v30 = vld [vmem:[%s3709_s10 + $0xd0] sm:$0xff] }
 0x177   :  { %1304 = vmatprep.subr.mxu1 %v1193_v31  ;;  %v987_v31 = vld [vmem:[%s3709_s10 + $0x98] sm:$0xff] }
 0x178   :  { %1305 = vmatpush2.msra.mxu1 %v1192_v32  ;;  %v986_v32 = vld [vmem:[%s3709_s10 + $0x90] sm:$0xff] }
 0x179   :  { %1306 = vmatprep.subr.mxu1 %v1185_v33  ;;  %v979_v33 = vld [vmem:[%s3709_s10 + $0x58] sm:$0xff] }
 0x17a   :  { %1307 = vmatpush2.msra.mxu1 %v1184_v34  ;;  %v978_v34 = vld [vmem:[%s3709_s10 + $0x50] sm:$0xff] }
 0x17b   :  { %1308 = vmatprep.subr.mxu1 %v1177_v35  ;;  %v971_v35 = vld [vmem:[%s3709_s10 + $0x18] sm:$0xff] }
 0x17c   :  { %1309 = vmatpush2.msra.mxu1 %v1176_v36  ;;  %v970_v36 = vld [vmem:[%s3709_s10 + $0x10] sm:$0xff] }
 0x17d   :  { %1310 = vmatprep.subr.mxu1 %v1169_v37  ;;  %v1219_v37 = vld [vmem:[%s3709_s10 + $0x7d8] sm:$0xff] }
 0x17e   :  { %1311 = vmatpush2.msra.mxu1 %v1168_v38  ;;  %v1218_v38 = vld [vmem:[%s3709_s10 + $0x7d0] sm:$0xff] }
 0x17f   :  { %1312 = vmatprep.subr.mxu1 %v1161_v39  ;;  %v1211_v39 = vld [vmem:[%s3709_s10 + $0x798] sm:$0xff] }
 0x180   :  { %1313 = vmatpush2.msra.mxu1 %v1160_v40  ;;  %v1210_v40 = vld [vmem:[%s3709_s10 + $0x790] sm:$0xff] }
 0x181   :  { %1314 = vmatprep.subr.mxu1 %v1153_v42  ;;  %v1203_v42 = vld [vmem:[%s3709_s10 + $0x758] sm:$0xff] }
 0x182   :  { %1315 = vmatpush2.msra.mxu1 %v1152_v43  ;;  %v1202_v43 = vld [vmem:[%s3709_s10 + $0x750] sm:$0xff] }
 0x183   :  { %1316 = vmatprep.subr.mxu1 %v1145_v44  ;;  %v1195_v44 = vld [vmem:[%s3709_s10 + $0x718] sm:$0xff] }
 0x184   :  { %1317 = vmatpush2.msra.mxu1 %v1144_v45  ;;  %v1194_v45 = vld [vmem:[%s3709_s10 + $0x710] sm:$0xff] }
 0x185   :  { %1318 = vmatprep.subr.mxu1 %v1137_v46  ;;  %v1187_v46 = vld [vmem:[%s3709_s10 + $0x6d8] sm:$0xff] }
 0x186   :  { %1319 = vmatpush2.msra.mxu1 %v1136_v47  ;;  %v1186_v47 = vld [vmem:[%s3709_s10 + $0x6d0] sm:$0xff] }
 0x187   :  { %1320 = vmatprep.subr.mxu1 %v1129_v48  ;;  %v1179_v48 = vld [vmem:[%s3709_s10 + $0x698] sm:$0xff] }
 0x188   :  { %1321 = vmatpush2.msra.mxu1 %v1128_v49  ;;  %v1178_v49 = vld [vmem:[%s3709_s10 + $0x690] sm:$0xff] }
 0x189   :  { %1322 = vmatprep.subr.mxu1 %v1121_v50  ;;  %v1171_v50 = vld [vmem:[%s3709_s10 + $0x658] sm:$0xff] }
 0x210   :  { %v1684_v51 = vpop.f32.mrf.mxu0  ;;  %v1719_v53 = vpop.f32.mrf.mxu1 }
 0x212   :  { %v1685_v55 = vpop.f32.mrf.mxu0  ;;  %v1720_v57 = vpop.f32.mrf.mxu1 }
 0x213   :  { %v1686_v58 = vadd.f32 %v1685_v55, %v1684_v51  ;;  %v1721_v59 = vadd.f32 %v1720_v57, %v1719_v53  ;;  %v1170_v51 = vld [vmem:[%s3709_s10 + $0x650] sm:$0xff]  ;;  %v1163_v53 = vld [vmem:[%s3709_s10 + $0x618] sm:$0xff] }
 0x214   :  { %v1155_v55 = vld [vmem:[%s3709_s10 + $0x5d8] sm:$0xff] }
 0x215   :  { %v753_v60 = vadd.f32 %v1686_v58, %v1649_v54  ;;  %v862_v61 = vadd.f32 %v1721_v59, %v1650_v56  ;;  %v1162_v54 = vld [vmem:[%s3709_s10 + $0x610] sm:$0xff]  ;;  %v1147_v57 = vld [vmem:[%s3709_s10 + $0x598] sm:$0xff] }
 0x216   :  { %v1154_v56 = vld [vmem:[%s3709_s10 + $0x5d0] sm:$0xff]  ;;  %v1139_v59 = vld [vmem:[%s3709_s10 + $0x558] sm:$0xff] }
 0x217   :  { %v866_v62 = vmul.f32 0.5, %v862_v61  ;;  %873 = vst.msk [vmem:[#allocation4] sm:$0x3] %vm871_vm0, %v862_v61  ;;  %872 = vst.msk [vmem:[#allocation2] sm:$0x3] %vm871_vm0, %v753_v60  ;;  %v1146_v58 = vld [vmem:[%s3709_s10 + $0x590] sm:$0xff] }
 0x218   :  { %v1131_v61 = vld [vmem:[%s3709_s10 + $0x518] sm:$0xff] }
 0x219   :  { %v867_v63 = vmul.f32 1.442695, %v866_v62  ;;  %v1130_v62 = vld [vmem:[%s3709_s10 + $0x510] sm:$0xff] }
 0x21b   :  { %1729 = vpow2.f32 %v867_v63  ;;  %v1123_v63 = vld [vmem:[%s3709_s10 + $0x4d8] sm:$0xff] }
 0x228   :  { %v1730_v1 = vpop.eup %1729 }
 0x229   :  { %v869_v2 = vmul.f32 %v1730_v1, %v865_v0  ;;  %v1120_v0 = vld [vmem:[%s3709_s10 + $0x4c0] sm:$0xff]  ;;  %v1122_v1 = vld [vmem:[%s3709_s10 + $0x4d0] sm:$0xff] }
 0x22a   :  { %1323 = vmatpush2.msra.mxu1 %v1120_v0  ;;  %v1023_v0 = vld [vmem:[%s3709_s10 + $0x1b8] sm:$0xff] }
 0x22b   :  { %v870_v3 = vadd.f32 %v869_v2, %v753_v60  ;;  %v1138_v60 = vld [vmem:[%s3709_s10 + $0x550] sm:$0xff]  ;;  %v1113_v2 = vld [vmem:[%s3709_s10 + $0x488] sm:$0xff] }
 0x22c   :  { %1324 = vmatprep.subr.mxu1 %v1113_v2  ;;  %v1022_v2 = vld [vmem:[%s3709_s10 + $0x1b0] sm:$0xff] }
 0x22d   :  { %1651 = vmatmul.mubr.msk.f32.vlgmr.msra.gmra.mxu0 %vm891_vm1, %v870_v3  ;;  %874 = vst.msk [vmem:[#allocation6] sm:$0x3] %vm871_vm0, %v870_v3  ;;  %v1115_v3 = vld [vmem:[%s3709_s10 + $0x498] sm:$0xff] }
 0x22e   :  { %1338 = vmatpush1.msra.mxu0 %v1090_v4  ;;  %v1112_v4 = vld [vmem:[%s3709_s10 + $0x480] sm:$0xff] }
 0x22f   :  { %1339 = vmatprep.subr.mxu0 %v1083_v5  ;;  %v1114_v5 = vld [vmem:[%s3709_s10 + $0x490] sm:$0xff]  ;;  %1325 = vmatpush2.msra.mxu1 %v1112_v4  ;;  %v1015_v4 = vld [vmem:[%s3709_s10 + $0x178] sm:$0xff] }
 0x230   :  { %1340 = vmatpush1.msra.mxu0 %v1082_v6  ;;  %v1105_v6 = vld [vmem:[%s3709_s10 + $0x448] sm:$0xff] }
 0x231   :  { %1341 = vmatprep.subr.mxu0 %v1075_v7  ;;  %v1107_v7 = vld [vmem:[%s3709_s10 + $0x458] sm:$0xff]  ;;  %1326 = vmatprep.subr.mxu1 %v1105_v6  ;;  %v1014_v6 = vld [vmem:[%s3709_s10 + $0x170] sm:$0xff] }
 0x232   :  { %1342 = vmatpush1.msra.mxu0 %v1074_v8  ;;  %v1104_v8 = vld [vmem:[%s3709_s10 + $0x440] sm:$0xff] }
 0x233   :  { %1343 = vmatprep.subr.mxu0 %v1067_v9  ;;  %v1106_v9 = vld [vmem:[%s3709_s10 + $0x450] sm:$0xff]  ;;  %1327 = vmatpush2.msra.mxu1 %v1104_v8  ;;  %v1007_v8 = vld [vmem:[%s3709_s10 + $0x138] sm:$0xff] }
 0x234   :  { %1344 = vmatpush1.msra.mxu0 %v1066_v10  ;;  %v1097_v10 = vld [vmem:[%s3709_s10 + $0x408] sm:$0xff] }
 0x235   :  { %1345 = vmatprep.subr.mxu0 %v1059_v11  ;;  %v1099_v11 = vld [vmem:[%s3709_s10 + $0x418] sm:$0xff]  ;;  %1328 = vmatprep.subr.mxu1 %v1097_v10  ;;  %v1006_v10 = vld [vmem:[%s3709_s10 + $0x130] sm:$0xff] }
 0x236   :  { %1346 = vmatpush1.msra.mxu0 %v1058_v12  ;;  %v1096_v12 = vld [vmem:[%s3709_s10 + $0x400] sm:$0xff] }
 0x237   :  { %1347 = vmatprep.subr.mxu0 %v1051_v13  ;;  %v1098_v13 = vld [vmem:[%s3709_s10 + $0x410] sm:$0xff]  ;;  %1329 = vmatpush2.msra.mxu1 %v1096_v12  ;;  %v999_v12 = vld [vmem:[%s3709_s10 + $0xf8] sm:$0xff] }
 0x238   :  { %1348 = vmatpush1.msra.mxu0 %v1050_v14  ;;  %v1093_v14 = vld [vmem:[%s3709_s10 + $0x3e8] sm:$0xff] }
 0x239   :  { %1349 = vmatprep.subr.mxu0 %v1043_v15  ;;  %v1095_v15 = vld [vmem:[%s3709_s10 + $0x3f8] sm:$0xff]  ;;  %1408 = vmatprep.subr.mxu1 %v1093_v14  ;;  %v998_v14 = vld [vmem:[%s3709_s10 + $0xf0] sm:$0xff] }
 0x23a   :  { %1350 = vmatpush1.msra.mxu0 %v1042_v16  ;;  %v879_v16 = vld [vmem:[%s3708_s9] sm:$0x3]  ;;  %s1798_s9 = smov [#allocation2]  }
 0x23b   :  { %1351 = vmatprep.subr.mxu0 %v1035_v17  ;;  %v884_v17 = vrot.slane %v879_v16, %v2856_v24  ;;  %s1610_s7 = sshll.u32 %s1798_s9, 4  ;;  %s1611_s7 = int_to_ptr.vmem [resolvable:$true] %s1610_s7 }
 0x23c   :  { %1352 = vmatpush1.msra.mxu0 %v1034_v18  ;;  %v888_v18 = vrot.slane %v879_v16, %v2862_v26  ;;  %v991_v16 = vld [vmem:[%s3709_s10 + $0xb8] sm:$0xff] }
 0x23d   :  { %1353 = vmatprep.subr.mxu0 %v1027_v19 }
 0x23e   :  { %1354 = vmatpush1.msra.mxu0 %v1026_v20 }
 0x23f   :  { %1355 = vmatprep.subr.mxu0 %v1019_v21 }
 0x240   :  { %1356 = vmatpush1.msra.mxu0 %v1018_v22 }
 0x241   :  { %1357 = vmatprep.subr.mxu0 %v1011_v23 }
 0x242   :  { %1358 = vmatpush1.msra.mxu0 %v1010_v25 }
 0x243   :  { %1359 = vmatprep.subr.mxu0 %v1003_v27  ;;  %v1092_v27 = vld [vmem:[%s3709_s10 + $0x3e0] sm:$0xff] }
 0x244   :  { %1360 = vmatpush1.msra.mxu0 %v1002_v28  ;;  %v1094_v28 = vld [vmem:[%s3709_s10 + $0x3f0] sm:$0xff] }
 0x245   :  { %1361 = vmatprep.subr.mxu0 %v995_v29  ;;  %v1085_v29 = vld [vmem:[%s3709_s10 + $0x3a8] sm:$0xff] }
 0x246   :  { %1362 = vmatpush1.msra.mxu0 %v994_v30  ;;  %v1087_v30 = vld [vmem:[%s3709_s10 + $0x3b8] sm:$0xff] }
 0x247   :  { %1363 = vmatprep.subr.mxu0 %v987_v31  ;;  %v1084_v31 = vld [vmem:[%s3709_s10 + $0x3a0] sm:$0xff] }
 0x248   :  { %1364 = vmatpush1.msra.mxu0 %v986_v32  ;;  %v1086_v32 = vld [vmem:[%s3709_s10 + $0x3b0] sm:$0xff] }
 0x249   :  { %1365 = vmatprep.subr.mxu0 %v979_v33  ;;  %v1077_v33 = vld [vmem:[%s3709_s10 + $0x368] sm:$0xff] }
 0x24a   :  { %1366 = vmatpush1.msra.mxu0 %v978_v34  ;;  %v1079_v34 = vld [vmem:[%s3709_s10 + $0x378] sm:$0xff] }
 0x24b   :  { %1367 = vmatprep.subr.mxu0 %v971_v35  ;;  %v1076_v35 = vld [vmem:[%s3709_s10 + $0x360] sm:$0xff] }
 0x24c   :  { %1368 = vmatpush1.msra.mxu0 %v970_v36  ;;  %v1078_v36 = vld [vmem:[%s3709_s10 + $0x370] sm:$0xff] }
 0x24d   :  { %1369 = vmatprep.subr.mxu0 %v1219_v37  ;;  %v1069_v37 = vld [vmem:[%s3709_s10 + $0x328] sm:$0xff] }
 0x24e   :  { %1370 = vmatpush2.msra.mxu0 %v1218_v38  ;;  %v1071_v38 = vld [vmem:[%s3709_s10 + $0x338] sm:$0xff] }
 0x24f   :  { %1371 = vmatprep.subr.mxu0 %v1211_v39  ;;  %v1068_v39 = vld [vmem:[%s3709_s10 + $0x320] sm:$0xff] }
 0x250   :  { %1372 = vmatpush2.msra.mxu0 %v1210_v40  ;;  %v1070_v40 = vld [vmem:[%s3709_s10 + $0x330] sm:$0xff] }
 0x251   :  { %1373 = vmatprep.subr.mxu0 %v1203_v42  ;;  %v1061_v42 = vld [vmem:[%s3709_s10 + $0x2e8] sm:$0xff] }
 0x252   :  { %1374 = vmatpush2.msra.mxu0 %v1202_v43  ;;  %v1063_v43 = vld [vmem:[%s3709_s10 + $0x2f8] sm:$0xff] }
 0x253   :  { %1375 = vmatprep.subr.mxu0 %v1195_v44  ;;  %v1060_v44 = vld [vmem:[%s3709_s10 + $0x2e0] sm:$0xff] }
 0x254   :  { %1376 = vmatpush2.msra.mxu0 %v1194_v45  ;;  %v1062_v45 = vld [vmem:[%s3709_s10 + $0x2f0] sm:$0xff] }
 0x255   :  { %1377 = vmatprep.subr.mxu0 %v1187_v46  ;;  %v1053_v46 = vld [vmem:[%s3709_s10 + $0x2a8] sm:$0xff] }
 0x256   :  { %1378 = vmatpush2.msra.mxu0 %v1186_v47  ;;  %v1055_v47 = vld [vmem:[%s3709_s10 + $0x2b8] sm:$0xff] }
 0x257   :  { %1379 = vmatprep.subr.mxu0 %v1179_v48  ;;  %v1052_v48 = vld [vmem:[%s3709_s10 + $0x2a0] sm:$0xff] }
 0x258   :  { %1380 = vmatpush2.msra.mxu0 %v1178_v49  ;;  %v1054_v49 = vld [vmem:[%s3709_s10 + $0x2b0] sm:$0xff] }
 0x259   :  { %1381 = vmatprep.subr.mxu0 %v1171_v50  ;;  %v1045_v50 = vld [vmem:[%s3709_s10 + $0x268] sm:$0xff] }
 0x25a   :  { %1382 = vmatpush2.msra.mxu0 %v1170_v51  ;;  %v1047_v51 = vld [vmem:[%s3709_s10 + $0x278] sm:$0xff] }
 0x25b   :  { %1383 = vmatprep.subr.mxu0 %v1163_v53  ;;  %v1044_v53 = vld [vmem:[%s3709_s10 + $0x260] sm:$0xff] }
 0x25c   :  { %1384 = vmatpush2.msra.mxu0 %v1162_v54  ;;  %v1046_v54 = vld [vmem:[%s3709_s10 + $0x270] sm:$0xff] }
 0x25d   :  { %1385 = vmatprep.subr.mxu0 %v1155_v55  ;;  %v1037_v55 = vld [vmem:[%s3709_s10 + $0x228] sm:$0xff] }
 0x25e   :  { %1386 = vmatpush2.msra.mxu0 %v1154_v56  ;;  %v1039_v56 = vld [vmem:[%s3709_s10 + $0x238] sm:$0xff] }
 0x25f   :  { %1387 = vmatprep.subr.mxu0 %v1147_v57  ;;  %v1036_v57 = vld [vmem:[%s3709_s10 + $0x220] sm:$0xff] }
 0x260   :  { %1388 = vmatpush2.msra.mxu0 %v1146_v58  ;;  %v1038_v58 = vld [vmem:[%s3709_s10 + $0x230] sm:$0xff] }
 0x261   :  { %1389 = vmatprep.subr.mxu0 %v1139_v59  ;;  %v1029_v59 = vld [vmem:[%s3709_s10 + $0x1e8] sm:$0xff] }
 0x262   :  { %1390 = vmatpush2.msra.mxu0 %v1138_v60  ;;  %v1031_v60 = vld [vmem:[%s3709_s10 + $0x1f8] sm:$0xff] }
 0x263   :  { %1391 = vmatprep.subr.mxu0 %v1131_v61  ;;  %v1028_v61 = vld [vmem:[%s3709_s10 + $0x1e0] sm:$0xff] }
 0x264   :  { %1392 = vmatpush2.msra.mxu0 %v1130_v62  ;;  %v1030_v62 = vld [vmem:[%s3709_s10 + $0x1f0] sm:$0xff] }
 0x265   :  { %1393 = vmatprep.subr.mxu0 %v1123_v63  ;;  %v1021_v63 = vld [vmem:[%s3709_s10 + $0x1a8] sm:$0xff] }
 0x266   :  { %1394 = vmatpush2.msra.mxu0 %v1122_v1  ;;  %v1020_v1 = vld [vmem:[%s3709_s10 + $0x1a0] sm:$0xff] }
 0x267   :  { %1395 = vmatprep.subr.mxu0 %v1115_v3  ;;  %v1013_v3 = vld [vmem:[%s3709_s10 + $0x168] sm:$0xff] }
 0x268   :  { %1396 = vmatpush2.msra.mxu0 %v1114_v5  ;;  %v1012_v5 = vld [vmem:[%s3709_s10 + $0x160] sm:$0xff] }
 0x269   :  { %1397 = vmatprep.subr.mxu0 %v1107_v7  ;;  %v1005_v7 = vld [vmem:[%s3709_s10 + $0x128] sm:$0xff] }
 0x26a   :  { %1398 = vmatpush2.msra.mxu0 %v1106_v9  ;;  %v1004_v9 = vld [vmem:[%s3709_s10 + $0x120] sm:$0xff] }
 0x26b   :  { %1399 = vmatprep.subr.mxu0 %v1099_v11  ;;  %v997_v11 = vld [vmem:[%s3709_s10 + $0xe8] sm:$0xff] }
 0x26c   :  { %1400 = vmatpush2.msra.mxu0 %v1098_v13  ;;  %v996_v13 = vld [vmem:[%s3709_s10 + $0xe0] sm:$0xff] }
 0x26d   :  { %1479 = vmatprep.subr.mxu0 %v1095_v15  ;;  %v989_v15 = vld [vmem:[%s3709_s10 + $0xa8] sm:$0xff] }
 0x2ed   :  { %v961_v19 = vpop.f32.mrf.mxu0 }
 0x2ee   :  { %v962_v20 = vadd.f32 %v961_v19, %v884_v17  ;;  %v988_v17 = vld [vmem:[%s3709_s10 + $0xa0] sm:$0xff]  ;;  %v981_v19 = vld [vmem:[%s3709_s10 + $0x68] sm:$0xff] }
 0x2ef   :  { %v963_v21 = vpop.f32.mrf.mxu0 }
 0x2f0   :  { %v964_v22 = vadd.f32 %v963_v21, %v888_v18  ;;  %v3285_v25 = vmax.f32 %v962_v20, 0.0  ;;  %v990_v18 = vld [vmem:[%s3709_s10 + $0xb0] sm:$0xff]  ;;  %v983_v20 = vld [vmem:[%s3709_s10 + $0x78] sm:$0xff]  ;;  %v980_v21 = vld [vmem:[%s3709_s10 + $0x60] sm:$0xff] }
 0x2f2   :  { %v967_v23 = vmax.f32 %v964_v22, 0.0  ;;  %v982_v22 = vld [vmem:[%s3709_s10 + $0x70] sm:$0xff] }
 0x2f4   :  { %1330 = vmatprep.mubr.f32.mxu1 %v967_v23  ;;  %1401 = vmatprep.mubr.f32.mxu0 %v967_v23 }
 0x2f5   :  { %1331 = vmatmul.mubr.f32.vlgmr.msra.gmra.mxu1 %v3285_v25  ;;  %1402 = vmatmul.mubr.f32.vlgmr.msra.gmra.mxu0 %v3285_v25 }
 0x2f6   :  { %1409 = vmatpush1.msra.mxu1 %v1092_v27  ;;  %1480 = vmatpush1.msra.mxu0 %v1094_v28  ;;  %v975_v27 = vld [vmem:[%s3709_s10 + $0x38] sm:$0xff]  ;;  %v972_v28 = vld [vmem:[%s3709_s10 + $0x20] sm:$0xff] }
 0x2f7   :  { %1410 = vmatprep.subr.mxu1 %v1085_v29  ;;  %1472 = vmatprep.mubr.f32.mxu1 %v967_v23  ;;  %v974_v29 = vld [vmem:[%s3709_s10 + $0x30] sm:$0xff] }
 0x2f8   :  { %1481 = vmatprep.subr.mxu0 %v1087_v30  ;;  %1543 = vmatprep.mubr.f32.mxu0 %v967_v23  ;;  %v973_v23 = vld [vmem:[%s3709_s10 + $0x28] sm:$0xff] }
 0x2f9   :  { %1411 = vmatpush1.msra.mxu1 %v1084_v31  ;;  %1482 = vmatpush1.msra.mxu0 %v1086_v32  ;;  %v1221_v30 = vld [vmem:[%s3709_s10 + $0x7e8] sm:$0xff]  ;;  %v1223_v31 = vld [vmem:[%s3709_s10 + $0x7f8] sm:$0xff]  ;;  %v1220_v32 = vld [vmem:[%s3709_s10 + $0x7e0] sm:$0xff] }
 0x2fa   :  { %1412 = vmatprep.subr.mxu1 %v1077_v33  ;;  %1483 = vmatprep.subr.mxu0 %v1079_v34  ;;  %v1222_v33 = vld [vmem:[%s3709_s10 + $0x7f0] sm:$0xff]  ;;  %v1213_v34 = vld [vmem:[%s3709_s10 + $0x7a8] sm:$0xff] }
 0x2fb   :  { %1413 = vmatpush1.msra.mxu1 %v1076_v35  ;;  %1484 = vmatpush1.msra.mxu0 %v1078_v36  ;;  %v1215_v35 = vld [vmem:[%s3709_s10 + $0x7b8] sm:$0xff]  ;;  %v1212_v36 = vld [vmem:[%s3709_s10 + $0x7a0] sm:$0xff] }
 0x2fc   :  { %1414 = vmatprep.subr.mxu1 %v1069_v37  ;;  %1485 = vmatprep.subr.mxu0 %v1071_v38  ;;  %v1214_v37 = vld [vmem:[%s3709_s10 + $0x7b0] sm:$0xff]  ;;  %v1205_v38 = vld [vmem:[%s3709_s10 + $0x768] sm:$0xff] }
 0x2fd   :  { %1415 = vmatpush1.msra.mxu1 %v1068_v39  ;;  %1486 = vmatpush1.msra.mxu0 %v1070_v40  ;;  %v1207_v39 = vld [vmem:[%s3709_s10 + $0x778] sm:$0xff]  ;;  %v1204_v40 = vld [vmem:[%s3709_s10 + $0x760] sm:$0xff] }
 0x2fe   :  { %1416 = vmatprep.subr.mxu1 %v1061_v42  ;;  %1487 = vmatprep.subr.mxu0 %v1063_v43  ;;  %v1206_v42 = vld [vmem:[%s3709_s10 + $0x770] sm:$0xff]  ;;  %v1197_v43 = vld [vmem:[%s3709_s10 + $0x728] sm:$0xff] }
 0x2ff   :  { %1417 = vmatpush1.msra.mxu1 %v1060_v44  ;;  %1488 = vmatpush1.msra.mxu0 %v1062_v45  ;;  %v1199_v44 = vld [vmem:[%s3709_s10 + $0x738] sm:$0xff]  ;;  %v1196_v45 = vld [vmem:[%s3709_s10 + $0x720] sm:$0xff] }
 0x300   :  { %1418 = vmatprep.subr.mxu1 %v1053_v46  ;;  %1489 = vmatprep.subr.mxu0 %v1055_v47  ;;  %v1198_v46 = vld [vmem:[%s3709_s10 + $0x730] sm:$0xff]  ;;  %v1189_v47 = vld [vmem:[%s3709_s10 + $0x6e8] sm:$0xff] }
 0x301   :  { %1419 = vmatpush1.msra.mxu1 %v1052_v48  ;;  %1490 = vmatpush1.msra.mxu0 %v1054_v49  ;;  %v1191_v48 = vld [vmem:[%s3709_s10 + $0x6f8] sm:$0xff]  ;;  %v1188_v49 = vld [vmem:[%s3709_s10 + $0x6e0] sm:$0xff] }
 0x302   :  { %1420 = vmatprep.subr.mxu1 %v1045_v50  ;;  %1491 = vmatprep.subr.mxu0 %v1047_v51  ;;  %v1190_v50 = vld [vmem:[%s3709_s10 + $0x6f0] sm:$0xff]  ;;  %v1181_v51 = vld [vmem:[%s3709_s10 + $0x6a8] sm:$0xff] }
 0x303   :  { %1421 = vmatpush1.msra.mxu1 %v1044_v53  ;;  %1492 = vmatpush1.msra.mxu0 %v1046_v54  ;;  %v1183_v53 = vld [vmem:[%s3709_s10 + $0x6b8] sm:$0xff]  ;;  %v1180_v54 = vld [vmem:[%s3709_s10 + $0x6a0] sm:$0xff] }
 0x304   :  { %1422 = vmatprep.subr.mxu1 %v1037_v55  ;;  %1493 = vmatprep.subr.mxu0 %v1039_v56  ;;  %v1182_v55 = vld [vmem:[%s3709_s10 + $0x6b0] sm:$0xff]  ;;  %v1173_v56 = vld [vmem:[%s3709_s10 + $0x668] sm:$0xff] }
 0x305   :  { %1423 = vmatpush1.msra.mxu1 %v1036_v57  ;;  %1494 = vmatpush1.msra.mxu0 %v1038_v58  ;;  %v1175_v57 = vld [vmem:[%s3709_s10 + $0x678] sm:$0xff]  ;;  %v1172_v58 = vld [vmem:[%s3709_s10 + $0x660] sm:$0xff] }
 0x306   :  { %1424 = vmatprep.subr.mxu1 %v1029_v59  ;;  %1495 = vmatprep.subr.mxu0 %v1031_v60  ;;  %v1174_v59 = vld [vmem:[%s3709_s10 + $0x670] sm:$0xff]  ;;  %v1165_v60 = vld [vmem:[%s3709_s10 + $0x628] sm:$0xff] }
 0x307   :  { %1425 = vmatpush1.msra.mxu1 %v1028_v61  ;;  %1496 = vmatpush1.msra.mxu0 %v1030_v62  ;;  %v1167_v61 = vld [vmem:[%s3709_s10 + $0x638] sm:$0xff]  ;;  %v1164_v62 = vld [vmem:[%s3709_s10 + $0x620] sm:$0xff] }
 0x308   :  { %1426 = vmatprep.subr.mxu1 %v1021_v63  ;;  %1497 = vmatprep.subr.mxu0 %v1023_v0  ;;  %v1166_v63 = vld [vmem:[%s3709_s10 + $0x630] sm:$0xff]  ;;  %v1157_v0 = vld [vmem:[%s3709_s10 + $0x5e8] sm:$0xff] }
 0x309   :  { %1427 = vmatpush1.msra.mxu1 %v1020_v1  ;;  %1498 = vmatpush1.msra.mxu0 %v1022_v2  ;;  %v1159_v1 = vld [vmem:[%s3709_s10 + $0x5f8] sm:$0xff]  ;;  %v1156_v2 = vld [vmem:[%s3709_s10 + $0x5e0] sm:$0xff] }
 0x30a   :  { %1428 = vmatprep.subr.mxu1 %v1013_v3  ;;  %1499 = vmatprep.subr.mxu0 %v1015_v4  ;;  %v1158_v3 = vld [vmem:[%s3709_s10 + $0x5f0] sm:$0xff]  ;;  %v1149_v4 = vld [vmem:[%s3709_s10 + $0x5a8] sm:$0xff] }
 0x30b   :  { %1429 = vmatpush1.msra.mxu1 %v1012_v5  ;;  %1500 = vmatpush1.msra.mxu0 %v1014_v6  ;;  %v1151_v5 = vld [vmem:[%s3709_s10 + $0x5b8] sm:$0xff]  ;;  %v1148_v6 = vld [vmem:[%s3709_s10 + $0x5a0] sm:$0xff] }
 0x30c   :  { %1430 = vmatprep.subr.mxu1 %v1005_v7  ;;  %1501 = vmatprep.subr.mxu0 %v1007_v8  ;;  %v1150_v7 = vld [vmem:[%s3709_s10 + $0x5b0] sm:$0xff]  ;;  %v1141_v8 = vld [vmem:[%s3709_s10 + $0x568] sm:$0xff] }
 0x30d   :  { %1431 = vmatpush1.msra.mxu1 %v1004_v9  ;;  %1502 = vmatpush1.msra.mxu0 %v1006_v10  ;;  %v1143_v9 = vld [vmem:[%s3709_s10 + $0x578] sm:$0xff]  ;;  %v1140_v10 = vld [vmem:[%s3709_s10 + $0x560] sm:$0xff] }
 0x30e   :  { %1432 = vmatprep.subr.mxu1 %v997_v11  ;;  %1503 = vmatprep.subr.mxu0 %v999_v12  ;;  %v1142_v11 = vld [vmem:[%s3709_s10 + $0x570] sm:$0xff]  ;;  %v1133_v12 = vld [vmem:[%s3709_s10 + $0x528] sm:$0xff] }
 0x30f   :  { %1433 = vmatpush1.msra.mxu1 %v996_v13  ;;  %1504 = vmatpush1.msra.mxu0 %v998_v14  ;;  %v1135_v13 = vld [vmem:[%s3709_s10 + $0x538] sm:$0xff]  ;;  %v1132_v14 = vld [vmem:[%s3709_s10 + $0x520] sm:$0xff] }
 0x310   :  { %1434 = vmatprep.subr.mxu1 %v989_v15  ;;  %1505 = vmatprep.subr.mxu0 %v991_v16  ;;  %v1134_v15 = vld [vmem:[%s3709_s10 + $0x530] sm:$0xff]  ;;  %v1125_v16 = vld [vmem:[%s3709_s10 + $0x4e8] sm:$0xff] }
 0x311   :  { %1435 = vmatpush1.msra.mxu1 %v988_v17  ;;  %1506 = vmatpush1.msra.mxu0 %v990_v18  ;;  %v1127_v17 = vld [vmem:[%s3709_s10 + $0x4f8] sm:$0xff]  ;;  %v1124_v18 = vld [vmem:[%s3709_s10 + $0x4e0] sm:$0xff] }
 0x312   :  { %1436 = vmatprep.subr.mxu1 %v981_v19  ;;  %1507 = vmatprep.subr.mxu0 %v983_v20  ;;  %v1126_v19 = vld [vmem:[%s3709_s10 + $0x4f0] sm:$0xff]  ;;  %v1117_v20 = vld [vmem:[%s3709_s10 + $0x4a8] sm:$0xff] }
 0x313   :  { %1437 = vmatpush1.msra.mxu1 %v980_v21  ;;  %1508 = vmatpush1.msra.mxu0 %v982_v22  ;;  %v1119_v21 = vld [vmem:[%s3709_s10 + $0x4b8] sm:$0xff]  ;;  %v1116_v22 = vld [vmem:[%s3709_s10 + $0x4a0] sm:$0xff] }
 0x314   :  { %1438 = vmatprep.subr.mxu1 %v973_v23  ;;  %1509 = vmatprep.subr.mxu0 %v975_v27  ;;  %v1118_v23 = vld [vmem:[%s3709_s10 + $0x4b0] sm:$0xff]  ;;  %v1109_v27 = vld [vmem:[%s3709_s10 + $0x468] sm:$0xff] }
 0x315   :  { %1439 = vmatpush1.msra.mxu1 %v972_v28  ;;  %1510 = vmatpush1.msra.mxu0 %v974_v29  ;;  %v1111_v28 = vld [vmem:[%s3709_s10 + $0x478] sm:$0xff]  ;;  %v1108_v29 = vld [vmem:[%s3709_s10 + $0x460] sm:$0xff] }
 0x316   :  { %1440 = vmatprep.subr.mxu1 %v1221_v30  ;;  %1511 = vmatprep.subr.mxu0 %v1223_v31  ;;  %v1110_v30 = vld [vmem:[%s3709_s10 + $0x470] sm:$0xff]  ;;  %v1101_v31 = vld [vmem:[%s3709_s10 + $0x428] sm:$0xff] }
 0x317   :  { %1441 = vmatpush2.msra.mxu1 %v1220_v32  ;;  %1512 = vmatpush2.msra.mxu0 %v1222_v33  ;;  %v1103_v32 = vld [vmem:[%s3709_s10 + $0x438] sm:$0xff]  ;;  %v1100_v33 = vld [vmem:[%s3709_s10 + $0x420] sm:$0xff] }
 0x318   :  { %1442 = vmatprep.subr.mxu1 %v1213_v34  ;;  %1513 = vmatprep.subr.mxu0 %v1215_v35  ;;  %v1102_v34 = vld [vmem:[%s3709_s10 + $0x430] sm:$0xff] }
 0x319   :  { %1443 = vmatpush2.msra.mxu1 %v1212_v36  ;;  %1514 = vmatpush2.msra.mxu0 %v1214_v37 }
 0x31a   :  { %1444 = vmatprep.subr.mxu1 %v1205_v38  ;;  %1515 = vmatprep.subr.mxu0 %v1207_v39 }
 0x31b   :  { %1445 = vmatpush2.msra.mxu1 %v1204_v40  ;;  %1516 = vmatpush2.msra.mxu0 %v1206_v42 }
 0x31c   :  { %1446 = vmatprep.subr.mxu1 %v1197_v43  ;;  %1517 = vmatprep.subr.mxu0 %v1199_v44 }
 0x31d   :  { %1447 = vmatpush2.msra.mxu1 %v1196_v45  ;;  %1518 = vmatpush2.msra.mxu0 %v1198_v46 }
 0x31e   :  { %1448 = vmatprep.subr.mxu1 %v1189_v47  ;;  %1519 = vmatprep.subr.mxu0 %v1191_v48 }
 0x31f   :  { %1449 = vmatpush2.msra.mxu1 %v1188_v49  ;;  %1520 = vmatpush2.msra.mxu0 %v1190_v50 }
 0x320   :  { %1450 = vmatprep.subr.mxu1 %v1181_v51  ;;  %1521 = vmatprep.subr.mxu0 %v1183_v53 }
 0x321   :  { %1451 = vmatpush2.msra.mxu1 %v1180_v54  ;;  %1522 = vmatpush2.msra.mxu0 %v1182_v55 }
 0x322   :  { %1452 = vmatprep.subr.mxu1 %v1173_v56  ;;  %1523 = vmatprep.subr.mxu0 %v1175_v57 }
 0x323   :  { %1453 = vmatpush2.msra.mxu1 %v1172_v58  ;;  %1524 = vmatpush2.msra.mxu0 %v1174_v59 }
 0x324   :  { %1454 = vmatprep.subr.mxu1 %v1165_v60  ;;  %1525 = vmatprep.subr.mxu0 %v1167_v61 }
 0x325   :  { %1455 = vmatpush2.msra.mxu1 %v1164_v62  ;;  %1526 = vmatpush2.msra.mxu0 %v1166_v63 }
 0x326   :  { %1456 = vmatprep.subr.mxu1 %v1157_v0  ;;  %1527 = vmatprep.subr.mxu0 %v1159_v1 }
 0x327   :  { %1457 = vmatpush2.msra.mxu1 %v1156_v2  ;;  %1528 = vmatpush2.msra.mxu0 %v1158_v3 }
 0x328   :  { %1458 = vmatprep.subr.mxu1 %v1149_v4  ;;  %1529 = vmatprep.subr.mxu0 %v1151_v5 }
 0x329   :  { %1459 = vmatpush2.msra.mxu1 %v1148_v6  ;;  %1530 = vmatpush2.msra.mxu0 %v1150_v7 }
 0x32a   :  { %1460 = vmatprep.subr.mxu1 %v1141_v8  ;;  %1531 = vmatprep.subr.mxu0 %v1143_v9 }
 0x32b   :  { %1461 = vmatpush2.msra.mxu1 %v1140_v10  ;;  %1532 = vmatpush2.msra.mxu0 %v1142_v11 }
 0x32c   :  { %1462 = vmatprep.subr.mxu1 %v1133_v12  ;;  %1533 = vmatprep.subr.mxu0 %v1135_v13 }
 0x32d   :  { %1463 = vmatpush2.msra.mxu1 %v1132_v14  ;;  %1534 = vmatpush2.msra.mxu0 %v1134_v15 }
 0x32e   :  { %1464 = vmatprep.subr.mxu1 %v1125_v16  ;;  %1535 = vmatprep.subr.mxu0 %v1127_v17 }
 0x32f   :  { %1465 = vmatpush2.msra.mxu1 %v1124_v18  ;;  %1536 = vmatpush2.msra.mxu0 %v1126_v19 }
 0x330   :  { %1466 = vmatprep.subr.mxu1 %v1117_v20  ;;  %1537 = vmatprep.subr.mxu0 %v1119_v21 }
 0x331   :  { %1467 = vmatpush2.msra.mxu1 %v1116_v22  ;;  %1538 = vmatpush2.msra.mxu0 %v1118_v23 }
 0x332   :  { %1468 = vmatprep.subr.mxu1 %v1109_v27  ;;  %1539 = vmatprep.subr.mxu0 %v1111_v28 }
 0x333   :  { %1469 = vmatpush2.msra.mxu1 %v1108_v29  ;;  %1540 = vmatpush2.msra.mxu0 %v1110_v30 }
 0x334   :  { %1470 = vmatprep.subr.mxu1 %v1101_v31  ;;  %1541 = vmatprep.subr.mxu0 %v1103_v32 }
 0x335   :  { %1471 = vmatpush2.msra.mxu1 %v1100_v33  ;;  %1542 = vmatpush2.msra.mxu0 %v1102_v34 }
 0x336   :  { %1473 = vmatmul.mubr.f32.vlgmr.msra.gmra.mxu1 %v3285_v25  ;;  %1544 = vmatmul.mubr.f32.vlgmr.msra.gmra.mxu0 %v3285_v25 }
 0x337   :  { %1742 = shalt.err (!%p1739_p4)
}
 0x338   :  { %1623 = dma.vmem_to_hbm [thread:$0]  %s1621_s19, 32, %s3712_s13, [#allocation5]  }
 0x339   :  { %s1751_s22 = scalar_lea.vmem %s1611_s7, 32  ;;  %p1756_p6 = scmp.lt.s32.totalorder %s1611_s7, %s1611_s7 }
 0x33a   :  { %p1752_p5 = scmp.ne.s32.totalorder %s1611_s7, %s1751_s22  ;;  %p1757_p7 = scmp.lt.s32.totalorder %s1751_s22, %s1751_s22 }
 0x33c   :  { %p1758_p8 = por %p1757_p7, %p1756_p6 }
 0x33e   :  { %p1759_p9 = pnand %p1758_p8, %p1752_p5 }
 0x340   :  { %1762 = shalt.err (!%p1759_p9)
}
 0x341   :  { %1613 = dma.vmem_to_hbm [thread:$0]  %s1611_s7, 32, %s3711_s12, [#allocation3]  }
 0x342   :  { %s1799_s25 = smov [#allocation6]  }
 0x343   :  { %s1630_s8 = sshll.u32 %s1799_s25, 4  ;;  %s1631_s8 = int_to_ptr.vmem [resolvable:$true] %s1630_s8 }
 0x344   :  { %s1771_s26 = scalar_lea.vmem %s1631_s8, 32  ;;  %p1776_p11 = scmp.lt.s32.totalorder %s1631_s8, %s1631_s8 }
 0x345   :  { %p1772_p10 = scmp.ne.s32.totalorder %s1631_s8, %s1771_s26  ;;  %p1777_p12 = scmp.lt.s32.totalorder %s1771_s26, %s1771_s26 }
 0x347   :  { %p1778_p13 = por %p1777_p12, %p1776_p11 }
 0x349   :  { %p1779_p0 = pnand %p1778_p13, %p1772_p10 }
 0x34b   :  { %1782 = shalt.err (!%p1779_p0)
}
 0x34c   :  { %1633 = dma.vmem_to_hbm [thread:$0]  %s1631_s8, 32, %s3713_s14, [#allocation5]   ;;  %v1236_v25 = vsub.s32 2, %v2186_v41  ;;  %v1224_v35 = vld [vmem:[%s3710_s11] sm:$0xff]  ;;  %v1240_v36 = vsub.s32 3, %v2186_v41  ;;  %v1244_v58 = vsub.s32 4, %v2186_v41 }
 0x34d   :  { %v1229_v37 = vrot.slane %v1224_v35, %v2856_v24  ;;  %v1233_v39 = vrot.slane %v1224_v35, %v2862_v26  ;;  %v1252_v59 = vsub.s32 6, %v2186_v41  ;;  %v1248_v60 = vsub.s32 5, %v2186_v41 }
 0x34e   :  { %v1237_v38 = vrot.slane %v1224_v35, %v1236_v25  ;;  %v1241_v40 = vrot.slane %v1224_v35, %v1240_v36  ;;  %v1256_v61 = vsub.s32 7, %v2186_v41  ;;  %v1245_v62 = vrot.slane %v1224_v35, %v1244_v58 }
 0x34f   :  { %v1253_v63 = vrot.slane %v1224_v35, %v1252_v59  ;;  %v1249_v0 = vrot.slane %v1224_v35, %v1248_v60 }
 0x350   :  { %v1257_v1 = vrot.slane %v1224_v35, %v1256_v61 }
 0x3b5   :  { %v1332_v42 = vpop.f32.mrf.mxu1  ;;  %v1403_v43 = vpop.f32.mrf.mxu0 }
 0x3b6   :  { %v1333_v44 = vadd.f32 %v1332_v42, %v1229_v37  ;;  %v1404_v45 = vadd.f32 %v1403_v43, %v1237_v38 }
 0x3b7   :  { %v1334_v46 = vpop.f32.mrf.mxu1  ;;  %v1405_v47 = vpop.f32.mrf.mxu0 }
 0x3b8   :  { %v1335_v48 = vadd.f32 %v1334_v46, %v1233_v39  ;;  %v1406_v49 = vadd.f32 %v1405_v47, %v1241_v40  ;;  %v1550_v50 = vmax.f32 %v1333_v44, 0.0  ;;  %v1552_v51 = vmax.f32 %v1404_v45, 0.0 }
 0x3ba   :  { %v1551_v53 = vmax.f32 %v1335_v48, 0.0  ;;  %v1553_v54 = vmax.f32 %v1406_v49, 0.0 }
 0x3bc   :  { %v1566_v55 = vcombine.low %v1550_v50, %v1551_v53  ;;  %v1567_v56 = vcombine.low %v1552_v51, %v1553_v54 }
 0x3be   :  { %v1574_v24 = vrot.slane %v1566_v55, %v2216_v52  ;;  %v1581_v57 = vrot.slane %v1567_v56, %v2216_v52 }
 0x3c0   :  { %v1582_v26 = vcombine.low %v1574_v24, %v1581_v57 }
 0x3c2   :  { %1602 = vst [vmem:[%s3714_s15] sm:$0xff] %v1582_v26 }
 0x3f6   :  { %v1474_v2 = vpop.f32.mrf.mxu1  ;;  %v1545_v3 = vpop.f32.mrf.mxu0 }
 0x3f7   :  { %v1475_v4 = vadd.f32 %v1474_v2, %v1245_v62  ;;  %v1546_v5 = vadd.f32 %v1545_v3, %v1253_v63 }
 0x3f8   :  { %v1476_v6 = vpop.f32.mrf.mxu1  ;;  %v1547_v7 = vpop.f32.mrf.mxu0 }
 0x3f9   :  { %v1477_v8 = vadd.f32 %v1476_v6, %v1249_v0  ;;  %v1548_v9 = vadd.f32 %v1547_v7, %v1257_v1  ;;  %v1554_v10 = vmax.f32 %v1475_v4, 0.0  ;;  %v1556_v11 = vmax.f32 %v1546_v5, 0.0 }
 0x3fb   :  { %v1555_v12 = vmax.f32 %v1477_v8, 0.0  ;;  %v1557_v13 = vmax.f32 %v1548_v9, 0.0 }
 0x3fd   :  { %v1583_v14 = vcombine.low %v1554_v10, %v1555_v12  ;;  %v1584_v15 = vcombine.low %v1556_v11, %v1557_v13 }
 0x3ff   :  { %v1591_v41 = vrot.slane %v1583_v14, %v2216_v52  ;;  %v1598_v16 = vrot.slane %v1584_v15, %v2216_v52 }
 0x401   :  { %v1599_v17 = vcombine.low %v1591_v41, %v1598_v16 }
 0x403   :  { %1603 = vst [vmem:[%s3714_s15 + $0x8] sm:$0xff] %v1599_v17 }
 0x404   :  { %1791 = dma.done.wait [#allocation3], 32  }
 0x405   :  { %1792 = vsyncadd [#allocation3], 4294967264 }
 0x406   :  { %1793 = dma.done.wait [#allocation5], 64  }
 0x407   :  { %1794 = vsyncadd [#allocation5], 4294967232 }
 0x408   :  { %1647 = vsyncpa [#allocation3], 1 }
 0x409   :  { %1648 = vsyncpa [#allocation5], 1 }

// kernel: _lambda_.14
= control target key start
LH: loop header
LB: loop body
LE: loop exit
PB: predicated region body
PF: predicated region fallthrough
CT: control target
= control target key end

     0   :  { %v664_v0 = vmov 0.0   ;;  %v665_v45 = vmov 0   ;;  %vm559_vm0 = vcmask 408576   ;;  %s1295_s1 = inlined_call_operand.vmem [shape: f32[256,50], index: 1, kind: input, shape index: {}]   ;;  %s1296_s0 = inlined_call_operand.vmem [shape: f32[256,256], index: 0, kind: input, shape index: {}]   ;;  %s1297_s2 = inlined_call_operand.vmem [shape: f32[256,1], index: 2, kind: input, shape index: {}]   ;;  %s1298_s3 = inlined_call_operand.vmem [shape: f32[256,50], index: 3, kind: output, shape index: {}]  }
   0x1   :  { %302 = vmatprep.subr.mxu0 %v664_v0  ;;  %596 = vmatprep.subr.mxu1 %v664_v0  ;;  %v93_v1 = vld [vmem:[%s1295_s1 + $0x78] sm:$0xff]  ;;  %v92_v2 = vld [vmem:[%s1295_s1 + $0x70] sm:$0xff]  ;;  %v91_v3 = vld [vmem:[%s1295_s1 + $0x68] sm:$0xff] }
   0x2   :  { %303 = vmatpush1.msra.mxu0 %v93_v1  ;;  %628 = vmatpush1.msra.mxu1 %v93_v1  ;;  %v90_v4 = vld [vmem:[%s1295_s1 + $0x60] sm:$0xff]  ;;  %v89_v5 = vld [vmem:[%s1295_s1 + $0x58] sm:$0xff]  ;;  %v88_v6 = vld [vmem:[%s1295_s1 + $0x50] sm:$0xff] }
   0x3   :  { %304 = vmatprep.subr.mxu0 %v664_v0  ;;  %597 = vmatprep.subr.mxu1 %v664_v0  ;;  %v87_v7 = vld [vmem:[%s1295_s1 + $0x48] sm:$0xff]  ;;  %v86_v8 = vld [vmem:[%s1295_s1 + $0x40] sm:$0xff]  ;;  %v85_v9 = vld [vmem:[%s1295_s1 + $0x38] sm:$0xff] }
   0x4   :  { %305 = vmatpush1.msra.mxu0 %v92_v2  ;;  %629 = vmatpush1.msra.mxu1 %v92_v2  ;;  %v84_v10 = vld [vmem:[%s1295_s1 + $0x30] sm:$0xff]  ;;  %v83_v11 = vld [vmem:[%s1295_s1 + $0x28] sm:$0xff]  ;;  %v82_v12 = vld [vmem:[%s1295_s1 + $0x20] sm:$0xff] }
   0x5   :  { %306 = vmatprep.subr.mxu0 %v664_v0  ;;  %598 = vmatprep.subr.mxu1 %v664_v0  ;;  %v81_v13 = vld [vmem:[%s1295_s1 + $0x18] sm:$0xff]  ;;  %v80_v14 = vld [vmem:[%s1295_s1 + $0x10] sm:$0xff]  ;;  %v79_v15 = vld [vmem:[%s1295_s1 + $0x8] sm:$0xff] }
   0x6   :  { %307 = vmatpush1.msra.mxu0 %v91_v3  ;;  %630 = vmatpush1.msra.mxu1 %v91_v3  ;;  %v78_v16 = vld [vmem:[%s1295_s1] sm:$0xff]  ;;  %v109_v17 = vld [vmem:[%s1295_s1 + $0xf8] sm:$0xff]  ;;  %v108_v18 = vld [vmem:[%s1295_s1 + $0xf0] sm:$0xff] }
   0x7   :  { %308 = vmatprep.subr.mxu0 %v664_v0  ;;  %599 = vmatprep.subr.mxu1 %v664_v0  ;;  %v107_v19 = vld [vmem:[%s1295_s1 + $0xe8] sm:$0xff]  ;;  %v106_v20 = vld [vmem:[%s1295_s1 + $0xe0] sm:$0xff]  ;;  %v105_v21 = vld [vmem:[%s1295_s1 + $0xd8] sm:$0xff] }
   0x8   :  { %309 = vmatpush1.msra.mxu0 %v90_v4  ;;  %631 = vmatpush1.msra.mxu1 %v90_v4  ;;  %v104_v22 = vld [vmem:[%s1295_s1 + $0xd0] sm:$0xff]  ;;  %v103_v23 = vld [vmem:[%s1295_s1 + $0xc8] sm:$0xff]  ;;  %v102_v24 = vld [vmem:[%s1295_s1 + $0xc0] sm:$0xff] }
   0x9   :  { %310 = vmatprep.subr.mxu0 %v664_v0  ;;  %600 = vmatprep.subr.mxu1 %v664_v0  ;;  %v101_v25 = vld [vmem:[%s1295_s1 + $0xb8] sm:$0xff]  ;;  %v100_v26 = vld [vmem:[%s1295_s1 + $0xb0] sm:$0xff]  ;;  %v99_v27 = vld [vmem:[%s1295_s1 + $0xa8] sm:$0xff] }
   0xa   :  { %311 = vmatpush1.msra.mxu0 %v89_v5  ;;  %632 = vmatpush1.msra.mxu1 %v89_v5  ;;  %v98_v28 = vld [vmem:[%s1295_s1 + $0xa0] sm:$0xff]  ;;  %v97_v29 = vld [vmem:[%s1295_s1 + $0x98] sm:$0xff]  ;;  %v96_v30 = vld [vmem:[%s1295_s1 + $0x90] sm:$0xff] }
   0xb   :  { %312 = vmatprep.subr.mxu0 %v664_v0  ;;  %601 = vmatprep.subr.mxu1 %v664_v0  ;;  %v95_v31 = vld [vmem:[%s1295_s1 + $0x88] sm:$0xff]  ;;  %v94_v32 = vld [vmem:[%s1295_s1 + $0x80] sm:$0xff]  ;;  %v17_v37 = vld [vmem:[%s1296_s0 + $0x18] sm:$0xff] }
   0xc   :  { %313 = vmatpush1.msra.mxu0 %v88_v6  ;;  %633 = vmatpush1.msra.mxu1 %v88_v6  ;;  %v15_v33 = vld [vmem:[%s1296_s0 + $0x8] sm:$0xff]  ;;  %v14_v35 = vld [vmem:[%s1296_s0] sm:$0xff]  ;;  %v49_v38 = vld [vmem:[%s1296_s0 + $0x118] sm:$0xff] }
   0xd   :  { %314 = vmatprep.subr.mxu0 %v664_v0  ;;  %602 = vmatprep.subr.mxu1 %v664_v0  ;;  %v47_v34 = vld [vmem:[%s1296_s0 + $0x108] sm:$0xff]  ;;  %v46_v36 = vld [vmem:[%s1296_s0 + $0x100] sm:$0xff]  ;;  %v112_v39 = vld [vmem:[%s1297_s2 + $0x10] sm:$0xff] }
   0xe   :  { %315 = vmatpush1.msra.mxu0 %v87_v7  ;;  %634 = vmatpush1.msra.mxu1 %v87_v7  ;;  %v110_v40 = vld [vmem:[%s1297_s2] sm:$0xff]  ;;  %v16_v41 = vld [vmem:[%s1296_s0 + $0x10] sm:$0xff]  ;;  %v19_v43 = vld [vmem:[%s1296_s0 + $0x28] sm:$0xff] }
   0xf   :  { %316 = vmatprep.subr.mxu0 %v664_v0  ;;  %603 = vmatprep.subr.mxu1 %v664_v0  ;;  %v48_v42 = vld [vmem:[%s1296_s0 + $0x110] sm:$0xff]  ;;  %v51_v44 = vld [vmem:[%s1296_s0 + $0x128] sm:$0xff]  ;;  %v113_v46 = vld [vmem:[%s1297_s2 + $0x18] sm:$0xff] }
  0x10   :  { %317 = vmatpush1.msra.mxu0 %v86_v8  ;;  %635 = vmatpush1.msra.mxu1 %v86_v8  ;;  %v111_v47 = vld [vmem:[%s1297_s2 + $0x8] sm:$0xff]  ;;  %v18_v48 = vld [vmem:[%s1296_s0 + $0x20] sm:$0xff]  ;;  %v21_v50 = vld [vmem:[%s1296_s0 + $0x38] sm:$0xff] }
  0x11   :  { %318 = vmatprep.subr.mxu0 %v664_v0  ;;  %604 = vmatprep.subr.mxu1 %v664_v0  ;;  %v50_v49 = vld [vmem:[%s1296_s0 + $0x120] sm:$0xff]  ;;  %v53_v51 = vld [vmem:[%s1296_s0 + $0x138] sm:$0xff]  ;;  %v115_v52 = vld [vmem:[%s1297_s2 + $0x28] sm:$0xff] }
  0x12   :  { %319 = vmatpush1.msra.mxu0 %v85_v9  ;;  %636 = vmatpush1.msra.mxu1 %v85_v9  ;;  %v114_v53 = vld [vmem:[%s1297_s2 + $0x20] sm:$0xff]  ;;  %v20_v54 = vld [vmem:[%s1296_s0 + $0x30] sm:$0xff]  ;;  %v23_v56 = vld [vmem:[%s1296_s0 + $0x48] sm:$0xff] }
  0x13   :  { %320 = vmatprep.subr.mxu0 %v664_v0  ;;  %605 = vmatprep.subr.mxu1 %v664_v0  ;;  %v52_v55 = vld [vmem:[%s1296_s0 + $0x130] sm:$0xff]  ;;  %v55_v57 = vld [vmem:[%s1296_s0 + $0x148] sm:$0xff]  ;;  %v117_v58 = vld [vmem:[%s1297_s2 + $0x38] sm:$0xff] }
  0x14   :  { %321 = vmatpush1.msra.mxu0 %v84_v10  ;;  %637 = vmatpush1.msra.mxu1 %v84_v10  ;;  %v116_v59 = vld [vmem:[%s1297_s2 + $0x30] sm:$0xff]  ;;  %v22_v60 = vld [vmem:[%s1296_s0 + $0x40] sm:$0xff]  ;;  %v25_v62 = vld [vmem:[%s1296_s0 + $0x58] sm:$0xff] }
  0x15   :  { %322 = vmatprep.subr.mxu0 %v664_v0  ;;  %606 = vmatprep.subr.mxu1 %v664_v0  ;;  %v54_v61 = vld [vmem:[%s1296_s0 + $0x140] sm:$0xff]  ;;  %v57_v63 = vld [vmem:[%s1296_s0 + $0x158] sm:$0xff]  ;;  %v24_v2 = vld [vmem:[%s1296_s0 + $0x50] sm:$0xff] }
  0x16   :  { %323 = vmatpush1.msra.mxu0 %v83_v11  ;;  %638 = vmatpush1.msra.mxu1 %v83_v11  ;;  %v118_v1 = vld [vmem:[%s1297_s2 + $0x40] sm:$0xff]  ;;  %v56_v3 = vld [vmem:[%s1296_s0 + $0x150] sm:$0xff]  ;;  %v27_v4 = vld [vmem:[%s1296_s0 + $0x68] sm:$0xff] }
  0x17   :  { %324 = vmatprep.subr.mxu0 %v664_v0  ;;  %607 = vmatprep.subr.mxu1 %v664_v0  ;;  %v59_v5 = vld [vmem:[%s1296_s0 + $0x168] sm:$0xff]  ;;  %v121_v6 = vld [vmem:[%s1297_s2 + $0x58] sm:$0xff]  ;;  %v120_v7 = vld [vmem:[%s1297_s2 + $0x50] sm:$0xff] }
  0x18   :  { %325 = vmatpush1.msra.mxu0 %v82_v12  ;;  %639 = vmatpush1.msra.mxu1 %v82_v12  ;;  %v26_v8 = vld [vmem:[%s1296_s0 + $0x60] sm:$0xff]  ;;  %v29_v10 = vld [vmem:[%s1296_s0 + $0x78] sm:$0xff]  ;;  %v123_v12 = vld [vmem:[%s1297_s2 + $0x68] sm:$0xff] }
  0x19   :  { %326 = vmatprep.subr.mxu0 %v664_v0  ;;  %608 = vmatprep.subr.mxu1 %v664_v0  ;;  %v58_v9 = vld [vmem:[%s1296_s0 + $0x160] sm:$0xff]  ;;  %v61_v11 = vld [vmem:[%s1296_s0 + $0x178] sm:$0xff] }
  0x1a   :  { %327 = vmatpush1.msra.mxu0 %v81_v13  ;;  %640 = vmatpush1.msra.mxu1 %v81_v13  ;;  %v122_v13 = vld [vmem:[%s1297_s2 + $0x60] sm:$0xff] }
  0x1b   :  { %328 = vmatprep.subr.mxu0 %v664_v0  ;;  %609 = vmatprep.subr.mxu1 %v664_v0 }
  0x1c   :  { %329 = vmatpush1.msra.mxu0 %v80_v14  ;;  %641 = vmatpush1.msra.mxu1 %v80_v14  ;;  %v28_v14 = vld [vmem:[%s1296_s0 + $0x70] sm:$0xff] }
  0x1d   :  { %330 = vmatprep.subr.mxu0 %v664_v0  ;;  %610 = vmatprep.subr.mxu1 %v664_v0 }
  0x1e   :  { %331 = vmatpush1.msra.mxu0 %v79_v15  ;;  %642 = vmatpush1.msra.mxu1 %v79_v15  ;;  %v60_v15 = vld [vmem:[%s1296_s0 + $0x170] sm:$0xff] }
  0x1f   :  { %332 = vmatprep.subr.mxu0 %v664_v0  ;;  %611 = vmatprep.subr.mxu1 %v664_v0 }
  0x20   :  { %333 = vmatpush1.msra.mxu0 %v78_v16  ;;  %643 = vmatpush1.msra.mxu1 %v78_v16  ;;  %v31_v16 = vld [vmem:[%s1296_s0 + $0x88] sm:$0xff] }
  0x21   :  { %334 = vmatprep.subr.mxu0 %v664_v0  ;;  %612 = vmatprep.subr.mxu1 %v664_v0 }
  0x22   :  { %335 = vmatpush2.msra.mxu0 %v109_v17  ;;  %644 = vmatpush2.msra.mxu1 %v109_v17  ;;  %v63_v17 = vld [vmem:[%s1296_s0 + $0x188] sm:$0xff] }
  0x23   :  { %336 = vmatprep.subr.mxu0 %v664_v0  ;;  %613 = vmatprep.subr.mxu1 %v664_v0 }
  0x24   :  { %337 = vmatpush2.msra.mxu0 %v108_v18  ;;  %645 = vmatpush2.msra.mxu1 %v108_v18  ;;  %v125_v18 = vld [vmem:[%s1297_s2 + $0x78] sm:$0xff] }
  0x25   :  { %338 = vmatprep.subr.mxu0 %v664_v0  ;;  %614 = vmatprep.subr.mxu1 %v664_v0 }
  0x26   :  { %339 = vmatpush2.msra.mxu0 %v107_v19  ;;  %646 = vmatpush2.msra.mxu1 %v107_v19  ;;  %v124_v19 = vld [vmem:[%s1297_s2 + $0x70] sm:$0xff] }
  0x27   :  { %340 = vmatprep.subr.mxu0 %v664_v0  ;;  %615 = vmatprep.subr.mxu1 %v664_v0 }
  0x28   :  { %341 = vmatpush2.msra.mxu0 %v106_v20  ;;  %647 = vmatpush2.msra.mxu1 %v106_v20  ;;  %v30_v20 = vld [vmem:[%s1296_s0 + $0x80] sm:$0xff] }
  0x29   :  { %342 = vmatprep.subr.mxu0 %v664_v0  ;;  %616 = vmatprep.subr.mxu1 %v664_v0 }
  0x2a   :  { %343 = vmatpush2.msra.mxu0 %v105_v21  ;;  %648 = vmatpush2.msra.mxu1 %v105_v21  ;;  %v62_v21 = vld [vmem:[%s1296_s0 + $0x180] sm:$0xff] }
  0x2b   :  { %344 = vmatprep.subr.mxu0 %v664_v0  ;;  %617 = vmatprep.subr.mxu1 %v664_v0 }
  0x2c   :  { %345 = vmatpush2.msra.mxu0 %v104_v22  ;;  %649 = vmatpush2.msra.mxu1 %v104_v22  ;;  %v33_v22 = vld [vmem:[%s1296_s0 + $0x98] sm:$0xff] }
  0x2d   :  { %346 = vmatprep.subr.mxu0 %v664_v0  ;;  %618 = vmatprep.subr.mxu1 %v664_v0 }
  0x2e   :  { %347 = vmatpush2.msra.mxu0 %v103_v23  ;;  %650 = vmatpush2.msra.mxu1 %v103_v23  ;;  %v65_v23 = vld [vmem:[%s1296_s0 + $0x198] sm:$0xff] }
  0x2f   :  { %348 = vmatprep.subr.mxu0 %v664_v0  ;;  %619 = vmatprep.subr.mxu1 %v664_v0 }
  0x30   :  { %349 = vmatpush2.msra.mxu0 %v102_v24  ;;  %651 = vmatpush2.msra.mxu1 %v102_v24  ;;  %v127_v24 = vld [vmem:[%s1297_s2 + $0x88] sm:$0xff] }
  0x31   :  { %350 = vmatprep.subr.mxu0 %v664_v0  ;;  %620 = vmatprep.subr.mxu1 %v664_v0 }
  0x32   :  { %351 = vmatpush2.msra.mxu0 %v101_v25  ;;  %652 = vmatpush2.msra.mxu1 %v101_v25  ;;  %v126_v25 = vld [vmem:[%s1297_s2 + $0x80] sm:$0xff] }
  0x33   :  { %352 = vmatprep.subr.mxu0 %v664_v0  ;;  %621 = vmatprep.subr.mxu1 %v664_v0 }
  0x34   :  { %353 = vmatpush2.msra.mxu0 %v100_v26  ;;  %653 = vmatpush2.msra.mxu1 %v100_v26  ;;  %v32_v26 = vld [vmem:[%s1296_s0 + $0x90] sm:$0xff] }
  0x35   :  { %354 = vmatprep.subr.mxu0 %v664_v0  ;;  %622 = vmatprep.subr.mxu1 %v664_v0 }
  0x36   :  { %355 = vmatpush2.msra.mxu0 %v99_v27  ;;  %654 = vmatpush2.msra.mxu1 %v99_v27  ;;  %v64_v27 = vld [vmem:[%s1296_s0 + $0x190] sm:$0xff] }
  0x37   :  { %356 = vmatprep.subr.mxu0 %v664_v0  ;;  %623 = vmatprep.subr.mxu1 %v664_v0 }
  0x38   :  { %357 = vmatpush2.msra.mxu0 %v98_v28  ;;  %655 = vmatpush2.msra.mxu1 %v98_v28  ;;  %v35_v28 = vld [vmem:[%s1296_s0 + $0xa8] sm:$0xff] }
  0x39   :  { %358 = vmatprep.subr.mxu0 %v664_v0  ;;  %624 = vmatprep.subr.mxu1 %v664_v0 }
  0x3a   :  { %359 = vmatpush2.msra.mxu0 %v97_v29  ;;  %656 = vmatpush2.msra.mxu1 %v97_v29  ;;  %v67_v29 = vld [vmem:[%s1296_s0 + $0x1a8] sm:$0xff] }
  0x3b   :  { %360 = vmatprep.subr.mxu0 %v664_v0  ;;  %625 = vmatprep.subr.mxu1 %v664_v0 }
  0x3c   :  { %361 = vmatpush2.msra.mxu0 %v96_v30  ;;  %657 = vmatpush2.msra.mxu1 %v96_v30  ;;  %v129_v30 = vld [vmem:[%s1297_s2 + $0x98] sm:$0xff] }
  0x3d   :  { %362 = vmatprep.subr.mxu0 %v664_v0  ;;  %626 = vmatprep.subr.mxu1 %v664_v0 }
  0x3e   :  { %363 = vmatpush2.msra.mxu0 %v95_v31  ;;  %658 = vmatpush2.msra.mxu1 %v95_v31  ;;  %v128_v31 = vld [vmem:[%s1297_s2 + $0x90] sm:$0xff] }
  0x3f   :  { %364 = vmatprep.subr.mxu0 %v664_v0  ;;  %627 = vmatprep.subr.mxu1 %v664_v0  ;;  %v119_v0 = vld [vmem:[%s1297_s2 + $0x48] sm:$0xff] }
  0x40   :  { %365 = vmatpush2.msra.mxu0 %v94_v32  ;;  %659 = vmatpush2.msra.mxu1 %v94_v32  ;;  %v34_v32 = vld [vmem:[%s1296_s0 + $0xa0] sm:$0xff] }
  0x41   :  { %366 = vmatprep.mubr.f32.mxu0 %v15_v33  ;;  %446 = vmatprep.mubr.f32.mxu1 %v47_v34  ;;  %v66_v33 = vld [vmem:[%s1296_s0 + $0x1a0] sm:$0xff]  ;;  %v37_v34 = vld [vmem:[%s1296_s0 + $0xb8] sm:$0xff] }
  0x42   :  { %367 = vmatmul.mubr.f32.vlgmr.msra.gmra.mxu0 %v14_v35  ;;  %447 = vmatmul.mubr.f32.vlgmr.msra.gmra.mxu1 %v46_v36  ;;  %v69_v35 = vld [vmem:[%s1296_s0 + $0x1b8] sm:$0xff]  ;;  %v131_v36 = vld [vmem:[%s1297_s2 + $0xa8] sm:$0xff] }
  0x43   :  { %371 = vmatprep.mubr.f32.mxu0 %v17_v37  ;;  %451 = vmatprep.mubr.f32.mxu1 %v49_v38  ;;  %v130_v37 = vld [vmem:[%s1297_s2 + $0xa0] sm:$0xff]  ;;  %v36_v38 = vld [vmem:[%s1296_s0 + $0xb0] sm:$0xff] }
  0x44   :  { %663 = vset.pattern.permute.xlu1 %v665_v45  ;;  %662 = vset.pattern.permute.xlu0 %v665_v45  ;;  %v70_v45 = vld [vmem:[%s1296_s0 + $0x1c0] sm:$0xff] }
  0x45   :  { %154 = vperm.xlu1 %663, %v112_v39   ;;  %144 = vperm.xlu0 %662, %v110_v40   ;;  %v68_v39 = vld [vmem:[%s1296_s0 + $0x1b0] sm:$0xff]  ;;  %v39_v40 = vld [vmem:[%s1296_s0 + $0xc8] sm:$0xff] }
  0x46   :  { %372 = vmatmul.mubr.f32.gmra.mxu0 %v16_v41  ;;  %452 = vmatmul.mubr.f32.gmra.mxu1 %v48_v42  ;;  %v71_v41 = vld [vmem:[%s1296_s0 + $0x1c8] sm:$0xff]  ;;  %v133_v42 = vld [vmem:[%s1297_s2 + $0xb8] sm:$0xff] }
  0x47   :  { %376 = vmatprep.mubr.f32.mxu0 %v19_v43  ;;  %456 = vmatprep.mubr.f32.mxu1 %v51_v44  ;;  %v132_v43 = vld [vmem:[%s1297_s2 + $0xb0] sm:$0xff]  ;;  %v38_v44 = vld [vmem:[%s1296_s0 + $0xc0] sm:$0xff] }
  0x49   :  { %159 = vperm.xlu1 %663, %v113_v46   ;;  %149 = vperm.xlu0 %662, %v111_v47   ;;  %v41_v46 = vld [vmem:[%s1296_s0 + $0xd8] sm:$0xff] }
  0x4a   :  { %377 = vmatmul.mubr.f32.gmra.mxu0 %v18_v48  ;;  %457 = vmatmul.mubr.f32.gmra.mxu1 %v50_v49  ;;  %v73_v47 = vld [vmem:[%s1296_s0 + $0x1d8] sm:$0xff]  ;;  %v135_v48 = vld [vmem:[%s1297_s2 + $0xc8] sm:$0xff]  ;;  %v134_v49 = vld [vmem:[%s1297_s2 + $0xc0] sm:$0xff] }
  0x4b   :  { %381 = vmatprep.mubr.f32.mxu0 %v21_v50  ;;  %461 = vmatprep.mubr.f32.mxu1 %v53_v51  ;;  %v40_v50 = vld [vmem:[%s1296_s0 + $0xd0] sm:$0xff] }
  0x4c   :  { %v72_v51 = vld [vmem:[%s1296_s0 + $0x1d0] sm:$0xff] }
  0x4d   :  { %169 = vperm.xlu1 %663, %v115_v52   ;;  %164 = vperm.xlu0 %662, %v114_v53   ;;  %v43_v52 = vld [vmem:[%s1296_s0 + $0xe8] sm:$0xff] }
  0x4e   :  { %382 = vmatmul.mubr.f32.gmra.mxu0 %v20_v54  ;;  %462 = vmatmul.mubr.f32.gmra.mxu1 %v52_v55  ;;  %v75_v53 = vld [vmem:[%s1296_s0 + $0x1e8] sm:$0xff]  ;;  %v137_v54 = vld [vmem:[%s1297_s2 + $0xd8] sm:$0xff]  ;;  %v136_v55 = vld [vmem:[%s1297_s2 + $0xd0] sm:$0xff] }
  0x4f   :  { %386 = vmatprep.mubr.f32.mxu0 %v23_v56  ;;  %466 = vmatprep.mubr.f32.mxu1 %v55_v57  ;;  %v42_v56 = vld [vmem:[%s1296_s0 + $0xe0] sm:$0xff] }
  0x50   :  { %v74_v57 = vld [vmem:[%s1296_s0 + $0x1e0] sm:$0xff] }
  0x51   :  { %179 = vperm.xlu1 %663, %v117_v58   ;;  %174 = vperm.xlu0 %662, %v116_v59   ;;  %v45_v58 = vld [vmem:[%s1296_s0 + $0xf8] sm:$0xff] }
  0x52   :  { %387 = vmatmul.mubr.f32.gmra.mxu0 %v22_v60  ;;  %467 = vmatmul.mubr.f32.gmra.mxu1 %v54_v61  ;;  %v77_v59 = vld [vmem:[%s1296_s0 + $0x1f8] sm:$0xff]  ;;  %v139_v60 = vld [vmem:[%s1297_s2 + $0xe8] sm:$0xff]  ;;  %v138_v61 = vld [vmem:[%s1297_s2 + $0xe0] sm:$0xff] }
  0x53   :  { %391 = vmatprep.mubr.f32.mxu0 %v25_v62  ;;  %471 = vmatprep.mubr.f32.mxu1 %v57_v63  ;;  %v44_v62 = vld [vmem:[%s1296_s0 + $0xf0] sm:$0xff] }
  0x54   :  { %v76_v63 = vld [vmem:[%s1296_s0 + $0x1f0] sm:$0xff] }
  0x55   :  { %189 = vperm.xlu1 %663, %v119_v0   ;;  %184 = vperm.xlu0 %662, %v118_v1   ;;  %v141_v0 = vld [vmem:[%s1297_s2 + $0xf8] sm:$0xff]  ;;  %v140_v1 = vld [vmem:[%s1297_s2 + $0xf0] sm:$0xff] }
  0x56   :  { %392 = vmatmul.mubr.f32.gmra.mxu0 %v24_v2  ;;  %472 = vmatmul.mubr.f32.gmra.mxu1 %v56_v3 }
  0x57   :  { %396 = vmatprep.mubr.f32.mxu0 %v27_v4  ;;  %476 = vmatprep.mubr.f32.mxu1 %v59_v5 }
  0x59   :  { %199 = vperm.xlu1 %663, %v121_v6   ;;  %194 = vperm.xlu0 %662, %v120_v7  }
  0x5a   :  { %397 = vmatmul.mubr.f32.gmra.mxu0 %v26_v8  ;;  %477 = vmatmul.mubr.f32.gmra.mxu1 %v58_v9 }
  0x5b   :  { %401 = vmatprep.mubr.f32.mxu0 %v29_v10  ;;  %481 = vmatprep.mubr.f32.mxu1 %v61_v11 }
  0x5d   :  { %209 = vperm.xlu1 %663, %v123_v12   ;;  %204 = vperm.xlu0 %662, %v122_v13  }
  0x5e   :  { %402 = vmatmul.mubr.f32.gmra.mxu0 %v28_v14  ;;  %482 = vmatmul.mubr.f32.gmra.mxu1 %v60_v15 }
  0x5f   :  { %406 = vmatprep.mubr.f32.mxu0 %v31_v16  ;;  %486 = vmatprep.mubr.f32.mxu1 %v63_v17 }
  0x61   :  { %219 = vperm.xlu1 %663, %v125_v18   ;;  %214 = vperm.xlu0 %662, %v124_v19  }
  0x62   :  { %407 = vmatmul.mubr.f32.gmra.mxu0 %v30_v20  ;;  %487 = vmatmul.mubr.f32.gmra.mxu1 %v62_v21 }
  0x63   :  { %411 = vmatprep.mubr.f32.mxu0 %v33_v22  ;;  %491 = vmatprep.mubr.f32.mxu1 %v65_v23 }
  0x65   :  { %229 = vperm.xlu1 %663, %v127_v24   ;;  %224 = vperm.xlu0 %662, %v126_v25  }
  0x66   :  { %412 = vmatmul.mubr.f32.gmra.mxu0 %v32_v26  ;;  %492 = vmatmul.mubr.f32.gmra.mxu1 %v64_v27 }
  0x67   :  { %416 = vmatprep.mubr.f32.mxu0 %v35_v28  ;;  %496 = vmatprep.mubr.f32.mxu1 %v67_v29 }
  0x69   :  { %239 = vperm.xlu1 %663, %v129_v30   ;;  %234 = vperm.xlu0 %662, %v128_v31  }
  0x6a   :  { %417 = vmatmul.mubr.f32.gmra.mxu0 %v34_v32  ;;  %497 = vmatmul.mubr.f32.gmra.mxu1 %v66_v33 }
  0x6b   :  { %421 = vmatprep.mubr.f32.mxu0 %v37_v34  ;;  %501 = vmatprep.mubr.f32.mxu1 %v69_v35 }
  0x6d   :  { %249 = vperm.xlu1 %663, %v131_v36   ;;  %244 = vperm.xlu0 %662, %v130_v37  }
  0x6e   :  { %422 = vmatmul.mubr.f32.gmra.mxu0 %v36_v38  ;;  %502 = vmatmul.mubr.f32.gmra.mxu1 %v68_v39 }
  0x6f   :  { %426 = vmatprep.mubr.f32.mxu0 %v39_v40  ;;  %506 = vmatprep.mubr.f32.mxu1 %v71_v41 }
  0x71   :  { %259 = vperm.xlu1 %663, %v133_v42   ;;  %254 = vperm.xlu0 %662, %v132_v43  }
  0x72   :  { %427 = vmatmul.mubr.f32.gmra.mxu0 %v38_v44  ;;  %507 = vmatmul.mubr.f32.gmra.mxu1 %v70_v45 }
  0x73   :  { %431 = vmatprep.mubr.f32.mxu0 %v41_v46  ;;  %511 = vmatprep.mubr.f32.mxu1 %v73_v47 }
  0x75   :  { %269 = vperm.xlu1 %663, %v135_v48   ;;  %264 = vperm.xlu0 %662, %v134_v49  }
  0x76   :  { %432 = vmatmul.mubr.f32.gmra.mxu0 %v40_v50  ;;  %512 = vmatmul.mubr.f32.gmra.mxu1 %v72_v51 }
  0x77   :  { %436 = vmatprep.mubr.f32.mxu0 %v43_v52  ;;  %516 = vmatprep.mubr.f32.mxu1 %v75_v53 }
  0x79   :  { %279 = vperm.xlu1 %663, %v137_v54   ;;  %274 = vperm.xlu0 %662, %v136_v55  }
  0x7a   :  { %437 = vmatmul.mubr.f32.gmra.mxu0 %v42_v56  ;;  %517 = vmatmul.mubr.f32.gmra.mxu1 %v74_v57 }
  0x7b   :  { %441 = vmatprep.mubr.f32.mxu0 %v45_v58  ;;  %521 = vmatprep.mubr.f32.mxu1 %v77_v59 }
  0x7d   :  { %289 = vperm.xlu1 %663, %v139_v60   ;;  %284 = vperm.xlu0 %662, %v138_v61  }
  0x7e   :  { %442 = vmatmul.mubr.f32.gmra.mxu0 %v44_v62  ;;  %522 = vmatmul.mubr.f32.gmra.mxu1 %v76_v63 }
  0x81   :  { %299 = vperm.xlu1 %663, %v141_v0   ;;  %294 = vperm.xlu0 %662, %v140_v1  }
  0xc0   :  { %v145_v2 = vpop.permute.xlu0 %144  ;;  %v155_v3 = vpop.permute.xlu1 %154 }
  0xc4   :  { %v150_v4 = vpop.permute.xlu0 %149  ;;  %v160_v5 = vpop.permute.xlu1 %159 }
  0xc8   :  { %v165_v6 = vpop.permute.xlu0 %164  ;;  %v1134_v7 = vpop.permute.xlu1 %169 }
  0xcc   :  { %v1136_v8 = vpop.permute.xlu0 %174  ;;  %v1138_v9 = vpop.permute.xlu1 %179 }
  0xd0   :  { %v1140_v10 = vpop.permute.xlu0 %184  ;;  %v1142_v11 = vpop.permute.xlu1 %189 }
  0xd4   :  { %v1144_v12 = vpop.permute.xlu0 %194  ;;  %v1146_v13 = vpop.permute.xlu1 %199 }
  0xd8   :  { %v1148_v14 = vpop.permute.xlu0 %204  ;;  %v1150_v15 = vpop.permute.xlu1 %209 }
  0xdc   :  { %v1152_v16 = vpop.permute.xlu0 %214  ;;  %v1154_v17 = vpop.permute.xlu1 %219 }
  0xe0   :  { %v225_v18 = vpop.permute.xlu0 %224  ;;  %v230_v25 = vpop.permute.xlu1 %229 }
  0xe4   :  { %v235_v34 = vpop.permute.xlu0 %234  ;;  %v240_v43 = vpop.permute.xlu1 %239 }
  0xe8   :  { %v245_v52 = vpop.permute.xlu0 %244  ;;  %v250_v61 = vpop.permute.xlu1 %249 }
 0x102   :  { %v368_v19 = vpop.f32.mrf.mxu0  ;;  %v448_v20 = vpop.f32.mrf.mxu1 }
 0x103   :  { %v369_v21 = vadd.f32 %v368_v19, %v145_v2  ;;  %v449_v22 = vadd.f32 %v448_v20, %v225_v18 }
 0x104   :  { %v370_v23 = vpop.f32.mrf.mxu0  ;;  %v450_v24 = vpop.f32.mrf.mxu1 }
 0x105   :  { %v527_v26 = vmax.f32 %v369_v21, 0.0  ;;  %v543_v27 = vmax.f32 %v449_v22, 0.0 }
 0x106   :  { %v373_v28 = vpop.f32.mrf.mxu0  ;;  %v453_v29 = vpop.f32.mrf.mxu1 }
 0x107   :  { %560 = vst.msk [vmem:[%s1298_s3] sm:$0xff] %vm559_vm0, %v527_v26  ;;  %576 = vst.msk [vmem:[%s1298_s3 + $0x80] sm:$0xff] %vm559_vm0, %v543_v27  ;;  %v374_v30 = vadd.f32 %v373_v28, %v150_v4  ;;  %v454_v31 = vadd.f32 %v453_v29, %v230_v25  ;;  %v260_v25 = vpop.permute.xlu1 %259 }
 0x108   :  { %v375_v32 = vpop.f32.mrf.mxu0  ;;  %v455_v33 = vpop.f32.mrf.mxu1 }
 0x109   :  { %v528_v35 = vmax.f32 %v374_v30, 0.0  ;;  %v544_v36 = vmax.f32 %v454_v31, 0.0 }
 0x10a   :  { %v378_v37 = vpop.f32.mrf.mxu0  ;;  %v458_v38 = vpop.f32.mrf.mxu1 }
 0x10b   :  { %561 = vst.msk [vmem:[%s1298_s3 + $0x8] sm:$0xff] %vm559_vm0, %v528_v35  ;;  %577 = vst.msk [vmem:[%s1298_s3 + $0x88] sm:$0xff] %vm559_vm0, %v544_v36  ;;  %v379_v39 = vadd.f32 %v378_v37, %v155_v3  ;;  %v459_v40 = vadd.f32 %v458_v38, %v235_v34 }
 0x10c   :  { %v380_v41 = vpop.f32.mrf.mxu0  ;;  %v460_v42 = vpop.f32.mrf.mxu1 }
 0x10d   :  { %v529_v44 = vmax.f32 %v379_v39, 0.0  ;;  %v545_v45 = vmax.f32 %v459_v40, 0.0  ;;  %v270_v41 = vpop.permute.xlu1 %269 }
 0x10e   :  { %v383_v46 = vpop.f32.mrf.mxu0  ;;  %v463_v47 = vpop.f32.mrf.mxu1 }
 0x10f   :  { %562 = vst.msk [vmem:[%s1298_s3 + $0x10] sm:$0xff] %vm559_vm0, %v529_v44  ;;  %578 = vst.msk [vmem:[%s1298_s3 + $0x90] sm:$0xff] %vm559_vm0, %v545_v45  ;;  %v384_v48 = vadd.f32 %v383_v46, %v160_v5  ;;  %v464_v49 = vadd.f32 %v463_v47, %v240_v43 }
 0x110   :  { %v385_v50 = vpop.f32.mrf.mxu0  ;;  %v465_v51 = vpop.f32.mrf.mxu1 }
 0x111   :  { %v530_v53 = vmax.f32 %v384_v48, 0.0  ;;  %v546_v54 = vmax.f32 %v464_v49, 0.0 }
 0x112   :  { %v388_v55 = vpop.f32.mrf.mxu0  ;;  %v468_v56 = vpop.f32.mrf.mxu1 }
 0x113   :  { %563 = vst.msk [vmem:[%s1298_s3 + $0x18] sm:$0xff] %vm559_vm0, %v530_v53  ;;  %579 = vst.msk [vmem:[%s1298_s3 + $0x98] sm:$0xff] %vm559_vm0, %v546_v54  ;;  %v389_v57 = vadd.f32 %v388_v55, %v165_v6  ;;  %v469_v58 = vadd.f32 %v468_v56, %v245_v52  ;;  %v255_v6 = vpop.permute.xlu0 %254 }
 0x114   :  { %v390_v59 = vpop.f32.mrf.mxu0  ;;  %v470_v60 = vpop.f32.mrf.mxu1 }
 0x115   :  { %v531_v62 = vmax.f32 %v389_v57, 0.0  ;;  %v547_v63 = vmax.f32 %v469_v58, 0.0  ;;  %v280_v57 = vpop.permute.xlu1 %279 }
 0x116   :  { %v393_v0 = vpop.f32.mrf.mxu0  ;;  %v473_v1 = vpop.f32.mrf.mxu1 }
 0x117   :  { %564 = vst.msk [vmem:[%s1298_s3 + $0x20] sm:$0xff] %vm559_vm0, %v531_v62  ;;  %580 = vst.msk [vmem:[%s1298_s3 + $0xa0] sm:$0xff] %vm559_vm0, %v547_v63  ;;  %v394_v2 = vadd.f32 %v393_v0, %v1134_v7  ;;  %v474_v3 = vadd.f32 %v473_v1, %v250_v61  ;;  %v265_v33 = vpop.permute.xlu0 %264 }
 0x118   :  { %v395_v4 = vpop.f32.mrf.mxu0  ;;  %v475_v5 = vpop.f32.mrf.mxu1 }
 0x119   :  { %v532_v18 = vmax.f32 %v394_v2, 0.0  ;;  %v548_v19 = vmax.f32 %v474_v3, 0.0 }
 0x11a   :  { %v398_v20 = vpop.f32.mrf.mxu0  ;;  %v478_v21 = vpop.f32.mrf.mxu1 }
 0x11b   :  { %565 = vst.msk [vmem:[%s1298_s3 + $0x28] sm:$0xff] %vm559_vm0, %v532_v18  ;;  %581 = vst.msk [vmem:[%s1298_s3 + $0xa8] sm:$0xff] %vm559_vm0, %v548_v19  ;;  %v399_v7 = vadd.f32 %v398_v20, %v1136_v8  ;;  %v479_v22 = vadd.f32 %v478_v21, %v255_v6  ;;  %v275_v49 = vpop.permute.xlu0 %274  ;;  %v290_v20 = vpop.permute.xlu1 %289 }
 0x11c   :  { %v400_v23 = vpop.f32.mrf.mxu0  ;;  %v480_v24 = vpop.f32.mrf.mxu1 }
 0x11d   :  { %v533_v26 = vmax.f32 %v399_v7, 0.0  ;;  %v549_v27 = vmax.f32 %v479_v22, 0.0 }
 0x11e   :  { %v403_v28 = vpop.f32.mrf.mxu0  ;;  %v483_v29 = vpop.f32.mrf.mxu1 }
 0x11f   :  { %566 = vst.msk [vmem:[%s1298_s3 + $0x30] sm:$0xff] %vm559_vm0, %v533_v26  ;;  %582 = vst.msk [vmem:[%s1298_s3 + $0xb0] sm:$0xff] %vm559_vm0, %v549_v27  ;;  %v404_v8 = vadd.f32 %v403_v28, %v1138_v9  ;;  %v484_v30 = vadd.f32 %v483_v29, %v260_v25  ;;  %v285_v1 = vpop.permute.xlu0 %284 }
 0x120   :  { %v405_v31 = vpop.f32.mrf.mxu0  ;;  %v485_v32 = vpop.f32.mrf.mxu1 }
 0x121   :  { %v534_v34 = vmax.f32 %v404_v8, 0.0  ;;  %v550_v35 = vmax.f32 %v484_v30, 0.0 }
 0x122   :  { %v408_v36 = vpop.f32.mrf.mxu0  ;;  %v488_v37 = vpop.f32.mrf.mxu1 }
 0x123   :  { %567 = vst.msk [vmem:[%s1298_s3 + $0x38] sm:$0xff] %vm559_vm0, %v534_v34  ;;  %583 = vst.msk [vmem:[%s1298_s3 + $0xb8] sm:$0xff] %vm559_vm0, %v550_v35  ;;  %v409_v9 = vadd.f32 %v408_v36, %v1140_v10  ;;  %v489_v38 = vadd.f32 %v488_v37, %v265_v33  ;;  %v295_v27 = vpop.permute.xlu0 %294  ;;  %v300_v34 = vpop.permute.xlu1 %299 }
 0x124   :  { %v410_v39 = vpop.f32.mrf.mxu0  ;;  %v490_v40 = vpop.f32.mrf.mxu1 }
 0x125   :  { %v535_v42 = vmax.f32 %v409_v9, 0.0  ;;  %v551_v43 = vmax.f32 %v489_v38, 0.0 }
 0x126   :  { %v413_v44 = vpop.f32.mrf.mxu0  ;;  %v493_v45 = vpop.f32.mrf.mxu1 }
 0x127   :  { %568 = vst.msk [vmem:[%s1298_s3 + $0x40] sm:$0xff] %vm559_vm0, %v535_v42  ;;  %584 = vst.msk [vmem:[%s1298_s3 + $0xc0] sm:$0xff] %vm559_vm0, %v551_v43  ;;  %v414_v10 = vadd.f32 %v413_v44, %v1142_v11  ;;  %v494_v46 = vadd.f32 %v493_v45, %v270_v41 }
 0x128   :  { %v415_v47 = vpop.f32.mrf.mxu0  ;;  %v495_v48 = vpop.f32.mrf.mxu1 }
 0x129   :  { %v536_v50 = vmax.f32 %v414_v10, 0.0  ;;  %v552_v51 = vmax.f32 %v494_v46, 0.0 }
 0x12a   :  { %v418_v52 = vpop.f32.mrf.mxu0  ;;  %v498_v53 = vpop.f32.mrf.mxu1 }
 0x12b   :  { %569 = vst.msk [vmem:[%s1298_s3 + $0x48] sm:$0xff] %vm559_vm0, %v536_v50  ;;  %585 = vst.msk [vmem:[%s1298_s3 + $0xc8] sm:$0xff] %vm559_vm0, %v552_v51  ;;  %v419_v11 = vadd.f32 %v418_v52, %v1144_v12  ;;  %v499_v54 = vadd.f32 %v498_v53, %v275_v49 }
 0x12c   :  { %v420_v55 = vpop.f32.mrf.mxu0  ;;  %v500_v56 = vpop.f32.mrf.mxu1 }
 0x12d   :  { %v537_v58 = vmax.f32 %v419_v11, 0.0  ;;  %v553_v59 = vmax.f32 %v499_v54, 0.0 }
 0x12e   :  { %v423_v60 = vpop.f32.mrf.mxu0  ;;  %v503_v61 = vpop.f32.mrf.mxu1 }
 0x12f   :  { %570 = vst.msk [vmem:[%s1298_s3 + $0x50] sm:$0xff] %vm559_vm0, %v537_v58  ;;  %586 = vst.msk [vmem:[%s1298_s3 + $0xd0] sm:$0xff] %vm559_vm0, %v553_v59  ;;  %v424_v12 = vadd.f32 %v423_v60, %v1146_v13  ;;  %v504_v62 = vadd.f32 %v503_v61, %v280_v57 }
 0x130   :  { %v425_v63 = vpop.f32.mrf.mxu0  ;;  %v505_v0 = vpop.f32.mrf.mxu1 }
 0x131   :  { %v538_v2 = vmax.f32 %v424_v12, 0.0  ;;  %v554_v3 = vmax.f32 %v504_v62, 0.0 }
 0x132   :  { %v428_v4 = vpop.f32.mrf.mxu0  ;;  %v508_v5 = vpop.f32.mrf.mxu1 }
 0x133   :  { %571 = vst.msk [vmem:[%s1298_s3 + $0x58] sm:$0xff] %vm559_vm0, %v538_v2  ;;  %587 = vst.msk [vmem:[%s1298_s3 + $0xd8] sm:$0xff] %vm559_vm0, %v554_v3  ;;  %v429_v13 = vadd.f32 %v428_v4, %v1148_v14  ;;  %v509_v6 = vadd.f32 %v508_v5, %v285_v1 }
 0x134   :  { %v430_v18 = vpop.f32.mrf.mxu0  ;;  %v510_v19 = vpop.f32.mrf.mxu1 }
 0x135   :  { %v539_v21 = vmax.f32 %v429_v13, 0.0  ;;  %v555_v7 = vmax.f32 %v509_v6, 0.0 }
 0x136   :  { %v433_v22 = vpop.f32.mrf.mxu0  ;;  %v513_v23 = vpop.f32.mrf.mxu1 }
 0x137   :  { %572 = vst.msk [vmem:[%s1298_s3 + $0x60] sm:$0xff] %vm559_vm0, %v539_v21  ;;  %588 = vst.msk [vmem:[%s1298_s3 + $0xe0] sm:$0xff] %vm559_vm0, %v555_v7  ;;  %v434_v14 = vadd.f32 %v433_v22, %v1150_v15  ;;  %v514_v24 = vadd.f32 %v513_v23, %v290_v20 }
 0x138   :  { %v435_v25 = vpop.f32.mrf.mxu0  ;;  %v515_v26 = vpop.f32.mrf.mxu1 }
 0x139   :  { %v540_v28 = vmax.f32 %v434_v14, 0.0  ;;  %v556_v29 = vmax.f32 %v514_v24, 0.0 }
 0x13a   :  { %v438_v8 = vpop.f32.mrf.mxu0  ;;  %v518_v30 = vpop.f32.mrf.mxu1 }
 0x13b   :  { %573 = vst.msk [vmem:[%s1298_s3 + $0x68] sm:$0xff] %vm559_vm0, %v540_v28  ;;  %589 = vst.msk [vmem:[%s1298_s3 + $0xe8] sm:$0xff] %vm559_vm0, %v556_v29  ;;  %v439_v15 = vadd.f32 %v438_v8, %v1152_v16  ;;  %v519_v31 = vadd.f32 %v518_v30, %v295_v27 }
 0x13c   :  { %v440_v32 = vpop.f32.mrf.mxu0  ;;  %v520_v33 = vpop.f32.mrf.mxu1 }
 0x13d   :  { %v541_v35 = vmax.f32 %v439_v15, 0.0  ;;  %v557_v36 = vmax.f32 %v519_v31, 0.0 }
 0x13e   :  { %v443_v37 = vpop.f32.mrf.mxu0  ;;  %v523_v9 = vpop.f32.mrf.mxu1 }
 0x13f   :  { %574 = vst.msk [vmem:[%s1298_s3 + $0x70] sm:$0xff] %vm559_vm0, %v541_v35  ;;  %590 = vst.msk [vmem:[%s1298_s3 + $0xf0] sm:$0xff] %vm559_vm0, %v557_v36  ;;  %v444_v16 = vadd.f32 %v443_v37, %v1154_v17  ;;  %v524_v38 = vadd.f32 %v523_v9, %v300_v34 }
 0x140   :  { %v445_v39 = vpop.f32.mrf.mxu0  ;;  %v525_v40 = vpop.f32.mrf.mxu1 }
 0x141   :  { %v542_v41 = vmax.f32 %v444_v16, 0.0  ;;  %v558_v42 = vmax.f32 %v524_v38, 0.0 }
 0x143   :  { %575 = vst.msk [vmem:[%s1298_s3 + $0x78] sm:$0xff] %vm559_vm0, %v542_v41  ;;  %591 = vst.msk [vmem:[%s1298_s3 + $0xf8] sm:$0xff] %vm559_vm0, %v558_v42 }

// kernel: _lambda_.15
= control target key start
LH: loop header
LB: loop body
LE: loop exit
PB: predicated region body
PF: predicated region fallthrough
CT: control target
= control target key end

     0   :  { %v503_v3 = vmov 0   ;;  %vm400_vm0 = vcmask 277504   ;;  %s992_s1 = inlined_call_operand.vmem [shape: f32[256,162], index: 1, kind: input, shape index: {}]   ;;  %s993_s0 = inlined_call_operand.vmem [shape: f32[128,256], index: 0, kind: input, shape index: {}]   ;;  %s994_s2 = inlined_call_operand.vmem [shape: f32[128,1], index: 2, kind: input, shape index: {}]   ;;  %s995_s3 = inlined_call_operand.vmem [shape: f32[128,162], index: 3, kind: output, shape index: {}]  }
   0x1   :  { %v77_v0 = vld [vmem:[%s992_s1 + $0xf8] sm:$0xff]  ;;  %v76_v1 = vld [vmem:[%s992_s1 + $0xf0] sm:$0xff]  ;;  %v75_v2 = vld [vmem:[%s992_s1 + $0xe8] sm:$0xff]  ;;  %502 = vset.pattern.permute.xlu1 %v503_v3  ;;  %501 = vset.pattern.permute.xlu0 %v503_v3 }
   0x2   :  { %206 = vmatprep.subr.mxu0 %v77_v0  ;;  %436 = vmatprep.subr.mxu1 %v77_v0  ;;  %v74_v4 = vld [vmem:[%s992_s1 + $0xe0] sm:$0xff]  ;;  %v73_v5 = vld [vmem:[%s992_s1 + $0xd8] sm:$0xff]  ;;  %v72_v6 = vld [vmem:[%s992_s1 + $0xd0] sm:$0xff] }
   0x3   :  { %207 = vmatpush1.msra.mxu0 %v76_v1  ;;  %468 = vmatpush1.msra.mxu1 %v76_v1  ;;  %v71_v7 = vld [vmem:[%s992_s1 + $0xc8] sm:$0xff]  ;;  %v70_v8 = vld [vmem:[%s992_s1 + $0xc0] sm:$0xff]  ;;  %v69_v9 = vld [vmem:[%s992_s1 + $0xb8] sm:$0xff] }
   0x4   :  { %208 = vmatprep.subr.mxu0 %v75_v2  ;;  %437 = vmatprep.subr.mxu1 %v75_v2  ;;  %v68_v10 = vld [vmem:[%s992_s1 + $0xb0] sm:$0xff]  ;;  %v67_v11 = vld [vmem:[%s992_s1 + $0xa8] sm:$0xff]  ;;  %v66_v12 = vld [vmem:[%s992_s1 + $0xa0] sm:$0xff] }
   0x5   :  { %209 = vmatpush1.msra.mxu0 %v74_v4  ;;  %469 = vmatpush1.msra.mxu1 %v74_v4  ;;  %v65_v13 = vld [vmem:[%s992_s1 + $0x98] sm:$0xff]  ;;  %v64_v14 = vld [vmem:[%s992_s1 + $0x90] sm:$0xff]  ;;  %v63_v15 = vld [vmem:[%s992_s1 + $0x88] sm:$0xff] }
   0x6   :  { %210 = vmatprep.subr.mxu0 %v73_v5  ;;  %438 = vmatprep.subr.mxu1 %v73_v5  ;;  %v62_v16 = vld [vmem:[%s992_s1 + $0x80] sm:$0xff]  ;;  %v61_v17 = vld [vmem:[%s992_s1 + $0x78] sm:$0xff]  ;;  %v60_v18 = vld [vmem:[%s992_s1 + $0x70] sm:$0xff] }
   0x7   :  { %211 = vmatpush1.msra.mxu0 %v72_v6  ;;  %470 = vmatpush1.msra.mxu1 %v72_v6  ;;  %v59_v19 = vld [vmem:[%s992_s1 + $0x68] sm:$0xff]  ;;  %v58_v20 = vld [vmem:[%s992_s1 + $0x60] sm:$0xff]  ;;  %v57_v21 = vld [vmem:[%s992_s1 + $0x58] sm:$0xff] }
   0x8   :  { %212 = vmatprep.subr.mxu0 %v71_v7  ;;  %439 = vmatprep.subr.mxu1 %v71_v7  ;;  %v56_v22 = vld [vmem:[%s992_s1 + $0x50] sm:$0xff]  ;;  %v55_v23 = vld [vmem:[%s992_s1 + $0x48] sm:$0xff]  ;;  %v54_v24 = vld [vmem:[%s992_s1 + $0x40] sm:$0xff] }
   0x9   :  { %213 = vmatpush1.msra.mxu0 %v70_v8  ;;  %471 = vmatpush1.msra.mxu1 %v70_v8  ;;  %v53_v25 = vld [vmem:[%s992_s1 + $0x38] sm:$0xff]  ;;  %v52_v26 = vld [vmem:[%s992_s1 + $0x30] sm:$0xff]  ;;  %v51_v27 = vld [vmem:[%s992_s1 + $0x28] sm:$0xff] }
   0xa   :  { %214 = vmatprep.subr.mxu0 %v69_v9  ;;  %440 = vmatprep.subr.mxu1 %v69_v9  ;;  %v50_v28 = vld [vmem:[%s992_s1 + $0x20] sm:$0xff]  ;;  %v49_v29 = vld [vmem:[%s992_s1 + $0x18] sm:$0xff]  ;;  %v48_v30 = vld [vmem:[%s992_s1 + $0x10] sm:$0xff] }
   0xb   :  { %215 = vmatpush1.msra.mxu0 %v68_v10  ;;  %472 = vmatpush1.msra.mxu1 %v68_v10  ;;  %v47_v31 = vld [vmem:[%s992_s1 + $0x8] sm:$0xff]  ;;  %v46_v32 = vld [vmem:[%s992_s1] sm:$0xff]  ;;  %v109_v33 = vld [vmem:[%s992_s1 + $0x1f8] sm:$0xff] }
   0xc   :  { %216 = vmatprep.subr.mxu0 %v67_v11  ;;  %441 = vmatprep.subr.mxu1 %v67_v11  ;;  %v108_v34 = vld [vmem:[%s992_s1 + $0x1f0] sm:$0xff]  ;;  %v107_v35 = vld [vmem:[%s992_s1 + $0x1e8] sm:$0xff]  ;;  %v106_v36 = vld [vmem:[%s992_s1 + $0x1e0] sm:$0xff] }
   0xd   :  { %217 = vmatpush1.msra.mxu0 %v66_v12  ;;  %473 = vmatpush1.msra.mxu1 %v66_v12  ;;  %v105_v37 = vld [vmem:[%s992_s1 + $0x1d8] sm:$0xff]  ;;  %v104_v38 = vld [vmem:[%s992_s1 + $0x1d0] sm:$0xff]  ;;  %v103_v39 = vld [vmem:[%s992_s1 + $0x1c8] sm:$0xff] }
   0xe   :  { %218 = vmatprep.subr.mxu0 %v65_v13  ;;  %442 = vmatprep.subr.mxu1 %v65_v13  ;;  %v102_v40 = vld [vmem:[%s992_s1 + $0x1c0] sm:$0xff]  ;;  %v101_v41 = vld [vmem:[%s992_s1 + $0x1b8] sm:$0xff]  ;;  %v100_v42 = vld [vmem:[%s992_s1 + $0x1b0] sm:$0xff] }
   0xf   :  { %219 = vmatpush1.msra.mxu0 %v64_v14  ;;  %474 = vmatpush1.msra.mxu1 %v64_v14  ;;  %v99_v43 = vld [vmem:[%s992_s1 + $0x1a8] sm:$0xff]  ;;  %v98_v44 = vld [vmem:[%s992_s1 + $0x1a0] sm:$0xff]  ;;  %v97_v45 = vld [vmem:[%s992_s1 + $0x198] sm:$0xff] }
  0x10   :  { %220 = vmatprep.subr.mxu0 %v63_v15  ;;  %443 = vmatprep.subr.mxu1 %v63_v15  ;;  %v96_v46 = vld [vmem:[%s992_s1 + $0x190] sm:$0xff]  ;;  %v95_v47 = vld [vmem:[%s992_s1 + $0x188] sm:$0xff]  ;;  %v94_v48 = vld [vmem:[%s992_s1 + $0x180] sm:$0xff] }
  0x11   :  { %221 = vmatpush1.msra.mxu0 %v62_v16  ;;  %475 = vmatpush1.msra.mxu1 %v62_v16  ;;  %v93_v49 = vld [vmem:[%s992_s1 + $0x178] sm:$0xff]  ;;  %v92_v50 = vld [vmem:[%s992_s1 + $0x170] sm:$0xff]  ;;  %v91_v51 = vld [vmem:[%s992_s1 + $0x168] sm:$0xff] }
  0x12   :  { %222 = vmatprep.subr.mxu0 %v61_v17  ;;  %444 = vmatprep.subr.mxu1 %v61_v17  ;;  %v90_v52 = vld [vmem:[%s992_s1 + $0x160] sm:$0xff]  ;;  %v89_v53 = vld [vmem:[%s992_s1 + $0x158] sm:$0xff]  ;;  %v88_v54 = vld [vmem:[%s992_s1 + $0x150] sm:$0xff] }
  0x13   :  { %223 = vmatpush1.msra.mxu0 %v60_v18  ;;  %476 = vmatpush1.msra.mxu1 %v60_v18  ;;  %v87_v55 = vld [vmem:[%s992_s1 + $0x148] sm:$0xff]  ;;  %v86_v56 = vld [vmem:[%s992_s1 + $0x140] sm:$0xff]  ;;  %v85_v57 = vld [vmem:[%s992_s1 + $0x138] sm:$0xff] }
  0x14   :  { %224 = vmatprep.subr.mxu0 %v59_v19  ;;  %445 = vmatprep.subr.mxu1 %v59_v19  ;;  %v84_v58 = vld [vmem:[%s992_s1 + $0x130] sm:$0xff]  ;;  %v83_v59 = vld [vmem:[%s992_s1 + $0x128] sm:$0xff]  ;;  %v82_v60 = vld [vmem:[%s992_s1 + $0x120] sm:$0xff] }
  0x15   :  { %225 = vmatpush1.msra.mxu0 %v58_v20  ;;  %477 = vmatpush1.msra.mxu1 %v58_v20  ;;  %v81_v61 = vld [vmem:[%s992_s1 + $0x118] sm:$0xff]  ;;  %v80_v62 = vld [vmem:[%s992_s1 + $0x110] sm:$0xff]  ;;  %v79_v63 = vld [vmem:[%s992_s1 + $0x108] sm:$0xff] }
  0x16   :  { %226 = vmatprep.subr.mxu0 %v57_v21  ;;  %446 = vmatprep.subr.mxu1 %v57_v21  ;;  %v78_v0 = vld [vmem:[%s992_s1 + $0x100] sm:$0xff]  ;;  %v15_v1 = vld [vmem:[%s993_s0 + $0x8] sm:$0xff]  ;;  %v17_v5 = vld [vmem:[%s993_s0 + $0x18] sm:$0xff] }
  0x17   :  { %227 = vmatpush1.msra.mxu0 %v56_v22  ;;  %478 = vmatpush1.msra.mxu1 %v56_v22  ;;  %v31_v2 = vld [vmem:[%s993_s0 + $0x88] sm:$0xff]  ;;  %v14_v3 = vld [vmem:[%s993_s0] sm:$0xff]  ;;  %v33_v6 = vld [vmem:[%s993_s0 + $0x98] sm:$0xff] }
  0x18   :  { %228 = vmatprep.subr.mxu0 %v55_v23  ;;  %447 = vmatprep.subr.mxu1 %v55_v23  ;;  %v30_v4 = vld [vmem:[%s993_s0 + $0x80] sm:$0xff]  ;;  %v112_v7 = vld [vmem:[%s994_s2 + $0x10] sm:$0xff]  ;;  %v19_v11 = vld [vmem:[%s993_s0 + $0x28] sm:$0xff] }
  0x19   :  { %229 = vmatpush1.msra.mxu0 %v54_v24  ;;  %479 = vmatpush1.msra.mxu1 %v54_v24  ;;  %v110_v8 = vld [vmem:[%s994_s2] sm:$0xff]  ;;  %v16_v9 = vld [vmem:[%s993_s0 + $0x10] sm:$0xff]  ;;  %v35_v12 = vld [vmem:[%s993_s0 + $0xa8] sm:$0xff] }
  0x1a   :  { %230 = vmatprep.subr.mxu0 %v53_v25  ;;  %448 = vmatprep.subr.mxu1 %v53_v25  ;;  %v32_v10 = vld [vmem:[%s993_s0 + $0x90] sm:$0xff]  ;;  %v113_v13 = vld [vmem:[%s994_s2 + $0x18] sm:$0xff]  ;;  %v111_v14 = vld [vmem:[%s994_s2 + $0x8] sm:$0xff] }
  0x1b   :  { %231 = vmatpush1.msra.mxu0 %v52_v26  ;;  %480 = vmatpush1.msra.mxu1 %v52_v26  ;;  %v18_v15 = vld [vmem:[%s993_s0 + $0x20] sm:$0xff]  ;;  %v21_v17 = vld [vmem:[%s993_s0 + $0x38] sm:$0xff]  ;;  %v115_v19 = vld [vmem:[%s994_s2 + $0x28] sm:$0xff] }
  0x1c   :  { %232 = vmatprep.subr.mxu0 %v51_v27  ;;  %449 = vmatprep.subr.mxu1 %v51_v27  ;;  %v34_v16 = vld [vmem:[%s993_s0 + $0xa0] sm:$0xff]  ;;  %v37_v18 = vld [vmem:[%s993_s0 + $0xb8] sm:$0xff]  ;;  %v20_v21 = vld [vmem:[%s993_s0 + $0x30] sm:$0xff] }
  0x1d   :  { %233 = vmatpush1.msra.mxu0 %v50_v28  ;;  %481 = vmatpush1.msra.mxu1 %v50_v28  ;;  %v114_v20 = vld [vmem:[%s994_s2 + $0x20] sm:$0xff]  ;;  %v36_v22 = vld [vmem:[%s993_s0 + $0xb0] sm:$0xff]  ;;  %v23_v23 = vld [vmem:[%s993_s0 + $0x48] sm:$0xff] }
  0x1e   :  { %234 = vmatprep.subr.mxu0 %v49_v29  ;;  %450 = vmatprep.subr.mxu1 %v49_v29  ;;  %v39_v24 = vld [vmem:[%s993_s0 + $0xc8] sm:$0xff]  ;;  %v117_v25 = vld [vmem:[%s994_s2 + $0x38] sm:$0xff]  ;;  %v116_v26 = vld [vmem:[%s994_s2 + $0x30] sm:$0xff] }
  0x1f   :  { %235 = vmatpush1.msra.mxu0 %v48_v30  ;;  %482 = vmatpush1.msra.mxu1 %v48_v30  ;;  %v22_v27 = vld [vmem:[%s993_s0 + $0x40] sm:$0xff]  ;;  %v25_v29 = vld [vmem:[%s993_s0 + $0x58] sm:$0xff] }
  0x20   :  { %236 = vmatprep.subr.mxu0 %v47_v31  ;;  %451 = vmatprep.subr.mxu1 %v47_v31  ;;  %v38_v28 = vld [vmem:[%s993_s0 + $0xc0] sm:$0xff]  ;;  %v41_v30 = vld [vmem:[%s993_s0 + $0xd8] sm:$0xff]  ;;  %v119_v31 = vld [vmem:[%s994_s2 + $0x48] sm:$0xff] }
  0x21   :  { %237 = vmatpush1.msra.mxu0 %v46_v32  ;;  %483 = vmatpush1.msra.mxu1 %v46_v32  ;;  %v118_v32 = vld [vmem:[%s994_s2 + $0x40] sm:$0xff] }
  0x22   :  { %238 = vmatprep.subr.mxu0 %v109_v33  ;;  %452 = vmatprep.subr.mxu1 %v109_v33  ;;  %v24_v33 = vld [vmem:[%s993_s0 + $0x50] sm:$0xff] }
  0x23   :  { %239 = vmatpush2.msra.mxu0 %v108_v34  ;;  %484 = vmatpush2.msra.mxu1 %v108_v34  ;;  %v40_v34 = vld [vmem:[%s993_s0 + $0xd0] sm:$0xff] }
  0x24   :  { %240 = vmatprep.subr.mxu0 %v107_v35  ;;  %453 = vmatprep.subr.mxu1 %v107_v35  ;;  %v27_v35 = vld [vmem:[%s993_s0 + $0x68] sm:$0xff] }
  0x25   :  { %241 = vmatpush2.msra.mxu0 %v106_v36  ;;  %485 = vmatpush2.msra.mxu1 %v106_v36  ;;  %v43_v36 = vld [vmem:[%s993_s0 + $0xe8] sm:$0xff] }
  0x26   :  { %242 = vmatprep.subr.mxu0 %v105_v37  ;;  %454 = vmatprep.subr.mxu1 %v105_v37  ;;  %v121_v37 = vld [vmem:[%s994_s2 + $0x58] sm:$0xff] }
  0x27   :  { %243 = vmatpush2.msra.mxu0 %v104_v38  ;;  %486 = vmatpush2.msra.mxu1 %v104_v38  ;;  %v120_v38 = vld [vmem:[%s994_s2 + $0x50] sm:$0xff] }
  0x28   :  { %244 = vmatprep.subr.mxu0 %v103_v39  ;;  %455 = vmatprep.subr.mxu1 %v103_v39  ;;  %v26_v39 = vld [vmem:[%s993_s0 + $0x60] sm:$0xff] }
  0x29   :  { %245 = vmatpush2.msra.mxu0 %v102_v40  ;;  %487 = vmatpush2.msra.mxu1 %v102_v40  ;;  %v42_v40 = vld [vmem:[%s993_s0 + $0xe0] sm:$0xff] }
  0x2a   :  { %246 = vmatprep.subr.mxu0 %v101_v41  ;;  %456 = vmatprep.subr.mxu1 %v101_v41  ;;  %v29_v41 = vld [vmem:[%s993_s0 + $0x78] sm:$0xff] }
  0x2b   :  { %247 = vmatpush2.msra.mxu0 %v100_v42  ;;  %488 = vmatpush2.msra.mxu1 %v100_v42  ;;  %v45_v42 = vld [vmem:[%s993_s0 + $0xf8] sm:$0xff] }
  0x2c   :  { %248 = vmatprep.subr.mxu0 %v99_v43  ;;  %457 = vmatprep.subr.mxu1 %v99_v43  ;;  %v123_v43 = vld [vmem:[%s994_s2 + $0x68] sm:$0xff] }
  0x2d   :  { %249 = vmatpush2.msra.mxu0 %v98_v44  ;;  %489 = vmatpush2.msra.mxu1 %v98_v44  ;;  %v122_v44 = vld [vmem:[%s994_s2 + $0x60] sm:$0xff] }
  0x2e   :  { %250 = vmatprep.subr.mxu0 %v97_v45  ;;  %458 = vmatprep.subr.mxu1 %v97_v45  ;;  %v28_v45 = vld [vmem:[%s993_s0 + $0x70] sm:$0xff] }
  0x2f   :  { %251 = vmatpush2.msra.mxu0 %v96_v46  ;;  %490 = vmatpush2.msra.mxu1 %v96_v46  ;;  %v44_v46 = vld [vmem:[%s993_s0 + $0xf0] sm:$0xff] }
  0x30   :  { %252 = vmatprep.subr.mxu0 %v95_v47  ;;  %459 = vmatprep.subr.mxu1 %v95_v47  ;;  %v125_v47 = vld [vmem:[%s994_s2 + $0x78] sm:$0xff] }
  0x31   :  { %253 = vmatpush2.msra.mxu0 %v94_v48  ;;  %491 = vmatpush2.msra.mxu1 %v94_v48  ;;  %v124_v48 = vld [vmem:[%s994_s2 + $0x70] sm:$0xff] }
  0x32   :  { %254 = vmatprep.subr.mxu0 %v93_v49  ;;  %460 = vmatprep.subr.mxu1 %v93_v49 }
  0x33   :  { %255 = vmatpush2.msra.mxu0 %v92_v50  ;;  %492 = vmatpush2.msra.mxu1 %v92_v50 }
  0x34   :  { %256 = vmatprep.subr.mxu0 %v91_v51  ;;  %461 = vmatprep.subr.mxu1 %v91_v51 }
  0x35   :  { %257 = vmatpush2.msra.mxu0 %v90_v52  ;;  %493 = vmatpush2.msra.mxu1 %v90_v52 }
  0x36   :  { %258 = vmatprep.subr.mxu0 %v89_v53  ;;  %462 = vmatprep.subr.mxu1 %v89_v53 }
  0x37   :  { %259 = vmatpush2.msra.mxu0 %v88_v54  ;;  %494 = vmatpush2.msra.mxu1 %v88_v54 }
  0x38   :  { %260 = vmatprep.subr.mxu0 %v87_v55  ;;  %463 = vmatprep.subr.mxu1 %v87_v55 }
  0x39   :  { %261 = vmatpush2.msra.mxu0 %v86_v56  ;;  %495 = vmatpush2.msra.mxu1 %v86_v56 }
  0x3a   :  { %262 = vmatprep.subr.mxu0 %v85_v57  ;;  %464 = vmatprep.subr.mxu1 %v85_v57 }
  0x3b   :  { %263 = vmatpush2.msra.mxu0 %v84_v58  ;;  %496 = vmatpush2.msra.mxu1 %v84_v58 }
  0x3c   :  { %264 = vmatprep.subr.mxu0 %v83_v59  ;;  %465 = vmatprep.subr.mxu1 %v83_v59 }
  0x3d   :  { %265 = vmatpush2.msra.mxu0 %v82_v60  ;;  %497 = vmatpush2.msra.mxu1 %v82_v60 }
  0x3e   :  { %266 = vmatprep.subr.mxu0 %v81_v61  ;;  %466 = vmatprep.subr.mxu1 %v81_v61 }
  0x3f   :  { %267 = vmatpush2.msra.mxu0 %v80_v62  ;;  %498 = vmatpush2.msra.mxu1 %v80_v62 }
  0x40   :  { %268 = vmatprep.subr.mxu0 %v79_v63  ;;  %467 = vmatprep.subr.mxu1 %v79_v63 }
  0x41   :  { %269 = vmatpush2.msra.mxu0 %v78_v0  ;;  %499 = vmatpush2.msra.mxu1 %v78_v0 }
  0x42   :  { %270 = vmatprep.mubr.f32.mxu0 %v15_v1  ;;  %318 = vmatprep.mubr.f32.mxu1 %v31_v2 }
  0x43   :  { %271 = vmatmul.mubr.f32.vlgmr.msra.gmra.mxu0 %v14_v3  ;;  %319 = vmatmul.mubr.f32.vlgmr.msra.gmra.mxu1 %v30_v4 }
  0x44   :  { %276 = vmatprep.mubr.f32.mxu0 %v17_v5  ;;  %324 = vmatprep.mubr.f32.mxu1 %v33_v6 }
  0x45   :  { %138 = vperm.xlu1 %502, %v112_v7   ;;  %128 = vperm.xlu0 %501, %v110_v8  }
  0x47   :  { %277 = vmatmul.mubr.f32.gmra.mxu0 %v16_v9  ;;  %325 = vmatmul.mubr.f32.gmra.mxu1 %v32_v10 }
  0x48   :  { %282 = vmatprep.mubr.f32.mxu0 %v19_v11  ;;  %330 = vmatprep.mubr.f32.mxu1 %v35_v12 }
  0x49   :  { %143 = vperm.xlu1 %502, %v113_v13   ;;  %133 = vperm.xlu0 %501, %v111_v14  }
  0x4b   :  { %283 = vmatmul.mubr.f32.gmra.mxu0 %v18_v15  ;;  %331 = vmatmul.mubr.f32.gmra.mxu1 %v34_v16 }
  0x4c   :  { %288 = vmatprep.mubr.f32.mxu0 %v21_v17  ;;  %336 = vmatprep.mubr.f32.mxu1 %v37_v18 }
  0x4d   :  { %153 = vperm.xlu1 %502, %v115_v19   ;;  %148 = vperm.xlu0 %501, %v114_v20  }
  0x4f   :  { %289 = vmatmul.mubr.f32.gmra.mxu0 %v20_v21  ;;  %337 = vmatmul.mubr.f32.gmra.mxu1 %v36_v22 }
  0x50   :  { %294 = vmatprep.mubr.f32.mxu0 %v23_v23  ;;  %342 = vmatprep.mubr.f32.mxu1 %v39_v24 }
  0x51   :  { %163 = vperm.xlu1 %502, %v117_v25   ;;  %158 = vperm.xlu0 %501, %v116_v26  }
  0x53   :  { %295 = vmatmul.mubr.f32.gmra.mxu0 %v22_v27  ;;  %343 = vmatmul.mubr.f32.gmra.mxu1 %v38_v28 }
  0x54   :  { %300 = vmatprep.mubr.f32.mxu0 %v25_v29  ;;  %348 = vmatprep.mubr.f32.mxu1 %v41_v30 }
  0x55   :  { %173 = vperm.xlu1 %502, %v119_v31   ;;  %168 = vperm.xlu0 %501, %v118_v32  }
  0x57   :  { %301 = vmatmul.mubr.f32.gmra.mxu0 %v24_v33  ;;  %349 = vmatmul.mubr.f32.gmra.mxu1 %v40_v34 }
  0x58   :  { %306 = vmatprep.mubr.f32.mxu0 %v27_v35  ;;  %354 = vmatprep.mubr.f32.mxu1 %v43_v36 }
  0x59   :  { %183 = vperm.xlu1 %502, %v121_v37   ;;  %178 = vperm.xlu0 %501, %v120_v38  }
  0x5b   :  { %307 = vmatmul.mubr.f32.gmra.mxu0 %v26_v39  ;;  %355 = vmatmul.mubr.f32.gmra.mxu1 %v42_v40 }
  0x5c   :  { %312 = vmatprep.mubr.f32.mxu0 %v29_v41  ;;  %360 = vmatprep.mubr.f32.mxu1 %v45_v42 }
  0x5d   :  { %193 = vperm.xlu1 %502, %v123_v43   ;;  %188 = vperm.xlu0 %501, %v122_v44  }
  0x5f   :  { %313 = vmatmul.mubr.f32.gmra.mxu0 %v28_v45  ;;  %361 = vmatmul.mubr.f32.gmra.mxu1 %v44_v46 }
  0x61   :  { %203 = vperm.xlu1 %502, %v125_v47   ;;  %198 = vperm.xlu0 %501, %v124_v48  }
  0xc0   :  { %v129_v49 = vpop.permute.xlu0 %128  ;;  %v139_v50 = vpop.permute.xlu1 %138 }
  0xc4   :  { %v134_v51 = vpop.permute.xlu0 %133  ;;  %v860_v52 = vpop.permute.xlu1 %143 }
  0xc8   :  { %v862_v53 = vpop.permute.xlu0 %148  ;;  %v864_v54 = vpop.permute.xlu1 %153 }
  0xcc   :  { %v866_v55 = vpop.permute.xlu0 %158  ;;  %v868_v56 = vpop.permute.xlu1 %163 }
  0xd0   :  { %v169_v57 = vpop.permute.xlu0 %168  ;;  %v174_v0 = vpop.permute.xlu1 %173 }
  0xd4   :  { %v179_v13 = vpop.permute.xlu0 %178  ;;  %v184_v26 = vpop.permute.xlu1 %183 }
  0xd8   :  { %v189_v39 = vpop.permute.xlu0 %188 }
 0x103   :  { %v272_v58 = vpop.f32.mrf.mxu0  ;;  %v320_v59 = vpop.f32.mrf.mxu1 }
 0x104   :  { %v273_v60 = vadd.f32 %v272_v58, %v129_v49  ;;  %v321_v61 = vadd.f32 %v320_v59, %v169_v57 }
 0x105   :  { %v274_v62 = vpop.f32.mrf.mxu0  ;;  %v322_v63 = vpop.f32.mrf.mxu1 }
 0x106   :  { %v367_v1 = vmax.f32 %v273_v60, 0.0  ;;  %v383_v2 = vmax.f32 %v321_v61, 0.0  ;;  %v275_v3 = vadd.f32 %v274_v62, %v129_v49  ;;  %v323_v4 = vadd.f32 %v322_v63, %v169_v57  ;;  %v194_v57 = vpop.permute.xlu1 %193 }
 0x107   :  { %v278_v5 = vpop.f32.mrf.mxu0  ;;  %v326_v6 = vpop.f32.mrf.mxu1 }
 0x108   :  { %399 = vst [vmem:[%s995_s3] sm:$0xff] %v367_v1  ;;  %416 = vst [vmem:[%s995_s3 + $0x80] sm:$0xff] %v383_v2  ;;  %v368_v7 = vmax.f32 %v275_v3, 0.0  ;;  %v384_v8 = vmax.f32 %v323_v4, 0.0  ;;  %v279_v9 = vadd.f32 %v278_v5, %v134_v51  ;;  %v327_v10 = vadd.f32 %v326_v6, %v174_v0  ;;  %v199_v5 = vpop.permute.xlu0 %198 }
 0x109   :  { %v280_v11 = vpop.f32.mrf.mxu0  ;;  %v328_v12 = vpop.f32.mrf.mxu1 }
 0x10a   :  { %401 = vst.msk [vmem:[%s995_s3 + $0x8] sm:$0xff] %vm400_vm0, %v368_v7  ;;  %417 = vst.msk [vmem:[%s995_s3 + $0x88] sm:$0xff] %vm400_vm0, %v384_v8  ;;  %v369_v14 = vmax.f32 %v279_v9, 0.0  ;;  %v385_v15 = vmax.f32 %v327_v10, 0.0  ;;  %v281_v16 = vadd.f32 %v280_v11, %v134_v51  ;;  %v329_v17 = vadd.f32 %v328_v12, %v174_v0 }
 0x10b   :  { %v284_v18 = vpop.f32.mrf.mxu0  ;;  %v332_v19 = vpop.f32.mrf.mxu1 }
 0x10c   :  { %402 = vst [vmem:[%s995_s3 + $0x10] sm:$0xff] %v369_v14  ;;  %418 = vst [vmem:[%s995_s3 + $0x90] sm:$0xff] %v385_v15  ;;  %v370_v20 = vmax.f32 %v281_v16, 0.0  ;;  %v386_v21 = vmax.f32 %v329_v17, 0.0  ;;  %v285_v22 = vadd.f32 %v284_v18, %v139_v50  ;;  %v333_v23 = vadd.f32 %v332_v19, %v179_v13  ;;  %v204_v17 = vpop.permute.xlu1 %203 }
 0x10d   :  { %v286_v24 = vpop.f32.mrf.mxu0  ;;  %v334_v25 = vpop.f32.mrf.mxu1 }
 0x10e   :  { %403 = vst.msk [vmem:[%s995_s3 + $0x18] sm:$0xff] %vm400_vm0, %v370_v20  ;;  %419 = vst.msk [vmem:[%s995_s3 + $0x98] sm:$0xff] %vm400_vm0, %v386_v21  ;;  %v371_v27 = vmax.f32 %v285_v22, 0.0  ;;  %v387_v28 = vmax.f32 %v333_v23, 0.0  ;;  %v287_v29 = vadd.f32 %v286_v24, %v139_v50  ;;  %v335_v30 = vadd.f32 %v334_v25, %v179_v13 }
 0x10f   :  { %v290_v31 = vpop.f32.mrf.mxu0  ;;  %v338_v32 = vpop.f32.mrf.mxu1 }
 0x110   :  { %404 = vst [vmem:[%s995_s3 + $0x20] sm:$0xff] %v371_v27  ;;  %420 = vst [vmem:[%s995_s3 + $0xa0] sm:$0xff] %v387_v28  ;;  %v372_v33 = vmax.f32 %v287_v29, 0.0  ;;  %v388_v34 = vmax.f32 %v335_v30, 0.0  ;;  %v291_v35 = vadd.f32 %v290_v31, %v860_v52  ;;  %v339_v36 = vadd.f32 %v338_v32, %v184_v26 }
 0x111   :  { %v292_v37 = vpop.f32.mrf.mxu0  ;;  %v340_v38 = vpop.f32.mrf.mxu1 }
 0x112   :  { %405 = vst.msk [vmem:[%s995_s3 + $0x28] sm:$0xff] %vm400_vm0, %v372_v33  ;;  %421 = vst.msk [vmem:[%s995_s3 + $0xa8] sm:$0xff] %vm400_vm0, %v388_v34  ;;  %v373_v40 = vmax.f32 %v291_v35, 0.0  ;;  %v389_v41 = vmax.f32 %v339_v36, 0.0  ;;  %v293_v42 = vadd.f32 %v292_v37, %v860_v52  ;;  %v341_v43 = vadd.f32 %v340_v38, %v184_v26 }
 0x113   :  { %v296_v44 = vpop.f32.mrf.mxu0  ;;  %v344_v45 = vpop.f32.mrf.mxu1 }
 0x114   :  { %406 = vst [vmem:[%s995_s3 + $0x30] sm:$0xff] %v373_v40  ;;  %422 = vst [vmem:[%s995_s3 + $0xb0] sm:$0xff] %v389_v41  ;;  %v374_v46 = vmax.f32 %v293_v42, 0.0  ;;  %v390_v47 = vmax.f32 %v341_v43, 0.0  ;;  %v297_v48 = vadd.f32 %v296_v44, %v862_v53  ;;  %v345_v49 = vadd.f32 %v344_v45, %v189_v39 }
 0x115   :  { %v298_v50 = vpop.f32.mrf.mxu0  ;;  %v346_v51 = vpop.f32.mrf.mxu1 }
 0x116   :  { %407 = vst.msk [vmem:[%s995_s3 + $0x38] sm:$0xff] %vm400_vm0, %v374_v46  ;;  %423 = vst.msk [vmem:[%s995_s3 + $0xb8] sm:$0xff] %vm400_vm0, %v390_v47  ;;  %v375_v52 = vmax.f32 %v297_v48, 0.0  ;;  %v391_v58 = vmax.f32 %v345_v49, 0.0  ;;  %v299_v59 = vadd.f32 %v298_v50, %v862_v53  ;;  %v347_v60 = vadd.f32 %v346_v51, %v189_v39 }
 0x117   :  { %v302_v61 = vpop.f32.mrf.mxu0  ;;  %v350_v62 = vpop.f32.mrf.mxu1 }
 0x118   :  { %408 = vst [vmem:[%s995_s3 + $0x40] sm:$0xff] %v375_v52  ;;  %424 = vst [vmem:[%s995_s3 + $0xc0] sm:$0xff] %v391_v58  ;;  %v376_v63 = vmax.f32 %v299_v59, 0.0  ;;  %v392_v0 = vmax.f32 %v347_v60, 0.0  ;;  %v303_v1 = vadd.f32 %v302_v61, %v864_v54  ;;  %v351_v2 = vadd.f32 %v350_v62, %v194_v57 }
 0x119   :  { %v304_v3 = vpop.f32.mrf.mxu0  ;;  %v352_v4 = vpop.f32.mrf.mxu1 }
 0x11a   :  { %409 = vst.msk [vmem:[%s995_s3 + $0x48] sm:$0xff] %vm400_vm0, %v376_v63  ;;  %425 = vst.msk [vmem:[%s995_s3 + $0xc8] sm:$0xff] %vm400_vm0, %v392_v0  ;;  %v377_v53 = vmax.f32 %v303_v1, 0.0  ;;  %v393_v6 = vmax.f32 %v351_v2, 0.0  ;;  %v305_v7 = vadd.f32 %v304_v3, %v864_v54  ;;  %v353_v8 = vadd.f32 %v352_v4, %v194_v57 }
 0x11b   :  { %v308_v9 = vpop.f32.mrf.mxu0  ;;  %v356_v10 = vpop.f32.mrf.mxu1 }
 0x11c   :  { %410 = vst [vmem:[%s995_s3 + $0x50] sm:$0xff] %v377_v53  ;;  %426 = vst [vmem:[%s995_s3 + $0xd0] sm:$0xff] %v393_v6  ;;  %v378_v11 = vmax.f32 %v305_v7, 0.0  ;;  %v394_v12 = vmax.f32 %v353_v8, 0.0  ;;  %v309_v13 = vadd.f32 %v308_v9, %v866_v55  ;;  %v357_v14 = vadd.f32 %v356_v10, %v199_v5 }
 0x11d   :  { %v310_v15 = vpop.f32.mrf.mxu0  ;;  %v358_v16 = vpop.f32.mrf.mxu1 }
 0x11e   :  { %411 = vst.msk [vmem:[%s995_s3 + $0x58] sm:$0xff] %vm400_vm0, %v378_v11  ;;  %427 = vst.msk [vmem:[%s995_s3 + $0xd8] sm:$0xff] %vm400_vm0, %v394_v12  ;;  %v379_v54 = vmax.f32 %v309_v13, 0.0  ;;  %v395_v18 = vmax.f32 %v357_v14, 0.0  ;;  %v311_v19 = vadd.f32 %v310_v15, %v866_v55  ;;  %v359_v20 = vadd.f32 %v358_v16, %v199_v5 }
 0x11f   :  { %v314_v21 = vpop.f32.mrf.mxu0  ;;  %v362_v22 = vpop.f32.mrf.mxu1 }
 0x120   :  { %412 = vst [vmem:[%s995_s3 + $0x60] sm:$0xff] %v379_v54  ;;  %428 = vst [vmem:[%s995_s3 + $0xe0] sm:$0xff] %v395_v18  ;;  %v380_v23 = vmax.f32 %v311_v19, 0.0  ;;  %v396_v24 = vmax.f32 %v359_v20, 0.0  ;;  %v315_v25 = vadd.f32 %v314_v21, %v868_v56  ;;  %v363_v26 = vadd.f32 %v362_v22, %v204_v17 }
 0x121   :  { %v316_v27 = vpop.f32.mrf.mxu0  ;;  %v364_v28 = vpop.f32.mrf.mxu1 }
 0x122   :  { %413 = vst.msk [vmem:[%s995_s3 + $0x68] sm:$0xff] %vm400_vm0, %v380_v23  ;;  %429 = vst.msk [vmem:[%s995_s3 + $0xe8] sm:$0xff] %vm400_vm0, %v396_v24  ;;  %v381_v55 = vmax.f32 %v315_v25, 0.0  ;;  %v397_v29 = vmax.f32 %v363_v26, 0.0  ;;  %v317_v30 = vadd.f32 %v316_v27, %v868_v56  ;;  %v365_v31 = vadd.f32 %v364_v28, %v204_v17 }
 0x124   :  { %414 = vst [vmem:[%s995_s3 + $0x70] sm:$0xff] %v381_v55  ;;  %430 = vst [vmem:[%s995_s3 + $0xf0] sm:$0xff] %v397_v29  ;;  %v382_v32 = vmax.f32 %v317_v30, 0.0  ;;  %v398_v33 = vmax.f32 %v365_v31, 0.0 }
 0x126   :  { %415 = vst.msk [vmem:[%s995_s3 + $0x78] sm:$0xff] %vm400_vm0, %v382_v32  ;;  %431 = vst.msk [vmem:[%s995_s3 + $0xf8] sm:$0xff] %vm400_vm0, %v398_v33 }

// kernel: _lambda_.16
= control target key start
LH: loop header
LB: loop body
LE: loop exit
PB: predicated region body
PF: predicated region fallthrough
CT: control target
= control target key end

     0   :  { %s1195_s12 = smov 0   ;;  %s1197_s13 = smov 0   ;;  %s1733_s0 = inlined_call_operand.vmem [shape: f32[128,128], index: 0, kind: input, shape index: {}]   ;;  %s1734_s1 = inlined_call_operand.vmem [shape: f32[128,768], index: 1, kind: input, shape index: {}]   ;;  %s1735_s2 = inlined_call_operand.vmem [shape: f32[128,1], index: 2, kind: input, shape index: {}]   ;;  %s1736_s3 = inlined_call_operand.vmem [shape: f32[128,768], index: 3, kind: output, shape index: {}]  }
   0x1   :  { %s1199_s14 = smov 0  }
   0x2 LB: > { %s1020_s15 = sadd.s32 4294967295, %s1171_s14   ;;  %s1212_s16 = sadd.s32 1, %s1171_s14   ;;  %s1171_s14 = sphi %s1199_s14, %s1740_s14   ;;  %s1167_s13 = sphi %s1197_s13, %s1739_s13   ;;  %s1163_s12 = sphi %s1195_s12, %s1738_s12  }
   0x3   : > { %s38_s17 = ssub.s32 %s1171_s14, %s1212_s16  ;;  %s41_s18 = sadd.s32 1, %s1167_s13 }
   0x4   : > { %p39_p0 = scmp.eq.s32.totalorder %s38_s17, 0  ;;  %p48_p1 = scmp.ne.s32.totalorder %s1167_s13, %s1163_s12 }
   0x5   : > { %p49_p2 = scmp.eq.s32.totalorder %s1171_s14, 0  ;;  %p99_p3 = scmp.eq.s32.totalorder %s1020_s15, 1 }
   0x6   : > { %s1223_s19 = scalar_select %p39_p0, %s1167_s13, %s41_s18  }
   0x7   : > { %p50_p4 = por %p49_p2, %p48_p1  ;;  %p1225_p5 = por %p99_p3, %p48_p1 }
   0x8   : > { %p1023_p6 = scmp.ge.s32.totalorder %s1171_s14, 2 }
   0xa   : > { %127 = sbr.rel (%p1023_p6) target bundleno = 44 (0x2c), region = 24 }
   0xf   : > { %130 = sbr.rel (!%p50_p4) target bundleno = 44 (0x2c), region = 28  ;;  %s132_s21 = sand.u32 (%p50_p4), 1, %s1167_s13  }
  0x10   : > { %s1029_s22 = smul.u32 (%p50_p4), 24, %s1171_s14 }
  0x11   : > { %s1119_s23 = smul.u32 (%p50_p4), 384, %s132_s21 }
  0x12   : > { %s1235_s26 = scalar_lea.vmem (%p50_p4), %s1734_s1, %s1029_s22 }
  0x13   : > { %v150_v0 = vld [vmem:[%s1235_s26] sm:$0xff] (%p50_p4)  ;;  %v152_v1 = vld [vmem:[%s1235_s26 + $0x8] sm:$0xff] (%p50_p4)  ;;  %v154_v2 = vld [vmem:[%s1235_s26 + $0x10] sm:$0xff] (%p50_p4)  ;;  %s1240_s27 = scalar_lea.vmem (%p50_p4), [#allocation2], %s1119_s23 }
  0x14   : > { %151 = vst [vmem:[%s1240_s27] sm:$0xff] %v150_v0  ;;  %153 = vst [vmem:[%s1240_s27 + $0x8] sm:$0xff] %v152_v1  ;;  %v156_v3 = vld [vmem:[%s1235_s26 + $0x30] sm:$0xff]  ;;  %v158_v4 = vld [vmem:[%s1235_s26 + $0x38] sm:$0xff] }
  0x15   : > { %155 = vst [vmem:[%s1240_s27 + $0x10] sm:$0xff] %v154_v2  ;;  %v160_v5 = vld [vmem:[%s1235_s26 + $0x40] sm:$0xff]  ;;  %157 = vst [vmem:[%s1240_s27 + $0x18] sm:$0xff] %v156_v3  ;;  %v164_v7 = vld [vmem:[%s1235_s26 + $0x68] sm:$0xff] }
  0x16   : > { %159 = vst [vmem:[%s1240_s27 + $0x20] sm:$0xff] %v158_v4  ;;  %161 = vst [vmem:[%s1240_s27 + $0x28] sm:$0xff] %v160_v5  ;;  %v162_v6 = vld [vmem:[%s1235_s26 + $0x60] sm:$0xff]  ;;  %v166_v8 = vld [vmem:[%s1235_s26 + $0x70] sm:$0xff] }
  0x17   : > { %163 = vst [vmem:[%s1240_s27 + $0x30] sm:$0xff] %v162_v6  ;;  %165 = vst [vmem:[%s1240_s27 + $0x38] sm:$0xff] %v164_v7  ;;  %v168_v9 = vld [vmem:[%s1235_s26 + $0x90] sm:$0xff]  ;;  %v170_v10 = vld [vmem:[%s1235_s26 + $0x98] sm:$0xff] }
  0x18   : > { %167 = vst [vmem:[%s1240_s27 + $0x40] sm:$0xff] %v166_v8  ;;  %v172_v11 = vld [vmem:[%s1235_s26 + $0xa0] sm:$0xff]  ;;  %169 = vst [vmem:[%s1240_s27 + $0x48] sm:$0xff] %v168_v9  ;;  %v176_v13 = vld [vmem:[%s1235_s26 + $0xc8] sm:$0xff] }
  0x19   : > { %171 = vst [vmem:[%s1240_s27 + $0x50] sm:$0xff] %v170_v10  ;;  %173 = vst [vmem:[%s1240_s27 + $0x58] sm:$0xff] %v172_v11  ;;  %v174_v12 = vld [vmem:[%s1235_s26 + $0xc0] sm:$0xff]  ;;  %v178_v14 = vld [vmem:[%s1235_s26 + $0xd0] sm:$0xff] }
  0x1a   : > { %175 = vst [vmem:[%s1240_s27 + $0x60] sm:$0xff] %v174_v12  ;;  %177 = vst [vmem:[%s1240_s27 + $0x68] sm:$0xff] %v176_v13  ;;  %v180_v15 = vld [vmem:[%s1235_s26 + $0xf0] sm:$0xff]  ;;  %v182_v16 = vld [vmem:[%s1235_s26 + $0xf8] sm:$0xff] }
  0x1b   : > { %179 = vst [vmem:[%s1240_s27 + $0x70] sm:$0xff] %v178_v14  ;;  %v184_v17 = vld [vmem:[%s1235_s26 + $0x100] sm:$0xff]  ;;  %181 = vst [vmem:[%s1240_s27 + $0x78] sm:$0xff] %v180_v15  ;;  %v188_v19 = vld [vmem:[%s1235_s26 + $0x128] sm:$0xff] }
  0x1c   : > { %183 = vst [vmem:[%s1240_s27 + $0x80] sm:$0xff] %v182_v16  ;;  %185 = vst [vmem:[%s1240_s27 + $0x88] sm:$0xff] %v184_v17  ;;  %v186_v18 = vld [vmem:[%s1235_s26 + $0x120] sm:$0xff]  ;;  %v190_v20 = vld [vmem:[%s1235_s26 + $0x130] sm:$0xff] }
  0x1d   : > { %187 = vst [vmem:[%s1240_s27 + $0x90] sm:$0xff] %v186_v18  ;;  %189 = vst [vmem:[%s1240_s27 + $0x98] sm:$0xff] %v188_v19  ;;  %v192_v21 = vld [vmem:[%s1235_s26 + $0x150] sm:$0xff]  ;;  %v194_v22 = vld [vmem:[%s1235_s26 + $0x158] sm:$0xff] }
  0x1e   : > { %191 = vst [vmem:[%s1240_s27 + $0xa0] sm:$0xff] %v190_v20  ;;  %v196_v23 = vld [vmem:[%s1235_s26 + $0x160] sm:$0xff]  ;;  %193 = vst [vmem:[%s1240_s27 + $0xa8] sm:$0xff] %v192_v21  ;;  %v200_v25 = vld [vmem:[%s1235_s26 + $0x188] sm:$0xff] }
  0x1f   : > { %195 = vst [vmem:[%s1240_s27 + $0xb0] sm:$0xff] %v194_v22  ;;  %197 = vst [vmem:[%s1240_s27 + $0xb8] sm:$0xff] %v196_v23  ;;  %v198_v24 = vld [vmem:[%s1235_s26 + $0x180] sm:$0xff]  ;;  %v202_v26 = vld [vmem:[%s1235_s26 + $0x190] sm:$0xff] }
  0x20   : > { %199 = vst [vmem:[%s1240_s27 + $0xc0] sm:$0xff] %v198_v24  ;;  %201 = vst [vmem:[%s1240_s27 + $0xc8] sm:$0xff] %v200_v25  ;;  %v204_v27 = vld [vmem:[%s1235_s26 + $0x1b0] sm:$0xff]  ;;  %v206_v28 = vld [vmem:[%s1235_s26 + $0x1b8] sm:$0xff] }
  0x21   : > { %203 = vst [vmem:[%s1240_s27 + $0xd0] sm:$0xff] %v202_v26  ;;  %v208_v29 = vld [vmem:[%s1235_s26 + $0x1c0] sm:$0xff]  ;;  %205 = vst [vmem:[%s1240_s27 + $0xd8] sm:$0xff] %v204_v27  ;;  %v212_v31 = vld [vmem:[%s1235_s26 + $0x1e8] sm:$0xff] }
  0x22   : > { %207 = vst [vmem:[%s1240_s27 + $0xe0] sm:$0xff] %v206_v28  ;;  %209 = vst [vmem:[%s1240_s27 + $0xe8] sm:$0xff] %v208_v29  ;;  %v210_v30 = vld [vmem:[%s1235_s26 + $0x1e0] sm:$0xff]  ;;  %v214_v32 = vld [vmem:[%s1235_s26 + $0x1f0] sm:$0xff] }
  0x23   : > { %211 = vst [vmem:[%s1240_s27 + $0xf0] sm:$0xff] %v210_v30  ;;  %213 = vst [vmem:[%s1240_s27 + $0xf8] sm:$0xff] %v212_v31  ;;  %v216_v33 = vld [vmem:[%s1235_s26 + $0x210] sm:$0xff]  ;;  %v218_v34 = vld [vmem:[%s1235_s26 + $0x218] sm:$0xff] }
  0x24   : > { %215 = vst [vmem:[%s1240_s27 + $0x100] sm:$0xff] %v214_v32  ;;  %v220_v35 = vld [vmem:[%s1235_s26 + $0x220] sm:$0xff]  ;;  %217 = vst [vmem:[%s1240_s27 + $0x108] sm:$0xff] %v216_v33  ;;  %v224_v37 = vld [vmem:[%s1235_s26 + $0x248] sm:$0xff] }
  0x25   : > { %219 = vst [vmem:[%s1240_s27 + $0x110] sm:$0xff] %v218_v34  ;;  %221 = vst [vmem:[%s1240_s27 + $0x118] sm:$0xff] %v220_v35  ;;  %v222_v36 = vld [vmem:[%s1235_s26 + $0x240] sm:$0xff]  ;;  %v226_v38 = vld [vmem:[%s1235_s26 + $0x250] sm:$0xff] }
  0x26   : > { %223 = vst [vmem:[%s1240_s27 + $0x120] sm:$0xff] %v222_v36  ;;  %225 = vst [vmem:[%s1240_s27 + $0x128] sm:$0xff] %v224_v37  ;;  %v228_v39 = vld [vmem:[%s1235_s26 + $0x270] sm:$0xff]  ;;  %v230_v40 = vld [vmem:[%s1235_s26 + $0x278] sm:$0xff] }
  0x27   : > { %227 = vst [vmem:[%s1240_s27 + $0x130] sm:$0xff] %v226_v38  ;;  %v232_v41 = vld [vmem:[%s1235_s26 + $0x280] sm:$0xff]  ;;  %229 = vst [vmem:[%s1240_s27 + $0x138] sm:$0xff] %v228_v39  ;;  %v236_v43 = vld [vmem:[%s1235_s26 + $0x2a8] sm:$0xff] }
  0x28   : > { %231 = vst [vmem:[%s1240_s27 + $0x140] sm:$0xff] %v230_v40  ;;  %233 = vst [vmem:[%s1240_s27 + $0x148] sm:$0xff] %v232_v41  ;;  %v234_v42 = vld [vmem:[%s1235_s26 + $0x2a0] sm:$0xff]  ;;  %v238_v44 = vld [vmem:[%s1235_s26 + $0x2b0] sm:$0xff] }
  0x29   : > { %235 = vst [vmem:[%s1240_s27 + $0x150] sm:$0xff] %v234_v42  ;;  %237 = vst [vmem:[%s1240_s27 + $0x158] sm:$0xff] %v236_v43  ;;  %v240_v45 = vld [vmem:[%s1235_s26 + $0x2d0] sm:$0xff]  ;;  %v242_v46 = vld [vmem:[%s1235_s26 + $0x2d8] sm:$0xff] }
  0x2a   : > { %239 = vst [vmem:[%s1240_s27 + $0x160] sm:$0xff] %v238_v44  ;;  %v244_v47 = vld [vmem:[%s1235_s26 + $0x2e0] sm:$0xff]  ;;  %241 = vst [vmem:[%s1240_s27 + $0x168] sm:$0xff] %v240_v45 }
  0x2b   : > { %243 = vst [vmem:[%s1240_s27 + $0x170] sm:$0xff] %v242_v46  ;;  %245 = vst [vmem:[%s1240_s27 + $0x178] sm:$0xff] %v244_v47 }
  0x2c PF: > { %p1025_p7 = scmp.ge.s32.totalorder %s1171_s14, 1  ;;  %p250_p8 = scmp.lt.s32.totalorder %s1171_s14, 3 }
  0x2e   : > { %p251_p9 = pnand %p1025_p7, %p250_p8 }
  0x2f   : > { %s257_s28 = sand.u32 (!%p251_p9), 1, %s1163_s12  }
  0x30   : > { %254 = sbr.rel (%p251_p9) target bundleno = 356 (0x164), region = 51 }
  0x31   : > { %s1343_s4 = smul.u32 (!%p251_p9), 384, %s257_s28 }
  0x33   : > { %s1348_s5 = scalar_lea.vmem (!%p251_p9), [#allocation2], %s1343_s4  ;;  %s1514_s8 = scalar_lea.vmem (!%p251_p9), [#allocation3], %s1343_s4 }
  0x35   : > { %v1341_v48 = vld [vmem:[%s1733_s0] sm:$0xff]  ;;  %v1173_v49 = vmov 0.0   ;;  %v1174_v50 = vmov 0   ;;  %v343_v51 = vld [vmem:[%s1348_s5 + $0x170] sm:$0xff]  ;;  %v342_v52 = vld [vmem:[%s1348_s5 + $0x168] sm:$0xff]  ;;  %s1030_s4 = smul.u32 (%p1225_p5), 24, %s1020_s15 }
  0x36   : > { %505 = vmatprep.mubr.f32.mxu0 %v1173_v49  ;;  %1095 = vmatprep.mubr.f32.mxu1 %v1341_v48  ;;  %v340_v53 = vld [vmem:[%s1348_s5 + $0x158] sm:$0xff]  ;;  %v339_v54 = vld [vmem:[%s1348_s5 + $0x150] sm:$0xff]  ;;  %v337_v56 = vld [vmem:[%s1348_s5 + $0x140] sm:$0xff] }
  0x37   : > { %1147 = vset.pattern.permute.xlu0 %v1174_v50  ;;  %1148 = vset.pattern.permute.xlu1 %v1174_v50  ;;  %v344_v55 = vld [vmem:[%s1348_s5 + $0x178] sm:$0xff]  ;;  %v341_v57 = vld [vmem:[%s1348_s5 + $0x160] sm:$0xff]  ;;  %v338_v59 = vld [vmem:[%s1348_s5 + $0x148] sm:$0xff]  ;;  %s1631_s9 = scalar_lea.vmem (%p1225_p5), %s1736_s3, %s1030_s4 }
  0x38   : > { %441 = vmatprep.subr.mxu0 %v343_v51  ;;  %1063 = vmatprep.subr.mxu1 %v344_v55  ;;  %v336_v58 = vld [vmem:[%s1348_s5 + $0x138] sm:$0xff]  ;;  %v334_v60 = vld [vmem:[%s1348_s5 + $0x128] sm:$0xff]  ;;  %v333_v61 = vld [vmem:[%s1348_s5 + $0x120] sm:$0xff] }
  0x39   : > { %442 = vmatpush1.msra.mxu0 %v342_v52  ;;  %1064 = vmatpush3.msra.mxu1 %v344_v55  ;;  %v335_v62 = vld [vmem:[%s1348_s5 + $0x130] sm:$0xff]  ;;  %v330_v0 = vld [vmem:[%s1348_s5 + $0x108] sm:$0xff]  ;;  %v332_v1 = vld [vmem:[%s1348_s5 + $0x118] sm:$0xff] }
  0x3a   : > { %443 = vmatprep.subr.mxu0 %v340_v53  ;;  %1065 = vmatprep.subr.mxu1 %v341_v57  ;;  %v331_v63 = vld [vmem:[%s1348_s5 + $0x110] sm:$0xff]  ;;  %v328_v2 = vld [vmem:[%s1348_s5 + $0xf8] sm:$0xff]  ;;  %v329_v4 = vld [vmem:[%s1348_s5 + $0x100] sm:$0xff] }
  0x3b   : > { %444 = vmatpush1.msra.mxu0 %v339_v54  ;;  %1066 = vmatpush3.msra.mxu1 %v341_v57  ;;  %v327_v3 = vld [vmem:[%s1348_s5 + $0xf0] sm:$0xff]  ;;  %v325_v5 = vld [vmem:[%s1348_s5 + $0xe0] sm:$0xff]  ;;  %v324_v6 = vld [vmem:[%s1348_s5 + $0xd8] sm:$0xff] }
  0x3c   : > { %445 = vmatprep.subr.mxu0 %v337_v56  ;;  %1067 = vmatprep.subr.mxu1 %v338_v59  ;;  %v326_v7 = vld [vmem:[%s1348_s5 + $0xe8] sm:$0xff]  ;;  %v321_v9 = vld [vmem:[%s1348_s5 + $0xc0] sm:$0xff]  ;;  %v323_v10 = vld [vmem:[%s1348_s5 + $0xd0] sm:$0xff] }
  0x3d   : > { %446 = vmatpush1.msra.mxu0 %v336_v58  ;;  %1068 = vmatpush3.msra.mxu1 %v338_v59  ;;  %v322_v8 = vld [vmem:[%s1348_s5 + $0xc8] sm:$0xff]  ;;  %v319_v11 = vld [vmem:[%s1348_s5 + $0xb0] sm:$0xff]  ;;  %v320_v13 = vld [vmem:[%s1348_s5 + $0xb8] sm:$0xff] }
  0x3e   : > { %447 = vmatprep.subr.mxu0 %v334_v60  ;;  %1069 = vmatprep.subr.mxu1 %v335_v62  ;;  %v318_v12 = vld [vmem:[%s1348_s5 + $0xa8] sm:$0xff]  ;;  %v316_v14 = vld [vmem:[%s1348_s5 + $0x98] sm:$0xff]  ;;  %v315_v15 = vld [vmem:[%s1348_s5 + $0x90] sm:$0xff] }
  0x3f   : > { %448 = vmatpush1.msra.mxu0 %v333_v61  ;;  %1070 = vmatpush3.msra.mxu1 %v335_v62  ;;  %v317_v16 = vld [vmem:[%s1348_s5 + $0xa0] sm:$0xff]  ;;  %v312_v18 = vld [vmem:[%s1348_s5 + $0x78] sm:$0xff]  ;;  %v314_v19 = vld [vmem:[%s1348_s5 + $0x88] sm:$0xff] }
  0x40   : > { %449 = vmatprep.subr.mxu0 %v331_v63  ;;  %1071 = vmatprep.subr.mxu1 %v332_v1  ;;  %v313_v17 = vld [vmem:[%s1348_s5 + $0x80] sm:$0xff]  ;;  %v310_v20 = vld [vmem:[%s1348_s5 + $0x68] sm:$0xff]  ;;  %v311_v22 = vld [vmem:[%s1348_s5 + $0x70] sm:$0xff] }
  0x41   : > { %450 = vmatpush1.msra.mxu0 %v330_v0  ;;  %1072 = vmatpush3.msra.mxu1 %v332_v1  ;;  %v309_v21 = vld [vmem:[%s1348_s5 + $0x60] sm:$0xff]  ;;  %v307_v23 = vld [vmem:[%s1348_s5 + $0x50] sm:$0xff]  ;;  %v306_v24 = vld [vmem:[%s1348_s5 + $0x48] sm:$0xff] }
  0x42   : > { %451 = vmatprep.subr.mxu0 %v328_v2  ;;  %1073 = vmatprep.subr.mxu1 %v329_v4  ;;  %v308_v25 = vld [vmem:[%s1348_s5 + $0x58] sm:$0xff]  ;;  %v303_v27 = vld [vmem:[%s1348_s5 + $0x30] sm:$0xff]  ;;  %v305_v28 = vld [vmem:[%s1348_s5 + $0x40] sm:$0xff] }
  0x43   : > { %452 = vmatpush1.msra.mxu0 %v327_v3  ;;  %1074 = vmatpush3.msra.mxu1 %v329_v4  ;;  %v304_v26 = vld [vmem:[%s1348_s5 + $0x38] sm:$0xff]  ;;  %v301_v29 = vld [vmem:[%s1348_s5 + $0x20] sm:$0xff]  ;;  %v302_v31 = vld [vmem:[%s1348_s5 + $0x28] sm:$0xff] }
  0x44   : > { %453 = vmatprep.subr.mxu0 %v325_v5  ;;  %1075 = vmatprep.subr.mxu1 %v326_v7  ;;  %v300_v30 = vld [vmem:[%s1348_s5 + $0x18] sm:$0xff]  ;;  %v298_v32 = vld [vmem:[%s1348_s5 + $0x8] sm:$0xff]  ;;  %v297_v33 = vld [vmem:[%s1348_s5] sm:$0xff] }
  0x45   : > { %454 = vmatpush1.msra.mxu0 %v324_v6  ;;  %1076 = vmatpush3.msra.mxu1 %v326_v7  ;;  %v299_v34 = vld [vmem:[%s1348_s5 + $0x10] sm:$0xff]  ;;  %v282_v35 = vld [vmem:[%s1733_s0 + $0x8] sm:$0xff]  ;;  %v345_v37 = vld [vmem:[%s1735_s2] sm:$0xff] }
  0x46   : > { %455 = vmatprep.subr.mxu0 %v322_v8  ;;  %1077 = vmatprep.subr.mxu1 %v323_v10  ;;  %v283_v36 = vld [vmem:[%s1733_s0 + $0x10] sm:$0xff]  ;;  %v284_v39 = vld [vmem:[%s1733_s0 + $0x18] sm:$0xff]  ;;  %v285_v40 = vld [vmem:[%s1733_s0 + $0x20] sm:$0xff] }
  0x47   : > { %456 = vmatpush1.msra.mxu0 %v321_v9  ;;  %1078 = vmatpush3.msra.mxu1 %v323_v10  ;;  %v347_v38 = vld [vmem:[%s1735_s2 + $0x10] sm:$0xff]  ;;  %v346_v41 = vld [vmem:[%s1735_s2 + $0x8] sm:$0xff]  ;;  %v348_v42 = vld [vmem:[%s1735_s2 + $0x18] sm:$0xff] }
  0x48   : > { %457 = vmatprep.subr.mxu0 %v319_v11  ;;  %1079 = vmatprep.subr.mxu1 %v320_v13  ;;  %v286_v43 = vld [vmem:[%s1733_s0 + $0x28] sm:$0xff]  ;;  %v287_v44 = vld [vmem:[%s1733_s0 + $0x30] sm:$0xff]  ;;  %v349_v45 = vld [vmem:[%s1735_s2 + $0x20] sm:$0xff] }
  0x49   : > { %458 = vmatpush1.msra.mxu0 %v318_v12  ;;  %1080 = vmatpush3.msra.mxu1 %v320_v13  ;;  %v350_v46 = vld [vmem:[%s1735_s2 + $0x28] sm:$0xff]  ;;  %v288_v47 = vld [vmem:[%s1733_s0 + $0x38] sm:$0xff]  ;;  %v351_v50 = vld [vmem:[%s1735_s2 + $0x30] sm:$0xff] }
  0x4a   : > { %459 = vmatprep.subr.mxu0 %v316_v14  ;;  %1081 = vmatprep.subr.mxu1 %v317_v16  ;;  %v352_v51 = vld [vmem:[%s1735_s2 + $0x38] sm:$0xff]  ;;  %v290_v52 = vld [vmem:[%s1733_s0 + $0x48] sm:$0xff]  ;;  %v291_v53 = vld [vmem:[%s1733_s0 + $0x50] sm:$0xff] }
  0x4b   : > { %460 = vmatpush1.msra.mxu0 %v315_v15  ;;  %1082 = vmatpush3.msra.mxu1 %v317_v16  ;;  %v353_v54 = vld [vmem:[%s1735_s2 + $0x40] sm:$0xff]  ;;  %v354_v55 = vld [vmem:[%s1735_s2 + $0x48] sm:$0xff]  ;;  %v292_v56 = vld [vmem:[%s1733_s0 + $0x58] sm:$0xff] }
  0x4c   : > { %461 = vmatprep.subr.mxu0 %v313_v17  ;;  %1083 = vmatprep.subr.mxu1 %v314_v19  ;;  %v293_v57 = vld [vmem:[%s1733_s0 + $0x60] sm:$0xff]  ;;  %v355_v58 = vld [vmem:[%s1735_s2 + $0x50] sm:$0xff]  ;;  %v356_v59 = vld [vmem:[%s1735_s2 + $0x58] sm:$0xff] }
  0x4d   : > { %462 = vmatpush1.msra.mxu0 %v312_v18  ;;  %1084 = vmatpush3.msra.mxu1 %v314_v19  ;;  %v294_v60 = vld [vmem:[%s1733_s0 + $0x68] sm:$0xff]  ;;  %v295_v61 = vld [vmem:[%s1733_s0 + $0x70] sm:$0xff]  ;;  %v357_v62 = vld [vmem:[%s1735_s2 + $0x60] sm:$0xff] }
  0x4e   : > { %463 = vmatprep.subr.mxu0 %v310_v20  ;;  %1085 = vmatprep.subr.mxu1 %v311_v22  ;;  %v358_v63 = vld [vmem:[%s1735_s2 + $0x68] sm:$0xff]  ;;  %v296_v0 = vld [vmem:[%s1733_s0 + $0x78] sm:$0xff]  ;;  %v359_v1 = vld [vmem:[%s1735_s2 + $0x70] sm:$0xff] }
  0x4f   : > { %464 = vmatpush1.msra.mxu0 %v309_v21  ;;  %1086 = vmatpush3.msra.mxu1 %v311_v22  ;;  %v360_v2 = vld [vmem:[%s1735_s2 + $0x78] sm:$0xff] }
  0x50   : > { %465 = vmatprep.subr.mxu0 %v307_v23  ;;  %1087 = vmatprep.subr.mxu1 %v308_v25 }
  0x51   : > { %466 = vmatpush1.msra.mxu0 %v306_v24  ;;  %1088 = vmatpush3.msra.mxu1 %v308_v25 }
  0x52   : > { %467 = vmatprep.subr.mxu0 %v304_v26  ;;  %1089 = vmatprep.subr.mxu1 %v305_v28 }
  0x53   : > { %468 = vmatpush1.msra.mxu0 %v303_v27  ;;  %1090 = vmatpush3.msra.mxu1 %v305_v28 }
  0x54   : > { %469 = vmatprep.subr.mxu0 %v301_v29  ;;  %1091 = vmatprep.subr.mxu1 %v302_v31 }
  0x55   : > { %470 = vmatpush1.msra.mxu0 %v300_v30  ;;  %1092 = vmatpush3.msra.mxu1 %v302_v31 }
  0x56   : > { %471 = vmatprep.subr.mxu0 %v298_v32  ;;  %1093 = vmatprep.subr.mxu1 %v299_v34 }
  0x57   : > { %472 = vmatpush1.msra.mxu0 %v297_v33  ;;  %1094 = vmatpush3.msra.mxu1 %v299_v34 }
  0x58   : > { %506 = vmatmul.mubr.f32.vlgmr.msra.gmra.mxu0 %v1341_v48  ;;  %1096 = vmatmul.mubr.f32.vlgmr.msra.gmra.mxu1 %v282_v35  ;;  %v289_v48 = vld [vmem:[%s1733_s0 + $0x40] sm:$0xff] }
  0x59   : > { %511 = vmatprep.mubr.f32.mxu0 %v1173_v49  ;;  %1098 = vmatprep.mubr.f32.mxu1 %v283_v36 }
  0x5a   : > { %363 = vperm.xlu0 %1147, %v345_v37   ;;  %373 = vperm.xlu1 %1148, %v347_v38  }
  0x5c   : > { %512 = vmatmul.mubr.f32.gmra.mxu0 %v282_v35  ;;  %1099 = vmatmul.mubr.f32.gmra.mxu1 %v284_v39 }
  0x5d   : > { %517 = vmatprep.mubr.f32.mxu0 %v1173_v49  ;;  %1101 = vmatprep.mubr.f32.mxu1 %v285_v40 }
  0x5e   : > { %368 = vperm.xlu0 %1147, %v346_v41   ;;  %378 = vperm.xlu1 %1148, %v348_v42  }
  0x60   : > { %518 = vmatmul.mubr.f32.gmra.mxu0 %v283_v36  ;;  %1102 = vmatmul.mubr.f32.gmra.mxu1 %v286_v43 }
  0x61   : > { %523 = vmatprep.mubr.f32.mxu0 %v1173_v49  ;;  %1104 = vmatprep.mubr.f32.mxu1 %v287_v44 }
  0x62   : > { %383 = vperm.xlu0 %1147, %v349_v45   ;;  %388 = vperm.xlu1 %1148, %v350_v46  }
  0x64   : > { %524 = vmatmul.mubr.f32.gmra.mxu0 %v284_v39  ;;  %1105 = vmatmul.mubr.f32.gmra.mxu1 %v288_v47 }
  0x65   : > { %529 = vmatprep.mubr.f32.mxu0 %v1173_v49  ;;  %1107 = vmatprep.mubr.f32.mxu1 %v289_v48 }
  0x66   : > { %393 = vperm.xlu0 %1147, %v351_v50   ;;  %398 = vperm.xlu1 %1148, %v352_v51  }
  0x68   : > { %530 = vmatmul.mubr.f32.gmra.mxu0 %v285_v40  ;;  %1108 = vmatmul.mubr.f32.gmra.mxu1 %v290_v52 }
  0x69   : > { %535 = vmatprep.mubr.f32.mxu0 %v1173_v49  ;;  %1110 = vmatprep.mubr.f32.mxu1 %v291_v53 }
  0x6a   : > { %403 = vperm.xlu0 %1147, %v353_v54   ;;  %408 = vperm.xlu1 %1148, %v354_v55  }
  0x6c   : > { %536 = vmatmul.mubr.f32.gmra.mxu0 %v286_v43  ;;  %1111 = vmatmul.mubr.f32.gmra.mxu1 %v292_v56 }
  0x6d   : > { %541 = vmatprep.mubr.f32.mxu0 %v1173_v49  ;;  %1113 = vmatprep.mubr.f32.mxu1 %v293_v57 }
  0x6e   : > { %413 = vperm.xlu0 %1147, %v355_v58   ;;  %418 = vperm.xlu1 %1148, %v356_v59  }
  0x70   : > { %542 = vmatmul.mubr.f32.gmra.mxu0 %v287_v44  ;;  %1114 = vmatmul.mubr.f32.gmra.mxu1 %v294_v60 }
  0x71   : > { %547 = vmatprep.mubr.f32.mxu0 %v1173_v49  ;;  %1116 = vmatprep.mubr.f32.mxu1 %v295_v61 }
  0x72   : > { %423 = vperm.xlu0 %1147, %v357_v62   ;;  %428 = vperm.xlu1 %1148, %v358_v63  }
  0x74   : > { %548 = vmatmul.mubr.f32.gmra.mxu0 %v288_v47  ;;  %1117 = vmatmul.mubr.f32.gmra.mxu1 %v296_v0 }
  0x75   : > { %553 = vmatprep.mubr.f32.mxu0 %v1173_v49 }
  0x76   : > { %433 = vperm.xlu0 %1147, %v359_v1   ;;  %438 = vperm.xlu1 %1148, %v360_v2  }
  0x78   : > { %554 = vmatmul.mubr.f32.gmra.mxu0 %v289_v48 }
  0x79   : > { %559 = vmatprep.mubr.f32.mxu0 %v1173_v49 }
  0x7c   : > { %560 = vmatmul.mubr.f32.gmra.mxu0 %v290_v52 }
  0x7d   : > { %565 = vmatprep.mubr.f32.mxu0 %v1173_v49 }
  0x80   : > { %566 = vmatmul.mubr.f32.gmra.mxu0 %v291_v53 }
  0x81   : > { %571 = vmatprep.mubr.f32.mxu0 %v1173_v49 }
  0x84   : > { %572 = vmatmul.mubr.f32.gmra.mxu0 %v292_v56 }
  0x85   : > { %577 = vmatprep.mubr.f32.mxu0 %v1173_v49 }
  0x88   : > { %578 = vmatmul.mubr.f32.gmra.mxu0 %v293_v57 }
  0x89   : > { %583 = vmatprep.mubr.f32.mxu0 %v1173_v49 }
  0x8c   : > { %584 = vmatmul.mubr.f32.gmra.mxu0 %v294_v60 }
  0x8d   : > { %589 = vmatprep.mubr.f32.mxu0 %v1173_v49 }
  0x90   : > { %590 = vmatmul.mubr.f32.gmra.mxu0 %v295_v61 }
  0x91   : > { %595 = vmatprep.mubr.f32.mxu0 %v1173_v49 }
  0x94   : > { %596 = vmatmul.mubr.f32.gmra.mxu0 %v296_v0 }
  0xd5   : > { %v374_v3 = vpop.permute.xlu1 %373  ;;  %v364_v4 = vpop.permute.xlu0 %363 }
  0xd9   : > { %v379_v5 = vpop.permute.xlu1 %378  ;;  %v369_v6 = vpop.permute.xlu0 %368 }
  0xdd   : > { %v1507_v7 = vpop.permute.xlu1 %388  ;;  %v1509_v8 = vpop.permute.xlu0 %383 }
  0xe1   : > { %v1511_v17 = vpop.permute.xlu1 %398  ;;  %v1517_v23 = vpop.permute.xlu0 %393 }
  0xe5   : > { %v1523_v36 = vpop.permute.xlu1 %408  ;;  %v1528_v43 = vpop.permute.xlu0 %403 }
  0xe9   : > { %v1536_v57 = vpop.permute.xlu1 %418  ;;  %v1542_v0 = vpop.permute.xlu0 %413 }
 0x118   : > { %v507_v9 = vpop.f32.mrf.mxu0  ;;  %v1097_v11 = vpop.f32.mrf.mxu1 }
 0x119   : > { %v508_v10 = vadd.f32 %v507_v9, %v364_v4  ;;  %v674_v13 = vadd.f32 %v1097_v11, %v369_v6 }
 0x11a   : > { %v509_v12 = vpop.f32.mrf.mxu0  ;;  %v668_v16 = vpop.f32.mrf.mxu1 }
 0x11b   : > { %v747_v14 = vmax.f32 %v508_v10, 0.0  ;;  %v510_v15 = vadd.f32 %v509_v12, %v364_v4  ;;  %v752_v18 = vmax.f32 %v674_v13, 0.0  ;;  %v669_v19 = vadd.f32 %v668_v16, %v364_v4 }
 0x11c   : > { %v513_v49 = vpop.f32.mrf.mxu0  ;;  %v1100_v22 = vpop.f32.mrf.mxu1 }
 0x11d   : > { %795 = vst [vmem:[%s1514_s8] sm:$0xff] %v747_v14  ;;  %v748_v20 = vmax.f32 %v510_v15, 0.0  ;;  %v514_v21 = vadd.f32 %v513_v49, %v369_v6  ;;  %800 = vst [vmem:[%s1514_s8 + $0x28] sm:$0xff] %v752_v18  ;;  %v749_v25 = vmax.f32 %v669_v19, 0.0  ;;  %v684_v26 = vadd.f32 %v1100_v22, %v379_v5  ;;  %v1552_v15 = vpop.permute.xlu1 %428 }
 0x11e   : > { %v515_v24 = vpop.f32.mrf.mxu0  ;;  %v678_v29 = vpop.f32.mrf.mxu1 }
 0x11f   : > { %796 = vst [vmem:[%s1514_s8 + $0x8] sm:$0xff] %v748_v20  ;;  %v750_v27 = vmax.f32 %v514_v21, 0.0  ;;  %v516_v28 = vadd.f32 %v515_v24, %v369_v6  ;;  %797 = vst [vmem:[%s1514_s8 + $0x10] sm:$0xff] %v749_v25  ;;  %v758_v31 = vmax.f32 %v684_v26, 0.0  ;;  %v679_v32 = vadd.f32 %v678_v29, %v374_v3  ;;  %v1558_v21 = vpop.permute.xlu0 %423 }
 0x120   : > { %v519_v30 = vpop.f32.mrf.mxu0  ;;  %v1103_v35 = vpop.f32.mrf.mxu1 }
 0x121   : > { %798 = vst [vmem:[%s1514_s8 + $0x18] sm:$0xff] %v750_v27  ;;  %v751_v33 = vmax.f32 %v516_v28, 0.0  ;;  %v520_v34 = vadd.f32 %v519_v30, %v374_v3  ;;  %806 = vst [vmem:[%s1514_s8 + $0x58] sm:$0xff] %v758_v31  ;;  %v755_v38 = vmax.f32 %v679_v32, 0.0  ;;  %v694_v39 = vadd.f32 %v1103_v35, %v1507_v7 }
 0x122   : > { %v521_v37 = vpop.f32.mrf.mxu0  ;;  %v688_v42 = vpop.f32.mrf.mxu1 }
 0x123   : > { %799 = vst [vmem:[%s1514_s8 + $0x20] sm:$0xff] %v751_v33  ;;  %v753_v40 = vmax.f32 %v520_v34, 0.0  ;;  %v522_v41 = vadd.f32 %v521_v37, %v374_v3  ;;  %803 = vst [vmem:[%s1514_s8 + $0x40] sm:$0xff] %v755_v38  ;;  %v764_v45 = vmax.f32 %v694_v39, 0.0  ;;  %v689_v46 = vadd.f32 %v688_v42, %v1509_v8  ;;  %v1568_v34 = vpop.permute.xlu1 %438  ;;  %v1574_v42 = vpop.permute.xlu0 %433 }
 0x124   : > { %v525_v44 = vpop.f32.mrf.mxu0  ;;  %v1106_v50 = vpop.f32.mrf.mxu1 }
 0x125   : > { %801 = vst [vmem:[%s1514_s8 + $0x30] sm:$0xff] %v753_v40  ;;  %v754_v47 = vmax.f32 %v522_v41, 0.0  ;;  %v526_v48 = vadd.f32 %v525_v44, %v379_v5  ;;  %812 = vst [vmem:[%s1514_s8 + $0x88] sm:$0xff] %v764_v45  ;;  %v761_v52 = vmax.f32 %v689_v46, 0.0  ;;  %v704_v53 = vadd.f32 %v1106_v50, %v1511_v17 }
 0x126   : > { %v527_v51 = vpop.f32.mrf.mxu0  ;;  %v698_v56 = vpop.f32.mrf.mxu1 }
 0x127   : > { %802 = vst [vmem:[%s1514_s8 + $0x38] sm:$0xff] %v754_v47  ;;  %v756_v54 = vmax.f32 %v526_v48, 0.0  ;;  %v528_v55 = vadd.f32 %v527_v51, %v379_v5  ;;  %809 = vst [vmem:[%s1514_s8 + $0x70] sm:$0xff] %v761_v52  ;;  %v770_v59 = vmax.f32 %v704_v53, 0.0  ;;  %v699_v60 = vadd.f32 %v698_v56, %v1517_v23 }
 0x128   : > { %v531_v58 = vpop.f32.mrf.mxu0  ;;  %v1109_v63 = vpop.f32.mrf.mxu1 }
 0x129   : > { %804 = vst [vmem:[%s1514_s8 + $0x48] sm:$0xff] %v756_v54  ;;  %v757_v61 = vmax.f32 %v528_v55, 0.0  ;;  %v532_v62 = vadd.f32 %v531_v58, %v1509_v8  ;;  %818 = vst [vmem:[%s1514_s8 + $0xb8] sm:$0xff] %v770_v59  ;;  %v767_v2 = vmax.f32 %v699_v60, 0.0  ;;  %v714_v3 = vadd.f32 %v1109_v63, %v1523_v36 }
 0x12a   : > { %v533_v1 = vpop.f32.mrf.mxu0  ;;  %v708_v6 = vpop.f32.mrf.mxu1 }
 0x12b   : > { %805 = vst [vmem:[%s1514_s8 + $0x50] sm:$0xff] %v757_v61  ;;  %v759_v4 = vmax.f32 %v532_v62, 0.0  ;;  %v534_v5 = vadd.f32 %v533_v1, %v1509_v8  ;;  %815 = vst [vmem:[%s1514_s8 + $0xa0] sm:$0xff] %v767_v2  ;;  %v776_v10 = vmax.f32 %v714_v3, 0.0  ;;  %v709_v11 = vadd.f32 %v708_v6, %v1528_v43 }
 0x12c   : > { %v537_v9 = vpop.f32.mrf.mxu0  ;;  %v1112_v14 = vpop.f32.mrf.mxu1 }
 0x12d   : > { %807 = vst [vmem:[%s1514_s8 + $0x60] sm:$0xff] %v759_v4  ;;  %v760_v12 = vmax.f32 %v534_v5, 0.0  ;;  %v538_v13 = vadd.f32 %v537_v9, %v1507_v7  ;;  %824 = vst [vmem:[%s1514_s8 + $0xe8] sm:$0xff] %v776_v10  ;;  %v773_v49 = vmax.f32 %v709_v11, 0.0  ;;  %v724_v8 = vadd.f32 %v1112_v14, %v1536_v57 }
 0x12e   : > { %v539_v16 = vpop.f32.mrf.mxu0  ;;  %v718_v20 = vpop.f32.mrf.mxu1 }
 0x12f   : > { %808 = vst [vmem:[%s1514_s8 + $0x68] sm:$0xff] %v760_v12  ;;  %v762_v18 = vmax.f32 %v538_v13, 0.0  ;;  %v540_v19 = vadd.f32 %v539_v16, %v1507_v7  ;;  %821 = vst [vmem:[%s1514_s8 + $0xd0] sm:$0xff] %v773_v49  ;;  %v782_v24 = vmax.f32 %v724_v8, 0.0  ;;  %v719_v25 = vadd.f32 %v718_v20, %v1542_v0 }
 0x130   : > { %v543_v22 = vpop.f32.mrf.mxu0  ;;  %v1115_v28 = vpop.f32.mrf.mxu1 }
 0x131   : > { %810 = vst [vmem:[%s1514_s8 + $0x78] sm:$0xff] %v762_v18  ;;  %v763_v26 = vmax.f32 %v540_v19, 0.0  ;;  %v544_v27 = vadd.f32 %v543_v22, %v1517_v23  ;;  %830 = vst [vmem:[%s1514_s8 + $0x118] sm:$0xff] %v782_v24  ;;  %v779_v30 = vmax.f32 %v719_v25, 0.0  ;;  %v734_v7 = vadd.f32 %v1115_v28, %v1552_v15 }
 0x132   : > { %v545_v29 = vpop.f32.mrf.mxu0  ;;  %v728_v33 = vpop.f32.mrf.mxu1 }
 0x133   : > { %811 = vst [vmem:[%s1514_s8 + $0x80] sm:$0xff] %v763_v26  ;;  %v765_v31 = vmax.f32 %v544_v27, 0.0  ;;  %v546_v32 = vadd.f32 %v545_v29, %v1517_v23  ;;  %827 = vst [vmem:[%s1514_s8 + $0x100] sm:$0xff] %v779_v30  ;;  %v788_v37 = vmax.f32 %v734_v7, 0.0  ;;  %v729_v38 = vadd.f32 %v728_v33, %v1558_v21 }
 0x134   : > { %v549_v35 = vpop.f32.mrf.mxu0  ;;  %v1118_v41 = vpop.f32.mrf.mxu1 }
 0x135   : > { %813 = vst [vmem:[%s1514_s8 + $0x90] sm:$0xff] %v765_v31  ;;  %v766_v39 = vmax.f32 %v546_v32, 0.0  ;;  %v550_v40 = vadd.f32 %v549_v35, %v1511_v17  ;;  %836 = vst [vmem:[%s1514_s8 + $0x148] sm:$0xff] %v788_v37  ;;  %v785_v44 = vmax.f32 %v729_v38, 0.0  ;;  %v744_v45 = vadd.f32 %v1118_v41, %v1568_v34  ;;  %v865_v38 = vld [vmem:[%s1514_s8] sm:$0xff] (%p1225_p5) }
 0x136   : > { %v551_v23 = vpop.f32.mrf.mxu0  ;;  %v738_v48 = vpop.f32.mrf.mxu1  ;;  %v873_v41 = vld [vmem:[%s1514_s8 + $0x20] sm:$0xff] (%p1225_p5)  ;;  %866 = vst [vmem:[%s1631_s9] sm:$0xff] (%p1225_p5), %v865_v38 }
 0x137   : > { %814 = vst [vmem:[%s1514_s8 + $0x98] sm:$0xff] %v766_v39  ;;  %v768_v46 = vmax.f32 %v550_v40, 0.0  ;;  %v552_v47 = vadd.f32 %v551_v23, %v1511_v17  ;;  %833 = vst [vmem:[%s1514_s8 + $0x130] sm:$0xff] %v785_v44  ;;  %v794_v51 = vmax.f32 %v744_v45, 0.0  ;;  %v739_v52 = vadd.f32 %v738_v48, %v1574_v42  ;;  %v869_v39 = vld [vmem:[%s1514_s8 + $0x10] sm:$0xff] (%p1225_p5)  ;;  %v871_v40 = vld [vmem:[%s1514_s8 + $0x18] sm:$0xff] (%p1225_p5) }
 0x138   : > { %v555_v50 = vpop.f32.mrf.mxu0  ;;  %v877_v23 = vld [vmem:[%s1514_s8 + $0x30] sm:$0xff] (%p1225_p5)  ;;  %v879_v44 = vld [vmem:[%s1514_s8 + $0x38] sm:$0xff] (%p1225_p5)  ;;  %v881_v45 = vld [vmem:[%s1514_s8 + $0x40] sm:$0xff] (%p1225_p5)  ;;  %870 = vst [vmem:[%s1631_s9 + $0x10] sm:$0xff] (%p1225_p5), %v869_v39 }
 0x139   : > { %816 = vst [vmem:[%s1514_s8 + $0xa8] sm:$0xff] %v768_v46  ;;  %v769_v53 = vmax.f32 %v552_v47, 0.0  ;;  %v556_v54 = vadd.f32 %v555_v50, %v1528_v43  ;;  %842 = vst [vmem:[%s1514_s8 + $0x178] sm:$0xff] %v794_v51  ;;  %v791_v56 = vmax.f32 %v739_v52, 0.0  ;;  %v883_v46 = vld [vmem:[%s1514_s8 + $0x48] sm:$0xff] (%p1225_p5)  ;;  %v885_v47 = vld [vmem:[%s1514_s8 + $0x50] sm:$0xff] (%p1225_p5) }
 0x13a   : > { %v557_v55 = vpop.f32.mrf.mxu0  ;;  %872 = vst [vmem:[%s1631_s9 + $0x30] sm:$0xff] (%p1225_p5), %v871_v40  ;;  %874 = vst [vmem:[%s1631_s9 + $0x38] sm:$0xff] (%p1225_p5), %v873_v41  ;;  %v887_v48 = vld [vmem:[%s1514_s8 + $0x58] sm:$0xff] (%p1225_p5)  ;;  %v889_v50 = vld [vmem:[%s1514_s8 + $0x60] sm:$0xff] (%p1225_p5) }
 0x13b   : > { %817 = vst [vmem:[%s1514_s8 + $0xb0] sm:$0xff] %v769_v53  ;;  %v771_v58 = vmax.f32 %v556_v54, 0.0  ;;  %v558_v17 = vadd.f32 %v557_v55, %v1528_v43  ;;  %839 = vst [vmem:[%s1514_s8 + $0x160] sm:$0xff] %v791_v56  ;;  %v891_v51 = vld [vmem:[%s1514_s8 + $0x68] sm:$0xff] (%p1225_p5)  ;;  %v893_v52 = vld [vmem:[%s1514_s8 + $0x70] sm:$0xff] (%p1225_p5) }
 0x13c   : > { %v561_v59 = vpop.f32.mrf.mxu0  ;;  %878 = vst [vmem:[%s1631_s9 + $0x60] sm:$0xff] (%p1225_p5), %v877_v23  ;;  %880 = vst [vmem:[%s1631_s9 + $0x68] sm:$0xff] (%p1225_p5), %v879_v44  ;;  %v895_v53 = vld [vmem:[%s1514_s8 + $0x78] sm:$0xff] (%p1225_p5)  ;;  %v897_v54 = vld [vmem:[%s1514_s8 + $0x80] sm:$0xff] (%p1225_p5) }
 0x13d   : > { %819 = vst [vmem:[%s1514_s8 + $0xc0] sm:$0xff] %v771_v58  ;;  %v772_v60 = vmax.f32 %v558_v17, 0.0  ;;  %v562_v61 = vadd.f32 %v561_v59, %v1523_v36  ;;  %882 = vst [vmem:[%s1631_s9 + $0x70] sm:$0xff] (%p1225_p5), %v881_v45  ;;  %v899_v55 = vld [vmem:[%s1514_s8 + $0x88] sm:$0xff] (%p1225_p5)  ;;  %v901_v56 = vld [vmem:[%s1514_s8 + $0x90] sm:$0xff] (%p1225_p5) }
 0x13e   : > { %v563_v62 = vpop.f32.mrf.mxu0  ;;  %884 = vst [vmem:[%s1631_s9 + $0x90] sm:$0xff] (%p1225_p5), %v883_v46  ;;  %886 = vst [vmem:[%s1631_s9 + $0x98] sm:$0xff] (%p1225_p5), %v885_v47  ;;  %v903_v58 = vld [vmem:[%s1514_s8 + $0x98] sm:$0xff] (%p1225_p5)  ;;  %v905_v17 = vld [vmem:[%s1514_s8 + $0xa0] sm:$0xff] (%p1225_p5) }
 0x13f   : > { %820 = vst [vmem:[%s1514_s8 + $0xc8] sm:$0xff] %v772_v60  ;;  %v774_v63 = vmax.f32 %v562_v61, 0.0  ;;  %v564_v1 = vadd.f32 %v563_v62, %v1523_v36  ;;  %888 = vst [vmem:[%s1631_s9 + $0xa0] sm:$0xff] (%p1225_p5), %v887_v48  ;;  %v911_v61 = vld [vmem:[%s1514_s8 + $0xb8] sm:$0xff] (%p1225_p5) }
 0x140   : > { %v567_v2 = vpop.f32.mrf.mxu0  ;;  %890 = vst [vmem:[%s1631_s9 + $0xc0] sm:$0xff] (%p1225_p5), %v889_v50  ;;  %892 = vst [vmem:[%s1631_s9 + $0xc8] sm:$0xff] (%p1225_p5), %v891_v51  ;;  %v907_v59 = vld [vmem:[%s1514_s8 + $0xa8] sm:$0xff] (%p1225_p5) }
 0x141   : > { %822 = vst [vmem:[%s1514_s8 + $0xd8] sm:$0xff] %v774_v63  ;;  %v775_v3 = vmax.f32 %v564_v1, 0.0  ;;  %v568_v4 = vadd.f32 %v567_v2, %v1542_v0  ;;  %894 = vst [vmem:[%s1631_s9 + $0xd0] sm:$0xff] (%p1225_p5), %v893_v52  ;;  %v917_v1 = vld [vmem:[%s1514_s8 + $0xd0] sm:$0xff] (%p1225_p5) }
 0x142   : > { %v569_v43 = vpop.f32.mrf.mxu0  ;;  %896 = vst [vmem:[%s1631_s9 + $0xf0] sm:$0xff] (%p1225_p5), %v895_v53  ;;  %898 = vst [vmem:[%s1631_s9 + $0xf8] sm:$0xff] (%p1225_p5), %v897_v54  ;;  %v909_v60 = vld [vmem:[%s1514_s8 + $0xb0] sm:$0xff] (%p1225_p5) }
 0x143   : > { %823 = vst [vmem:[%s1514_s8 + $0xe0] sm:$0xff] %v775_v3  ;;  %v777_v5 = vmax.f32 %v568_v4, 0.0  ;;  %v570_v6 = vadd.f32 %v569_v43, %v1542_v0  ;;  %900 = vst [vmem:[%s1631_s9 + $0x100] sm:$0xff] (%p1225_p5), %v899_v55  ;;  %v923_v4 = vld [vmem:[%s1514_s8 + $0xe8] sm:$0xff] (%p1225_p5) }
 0x144   : > { %v573_v9 = vpop.f32.mrf.mxu0  ;;  %902 = vst [vmem:[%s1631_s9 + $0x120] sm:$0xff] (%p1225_p5), %v901_v56  ;;  %904 = vst [vmem:[%s1631_s9 + $0x128] sm:$0xff] (%p1225_p5), %v903_v58  ;;  %v913_v62 = vld [vmem:[%s1514_s8 + $0xc0] sm:$0xff] (%p1225_p5) }
 0x145   : > { %825 = vst [vmem:[%s1514_s8 + $0xf0] sm:$0xff] %v777_v5  ;;  %v778_v10 = vmax.f32 %v570_v6, 0.0  ;;  %v574_v11 = vadd.f32 %v573_v9, %v1536_v57  ;;  %906 = vst [vmem:[%s1631_s9 + $0x130] sm:$0xff] (%p1225_p5), %v905_v17  ;;  %v929_v6 = vld [vmem:[%s1514_s8 + $0x100] sm:$0xff] (%p1225_p5) }
 0x146   : > { %v575_v12 = vpop.f32.mrf.mxu0  ;;  %908 = vst [vmem:[%s1631_s9 + $0x150] sm:$0xff] (%p1225_p5), %v907_v59  ;;  %910 = vst [vmem:[%s1631_s9 + $0x158] sm:$0xff] (%p1225_p5), %v909_v60  ;;  %v915_v63 = vld [vmem:[%s1514_s8 + $0xc8] sm:$0xff] (%p1225_p5) }
 0x147   : > { %826 = vst [vmem:[%s1514_s8 + $0xf8] sm:$0xff] %v778_v10  ;;  %v780_v36 = vmax.f32 %v574_v11, 0.0  ;;  %v576_v13 = vadd.f32 %v575_v12, %v1536_v57  ;;  %912 = vst [vmem:[%s1631_s9 + $0x160] sm:$0xff] (%p1225_p5), %v911_v61  ;;  %v935_v11 = vld [vmem:[%s1514_s8 + $0x118] sm:$0xff] (%p1225_p5) }
 0x148   : > { %v579_v14 = vpop.f32.mrf.mxu0  ;;  %914 = vst [vmem:[%s1631_s9 + $0x180] sm:$0xff] (%p1225_p5), %v913_v62  ;;  %916 = vst [vmem:[%s1631_s9 + $0x188] sm:$0xff] (%p1225_p5), %v915_v63  ;;  %v919_v2 = vld [vmem:[%s1514_s8 + $0xd8] sm:$0xff] (%p1225_p5) }
 0x149   : > { %828 = vst [vmem:[%s1514_s8 + $0x108] sm:$0xff] %v780_v36  ;;  %v781_v16 = vmax.f32 %v576_v13, 0.0  ;;  %v580_v49 = vadd.f32 %v579_v14, %v1558_v21  ;;  %918 = vst [vmem:[%s1631_s9 + $0x190] sm:$0xff] (%p1225_p5), %v917_v1  ;;  %v941_v13 = vld [vmem:[%s1514_s8 + $0x130] sm:$0xff] (%p1225_p5) }
 0x14a   : > { %v581_v8 = vpop.f32.mrf.mxu0  ;;  %v921_v3 = vld [vmem:[%s1514_s8 + $0xe0] sm:$0xff] (%p1225_p5)  ;;  %920 = vst [vmem:[%s1631_s9 + $0x1b0] sm:$0xff] (%p1225_p5), %v919_v2  ;;  %924 = vst [vmem:[%s1631_s9 + $0x1c0] sm:$0xff] (%p1225_p5), %v923_v4 }
 0x14b   : > { %829 = vst [vmem:[%s1514_s8 + $0x110] sm:$0xff] %v781_v16  ;;  %v783_v0 = vmax.f32 %v580_v49, 0.0  ;;  %v582_v18 = vadd.f32 %v581_v8, %v1558_v21  ;;  %922 = vst [vmem:[%s1631_s9 + $0x1b8] sm:$0xff] (%p1225_p5), %v921_v3  ;;  %v947_v49 = vld [vmem:[%s1514_s8 + $0x148] sm:$0xff] (%p1225_p5) }
 0x14c   : > { %v585_v19 = vpop.f32.mrf.mxu0  ;;  %v925_v43 = vld [vmem:[%s1514_s8 + $0xf0] sm:$0xff] (%p1225_p5)  ;;  %930 = vst [vmem:[%s1631_s9 + $0x1f0] sm:$0xff] (%p1225_p5), %v929_v6  ;;  %936 = vst [vmem:[%s1631_s9 + $0x220] sm:$0xff] (%p1225_p5), %v935_v11 }
 0x14d   : > { %831 = vst [vmem:[%s1514_s8 + $0x120] sm:$0xff] %v783_v0  ;;  %v784_v20 = vmax.f32 %v582_v18, 0.0  ;;  %v586_v22 = vadd.f32 %v585_v19, %v1552_v15  ;;  %926 = vst [vmem:[%s1631_s9 + $0x1e0] sm:$0xff] (%p1225_p5), %v925_v43  ;;  %v953_v18 = vld [vmem:[%s1514_s8 + $0x160] sm:$0xff] (%p1225_p5) }
 0x14e   : > { %v587_v24 = vpop.f32.mrf.mxu0  ;;  %v927_v5 = vld [vmem:[%s1514_s8 + $0xf8] sm:$0xff] (%p1225_p5)  ;;  %942 = vst [vmem:[%s1631_s9 + $0x250] sm:$0xff] (%p1225_p5), %v941_v13  ;;  %948 = vst [vmem:[%s1631_s9 + $0x280] sm:$0xff] (%p1225_p5), %v947_v49 }
 0x14f   : > { %832 = vst [vmem:[%s1514_s8 + $0x128] sm:$0xff] %v784_v20  ;;  %v786_v57 = vmax.f32 %v586_v22, 0.0  ;;  %v588_v25 = vadd.f32 %v587_v24, %v1552_v15  ;;  %928 = vst [vmem:[%s1631_s9 + $0x1e8] sm:$0xff] (%p1225_p5), %v927_v5  ;;  %v959_v22 = vld [vmem:[%s1514_s8 + $0x178] sm:$0xff] (%p1225_p5) }
 0x150   : > { %v591_v26 = vpop.f32.mrf.mxu0  ;;  %v931_v9 = vld [vmem:[%s1514_s8 + $0x108] sm:$0xff] (%p1225_p5)  ;;  %954 = vst [vmem:[%s1631_s9 + $0x2b0] sm:$0xff] (%p1225_p5), %v953_v18  ;;  %960 = vst [vmem:[%s1631_s9 + $0x2e0] sm:$0xff] (%p1225_p5), %v959_v22 }
 0x151   : > { %834 = vst [vmem:[%s1514_s8 + $0x138] sm:$0xff] %v786_v57  ;;  %v787_v27 = vmax.f32 %v588_v25, 0.0  ;;  %v592_v28 = vadd.f32 %v591_v26, %v1574_v42  ;;  %932 = vst [vmem:[%s1631_s9 + $0x210] sm:$0xff] (%p1225_p5), %v931_v9 }
 0x152   : > { %v593_v21 = vpop.f32.mrf.mxu0  ;;  %v933_v10 = vld [vmem:[%s1514_s8 + $0x110] sm:$0xff] (%p1225_p5) }
 0x153   : > { %835 = vst [vmem:[%s1514_s8 + $0x140] sm:$0xff] %v787_v27  ;;  %v789_v29 = vmax.f32 %v592_v28, 0.0  ;;  %v594_v30 = vadd.f32 %v593_v21, %v1574_v42  ;;  %v875_v42 = vld [vmem:[%s1514_s8 + $0x28] sm:$0xff] (%p1225_p5)  ;;  %934 = vst [vmem:[%s1631_s9 + $0x218] sm:$0xff] (%p1225_p5), %v933_v10 }
 0x154   : > { %v597_v7 = vpop.f32.mrf.mxu0  ;;  %876 = vst [vmem:[%s1631_s9 + $0x40] sm:$0xff] (%p1225_p5), %v875_v42  ;;  %v937_v12 = vld [vmem:[%s1514_s8 + $0x120] sm:$0xff] (%p1225_p5) }
 0x155   : > { %837 = vst [vmem:[%s1514_s8 + $0x150] sm:$0xff] %v789_v29  ;;  %v790_v31 = vmax.f32 %v594_v30, 0.0  ;;  %v598_v32 = vadd.f32 %v597_v7, %v1568_v34  ;;  %938 = vst [vmem:[%s1631_s9 + $0x240] sm:$0xff] (%p1225_p5), %v937_v12 }
 0x156   : > { %v599_v33 = vpop.f32.mrf.mxu0  ;;  %v939_v36 = vld [vmem:[%s1514_s8 + $0x128] sm:$0xff] (%p1225_p5) }
 0x157   : > { %838 = vst [vmem:[%s1514_s8 + $0x158] sm:$0xff] %v790_v31  ;;  %v792_v15 = vmax.f32 %v598_v32, 0.0  ;;  %v600_v35 = vadd.f32 %v599_v33, %v1568_v34  ;;  %849 = sbr.rel (!%p1225_p5) target bundleno = 356 (0x164), region = 59  ;;  %v867_v34 = vld [vmem:[%s1514_s8 + $0x8] sm:$0xff] (%p1225_p5)  ;;  %940 = vst [vmem:[%s1631_s9 + $0x248] sm:$0xff] (%p1225_p5), %v939_v36 }
 0x158   : > { %868 = vst [vmem:[%s1631_s9 + $0x8] sm:$0xff] (%p1225_p5), %v867_v34  ;;  %v943_v14 = vld [vmem:[%s1514_s8 + $0x138] sm:$0xff] (%p1225_p5) }
 0x159   : > { %840 = vst [vmem:[%s1514_s8 + $0x168] sm:$0xff] %v792_v15  ;;  %v793_v37 = vmax.f32 %v600_v35, 0.0  ;;  %944 = vst [vmem:[%s1631_s9 + $0x270] sm:$0xff] (%p1225_p5), %v943_v14 }
 0x15a   : > { %v945_v16 = vld [vmem:[%s1514_s8 + $0x140] sm:$0xff] (%p1225_p5) }
 0x15b   : > { %841 = vst [vmem:[%s1514_s8 + $0x170] sm:$0xff] %v793_v37  ;;  %946 = vst [vmem:[%s1631_s9 + $0x278] sm:$0xff] (%p1225_p5), %v945_v16 }
 0x15c   : > { %v949_v8 = vld [vmem:[%s1514_s8 + $0x150] sm:$0xff] }
 0x15d   : > { %950 = vst [vmem:[%s1631_s9 + $0x2a0] sm:$0xff] %v949_v8 }
 0x15e   : > { %v951_v0 = vld [vmem:[%s1514_s8 + $0x158] sm:$0xff] }
 0x15f   : > { %952 = vst [vmem:[%s1631_s9 + $0x2a8] sm:$0xff] %v951_v0 }
 0x160   : > { %v955_v19 = vld [vmem:[%s1514_s8 + $0x168] sm:$0xff] }
 0x161   : > { %956 = vst [vmem:[%s1631_s9 + $0x2d0] sm:$0xff] %v955_v19 }
 0x162   : > { %v957_v20 = vld [vmem:[%s1514_s8 + $0x170] sm:$0xff] }
 0x163   : > { %958 = vst [vmem:[%s1631_s9 + $0x2d8] sm:$0xff] %v957_v20 }
 0x164 PF: > { %p10_p10 = scmp.ge.s32.totalorder %s1212_s16, 4   ;;  %s1738_s12 = smov %s1167_s13 }
 0x165   : > { %s1739_s13 = smov %s1223_s19  ;;  %s1740_s14 = smov %s1212_s16 }
 0x166   :  { %12 = sbr.rel (!%p10_p10) target bundleno = 2 (0x2), region = 113 }

// kernel: _lambda_.17
= control target key start
LH: loop header
LB: loop body
LE: loop exit
PB: predicated region body
PF: predicated region fallthrough
CT: control target
= control target key end

     0   :  { %s1305_s12 = smov 0   ;;  %s1307_s13 = smov 0   ;;  %s1847_s0 = inlined_call_operand.vmem [shape: f32[4,128], index: 0, kind: input, shape index: {}]   ;;  %s1848_s1 = inlined_call_operand.vmem [shape: f32[128,2304], index: 1, kind: input, shape index: {}]   ;;  %s1849_s2 = inlined_call_operand.vmem [shape: f32[4,1], index: 2, kind: input, shape index: {}]   ;;  %s1850_s3 = inlined_call_operand.vmem [shape: f32[4,2304], index: 3, kind: output, shape index: {}]  }
   0x1   :  { %s1309_s14 = smov 0  }
   0x2 LB: > { %s1121_s15 = sadd.s32 4294967295, %s1280_s14   ;;  %s1322_s16 = sadd.s32 1, %s1280_s14   ;;  %s1280_s14 = sphi %s1309_s14, %s1853_s14   ;;  %s1276_s13 = sphi %s1307_s13, %s1852_s13   ;;  %s1272_s12 = sphi %s1305_s12, %s1851_s12  }
   0x3   : > { %s38_s17 = ssub.s32 %s1280_s14, %s1322_s16  ;;  %s41_s18 = sadd.s32 1, %s1276_s13 }
   0x4   : > { %p39_p0 = scmp.eq.s32.totalorder %s38_s17, 0  ;;  %p48_p1 = scmp.ne.s32.totalorder %s1276_s13, %s1272_s12 }
   0x5   : > { %p49_p2 = scmp.eq.s32.totalorder %s1280_s14, 0  ;;  %p1124_p4 = scmp.ge.s32.totalorder %s1280_s14, 2 }
   0x6   : > { %s1331_s19 = scalar_select %p39_p0, %s1276_s13, %s41_s18  }
   0x7   : > { %p50_p3 = por %p49_p2, %p48_p1  ;;  %127 = sbr.rel (%p1124_p4) target bundleno = 89 (0x59), region = 24 }
   0xc   : > { %130 = sbr.rel (!%p50_p3) target bundleno = 89 (0x59), region = 28  ;;  %s132_s20 = sand.u32 (%p50_p3), 1, %s1276_s13  }
   0xd   : > { %s1139_s21 = smul.u32 (%p50_p3), 72, %s1280_s14 }
   0xe   : > { %s1192_s22 = smul.u32 (%p50_p3), 1152, %s132_s20 }
   0xf   : > { %s1339_s25 = scalar_lea.vmem (%p50_p3), %s1848_s1, %s1139_s21 }
  0x10   : > { %v150_v0 = vld [vmem:[%s1339_s25] sm:$0xff] (%p50_p3)  ;;  %v152_v1 = vld [vmem:[%s1339_s25 + $0x8] sm:$0xff] (%p50_p3)  ;;  %v154_v2 = vld [vmem:[%s1339_s25 + $0x10] sm:$0xff] (%p50_p3)  ;;  %s1344_s26 = scalar_lea.vmem (%p50_p3), [#allocation2], %s1192_s22 }
  0x11   : > { %151 = vst [vmem:[%s1344_s26] sm:$0xff] %v150_v0  ;;  %153 = vst [vmem:[%s1344_s26 + $0x8] sm:$0xff] %v152_v1  ;;  %v156_v3 = vld [vmem:[%s1339_s25 + $0x18] sm:$0xff]  ;;  %v158_v4 = vld [vmem:[%s1339_s25 + $0x20] sm:$0xff] }
  0x12   : > { %155 = vst [vmem:[%s1344_s26 + $0x10] sm:$0xff] %v154_v2  ;;  %v160_v5 = vld [vmem:[%s1339_s25 + $0x28] sm:$0xff]  ;;  %157 = vst [vmem:[%s1344_s26 + $0x18] sm:$0xff] %v156_v3  ;;  %v162_v6 = vld [vmem:[%s1339_s25 + $0x30] sm:$0xff] }
  0x13   : > { %159 = vst [vmem:[%s1344_s26 + $0x20] sm:$0xff] %v158_v4  ;;  %161 = vst [vmem:[%s1344_s26 + $0x28] sm:$0xff] %v160_v5  ;;  %v164_v7 = vld [vmem:[%s1339_s25 + $0x38] sm:$0xff]  ;;  %v166_v8 = vld [vmem:[%s1339_s25 + $0x40] sm:$0xff] }
  0x14   : > { %163 = vst [vmem:[%s1344_s26 + $0x30] sm:$0xff] %v162_v6  ;;  %165 = vst [vmem:[%s1344_s26 + $0x38] sm:$0xff] %v164_v7  ;;  %v168_v9 = vld [vmem:[%s1339_s25 + $0x90] sm:$0xff]  ;;  %v170_v10 = vld [vmem:[%s1339_s25 + $0x98] sm:$0xff] }
  0x15   : > { %167 = vst [vmem:[%s1344_s26 + $0x40] sm:$0xff] %v166_v8  ;;  %v172_v11 = vld [vmem:[%s1339_s25 + $0xa0] sm:$0xff]  ;;  %169 = vst [vmem:[%s1344_s26 + $0x48] sm:$0xff] %v168_v9  ;;  %v174_v12 = vld [vmem:[%s1339_s25 + $0xa8] sm:$0xff] }
  0x16   : > { %171 = vst [vmem:[%s1344_s26 + $0x50] sm:$0xff] %v170_v10  ;;  %173 = vst [vmem:[%s1344_s26 + $0x58] sm:$0xff] %v172_v11  ;;  %v176_v13 = vld [vmem:[%s1339_s25 + $0xb0] sm:$0xff]  ;;  %v178_v14 = vld [vmem:[%s1339_s25 + $0xb8] sm:$0xff] }
  0x17   : > { %175 = vst [vmem:[%s1344_s26 + $0x60] sm:$0xff] %v174_v12  ;;  %177 = vst [vmem:[%s1344_s26 + $0x68] sm:$0xff] %v176_v13  ;;  %v180_v15 = vld [vmem:[%s1339_s25 + $0xc0] sm:$0xff]  ;;  %v182_v16 = vld [vmem:[%s1339_s25 + $0xc8] sm:$0xff] }
  0x18   : > { %179 = vst [vmem:[%s1344_s26 + $0x70] sm:$0xff] %v178_v14  ;;  %v184_v17 = vld [vmem:[%s1339_s25 + $0xd0] sm:$0xff]  ;;  %181 = vst [vmem:[%s1344_s26 + $0x78] sm:$0xff] %v180_v15  ;;  %v186_v18 = vld [vmem:[%s1339_s25 + $0x120] sm:$0xff] }
  0x19   : > { %183 = vst [vmem:[%s1344_s26 + $0x80] sm:$0xff] %v182_v16  ;;  %185 = vst [vmem:[%s1344_s26 + $0x88] sm:$0xff] %v184_v17  ;;  %v188_v19 = vld [vmem:[%s1339_s25 + $0x128] sm:$0xff]  ;;  %v190_v20 = vld [vmem:[%s1339_s25 + $0x130] sm:$0xff] }
  0x1a   : > { %187 = vst [vmem:[%s1344_s26 + $0x90] sm:$0xff] %v186_v18  ;;  %189 = vst [vmem:[%s1344_s26 + $0x98] sm:$0xff] %v188_v19  ;;  %v192_v21 = vld [vmem:[%s1339_s25 + $0x138] sm:$0xff]  ;;  %v194_v22 = vld [vmem:[%s1339_s25 + $0x140] sm:$0xff] }
  0x1b   : > { %191 = vst [vmem:[%s1344_s26 + $0xa0] sm:$0xff] %v190_v20  ;;  %v196_v23 = vld [vmem:[%s1339_s25 + $0x148] sm:$0xff]  ;;  %193 = vst [vmem:[%s1344_s26 + $0xa8] sm:$0xff] %v192_v21  ;;  %v198_v24 = vld [vmem:[%s1339_s25 + $0x150] sm:$0xff] }
  0x1c   : > { %195 = vst [vmem:[%s1344_s26 + $0xb0] sm:$0xff] %v194_v22  ;;  %197 = vst [vmem:[%s1344_s26 + $0xb8] sm:$0xff] %v196_v23  ;;  %v200_v25 = vld [vmem:[%s1339_s25 + $0x158] sm:$0xff]  ;;  %v202_v26 = vld [vmem:[%s1339_s25 + $0x160] sm:$0xff] }
  0x1d   : > { %199 = vst [vmem:[%s1344_s26 + $0xc0] sm:$0xff] %v198_v24  ;;  %201 = vst [vmem:[%s1344_s26 + $0xc8] sm:$0xff] %v200_v25  ;;  %v204_v27 = vld [vmem:[%s1339_s25 + $0x1b0] sm:$0xff]  ;;  %v206_v28 = vld [vmem:[%s1339_s25 + $0x1b8] sm:$0xff] }
  0x1e   : > { %203 = vst [vmem:[%s1344_s26 + $0xd0] sm:$0xff] %v202_v26  ;;  %v208_v29 = vld [vmem:[%s1339_s25 + $0x1c0] sm:$0xff]  ;;  %205 = vst [vmem:[%s1344_s26 + $0xd8] sm:$0xff] %v204_v27  ;;  %v210_v30 = vld [vmem:[%s1339_s25 + $0x1c8] sm:$0xff] }
  0x1f   : > { %207 = vst [vmem:[%s1344_s26 + $0xe0] sm:$0xff] %v206_v28  ;;  %209 = vst [vmem:[%s1344_s26 + $0xe8] sm:$0xff] %v208_v29  ;;  %v212_v31 = vld [vmem:[%s1339_s25 + $0x1d0] sm:$0xff]  ;;  %v214_v32 = vld [vmem:[%s1339_s25 + $0x1d8] sm:$0xff] }
  0x20   : > { %211 = vst [vmem:[%s1344_s26 + $0xf0] sm:$0xff] %v210_v30  ;;  %213 = vst [vmem:[%s1344_s26 + $0xf8] sm:$0xff] %v212_v31  ;;  %v216_v33 = vld [vmem:[%s1339_s25 + $0x1e0] sm:$0xff]  ;;  %v218_v34 = vld [vmem:[%s1339_s25 + $0x1e8] sm:$0xff] }
  0x21   : > { %215 = vst [vmem:[%s1344_s26 + $0x100] sm:$0xff] %v214_v32  ;;  %v220_v35 = vld [vmem:[%s1339_s25 + $0x1f0] sm:$0xff]  ;;  %217 = vst [vmem:[%s1344_s26 + $0x108] sm:$0xff] %v216_v33  ;;  %v222_v36 = vld [vmem:[%s1339_s25 + $0x240] sm:$0xff] }
  0x22   : > { %219 = vst [vmem:[%s1344_s26 + $0x110] sm:$0xff] %v218_v34  ;;  %221 = vst [vmem:[%s1344_s26 + $0x118] sm:$0xff] %v220_v35  ;;  %v224_v37 = vld [vmem:[%s1339_s25 + $0x248] sm:$0xff]  ;;  %v226_v38 = vld [vmem:[%s1339_s25 + $0x250] sm:$0xff] }
  0x23   : > { %223 = vst [vmem:[%s1344_s26 + $0x120] sm:$0xff] %v222_v36  ;;  %225 = vst [vmem:[%s1344_s26 + $0x128] sm:$0xff] %v224_v37  ;;  %v228_v39 = vld [vmem:[%s1339_s25 + $0x258] sm:$0xff]  ;;  %v230_v40 = vld [vmem:[%s1339_s25 + $0x260] sm:$0xff] }
  0x24   : > { %227 = vst [vmem:[%s1344_s26 + $0x130] sm:$0xff] %v226_v38  ;;  %v232_v41 = vld [vmem:[%s1339_s25 + $0x268] sm:$0xff]  ;;  %229 = vst [vmem:[%s1344_s26 + $0x138] sm:$0xff] %v228_v39  ;;  %v234_v42 = vld [vmem:[%s1339_s25 + $0x270] sm:$0xff] }
  0x25   : > { %231 = vst [vmem:[%s1344_s26 + $0x140] sm:$0xff] %v230_v40  ;;  %233 = vst [vmem:[%s1344_s26 + $0x148] sm:$0xff] %v232_v41  ;;  %v236_v43 = vld [vmem:[%s1339_s25 + $0x278] sm:$0xff]  ;;  %v238_v44 = vld [vmem:[%s1339_s25 + $0x280] sm:$0xff] }
  0x26   : > { %235 = vst [vmem:[%s1344_s26 + $0x150] sm:$0xff] %v234_v42  ;;  %237 = vst [vmem:[%s1344_s26 + $0x158] sm:$0xff] %v236_v43  ;;  %v240_v45 = vld [vmem:[%s1339_s25 + $0x2d0] sm:$0xff]  ;;  %v242_v46 = vld [vmem:[%s1339_s25 + $0x2d8] sm:$0xff] }
  0x27   : > { %239 = vst [vmem:[%s1344_s26 + $0x160] sm:$0xff] %v238_v44  ;;  %v244_v47 = vld [vmem:[%s1339_s25 + $0x2e0] sm:$0xff]  ;;  %241 = vst [vmem:[%s1344_s26 + $0x168] sm:$0xff] %v240_v45  ;;  %v246_v48 = vld [vmem:[%s1339_s25 + $0x2e8] sm:$0xff] }
  0x28   : > { %243 = vst [vmem:[%s1344_s26 + $0x170] sm:$0xff] %v242_v46  ;;  %245 = vst [vmem:[%s1344_s26 + $0x178] sm:$0xff] %v244_v47  ;;  %v248_v49 = vld [vmem:[%s1339_s25 + $0x2f0] sm:$0xff]  ;;  %v250_v50 = vld [vmem:[%s1339_s25 + $0x2f8] sm:$0xff] }
  0x29   : > { %247 = vst [vmem:[%s1344_s26 + $0x180] sm:$0xff] %v246_v48  ;;  %249 = vst [vmem:[%s1344_s26 + $0x188] sm:$0xff] %v248_v49  ;;  %v252_v51 = vld [vmem:[%s1339_s25 + $0x300] sm:$0xff]  ;;  %v254_v52 = vld [vmem:[%s1339_s25 + $0x308] sm:$0xff] }
  0x2a   : > { %251 = vst [vmem:[%s1344_s26 + $0x190] sm:$0xff] %v250_v50  ;;  %v256_v53 = vld [vmem:[%s1339_s25 + $0x310] sm:$0xff]  ;;  %253 = vst [vmem:[%s1344_s26 + $0x198] sm:$0xff] %v252_v51  ;;  %v258_v54 = vld [vmem:[%s1339_s25 + $0x360] sm:$0xff] }
  0x2b   : > { %255 = vst [vmem:[%s1344_s26 + $0x1a0] sm:$0xff] %v254_v52  ;;  %257 = vst [vmem:[%s1344_s26 + $0x1a8] sm:$0xff] %v256_v53  ;;  %v260_v55 = vld [vmem:[%s1339_s25 + $0x368] sm:$0xff]  ;;  %v262_v56 = vld [vmem:[%s1339_s25 + $0x370] sm:$0xff] }
  0x2c   : > { %259 = vst [vmem:[%s1344_s26 + $0x1b0] sm:$0xff] %v258_v54  ;;  %261 = vst [vmem:[%s1344_s26 + $0x1b8] sm:$0xff] %v260_v55  ;;  %v264_v57 = vld [vmem:[%s1339_s25 + $0x378] sm:$0xff]  ;;  %v266_v58 = vld [vmem:[%s1339_s25 + $0x380] sm:$0xff] }
  0x2d   : > { %263 = vst [vmem:[%s1344_s26 + $0x1c0] sm:$0xff] %v262_v56  ;;  %v268_v59 = vld [vmem:[%s1339_s25 + $0x388] sm:$0xff]  ;;  %265 = vst [vmem:[%s1344_s26 + $0x1c8] sm:$0xff] %v264_v57  ;;  %v270_v60 = vld [vmem:[%s1339_s25 + $0x390] sm:$0xff] }
  0x2e   : > { %267 = vst [vmem:[%s1344_s26 + $0x1d0] sm:$0xff] %v266_v58  ;;  %269 = vst [vmem:[%s1344_s26 + $0x1d8] sm:$0xff] %v268_v59  ;;  %v272_v61 = vld [vmem:[%s1339_s25 + $0x398] sm:$0xff]  ;;  %v274_v62 = vld [vmem:[%s1339_s25 + $0x3a0] sm:$0xff] }
  0x2f   : > { %271 = vst [vmem:[%s1344_s26 + $0x1e0] sm:$0xff] %v270_v60  ;;  %273 = vst [vmem:[%s1344_s26 + $0x1e8] sm:$0xff] %v272_v61  ;;  %v276_v63 = vld [vmem:[%s1339_s25 + $0x3f0] sm:$0xff]  ;;  %v278_v0 = vld [vmem:[%s1339_s25 + $0x3f8] sm:$0xff] }
  0x30   : > { %275 = vst [vmem:[%s1344_s26 + $0x1f0] sm:$0xff] %v274_v62  ;;  %v280_v1 = vld [vmem:[%s1339_s25 + $0x400] sm:$0xff]  ;;  %277 = vst [vmem:[%s1344_s26 + $0x1f8] sm:$0xff] %v276_v63  ;;  %v282_v2 = vld [vmem:[%s1339_s25 + $0x408] sm:$0xff] }
  0x31   : > { %279 = vst [vmem:[%s1344_s26 + $0x200] sm:$0xff] %v278_v0  ;;  %281 = vst [vmem:[%s1344_s26 + $0x208] sm:$0xff] %v280_v1  ;;  %v284_v3 = vld [vmem:[%s1339_s25 + $0x410] sm:$0xff]  ;;  %v286_v4 = vld [vmem:[%s1339_s25 + $0x418] sm:$0xff] }
  0x32   : > { %283 = vst [vmem:[%s1344_s26 + $0x210] sm:$0xff] %v282_v2  ;;  %285 = vst [vmem:[%s1344_s26 + $0x218] sm:$0xff] %v284_v3  ;;  %v288_v5 = vld [vmem:[%s1339_s25 + $0x420] sm:$0xff]  ;;  %v290_v6 = vld [vmem:[%s1339_s25 + $0x428] sm:$0xff] }
  0x33   : > { %287 = vst [vmem:[%s1344_s26 + $0x220] sm:$0xff] %v286_v4  ;;  %v292_v7 = vld [vmem:[%s1339_s25 + $0x430] sm:$0xff]  ;;  %289 = vst [vmem:[%s1344_s26 + $0x228] sm:$0xff] %v288_v5  ;;  %v294_v8 = vld [vmem:[%s1339_s25 + $0x480] sm:$0xff] }
  0x34   : > { %291 = vst [vmem:[%s1344_s26 + $0x230] sm:$0xff] %v290_v6  ;;  %293 = vst [vmem:[%s1344_s26 + $0x238] sm:$0xff] %v292_v7  ;;  %v296_v9 = vld [vmem:[%s1339_s25 + $0x488] sm:$0xff]  ;;  %v298_v10 = vld [vmem:[%s1339_s25 + $0x490] sm:$0xff] }
  0x35   : > { %295 = vst [vmem:[%s1344_s26 + $0x240] sm:$0xff] %v294_v8  ;;  %297 = vst [vmem:[%s1344_s26 + $0x248] sm:$0xff] %v296_v9  ;;  %v300_v11 = vld [vmem:[%s1339_s25 + $0x498] sm:$0xff]  ;;  %v302_v12 = vld [vmem:[%s1339_s25 + $0x4a0] sm:$0xff] }
  0x36   : > { %299 = vst [vmem:[%s1344_s26 + $0x250] sm:$0xff] %v298_v10  ;;  %v304_v13 = vld [vmem:[%s1339_s25 + $0x4a8] sm:$0xff]  ;;  %301 = vst [vmem:[%s1344_s26 + $0x258] sm:$0xff] %v300_v11  ;;  %v306_v14 = vld [vmem:[%s1339_s25 + $0x4b0] sm:$0xff] }
  0x37   : > { %303 = vst [vmem:[%s1344_s26 + $0x260] sm:$0xff] %v302_v12  ;;  %305 = vst [vmem:[%s1344_s26 + $0x268] sm:$0xff] %v304_v13  ;;  %v308_v15 = vld [vmem:[%s1339_s25 + $0x4b8] sm:$0xff]  ;;  %v310_v16 = vld [vmem:[%s1339_s25 + $0x4c0] sm:$0xff] }
  0x38   : > { %307 = vst [vmem:[%s1344_s26 + $0x270] sm:$0xff] %v306_v14  ;;  %309 = vst [vmem:[%s1344_s26 + $0x278] sm:$0xff] %v308_v15  ;;  %v312_v17 = vld [vmem:[%s1339_s25 + $0x510] sm:$0xff]  ;;  %v314_v18 = vld [vmem:[%s1339_s25 + $0x518] sm:$0xff] }
  0x39   : > { %311 = vst [vmem:[%s1344_s26 + $0x280] sm:$0xff] %v310_v16  ;;  %v316_v19 = vld [vmem:[%s1339_s25 + $0x520] sm:$0xff]  ;;  %313 = vst [vmem:[%s1344_s26 + $0x288] sm:$0xff] %v312_v17  ;;  %v318_v20 = vld [vmem:[%s1339_s25 + $0x528] sm:$0xff] }
  0x3a   : > { %315 = vst [vmem:[%s1344_s26 + $0x290] sm:$0xff] %v314_v18  ;;  %317 = vst [vmem:[%s1344_s26 + $0x298] sm:$0xff] %v316_v19  ;;  %v320_v21 = vld [vmem:[%s1339_s25 + $0x530] sm:$0xff]  ;;  %v322_v22 = vld [vmem:[%s1339_s25 + $0x538] sm:$0xff] }
  0x3b   : > { %319 = vst [vmem:[%s1344_s26 + $0x2a0] sm:$0xff] %v318_v20  ;;  %321 = vst [vmem:[%s1344_s26 + $0x2a8] sm:$0xff] %v320_v21  ;;  %v324_v23 = vld [vmem:[%s1339_s25 + $0x540] sm:$0xff]  ;;  %v326_v24 = vld [vmem:[%s1339_s25 + $0x548] sm:$0xff] }
  0x3c   : > { %323 = vst [vmem:[%s1344_s26 + $0x2b0] sm:$0xff] %v322_v22  ;;  %v328_v25 = vld [vmem:[%s1339_s25 + $0x550] sm:$0xff]  ;;  %325 = vst [vmem:[%s1344_s26 + $0x2b8] sm:$0xff] %v324_v23  ;;  %v330_v26 = vld [vmem:[%s1339_s25 + $0x5a0] sm:$0xff] }
  0x3d   : > { %327 = vst [vmem:[%s1344_s26 + $0x2c0] sm:$0xff] %v326_v24  ;;  %329 = vst [vmem:[%s1344_s26 + $0x2c8] sm:$0xff] %v328_v25  ;;  %v332_v27 = vld [vmem:[%s1339_s25 + $0x5a8] sm:$0xff]  ;;  %v334_v28 = vld [vmem:[%s1339_s25 + $0x5b0] sm:$0xff] }
  0x3e   : > { %331 = vst [vmem:[%s1344_s26 + $0x2d0] sm:$0xff] %v330_v26  ;;  %333 = vst [vmem:[%s1344_s26 + $0x2d8] sm:$0xff] %v332_v27  ;;  %v336_v29 = vld [vmem:[%s1339_s25 + $0x5b8] sm:$0xff]  ;;  %v338_v30 = vld [vmem:[%s1339_s25 + $0x5c0] sm:$0xff] }
  0x3f   : > { %335 = vst [vmem:[%s1344_s26 + $0x2e0] sm:$0xff] %v334_v28  ;;  %v340_v31 = vld [vmem:[%s1339_s25 + $0x5c8] sm:$0xff]  ;;  %337 = vst [vmem:[%s1344_s26 + $0x2e8] sm:$0xff] %v336_v29  ;;  %v342_v32 = vld [vmem:[%s1339_s25 + $0x5d0] sm:$0xff] }
  0x40   : > { %339 = vst [vmem:[%s1344_s26 + $0x2f0] sm:$0xff] %v338_v30  ;;  %341 = vst [vmem:[%s1344_s26 + $0x2f8] sm:$0xff] %v340_v31  ;;  %v344_v33 = vld [vmem:[%s1339_s25 + $0x5d8] sm:$0xff]  ;;  %v346_v34 = vld [vmem:[%s1339_s25 + $0x5e0] sm:$0xff] }
  0x41   : > { %343 = vst [vmem:[%s1344_s26 + $0x300] sm:$0xff] %v342_v32  ;;  %345 = vst [vmem:[%s1344_s26 + $0x308] sm:$0xff] %v344_v33  ;;  %v348_v35 = vld [vmem:[%s1339_s25 + $0x630] sm:$0xff]  ;;  %v350_v36 = vld [vmem:[%s1339_s25 + $0x638] sm:$0xff] }
  0x42   : > { %347 = vst [vmem:[%s1344_s26 + $0x310] sm:$0xff] %v346_v34  ;;  %v352_v37 = vld [vmem:[%s1339_s25 + $0x640] sm:$0xff]  ;;  %349 = vst [vmem:[%s1344_s26 + $0x318] sm:$0xff] %v348_v35  ;;  %v354_v38 = vld [vmem:[%s1339_s25 + $0x648] sm:$0xff] }
  0x43   : > { %351 = vst [vmem:[%s1344_s26 + $0x320] sm:$0xff] %v350_v36  ;;  %353 = vst [vmem:[%s1344_s26 + $0x328] sm:$0xff] %v352_v37  ;;  %v356_v39 = vld [vmem:[%s1339_s25 + $0x650] sm:$0xff]  ;;  %v358_v40 = vld [vmem:[%s1339_s25 + $0x658] sm:$0xff] }
  0x44   : > { %355 = vst [vmem:[%s1344_s26 + $0x330] sm:$0xff] %v354_v38  ;;  %357 = vst [vmem:[%s1344_s26 + $0x338] sm:$0xff] %v356_v39  ;;  %v360_v41 = vld [vmem:[%s1339_s25 + $0x660] sm:$0xff]  ;;  %v362_v42 = vld [vmem:[%s1339_s25 + $0x668] sm:$0xff] }
  0x45   : > { %359 = vst [vmem:[%s1344_s26 + $0x340] sm:$0xff] %v358_v40  ;;  %v364_v43 = vld [vmem:[%s1339_s25 + $0x670] sm:$0xff]  ;;  %361 = vst [vmem:[%s1344_s26 + $0x348] sm:$0xff] %v360_v41  ;;  %v366_v44 = vld [vmem:[%s1339_s25 + $0x6c0] sm:$0xff] }
  0x46   : > { %363 = vst [vmem:[%s1344_s26 + $0x350] sm:$0xff] %v362_v42  ;;  %365 = vst [vmem:[%s1344_s26 + $0x358] sm:$0xff] %v364_v43  ;;  %v368_v45 = vld [vmem:[%s1339_s25 + $0x6c8] sm:$0xff]  ;;  %v370_v46 = vld [vmem:[%s1339_s25 + $0x6d0] sm:$0xff] }
  0x47   : > { %367 = vst [vmem:[%s1344_s26 + $0x360] sm:$0xff] %v366_v44  ;;  %369 = vst [vmem:[%s1344_s26 + $0x368] sm:$0xff] %v368_v45  ;;  %v372_v47 = vld [vmem:[%s1339_s25 + $0x6d8] sm:$0xff]  ;;  %v374_v48 = vld [vmem:[%s1339_s25 + $0x6e0] sm:$0xff] }
  0x48   : > { %371 = vst [vmem:[%s1344_s26 + $0x370] sm:$0xff] %v370_v46  ;;  %v376_v49 = vld [vmem:[%s1339_s25 + $0x6e8] sm:$0xff]  ;;  %373 = vst [vmem:[%s1344_s26 + $0x378] sm:$0xff] %v372_v47  ;;  %v378_v50 = vld [vmem:[%s1339_s25 + $0x6f0] sm:$0xff] }
  0x49   : > { %375 = vst [vmem:[%s1344_s26 + $0x380] sm:$0xff] %v374_v48  ;;  %377 = vst [vmem:[%s1344_s26 + $0x388] sm:$0xff] %v376_v49  ;;  %v380_v51 = vld [vmem:[%s1339_s25 + $0x6f8] sm:$0xff]  ;;  %v382_v52 = vld [vmem:[%s1339_s25 + $0x700] sm:$0xff] }
  0x4a   : > { %379 = vst [vmem:[%s1344_s26 + $0x390] sm:$0xff] %v378_v50  ;;  %381 = vst [vmem:[%s1344_s26 + $0x398] sm:$0xff] %v380_v51  ;;  %v384_v53 = vld [vmem:[%s1339_s25 + $0x750] sm:$0xff]  ;;  %v386_v54 = vld [vmem:[%s1339_s25 + $0x758] sm:$0xff] }
  0x4b   : > { %383 = vst [vmem:[%s1344_s26 + $0x3a0] sm:$0xff] %v382_v52  ;;  %v388_v55 = vld [vmem:[%s1339_s25 + $0x760] sm:$0xff]  ;;  %385 = vst [vmem:[%s1344_s26 + $0x3a8] sm:$0xff] %v384_v53  ;;  %v390_v56 = vld [vmem:[%s1339_s25 + $0x768] sm:$0xff] }
  0x4c   : > { %387 = vst [vmem:[%s1344_s26 + $0x3b0] sm:$0xff] %v386_v54  ;;  %389 = vst [vmem:[%s1344_s26 + $0x3b8] sm:$0xff] %v388_v55  ;;  %v392_v57 = vld [vmem:[%s1339_s25 + $0x770] sm:$0xff]  ;;  %v394_v58 = vld [vmem:[%s1339_s25 + $0x778] sm:$0xff] }
  0x4d   : > { %391 = vst [vmem:[%s1344_s26 + $0x3c0] sm:$0xff] %v390_v56  ;;  %393 = vst [vmem:[%s1344_s26 + $0x3c8] sm:$0xff] %v392_v57  ;;  %v396_v59 = vld [vmem:[%s1339_s25 + $0x780] sm:$0xff]  ;;  %v398_v60 = vld [vmem:[%s1339_s25 + $0x788] sm:$0xff] }
  0x4e   : > { %395 = vst [vmem:[%s1344_s26 + $0x3d0] sm:$0xff] %v394_v58  ;;  %v400_v61 = vld [vmem:[%s1339_s25 + $0x790] sm:$0xff]  ;;  %397 = vst [vmem:[%s1344_s26 + $0x3d8] sm:$0xff] %v396_v59  ;;  %v402_v62 = vld [vmem:[%s1339_s25 + $0x7e0] sm:$0xff] }
  0x4f   : > { %399 = vst [vmem:[%s1344_s26 + $0x3e0] sm:$0xff] %v398_v60  ;;  %401 = vst [vmem:[%s1344_s26 + $0x3e8] sm:$0xff] %v400_v61  ;;  %v404_v63 = vld [vmem:[%s1339_s25 + $0x7e8] sm:$0xff]  ;;  %v406_v0 = vld [vmem:[%s1339_s25 + $0x7f0] sm:$0xff] }
  0x50   : > { %403 = vst [vmem:[%s1344_s26 + $0x3f0] sm:$0xff] %v402_v62  ;;  %405 = vst [vmem:[%s1344_s26 + $0x3f8] sm:$0xff] %v404_v63  ;;  %v408_v1 = vld [vmem:[%s1339_s25 + $0x7f8] sm:$0xff]  ;;  %v410_v2 = vld [vmem:[%s1339_s25 + $0x800] sm:$0xff] }
  0x51   : > { %407 = vst [vmem:[%s1344_s26 + $0x400] sm:$0xff] %v406_v0  ;;  %v412_v3 = vld [vmem:[%s1339_s25 + $0x808] sm:$0xff]  ;;  %409 = vst [vmem:[%s1344_s26 + $0x408] sm:$0xff] %v408_v1  ;;  %v414_v4 = vld [vmem:[%s1339_s25 + $0x810] sm:$0xff] }
  0x52   : > { %411 = vst [vmem:[%s1344_s26 + $0x410] sm:$0xff] %v410_v2  ;;  %413 = vst [vmem:[%s1344_s26 + $0x418] sm:$0xff] %v412_v3  ;;  %v416_v5 = vld [vmem:[%s1339_s25 + $0x818] sm:$0xff]  ;;  %v418_v6 = vld [vmem:[%s1339_s25 + $0x820] sm:$0xff] }
  0x53   : > { %415 = vst [vmem:[%s1344_s26 + $0x420] sm:$0xff] %v414_v4  ;;  %417 = vst [vmem:[%s1344_s26 + $0x428] sm:$0xff] %v416_v5  ;;  %v420_v7 = vld [vmem:[%s1339_s25 + $0x870] sm:$0xff]  ;;  %v422_v8 = vld [vmem:[%s1339_s25 + $0x878] sm:$0xff] }
  0x54   : > { %419 = vst [vmem:[%s1344_s26 + $0x430] sm:$0xff] %v418_v6  ;;  %v424_v9 = vld [vmem:[%s1339_s25 + $0x880] sm:$0xff]  ;;  %421 = vst [vmem:[%s1344_s26 + $0x438] sm:$0xff] %v420_v7  ;;  %v426_v10 = vld [vmem:[%s1339_s25 + $0x888] sm:$0xff] }
  0x55   : > { %423 = vst [vmem:[%s1344_s26 + $0x440] sm:$0xff] %v422_v8  ;;  %425 = vst [vmem:[%s1344_s26 + $0x448] sm:$0xff] %v424_v9  ;;  %v428_v11 = vld [vmem:[%s1339_s25 + $0x890] sm:$0xff]  ;;  %v430_v12 = vld [vmem:[%s1339_s25 + $0x898] sm:$0xff] }
  0x56   : > { %427 = vst [vmem:[%s1344_s26 + $0x450] sm:$0xff] %v426_v10  ;;  %429 = vst [vmem:[%s1344_s26 + $0x458] sm:$0xff] %v428_v11  ;;  %v432_v13 = vld [vmem:[%s1339_s25 + $0x8a0] sm:$0xff]  ;;  %v434_v14 = vld [vmem:[%s1339_s25 + $0x8a8] sm:$0xff] }
  0x57   : > { %431 = vst [vmem:[%s1344_s26 + $0x460] sm:$0xff] %v430_v12  ;;  %v436_v15 = vld [vmem:[%s1339_s25 + $0x8b0] sm:$0xff]  ;;  %433 = vst [vmem:[%s1344_s26 + $0x468] sm:$0xff] %v432_v13 }
  0x58   : > { %435 = vst [vmem:[%s1344_s26 + $0x470] sm:$0xff] %v434_v14  ;;  %437 = vst [vmem:[%s1344_s26 + $0x478] sm:$0xff] %v436_v15 }
  0x59 PF: > { %p1126_p5 = scmp.ge.s32.totalorder %s1280_s14, 1  ;;  %p442_p6 = scmp.lt.s32.totalorder %s1280_s14, 3 }
  0x5b   : > { %p443_p7 = pnand %p1126_p5, %p442_p6 }
  0x5c   : > { %s449_s27 = sand.u32 (!%p443_p7), 1, %s1272_s12   ;;  %s473_s7 = smul.u32 (!%p443_p7), 9, %s1121_s15 }
  0x5d   : > { %446 = sbr.rel (%p443_p7) target bundleno = 424 (0x1a8), region = 51 }
  0x5e   : > { %s1193_s28 = smul.u32 (!%p443_p7), 1152, %s449_s27  ;;  %p474_p8 = scmp.lt.s32.totalorder (!%p443_p7), %s473_s7, 17 }
  0x60   : > { %s1639_s4 = scalar_lea.vmem (!%p443_p7), [#allocation2], %s1193_s28 }
  0x62   : > { %v1282_v16 = vmov 0.0   ;;  %v624_v17 = vld [vmem:[%s1849_s2] sm:$0xf]  ;;  %v1283_v18 = vmov 0   ;;  %v615_v20 = vld [vmem:[%s1639_s4 + $0x438] sm:$0xff]  ;;  %v606_v22 = vld [vmem:[%s1639_s4 + $0x3f0] sm:$0xff] }
  0x63   : > { %694 = vmatprep.mubr.f32.mxu0 %v1282_v16  ;;  %765 = vmatprep.mubr.f32.mxu1 %v1282_v16  ;;  %v616_v19 = vld [vmem:[%s1639_s4 + $0x440] sm:$0xff]  ;;  %v607_v21 = vld [vmem:[%s1639_s4 + $0x3f8] sm:$0xff]  ;;  %v598_v23 = vld [vmem:[%s1639_s4 + $0x3b0] sm:$0xff]  ;;  %vm1284_vm0 = vmmov 0   ;;  %s1855_s7 = smov (!%p474_p8, %s473_s7), 17 }
  0x64   : > { %1221 = vset.pattern.permute.xlu0 %v1283_v18  ;;  %630 = vmatprep.subr.mxu0 %v616_v19  ;;  %v597_v24 = vld [vmem:[%s1639_s4 + $0x3a8] sm:$0xff]  ;;  %v588_v26 = vld [vmem:[%s1639_s4 + $0x360] sm:$0xff]  ;;  %v579_v28 = vld [vmem:[%s1639_s4 + $0x318] sm:$0xff]  ;;  %s1127_s8 = sshll.u32 %s1855_s7, 2 }
  0x65   : > { %627 = vperm.xlu0 %1221, %v624_v17   ;;  %631 = vmatpush1.msra.mxu0 %v615_v20  ;;  %v589_v25 = vld [vmem:[%s1639_s4 + $0x368] sm:$0xff]  ;;  %v580_v27 = vld [vmem:[%s1639_s4 + $0x320] sm:$0xff]  ;;  %v571_v29 = vld [vmem:[%s1639_s4 + $0x2d8] sm:$0xff]  ;;  %s1827_s11 = scalar_lea.vmem %s1850_s3, %s1127_s8 }
  0x66   : > { %632 = vmatprep.subr.mxu0 %v607_v21  ;;  %v570_v30 = vld [vmem:[%s1639_s4 + $0x2d0] sm:$0xff]  ;;  %v617_v32 = vld [vmem:[%s1639_s4 + $0x448] sm:$0xff]  ;;  %v608_v36 = vld [vmem:[%s1639_s4 + $0x400] sm:$0xff] }
  0x67   : > { %633 = vmatpush1.msra.mxu0 %v606_v22  ;;  %v618_v31 = vld [vmem:[%s1639_s4 + $0x450] sm:$0xff]  ;;  %v609_v34 = vld [vmem:[%s1639_s4 + $0x408] sm:$0xff]  ;;  %v600_v37 = vld [vmem:[%s1639_s4 + $0x3c0] sm:$0xff] }
  0x68   : > { %634 = vmatprep.subr.mxu0 %v598_v23  ;;  %v562_v33 = vld [vmem:[%s1639_s4 + $0x290] sm:$0xff]  ;;  %701 = vmatprep.subr.mxu1 %v618_v31  ;;  %v561_v35 = vld [vmem:[%s1639_s4 + $0x288] sm:$0xff]  ;;  %v599_v39 = vld [vmem:[%s1639_s4 + $0x3b8] sm:$0xff] }
  0x69   : > { %635 = vmatpush1.msra.mxu0 %v597_v24  ;;  %702 = vmatpush1.msra.mxu1 %v617_v32  ;;  %v553_v38 = vld [vmem:[%s1639_s4 + $0x248] sm:$0xff]  ;;  %v552_v40 = vld [vmem:[%s1639_s4 + $0x240] sm:$0xff]  ;;  %v591_v41 = vld [vmem:[%s1639_s4 + $0x378] sm:$0xff] }
  0x6a   : > { %636 = vmatprep.subr.mxu0 %v589_v25  ;;  %703 = vmatprep.subr.mxu1 %v609_v34  ;;  %v544_v42 = vld [vmem:[%s1639_s4 + $0x200] sm:$0xff]  ;;  %v590_v43 = vld [vmem:[%s1639_s4 + $0x370] sm:$0xff]  ;;  %v543_v44 = vld [vmem:[%s1639_s4 + $0x1f8] sm:$0xff] }
  0x6b   : > { %637 = vmatpush1.msra.mxu0 %v588_v26  ;;  %704 = vmatpush1.msra.mxu1 %v608_v36  ;;  %v582_v45 = vld [vmem:[%s1639_s4 + $0x330] sm:$0xff]  ;;  %v535_v46 = vld [vmem:[%s1639_s4 + $0x1b8] sm:$0xff]  ;;  %v581_v47 = vld [vmem:[%s1639_s4 + $0x328] sm:$0xff] }
  0x6c   : > { %638 = vmatprep.subr.mxu0 %v580_v27  ;;  %705 = vmatprep.subr.mxu1 %v600_v37  ;;  %v534_v48 = vld [vmem:[%s1639_s4 + $0x1b0] sm:$0xff]  ;;  %v573_v49 = vld [vmem:[%s1639_s4 + $0x2e8] sm:$0xff]  ;;  %v572_v51 = vld [vmem:[%s1639_s4 + $0x2e0] sm:$0xff] }
  0x6d   : > { %639 = vmatpush1.msra.mxu0 %v579_v28  ;;  %706 = vmatpush1.msra.mxu1 %v599_v39  ;;  %v526_v50 = vld [vmem:[%s1639_s4 + $0x170] sm:$0xff]  ;;  %v525_v52 = vld [vmem:[%s1639_s4 + $0x168] sm:$0xff]  ;;  %v564_v53 = vld [vmem:[%s1639_s4 + $0x2a0] sm:$0xff] }
  0x6e   : > { %640 = vmatprep.subr.mxu0 %v571_v29  ;;  %707 = vmatprep.subr.mxu1 %v591_v41  ;;  %v517_v54 = vld [vmem:[%s1639_s4 + $0x128] sm:$0xff]  ;;  %v563_v55 = vld [vmem:[%s1639_s4 + $0x298] sm:$0xff]  ;;  %v516_v56 = vld [vmem:[%s1639_s4 + $0x120] sm:$0xff] }
  0x6f   : > { %641 = vmatpush1.msra.mxu0 %v570_v30  ;;  %708 = vmatpush1.msra.mxu1 %v590_v43  ;;  %v555_v57 = vld [vmem:[%s1639_s4 + $0x258] sm:$0xff]  ;;  %v508_v58 = vld [vmem:[%s1639_s4 + $0xe0] sm:$0xff]  ;;  %v554_v59 = vld [vmem:[%s1639_s4 + $0x250] sm:$0xff] }
  0x70   : > { %642 = vmatprep.subr.mxu0 %v562_v33  ;;  %709 = vmatprep.subr.mxu1 %v582_v45  ;;  %v507_v60 = vld [vmem:[%s1639_s4 + $0xd8] sm:$0xff]  ;;  %v546_v61 = vld [vmem:[%s1639_s4 + $0x210] sm:$0xff]  ;;  %v545_v63 = vld [vmem:[%s1639_s4 + $0x208] sm:$0xff] }
  0x71   : > { %643 = vmatpush1.msra.mxu0 %v561_v35  ;;  %710 = vmatpush1.msra.mxu1 %v581_v47  ;;  %v499_v62 = vld [vmem:[%s1639_s4 + $0x98] sm:$0xff]  ;;  %v498_v0 = vld [vmem:[%s1639_s4 + $0x90] sm:$0xff]  ;;  %v537_v1 = vld [vmem:[%s1639_s4 + $0x1c8] sm:$0xff] }
  0x72   : > { %644 = vmatprep.subr.mxu0 %v553_v38  ;;  %711 = vmatprep.subr.mxu1 %v573_v49  ;;  %v490_v2 = vld [vmem:[%s1639_s4 + $0x50] sm:$0xff]  ;;  %v536_v3 = vld [vmem:[%s1639_s4 + $0x1c0] sm:$0xff]  ;;  %v489_v4 = vld [vmem:[%s1639_s4 + $0x48] sm:$0xff] }
  0x73   : > { %645 = vmatpush1.msra.mxu0 %v552_v40  ;;  %712 = vmatpush1.msra.mxu1 %v572_v51  ;;  %v528_v5 = vld [vmem:[%s1639_s4 + $0x180] sm:$0xff]  ;;  %v481_v6 = vld [vmem:[%s1639_s4 + $0x8] sm:$0xff]  ;;  %v527_v7 = vld [vmem:[%s1639_s4 + $0x178] sm:$0xff] }
  0x74   : > { %646 = vmatprep.subr.mxu0 %v544_v42  ;;  %713 = vmatprep.subr.mxu1 %v564_v53  ;;  %v480_v8 = vld [vmem:[%s1639_s4] sm:$0xff]  ;;  %v519_v9 = vld [vmem:[%s1639_s4 + $0x138] sm:$0xff]  ;;  %v518_v13 = vld [vmem:[%s1639_s4 + $0x130] sm:$0xff] }
  0x75   : > { %647 = vmatpush1.msra.mxu0 %v543_v44  ;;  %714 = vmatpush1.msra.mxu1 %v563_v55  ;;  %v1699_v10 = vld [vmem:[%s1847_s0] sm:$0xf]  ;;  %v619_v12 = vld [vmem:[%s1639_s4 + $0x458] sm:$0xff]  ;;  %v510_v15 = vld [vmem:[%s1639_s4 + $0xf0] sm:$0xff] }
  0x76   : > { %648 = vmatprep.subr.mxu0 %v535_v46  ;;  %715 = vmatprep.subr.mxu1 %v555_v57  ;;  %v620_v11 = vld [vmem:[%s1639_s4 + $0x460] sm:$0xff]  ;;  %v611_v14 = vld [vmem:[%s1639_s4 + $0x418] sm:$0xff]  ;;  %v610_v17 = vld [vmem:[%s1639_s4 + $0x410] sm:$0xff] }
  0x77   : > { %649 = vmatpush1.msra.mxu0 %v534_v48  ;;  %716 = vmatpush1.msra.mxu1 %v554_v59  ;;  %v509_v18 = vld [vmem:[%s1639_s4 + $0xe8] sm:$0xff]  ;;  %v602_v19 = vld [vmem:[%s1639_s4 + $0x3d0] sm:$0xff]  ;;  %v500_v22 = vld [vmem:[%s1639_s4 + $0xa0] sm:$0xff] }
  0x78   : > { %650 = vmatprep.subr.mxu0 %v526_v50  ;;  %717 = vmatprep.subr.mxu1 %v546_v61  ;;  %v501_v20 = vld [vmem:[%s1639_s4 + $0xa8] sm:$0xff]  ;;  %v492_v24 = vld [vmem:[%s1639_s4 + $0x60] sm:$0xff]  ;;  %v491_v26 = vld [vmem:[%s1639_s4 + $0x58] sm:$0xff] }
  0x79   : > { %651 = vmatpush1.msra.mxu0 %v525_v52  ;;  %718 = vmatpush1.msra.mxu1 %v545_v63  ;;  %v601_v21 = vld [vmem:[%s1639_s4 + $0x3c8] sm:$0xff]  ;;  %v592_v25 = vld [vmem:[%s1639_s4 + $0x380] sm:$0xff]  ;;  %v483_v28 = vld [vmem:[%s1639_s4 + $0x18] sm:$0xff] }
  0x7a   : > { %652 = vmatprep.subr.mxu0 %v517_v54  ;;  %719 = vmatprep.subr.mxu1 %v537_v1  ;;  %v593_v23 = vld [vmem:[%s1639_s4 + $0x388] sm:$0xff]  ;;  %v584_v27 = vld [vmem:[%s1639_s4 + $0x340] sm:$0xff]  ;;  %v583_v29 = vld [vmem:[%s1639_s4 + $0x338] sm:$0xff] }
  0x7b   : > { %653 = vmatpush1.msra.mxu0 %v516_v56  ;;  %720 = vmatpush1.msra.mxu1 %v536_v3  ;;  %v482_v30 = vld [vmem:[%s1639_s4 + $0x10] sm:$0xff]  ;;  %v575_v31 = vld [vmem:[%s1639_s4 + $0x2f8] sm:$0xff]  ;;  %v621_v35 = vld [vmem:[%s1639_s4 + $0x468] sm:$0xff] }
  0x7c   : > { %654 = vmatprep.subr.mxu0 %v508_v58  ;;  %721 = vmatprep.subr.mxu1 %v528_v5  ;;  %v622_v32 = vld [vmem:[%s1639_s4 + $0x470] sm:$0xff]  ;;  %v565_v36 = vld [vmem:[%s1639_s4 + $0x2a8] sm:$0xff]  ;;  %v612_v39 = vld [vmem:[%s1639_s4 + $0x420] sm:$0xff] }
  0x7d   : > { %655 = vmatpush1.msra.mxu0 %v507_v60  ;;  %722 = vmatpush1.msra.mxu1 %v527_v7  ;;  %v574_v33 = vld [vmem:[%s1639_s4 + $0x2f0] sm:$0xff]  ;;  %v613_v37 = vld [vmem:[%s1639_s4 + $0x428] sm:$0xff]  ;;  %v556_v40 = vld [vmem:[%s1639_s4 + $0x260] sm:$0xff] }
  0x7e   : > { %656 = vmatprep.subr.mxu0 %v499_v62  ;;  %723 = vmatprep.subr.mxu1 %v519_v9  ;;  %v566_v34 = vld [vmem:[%s1639_s4 + $0x2b0] sm:$0xff]  ;;  %v557_v38 = vld [vmem:[%s1639_s4 + $0x268] sm:$0xff]  ;;  %v604_v41 = vld [vmem:[%s1639_s4 + $0x3e0] sm:$0xff] }
  0x7f   : > { %657 = vmatpush1.msra.mxu0 %v498_v0  ;;  %724 = vmatpush1.msra.mxu1 %v518_v13  ;;  %v548_v42 = vld [vmem:[%s1639_s4 + $0x220] sm:$0xff]  ;;  %v547_v43 = vld [vmem:[%s1639_s4 + $0x218] sm:$0xff]  ;;  %v538_v47 = vld [vmem:[%s1639_s4 + $0x1d0] sm:$0xff] }
  0x80   : > { %658 = vmatprep.subr.mxu0 %v490_v2  ;;  %725 = vmatprep.subr.mxu1 %v510_v15  ;;  %v603_v44 = vld [vmem:[%s1639_s4 + $0x3d8] sm:$0xff]  ;;  %v594_v48 = vld [vmem:[%s1639_s4 + $0x390] sm:$0xff]  ;;  %v529_v51 = vld [vmem:[%s1639_s4 + $0x188] sm:$0xff] }
  0x81   : > { %659 = vmatpush1.msra.mxu0 %v489_v4  ;;  %726 = vmatpush1.msra.mxu1 %v509_v18  ;;  %v539_v45 = vld [vmem:[%s1639_s4 + $0x1d8] sm:$0xff]  ;;  %v530_v49 = vld [vmem:[%s1639_s4 + $0x190] sm:$0xff]  ;;  %v585_v52 = vld [vmem:[%s1639_s4 + $0x348] sm:$0xff] }
  0x82   : > { %660 = vmatprep.subr.mxu0 %v481_v6  ;;  %727 = vmatprep.subr.mxu1 %v501_v20  ;;  %v595_v46 = vld [vmem:[%s1639_s4 + $0x398] sm:$0xff]  ;;  %v586_v50 = vld [vmem:[%s1639_s4 + $0x350] sm:$0xff]  ;;  %v521_v53 = vld [vmem:[%s1639_s4 + $0x148] sm:$0xff] }
  0x83   : > { %661 = vmatpush1.msra.mxu0 %v480_v8  ;;  %728 = vmatpush1.msra.mxu1 %v500_v22  ;;  %v577_v54 = vld [vmem:[%s1639_s4 + $0x308] sm:$0xff]  ;;  %v520_v55 = vld [vmem:[%s1639_s4 + $0x140] sm:$0xff]  ;;  %v511_v59 = vld [vmem:[%s1639_s4 + $0xf8] sm:$0xff] }
  0x84   : > { %695 = vmatmul.mubr.f32.vlgmr.msra.gmra.mxu0 %v1699_v10  ;;  %772 = vmatprep.subr.mxu0 %v620_v11  ;;  %v576_v56 = vld [vmem:[%s1639_s4 + $0x300] sm:$0xff]  ;;  %v567_v60 = vld [vmem:[%s1639_s4 + $0x2b8] sm:$0xff]  ;;  %v502_v63 = vld [vmem:[%s1639_s4 + $0xb0] sm:$0xff] }
  0x85   : > { %773 = vmatpush1.msra.mxu0 %v619_v12  ;;  %729 = vmatprep.subr.mxu1 %v492_v24  ;;  %v512_v57 = vld [vmem:[%s1639_s4 + $0x100] sm:$0xff]  ;;  %v503_v61 = vld [vmem:[%s1639_s4 + $0xb8] sm:$0xff]  ;;  %v558_v0 = vld [vmem:[%s1639_s4 + $0x270] sm:$0xff] }
  0x86   : > { %774 = vmatprep.subr.mxu0 %v611_v14  ;;  %730 = vmatpush1.msra.mxu1 %v491_v26  ;;  %v568_v58 = vld [vmem:[%s1639_s4 + $0x2c0] sm:$0xff]  ;;  %v559_v62 = vld [vmem:[%s1639_s4 + $0x278] sm:$0xff]  ;;  %v494_v1 = vld [vmem:[%s1639_s4 + $0x70] sm:$0xff] }
  0x87   : > { %775 = vmatpush1.msra.mxu0 %v610_v17  ;;  %731 = vmatprep.subr.mxu1 %v483_v28  ;;  %v550_v2 = vld [vmem:[%s1639_s4 + $0x230] sm:$0xff]  ;;  %v493_v3 = vld [vmem:[%s1639_s4 + $0x68] sm:$0xff]  ;;  %v484_v7 = vld [vmem:[%s1639_s4 + $0x20] sm:$0xff] }
  0x88   : > { %776 = vmatprep.subr.mxu0 %v602_v19  ;;  %732 = vmatpush1.msra.mxu1 %v482_v30  ;;  %v549_v4 = vld [vmem:[%s1639_s4 + $0x228] sm:$0xff]  ;;  %v540_v8 = vld [vmem:[%s1639_s4 + $0x1e0] sm:$0xff]  ;;  %v623_v9 = vld [vmem:[%s1639_s4 + $0x478] sm:$0xff] }
  0x89   : > { %777 = vmatpush1.msra.mxu0 %v601_v21  ;;  %843 = vmatprep.subr.mxu1 %v622_v32  ;;  %v485_v5 = vld [vmem:[%s1639_s4 + $0x28] sm:$0xff]  ;;  %v532_v11 = vld [vmem:[%s1639_s4 + $0x1a0] sm:$0xff]  ;;  %v531_v12 = vld [vmem:[%s1639_s4 + $0x198] sm:$0xff] }
  0x8a   : > { %778 = vmatprep.subr.mxu0 %v593_v23  ;;  %766 = vmatmul.mubr.f32.vlgmr.msra.gmra.mxu1 %v1699_v10  ;;  %v541_v6 = vld [vmem:[%s1639_s4 + $0x1e8] sm:$0xff]  ;;  %v614_v13 = vld [vmem:[%s1639_s4 + $0x430] sm:$0xff]  ;;  %v523_v14 = vld [vmem:[%s1639_s4 + $0x158] sm:$0xff] }
  0x8b   : > { %779 = vmatpush1.msra.mxu0 %v592_v25  ;;  %844 = vmatpush1.msra.mxu1 %v621_v35  ;;  %v522_v15 = vld [vmem:[%s1639_s4 + $0x150] sm:$0xff]  ;;  %v605_v17 = vld [vmem:[%s1639_s4 + $0x3e8] sm:$0xff]  ;;  %v596_v20 = vld [vmem:[%s1639_s4 + $0x3a0] sm:$0xff] }
  0x8c   : > { %780 = vmatprep.subr.mxu0 %v584_v27  ;;  %845 = vmatprep.subr.mxu1 %v613_v37  ;;  %v514_v18 = vld [vmem:[%s1639_s4 + $0x110] sm:$0xff]  ;;  %v513_v19 = vld [vmem:[%s1639_s4 + $0x108] sm:$0xff]  ;;  %v504_v22 = vld [vmem:[%s1639_s4 + $0xc0] sm:$0xff] }
  0x8d   : > { %781 = vmatpush1.msra.mxu0 %v583_v29  ;;  %846 = vmatpush1.msra.mxu1 %v612_v39  ;;  %v505_v21 = vld [vmem:[%s1639_s4 + $0xc8] sm:$0xff]  ;;  %v587_v23 = vld [vmem:[%s1639_s4 + $0x358] sm:$0xff]  ;;  %v496_v24 = vld [vmem:[%s1639_s4 + $0x80] sm:$0xff] }
  0x8e   : > { %782 = vmatprep.subr.mxu0 %v575_v31  ;;  %847 = vmatprep.subr.mxu1 %v604_v41  ;;  %v495_v25 = vld [vmem:[%s1639_s4 + $0x78] sm:$0xff]  ;;  %v578_v26 = vld [vmem:[%s1639_s4 + $0x310] sm:$0xff]  ;;  %v569_v29 = vld [vmem:[%s1639_s4 + $0x2c8] sm:$0xff] }
  0x8f   : > { %783 = vmatpush1.msra.mxu0 %v574_v33  ;;  %836 = vmatprep.mubr.f32.mxu0 %v1282_v16  ;;  %v487_v27 = vld [vmem:[%s1639_s4 + $0x38] sm:$0xff]  ;;  %v486_v28 = vld [vmem:[%s1639_s4 + $0x30] sm:$0xff]  ;;  %v560_v30 = vld [vmem:[%s1639_s4 + $0x280] sm:$0xff] }
  0x90   : > { %784 = vmatprep.subr.mxu0 %v566_v34  ;;  %848 = vmatpush1.msra.mxu1 %v603_v44  ;;  %v551_v31 = vld [vmem:[%s1639_s4 + $0x238] sm:$0xff]  ;;  %v542_v32 = vld [vmem:[%s1639_s4 + $0x1f0] sm:$0xff]  ;;  %v533_v33 = vld [vmem:[%s1639_s4 + $0x1a8] sm:$0xff] }
  0x91   : > { %785 = vmatpush1.msra.mxu0 %v565_v36  ;;  %849 = vmatprep.subr.mxu1 %v595_v46  ;;  %v524_v34 = vld [vmem:[%s1639_s4 + $0x160] sm:$0xff]  ;;  %v515_v35 = vld [vmem:[%s1639_s4 + $0x118] sm:$0xff]  ;;  %v506_v36 = vld [vmem:[%s1639_s4 + $0xd0] sm:$0xff] }
  0x92   : > { %786 = vmatprep.subr.mxu0 %v557_v38  ;;  %850 = vmatpush1.msra.mxu1 %v594_v48  ;;  %v497_v37 = vld [vmem:[%s1639_s4 + $0x88] sm:$0xff]  ;;  %v488_v38 = vld [vmem:[%s1639_s4 + $0x40] sm:$0xff] }
  0x93   : > { %787 = vmatpush1.msra.mxu0 %v556_v40  ;;  %851 = vmatprep.subr.mxu1 %v586_v50 }
  0x94   : > { %788 = vmatprep.subr.mxu0 %v548_v42  ;;  %852 = vmatpush1.msra.mxu1 %v585_v52 }
  0x95   : > { %789 = vmatpush1.msra.mxu0 %v547_v43  ;;  %853 = vmatprep.subr.mxu1 %v577_v54 }
  0x96   : > { %790 = vmatprep.subr.mxu0 %v539_v45  ;;  %854 = vmatpush1.msra.mxu1 %v576_v56 }
  0x97   : > { %791 = vmatpush1.msra.mxu0 %v538_v47  ;;  %855 = vmatprep.subr.mxu1 %v568_v58 }
  0x98   : > { %792 = vmatprep.subr.mxu0 %v530_v49  ;;  %856 = vmatpush1.msra.mxu1 %v567_v60 }
  0x99   : > { %793 = vmatpush1.msra.mxu0 %v529_v51  ;;  %857 = vmatprep.subr.mxu1 %v559_v62 }
  0x9a   : > { %794 = vmatprep.subr.mxu0 %v521_v53  ;;  %858 = vmatpush1.msra.mxu1 %v558_v0 }
  0x9b   : > { %795 = vmatpush1.msra.mxu0 %v520_v55  ;;  %859 = vmatprep.subr.mxu1 %v550_v2 }
  0x9c   : > { %796 = vmatprep.subr.mxu0 %v512_v57  ;;  %860 = vmatpush1.msra.mxu1 %v549_v4 }
  0x9d   : > { %797 = vmatpush1.msra.mxu0 %v511_v59  ;;  %861 = vmatprep.subr.mxu1 %v541_v6 }
  0x9e   : > { %798 = vmatprep.subr.mxu0 %v503_v61  ;;  %862 = vmatpush1.msra.mxu1 %v540_v8 }
  0x9f   : > { %799 = vmatpush1.msra.mxu0 %v502_v63  ;;  %863 = vmatprep.subr.mxu1 %v532_v11 }
  0xa0   : > { %800 = vmatprep.subr.mxu0 %v494_v1  ;;  %864 = vmatpush1.msra.mxu1 %v531_v12 }
  0xa1   : > { %801 = vmatpush1.msra.mxu0 %v493_v3  ;;  %865 = vmatprep.subr.mxu1 %v523_v14 }
  0xa2   : > { %802 = vmatprep.subr.mxu0 %v485_v5  ;;  %866 = vmatpush1.msra.mxu1 %v522_v15 }
  0xa3   : > { %803 = vmatpush1.msra.mxu0 %v484_v7  ;;  %867 = vmatprep.subr.mxu1 %v514_v18 }
  0xa4   : > { %837 = vmatmul.mubr.f32.vlgmr.msra.gmra.mxu0 %v1699_v10  ;;  %1157 = vmatprep.subr.mxu0 %v1282_v16 }
  0xa5   : > { %1158 = vmatpush3.msra.mxu0 %v623_v9  ;;  %868 = vmatpush1.msra.mxu1 %v513_v19 }
  0xa6   : > { %1159 = vmatprep.subr.mxu0 %v1282_v16  ;;  %869 = vmatprep.subr.mxu1 %v505_v21 }
  0xa7   : > { %1160 = vmatpush3.msra.mxu0 %v614_v13  ;;  %870 = vmatpush1.msra.mxu1 %v504_v22 }
  0xa8   : > { %1161 = vmatprep.subr.mxu0 %v1282_v16  ;;  %871 = vmatprep.subr.mxu1 %v496_v24 }
  0xa9   : > { %1162 = vmatpush3.msra.mxu0 %v605_v17  ;;  %872 = vmatpush1.msra.mxu1 %v495_v25 }
  0xaa   : > { %1163 = vmatprep.subr.mxu0 %v1282_v16  ;;  %873 = vmatprep.subr.mxu1 %v487_v27 }
  0xab   : > { %1164 = vmatpush3.msra.mxu0 %v596_v20  ;;  %874 = vmatpush1.msra.mxu1 %v486_v28 }
  0xac   : > { %1165 = vmatprep.subr.mxu0 %v1282_v16  ;;  %907 = vmatprep.mubr.f32.mxu1 %v1282_v16 }
  0xad   : > { %1166 = vmatpush3.msra.mxu0 %v587_v23  ;;  %908 = vmatmul.mubr.f32.vlgmr.msra.gmra.mxu1 %v1699_v10 }
  0xae   : > { %1167 = vmatprep.subr.mxu0 %v1282_v16  ;;  %1189 = vmatprep.mubr.msk.f32.mxu0 %vm1284_vm0, %v1282_v16 }
  0xaf   : > { %1168 = vmatpush3.msra.mxu0 %v578_v26 }
  0xb0   : > { %1169 = vmatprep.subr.mxu0 %v1282_v16 }
  0xb1   : > { %1170 = vmatpush3.msra.mxu0 %v569_v29 }
  0xb2   : > { %1171 = vmatprep.subr.mxu0 %v1282_v16 }
  0xb3   : > { %1172 = vmatpush3.msra.mxu0 %v560_v30 }
  0xb4   : > { %1173 = vmatprep.subr.mxu0 %v1282_v16 }
  0xb5   : > { %1174 = vmatpush3.msra.mxu0 %v551_v31 }
  0xb6   : > { %1175 = vmatprep.subr.mxu0 %v1282_v16 }
  0xb7   : > { %1176 = vmatpush3.msra.mxu0 %v542_v32 }
  0xb8   : > { %1177 = vmatprep.subr.mxu0 %v1282_v16 }
  0xb9   : > { %1178 = vmatpush3.msra.mxu0 %v533_v33 }
  0xba   : > { %1179 = vmatprep.subr.mxu0 %v1282_v16 }
  0xbb   : > { %1180 = vmatpush3.msra.mxu0 %v524_v34 }
  0xbc   : > { %1181 = vmatprep.subr.mxu0 %v1282_v16 }
  0xbd   : > { %1182 = vmatpush3.msra.mxu0 %v515_v35 }
  0xbe   : > { %1183 = vmatprep.subr.mxu0 %v1282_v16 }
  0xbf   : > { %1184 = vmatpush3.msra.mxu0 %v506_v36 }
  0xc0   : > { %1185 = vmatprep.subr.mxu0 %v1282_v16 }
  0xc1   : > { %1186 = vmatpush3.msra.mxu0 %v497_v37 }
  0xc2   : > { %1187 = vmatprep.subr.mxu0 %v1282_v16 }
  0xc3   : > { %1188 = vmatpush3.msra.mxu0 %v488_v38 }
  0xc4   : > { %1190 = vmatmul.mubr.f32.vlgmr.msra.gmra.mxu0 %v1699_v10 }
  0xe0   : > { %v1814_v39 = vpop.permute.xlu0 %627 }
 0x144   : > { %v696_v40 = vpop.f32.mrf.mxu0 }
 0x145   : > { %v697_v41 = vadd.f32 %v696_v40, %v1814_v39 }
 0x146   : > { %v698_v42 = vpop.f32.mrf.mxu0 }
 0x147   : > { %v1128_v43 = vmul.f32 -1.442695, %v697_v41  ;;  %v699_v44 = vadd.f32 %v698_v42, %v1814_v39 }
 0x149   : > { %1222 = vpow2.f32 %v1128_v43  ;;  %v1129_v45 = vmul.f32 -1.442695, %v699_v44 }
 0x14a   : > { %v767_v46 = vpop.f32.mrf.mxu1 }
 0x14b   : > { %1224 = vpow2.f32 %v1129_v45  ;;  %v768_v47 = vadd.f32 %v767_v46, %v1814_v39 }
 0x14c   : > { %v769_v16 = vpop.f32.mrf.mxu1 }
 0x14d   : > { %v1130_v48 = vmul.f32 -1.442695, %v768_v47  ;;  %v770_v10 = vadd.f32 %v769_v16, %v1814_v39 }
 0x14f   : > { %1226 = vpow2.f32 %v1130_v48  ;;  %v1131_v49 = vmul.f32 -1.442695, %v770_v10 }
 0x151   : > { %1228 = vpow2.f32 %v1131_v49 }
 0x156   : > { %v1223_v50 = vpop.eup %1222 }
 0x157   : > { %v1011_v51 = vadd.f32 1.0, %v1223_v50 }
 0x158   : > { %v1225_v52 = vpop.eup %1224 }
 0x159   : > { %1230 = vrcp.f32 %v1011_v51  ;;  %v1012_v53 = vadd.f32 1.0, %v1225_v52 }
 0x15b   : > { %1232 = vrcp.f32 %v1012_v53 }
 0x15c   : > { %v1227_v54 = vpop.eup %1226 }
 0x15d   : > { %v1013_v55 = vadd.f32 1.0, %v1227_v54 }
 0x15e   : > { %v1229_v56 = vpop.eup %1228 }
 0x15f   : > { %1234 = vrcp.f32 %v1013_v55  ;;  %v1014_v57 = vadd.f32 1.0, %v1229_v56 }
 0x161   : > { %1236 = vrcp.f32 %v1014_v57 }
 0x164   : > { %v838_v58 = vpop.f32.mrf.mxu0 }
 0x165   : > { %v839_v59 = vadd.f32 %v838_v58, %v1814_v39 }
 0x166   : > { %v1231_v60 = vpop.eup %1230  ;;  %v840_v61 = vpop.f32.mrf.mxu0 }
 0x167   : > { %v1132_v62 = vmul.f32 -1.442695, %v839_v59  ;;  %v841_v63 = vadd.f32 %v840_v61, %v1814_v39 }
 0x168   : > { %v1233_v0 = vpop.eup %1232 }
 0x169   : > { %v1046_v1 = vcombine.low %v1231_v60, %v1233_v0  ;;  %1238 = vpow2.f32 %v1132_v62  ;;  %v1133_v2 = vmul.f32 -1.442695, %v841_v63 }
 0x16b   : > { %1054 = vst [vmem:[%s1827_s11] sm:$0xff] %v1046_v1  ;;  %1240 = vpow2.f32 %v1133_v2 }
 0x16c   : > { %v1235_v3 = vpop.eup %1234 }
 0x16d   : > { %v909_v4 = vpop.f32.mrf.mxu1 }
 0x16e   : > { %v1237_v5 = vpop.eup %1236  ;;  %v910_v6 = vadd.f32 %v909_v4, %v1814_v39 }
 0x16f   : > { %v1047_v7 = vcombine.low %v1235_v3, %v1237_v5  ;;  %v911_v8 = vpop.f32.mrf.mxu1 }
 0x170   : > { %v1134_v9 = vmul.f32 -1.442695, %v910_v6  ;;  %v912_v11 = vadd.f32 %v911_v8, %v1814_v39 }
 0x171   : > { %1055 = vst [vmem:[%s1827_s11 + $0x8] sm:$0xff] %v1047_v7 }
 0x172   : > { %1242 = vpow2.f32 %v1134_v9  ;;  %v1135_v14 = vmul.f32 -1.442695, %v912_v11 }
 0x176   : > { %v1239_v12 = vpop.eup %1238 }
 0x177   : > { %v1015_v13 = vadd.f32 1.0, %v1239_v12 }
 0x178   : > { %v1241_v15 = vpop.eup %1240 }
 0x179   : > { %1244 = vrcp.f32 %v1015_v13  ;;  %v1016_v17 = vadd.f32 1.0, %v1241_v15 }
 0x17a   : > { %1246 = vpow2.f32 %v1135_v14 }
 0x17b   : > { %1248 = vrcp.f32 %v1016_v17 }
 0x17f   : > { %v1243_v18 = vpop.eup %1242 }
 0x180   : > { %v1017_v20 = vadd.f32 1.0, %v1243_v18 }
 0x182   : > { %1250 = vrcp.f32 %v1017_v20 }
 0x184   : > { %v980_v19 = vpop.f32.mrf.mxu0 }
 0x185   : > { %v981_v21 = vadd.f32 %v980_v19, %v1814_v39 }
 0x186   : > { %v1245_v22 = vpop.eup %1244  ;;  %v1191_v23 = vpop.f32.mrf.mxu0 }
 0x187   : > { %v1247_v24 = vpop.eup %1246  ;;  %v1136_v25 = vmul.f32 -1.442695, %v981_v21 }
 0x188   : > { %v1249_v26 = vpop.eup %1248  ;;  %v1018_v27 = vadd.f32 1.0, %v1247_v24 }
 0x189   : > { %v1048_v28 = vcombine.low %v1245_v22, %v1249_v26  ;;  %1252 = vpow2.f32 %v1136_v25 }
 0x18a   : > { %1254 = vrcp.f32 %v1018_v27 }
 0x18b   : > { %1056 = vst [vmem:[%s1827_s11 + $0x10] sm:$0xff] %v1048_v28 }
 0x18f   : > { %v1251_v29 = vpop.eup %1250 }
 0x196   : > { %v1253_v30 = vpop.eup %1252 }
 0x197   : > { %v1255_v31 = vpop.eup %1254  ;;  %v1019_v32 = vadd.f32 1.0, %v1253_v30 }
 0x198   : > { %v1049_v33 = vcombine.low %v1251_v29, %v1255_v31 }
 0x199   : > { %1256 = vrcp.f32 %v1019_v32 }
 0x19a   : > { %1057 = vst [vmem:[%s1827_s11 + $0x18] sm:$0xff] %v1049_v33 }
 0x1a6   : > { %v1257_v34 = vpop.eup %1256 }
 0x1a7   : > { %1058 = vst [vmem:[%s1827_s11 + $0x20] sm:$0xf] %v1257_v34 }
 0x1a8 PF: > { %p10_p9 = scmp.ge.s32.totalorder %s1322_s16, 4   ;;  %s1851_s12 = smov %s1276_s13 }
 0x1a9   : > { %s1852_s13 = smov %s1331_s19  ;;  %s1853_s14 = smov %s1322_s16 }
 0x1aa   :  { %12 = sbr.rel (!%p10_p9) target bundleno = 2 (0x2), region = 90 }

</bundles_post_ra>
